<compile_context>
chip_gen: v7x
topology: tpu7x:2x2x1
jax: 0.10.0
libtpu: 0.0.40
codegen_flags: <defaults>
</compile_context>

<pallas_src>
import jax
import jax.numpy as jnp
from jax import lax
from jax.experimental import pallas as pl
from jax.experimental.pallas import tpu as pltpu

# ---------------------------------------------------------------------------
# Layout constants
# ---------------------------------------------------------------------------
LANE = 128     # TPU lane width
C_PAD = LANE   # every backbone channel count is padded to this (lane-dense)
K_PAD = LANE   # condition-head class count padded to this (lane-dense store)
HALO = 8       # sublane-aligned offset of the activation inside the VMEM buffer


# ---------------------------------------------------------------------------
# Fused kernel factory: conv stack + ConditionHead for ONE image (one grid step)
# ---------------------------------------------------------------------------
def make_fused_backbone_head_kernel(n_layers, H, W):
    HWF = H * W

    def kernel(*refs):
        x_ref = refs[0]                                   # (1, H, W, C_PAD) f32
        w_refs = refs[1:1 + n_layers]                     # (9*C_PAD, C_PAD) bf16
        b_refs = refs[1 + n_layers:1 + 2 * n_layers]      # (1, C_PAD) f32
        hw_ref = refs[1 + 2 * n_layers]                   # (C_PAD, K_PAD) bf16
        hb_ref = refs[2 + 2 * n_layers]                   # (1, K_PAD) f32
        o0 = 3 + 2 * n_layers
        enc_refs = refs[o0:o0 + n_layers]                 # (1, H, W, C_PAD) f32 outs
        head_ref = refs[o0 + n_layers]                    # (1, 1, K_PAD) f32 out
        buf = refs[o0 + n_layers + 1]                     # VMEM (H+2*HALO, W+2*HALO, C_PAD) f32

        # Zero the buffer (provides the 1-pixel zero halo "for free"), then put
        # the channel-padded input at a sublane-aligned offset (dense store).
        buf[...] = jnp.zeros_like(buf)
        buf[HALO:HALO + H, HALO:HALO + W, :] = x_ref[0]

        act = None
        for l in range(n_layers):
            # im2col: gather the 9 shifted windows ONCE -> (H*W, 9*C_PAD) bf16.
            taps = []
            for dy in range(3):
                for dx in range(3):
                    win = buf[HALO - 1 + dy:HALO - 1 + dy + H,
                              HALO - 1 + dx:HALO - 1 + dx + W, :]
                    taps.append(win.astype(jnp.bfloat16).reshape(HWF, C_PAD))
            patch = jnp.concatenate(taps, axis=-1)                 # (H*W, 9*C_PAD)

            # Single wide-K bf16 MXU matmul (K = 9*128), f32 accumulation.
            acc = jnp.dot(patch, w_refs[l][...],
                          preferred_element_type=jnp.float32)      # (H*W, C_PAD)
            act = jnp.maximum(acc + b_refs[l][...], 0.0)           # bias+ReLU (f32)

            # Lane-dense (128-wide) HBM store of this layer's features (`encoding`).
            enc_refs[l][...] = act.reshape(1, H, W, C_PAD)

            if l + 1 < n_layers:
                # Stage for the next layer: aligned dense store back into the
                # zero-haloed VMEM buffer -- no HBM round-trip between layers.
                buf[HALO:HALO + H, HALO:HALO + W, :] = act.reshape(H, W, C_PAD)

        # ConditionHead epilogue (fused): global spatial mean + Linear.
        pooled = jnp.mean(act, axis=0, keepdims=True)              # (1, C_PAD) f32
        logits = jnp.dot(pooled.astype(jnp.bfloat16), hw_ref[...],
                         preferred_element_type=jnp.float32) + hb_ref[...]
        head_ref[...] = logits.reshape(1, 1, K_PAD)                # lane-dense (128)

    return kernel


# ---------------------------------------------------------------------------
# Wrapper around the fused pallas_call
# ---------------------------------------------------------------------------
def backbone_head_forward(params, x_nhwc_padded):
    N, H, W, _ = x_nhwc_padded.shape
    n_layers = len(params["conv_w"])

    kernel = make_fused_backbone_head_kernel(n_layers, H, W)

    out_shape = tuple(jax.ShapeDtypeStruct((N, H, W, C_PAD), jnp.float32)
                      for _ in range(n_layers)) + (
        jax.ShapeDtypeStruct((N, 1, K_PAD), jnp.float32),)

    img_spec = pl.BlockSpec((1, H, W, C_PAD), lambda n: (n, 0, 0, 0))
    w_specs = [pl.BlockSpec((9 * C_PAD, C_PAD), lambda n: (0, 0))
               for _ in range(n_layers)]
    b_specs = [pl.BlockSpec((1, C_PAD), lambda n: (0, 0)) for _ in range(n_layers)]
    hw_spec = pl.BlockSpec((C_PAD, K_PAD), lambda n: (0, 0))
    hb_spec = pl.BlockSpec((1, K_PAD), lambda n: (0, 0))
    enc_specs = tuple(pl.BlockSpec((1, H, W, C_PAD), lambda n: (n, 0, 0, 0))
                      for _ in range(n_layers))
    head_spec = pl.BlockSpec((1, 1, K_PAD), lambda n: (n, 0, 0))

    # Advisory cost estimate (padded FLOPs: one wide-K matmul per layer + head).
    flops = N * n_layers * 2 * H * W * (9 * C_PAD) * C_PAD + N * 2 * C_PAD * K_PAD
    bytes_accessed = (N * H * W * C_PAD * 4                        # input
                      + n_layers * (9 * C_PAD * C_PAD * 2 + C_PAD * 4)
                      + C_PAD * K_PAD * 2 + K_PAD * 4              # weights
                      + n_layers * N * H * W * C_PAD * 4           # encodings
                      + N * K_PAD * 4)                             # head

    grid_spec = pltpu.PrefetchScalarGridSpec(
        num_scalar_prefetch=0,
        grid=(N,),
        in_specs=[img_spec] + w_specs + b_specs + [hw_spec, hb_spec],
        out_specs=enc_specs + (head_spec,),
        scratch_shapes=[pltpu.VMEM((H + 2 * HALO, W + 2 * HALO, C_PAD),
                                   jnp.float32)],
    )

    outs = pl.pallas_call(
        kernel,
        out_shape=out_shape,
        grid_spec=grid_spec,
        compiler_params=pltpu.CompilerParams(
            dimension_semantics=("parallel",),    # batch axis -> both TCs on v7x
            vmem_limit_bytes=32 * 1024 * 1024,    # small footprint; safe on v7x 64 MiB
        ),
        cost_estimate=pl.CostEstimate(flops=flops, transcendentals=0,
                                      bytes_accessed=bytes_accessed),
    )(x_nhwc_padded, *params["conv_w"], *params["conv_b"],
      params["head_w"], params["head_b"])

    return list(outs[:n_layers]), outs[n_layers]


# ---------------------------------------------------------------------------
# Parameters (deterministic synthetic stand-in for pretrained backbone weights)
# ---------------------------------------------------------------------------
def init_params(key, in_ch, channels, n_classes):
    conv_w_raw, conv_b_raw, conv_w, conv_b = [], [], [], []
    cin = in_ch
    for cout in channels:
        key, kw, kb = jax.random.split(key, 3)
        w = jax.random.normal(kw, (3, 3, cin, cout), jnp.float32) * 0.1
        b = jax.random.normal(kb, (cout,), jnp.float32) * 0.01
        conv_w_raw.append(w)
        conv_b_raw.append(b)
        # Channel-padded, im2col-flattened ((dy,dx,cin) -> rows) bf16 weights.
        wp = jnp.zeros((3, 3, C_PAD, C_PAD), jnp.float32).at[:, :, :cin, :cout].set(w)
        conv_w.append(wp.reshape(9 * C_PAD, C_PAD).astype(jnp.bfloat16))
        conv_b.append(jnp.zeros((1, C_PAD), jnp.float32).at[0, :cout].set(b))
        cin = cout

    key, kw, kb = jax.random.split(key, 3)
    hw = jax.random.normal(kw, (cin, n_classes), jnp.float32) * 0.1
    hb = jax.random.normal(kb, (n_classes,), jnp.float32) * 0.01
    head_w = jnp.zeros((C_PAD, K_PAD), jnp.float32).at[:cin, :n_classes].set(hw)
    head_b = jnp.zeros((1, K_PAD), jnp.float32).at[0, :n_classes].set(hb)

    return {
        "conv_w": conv_w, "conv_b": conv_b,
        "head_w": head_w.astype(jnp.bfloat16), "head_b": head_b,
        "conv_w_raw": conv_w_raw, "conv_b_raw": conv_b_raw,
        "head_w_raw": hw, "head_b_raw": hb,
        "channels": tuple(channels), "n_classes": int(n_classes), "in_ch": int(in_ch),
    }


# ---------------------------------------------------------------------------
# Model.forward(x, y) -> (detection_out, encoding, head(backbone(x)))
# ---------------------------------------------------------------------------
def model_forward(params, x_nchw, y=None, nchw_encoding=False):
    # NCHW -> NHWC once (channels land on the 128-lane axis); pad channels once.
    x_nhwc = jnp.transpose(x_nchw, (0, 2, 3, 1))
    cin = x_nhwc.shape[-1]
    x_pad = jnp.pad(x_nhwc, ((0, 0), (0, 0), (0, 0), (0, C_PAD - cin)))

    enc_padded, head_padded = backbone_head_forward(params, x_pad)

    # Layer outputs. Returned NHWC by default (avoids a full relayout per layer);
    # set nchw_encoding=True only if a consumer needs the PyTorch layout.
    encoding = [e[..., :c] for e, c in zip(enc_padded, params["channels"])]
    if nchw_encoding:
        encoding = [jnp.transpose(e, (0, 3, 1, 2)) for e in encoding]

    head_out = head_padded[:, 0, :params["n_classes"]]

    # TODO(synk): torchvision FCOS/SSD detection forward (self.model(x, y)) omitted.
    detection_out = None
    return detection_out, encoding, head_out


# ---------------------------------------------------------------------------
# Pure-JAX f32 reference (self-check; kernel matmuls use bf16 w/ f32 accumulation)
# ---------------------------------------------------------------------------
def reference_forward(params, x_nchw):
    x = jnp.transpose(x_nchw, (0, 2, 3, 1))
    encoding = []
    for w, b in zip(params["conv_w_raw"], params["conv_b_raw"]):
        x = lax.conv_general_dilated(x, w, (1, 1), "SAME",
                                     dimension_numbers=("NHWC", "HWIO", "NHWC"))
        x = jnp.maximum(x + b, 0.0)
        encoding.append(x)
    pooled = jnp.mean(x, axis=(1, 2))
    head = pooled @ params["head_w_raw"] + params["head_b_raw"]
    return encoding, head


if __name__ == "__main__":
    N, C_IN, HW_SIZE = 2, 3, 16
    BACKBONE_CHANNELS = (8, 16, 32)      # synthetic stand-in backbone widths
    N_CONDITION_CLASSES = 5

    key = jax.random.PRNGKey(0)
    key, kx = jax.random.split(key)
    x = jax.random.normal(kx, (N, C_IN, HW_SIZE, HW_SIZE), jnp.float32)

    params = init_params(key, C_IN, BACKBONE_CHANNELS, N_CONDITION_CLASSES)

    det, encoding, head_out = model_forward(params, x, None)
    jax.block_until_ready(head_out)
    jax.block_until_ready(encoding[-1])

    assert head_out.shape == (N, N_CONDITION_CLASSES)
    assert encoding[-1].shape == (N, HW_SIZE, HW_SIZE, BACKBONE_CHANNELS[-1])

    # Loose-tolerance numerical self-check against the f32 reference.
    enc_ref, head_ref = reference_forward(params, x)
    assert bool(jnp.allclose(head_out, head_ref, rtol=1e-1, atol=1e-1))
    assert bool(jnp.allclose(encoding[-1], enc_ref[-1], rtol=1e-1, atol=1e-1))

    print("KERNEL_OK")
</pallas_src>

<mosaic_0001>
module attributes {stable_mosaic.version = 11 : i64} {
  func.func @kernel(%arg0: i32, %arg1: memref<1x16x16x128xf32, #tpu.memory_space<vmem>>, %arg2: memref<1152x128xbf16, #tpu.memory_space<vmem>>, %arg3: memref<1152x128xbf16, #tpu.memory_space<vmem>>, %arg4: memref<1152x128xbf16, #tpu.memory_space<vmem>>, %arg5: memref<1x128xf32, #tpu.memory_space<vmem>>, %arg6: memref<1x128xf32, #tpu.memory_space<vmem>>, %arg7: memref<1x128xf32, #tpu.memory_space<vmem>>, %arg8: memref<128x128xbf16, #tpu.memory_space<vmem>>, %arg9: memref<1x128xf32, #tpu.memory_space<vmem>>, %arg10: memref<1x16x16x128xf32, #tpu.memory_space<vmem>>, %arg11: memref<1x16x16x128xf32, #tpu.memory_space<vmem>>, %arg12: memref<1x16x16x128xf32, #tpu.memory_space<vmem>>, %arg13: memref<1x1x128xf32, #tpu.memory_space<vmem>>, %arg14: memref<32x32x128xf32, #tpu.memory_space<vmem>>) attributes {dimension_semantics = [#tpu.dimension_semantics<parallel>], iteration_bounds = array<i64: 2>, scalar_prefetch = 0 : i64, scratch_operands = 1 : i64, tpu.core_type = #tpu.core_type<tc>, window_params = [{transform_indices = @transform_0, window_bounds = array<i64: 1, 16, 16, 128>}, {pipeline_mode = #tpu.pipeline_mode<synchronous>, transform_indices = @transform_1, window_bounds = array<i64: 1152, 128>}, {pipeline_mode = #tpu.pipeline_mode<synchronous>, transform_indices = @transform_2, window_bounds = array<i64: 1152, 128>}, {pipeline_mode = #tpu.pipeline_mode<synchronous>, transform_indices = @transform_3, window_bounds = array<i64: 1152, 128>}, {pipeline_mode = #tpu.pipeline_mode<synchronous>, transform_indices = @transform_4, window_bounds = array<i64: 1, 128>}, {pipeline_mode = #tpu.pipeline_mode<synchronous>, transform_indices = @transform_5, window_bounds = array<i64: 1, 128>}, {pipeline_mode = #tpu.pipeline_mode<synchronous>, transform_indices = @transform_6, window_bounds = array<i64: 1, 128>}, {pipeline_mode = #tpu.pipeline_mode<synchronous>, transform_indices = @transform_7, window_bounds = array<i64: 128, 128>}, {pipeline_mode = #tpu.pipeline_mode<synchronous>, transform_indices = @transform_8, window_bounds = array<i64: 1, 128>}, {transform_indices = @transform_9, window_bounds = array<i64: 1, 16, 16, 128>}, {transform_indices = @transform_10, window_bounds = array<i64: 1, 16, 16, 128>}, {transform_indices = @transform_11, window_bounds = array<i64: 1, 16, 16, 128>}, {transform_indices = @transform_12, window_bounds = array<i64: 1, 1, 128>}]} {
    %cst = arith.constant 0.000000e+00 : f32
    %0 = vector.broadcast %cst : f32 to vector<32x32x128xf32>
    %c0 = arith.constant 0 : index
    %c0_0 = arith.constant 0 : index
    %c0_1 = arith.constant 0 : index
    %1 = vector.load %arg14[%c0, %c0_0, %c0_1] : memref<32x32x128xf32, #tpu.memory_space<vmem>>, vector<32x32x128xf32>
    tpu.vector_store %arg14[%c0, %c0_0, %c0_1], %0 {strides = array<i32>} : memref<32x32x128xf32, #tpu.memory_space<vmem>>, vector<32x32x128xf32>,
    %c0_2 = arith.constant 0 : index
    %c0_3 = arith.constant 0 : index
    %c0_4 = arith.constant 0 : index
    %c0_5 = arith.constant 0 : index
    %2 = vector.load %arg1[%c0_2, %c0_3, %c0_4, %c0_5] : memref<1x16x16x128xf32, #tpu.memory_space<vmem>>, vector<1x16x16x128xf32>
    %3 = vector.shape_cast %2 : vector<1x16x16x128xf32> to vector<16x16x128xf32>
    %c8 = arith.constant 8 : index
    %c8_6 = arith.constant 8 : index
    %c0_7 = arith.constant 0 : index
    %4 = vector.load %arg14[%c8, %c8_6, %c0_7] : memref<32x32x128xf32, #tpu.memory_space<vmem>>, vector<16x16x128xf32>
    tpu.vector_store %arg14[%c8, %c8_6, %c0_7], %3 {strides = array<i32>} : memref<32x32x128xf32, #tpu.memory_space<vmem>>, vector<16x16x128xf32>,
    %c7 = arith.constant 7 : index
    %c7_8 = arith.constant 7 : index
    %c0_9 = arith.constant 0 : index
    %5 = vector.load %arg14[%c7, %c7_8, %c0_9] : memref<32x32x128xf32, #tpu.memory_space<vmem>>, vector<16x16x128xf32>
    %6 = arith.truncf %5 : vector<16x16x128xf32> to vector<16x16x128xbf16>
    %7 = vector.shape_cast %6 : vector<16x16x128xbf16> to vector<256x128xbf16>
    %c7_10 = arith.constant 7 : index
    %c8_11 = arith.constant 8 : index
    %c0_12 = arith.constant 0 : index
    %8 = vector.load %arg14[%c7_10, %c8_11, %c0_12] : memref<32x32x128xf32, #tpu.memory_space<vmem>>, vector<16x16x128xf32>
    %9 = arith.truncf %8 : vector<16x16x128xf32> to vector<16x16x128xbf16>
    %10 = vector.shape_cast %9 : vector<16x16x128xbf16> to vector<256x128xbf16>
    %c7_13 = arith.constant 7 : index
    %c9 = arith.constant 9 : index
    %c0_14 = arith.constant 0 : index
    %11 = vector.load %arg14[%c7_13, %c9, %c0_14] : memref<32x32x128xf32, #tpu.memory_space<vmem>>, vector<16x16x128xf32>
    %12 = arith.truncf %11 : vector<16x16x128xf32> to vector<16x16x128xbf16>
    %13 = vector.shape_cast %12 : vector<16x16x128xbf16> to vector<256x128xbf16>
    %c8_15 = arith.constant 8 : index
    %c7_16 = arith.constant 7 : index
    %c0_17 = arith.constant 0 : index
    %14 = vector.load %arg14[%c8_15, %c7_16, %c0_17] : memref<32x32x128xf32, #tpu.memory_space<vmem>>, vector<16x16x128xf32>
    %15 = arith.truncf %14 : vector<16x16x128xf32> to vector<16x16x128xbf16>
    %16 = vector.shape_cast %15 : vector<16x16x128xbf16> to vector<256x128xbf16>
    %c8_18 = arith.constant 8 : index
    %c8_19 = arith.constant 8 : index
    %c0_20 = arith.constant 0 : index
    %17 = vector.load %arg14[%c8_18, %c8_19, %c0_20] : memref<32x32x128xf32, #tpu.memory_space<vmem>>, vector<16x16x128xf32>
    %18 = arith.truncf %17 : vector<16x16x128xf32> to vector<16x16x128xbf16>
    %19 = vector.shape_cast %18 : vector<16x16x128xbf16> to vector<256x128xbf16>
    %c8_21 = arith.constant 8 : index
    %c9_22 = arith.constant 9 : index
    %c0_23 = arith.constant 0 : index
    %20 = vector.load %arg14[%c8_21, %c9_22, %c0_23] : memref<32x32x128xf32, #tpu.memory_space<vmem>>, vector<16x16x128xf32>
    %21 = arith.truncf %20 : vector<16x16x128xf32> to vector<16x16x128xbf16>
    %22 = vector.shape_cast %21 : vector<16x16x128xbf16> to vector<256x128xbf16>
    %c9_24 = arith.constant 9 : index
    %c7_25 = arith.constant 7 : index
    %c0_26 = arith.constant 0 : index
    %23 = vector.load %arg14[%c9_24, %c7_25, %c0_26] : memref<32x32x128xf32, #tpu.memory_space<vmem>>, vector<16x16x128xf32>
    %24 = arith.truncf %23 : vector<16x16x128xf32> to vector<16x16x128xbf16>
    %25 = vector.shape_cast %24 : vector<16x16x128xbf16> to vector<256x128xbf16>
    %c9_27 = arith.constant 9 : index
    %c8_28 = arith.constant 8 : index
    %c0_29 = arith.constant 0 : index
    %26 = vector.load %arg14[%c9_27, %c8_28, %c0_29] : memref<32x32x128xf32, #tpu.memory_space<vmem>>, vector<16x16x128xf32>
    %27 = arith.truncf %26 : vector<16x16x128xf32> to vector<16x16x128xbf16>
    %28 = vector.shape_cast %27 : vector<16x16x128xbf16> to vector<256x128xbf16>
    %c9_30 = arith.constant 9 : index
    %c9_31 = arith.constant 9 : index
    %c0_32 = arith.constant 0 : index
    %29 = vector.load %arg14[%c9_30, %c9_31, %c0_32] : memref<32x32x128xf32, #tpu.memory_space<vmem>>, vector<16x16x128xf32>
    %30 = arith.truncf %29 : vector<16x16x128xf32> to vector<16x16x128xbf16>
    %31 = vector.shape_cast %30 : vector<16x16x128xbf16> to vector<256x128xbf16>
    %32 = tpu.concatenate %7, %10, %13, %16, %19, %22, %25, %28, %31 in 1 : vector<256x128xbf16>, vector<256x128xbf16>, vector<256x128xbf16>, vector<256x128xbf16>, vector<256x128xbf16>, vector<256x128xbf16>, vector<256x128xbf16>, vector<256x128xbf16>, vector<256x128xbf16> -> vector<256x1152xbf16>
    %c0_33 = arith.constant 0 : index
    %c0_34 = arith.constant 0 : index
    %33 = vector.load %arg2[%c0_33, %c0_34] : memref<1152x128xbf16, #tpu.memory_space<vmem>>, vector<1152x128xbf16>
    %cst_35 = arith.constant dense<0.000000e+00> : vector<256x128xf32>
    %34 = tpu.matmul %32, %33, %cst_35 {dimension_numbers = #tpu.dot_dimension_numbers<[1], [0], [0], [1], [0, 0, 1, 1], [], []>} : vector<256x1152xbf16>, vector<1152x128xbf16>, vector<256x128xf32> -> vector<256x128xf32>
    %c0_36 = arith.constant 0 : index
    %c0_37 = arith.constant 0 : index
    %35 = vector.load %arg5[%c0_36, %c0_37] : memref<1x128xf32, #tpu.memory_space<vmem>>, vector<1x128xf32>
    %36 = vector.broadcast %35 : vector<1x128xf32> to vector<256x128xf32>
    %37 = arith.addf %34, %36 : vector<256x128xf32>
    %cst_38 = arith.constant 0.000000e+00 : f32
    %38 = vector.broadcast %cst_38 : f32 to vector<256x128xf32>
    %39 = arith.maximumf %37, %38 : vector<256x128xf32>
    %40 = vector.shape_cast %39 : vector<256x128xf32> to vector<1x16x16x128xf32>
    %c0_39 = arith.constant 0 : index
    %c0_40 = arith.constant 0 : index
    %c0_41 = arith.constant 0 : index
    %c0_42 = arith.constant 0 : index
    %41 = vector.load %arg10[%c0_39, %c0_40, %c0_41, %c0_42] : memref<1x16x16x128xf32, #tpu.memory_space<vmem>>, vector<1x16x16x128xf32>
    tpu.vector_store %arg10[%c0_39, %c0_40, %c0_41, %c0_42], %40 {strides = array<i32>} : memref<1x16x16x128xf32, #tpu.memory_space<vmem>>, vector<1x16x16x128xf32>,
    %42 = vector.shape_cast %39 : vector<256x128xf32> to vector<16x16x128xf32>
    %c8_43 = arith.constant 8 : index
    %c8_44 = arith.constant 8 : index
    %c0_45 = arith.constant 0 : index
    %43 = vector.load %arg14[%c8_43, %c8_44, %c0_45] : memref<32x32x128xf32, #tpu.memory_space<vmem>>, vector<16x16x128xf32>
    tpu.vector_store %arg14[%c8_43, %c8_44, %c0_45], %42 {strides = array<i32>} : memref<32x32x128xf32, #tpu.memory_space<vmem>>, vector<16x16x128xf32>,
    %c7_46 = arith.constant 7 : index
    %c7_47 = arith.constant 7 : index
    %c0_48 = arith.constant 0 : index
    %44 = vector.load %arg14[%c7_46, %c7_47, %c0_48] : memref<32x32x128xf32, #tpu.memory_space<vmem>>, vector<16x16x128xf32>
    %45 = arith.truncf %44 : vector<16x16x128xf32> to vector<16x16x128xbf16>
    %46 = vector.shape_cast %45 : vector<16x16x128xbf16> to vector<256x128xbf16>
    %c7_49 = arith.constant 7 : index
    %c8_50 = arith.constant 8 : index
    %c0_51 = arith.constant 0 : index
    %47 = vector.load %arg14[%c7_49, %c8_50, %c0_51] : memref<32x32x128xf32, #tpu.memory_space<vmem>>, vector<16x16x128xf32>
    %48 = arith.truncf %47 : vector<16x16x128xf32> to vector<16x16x128xbf16>
    %49 = vector.shape_cast %48 : vector<16x16x128xbf16> to vector<256x128xbf16>
    %c7_52 = arith.constant 7 : index
    %c9_53 = arith.constant 9 : index
    %c0_54 = arith.constant 0 : index
    %50 = vector.load %arg14[%c7_52, %c9_53, %c0_54] : memref<32x32x128xf32, #tpu.memory_space<vmem>>, vector<16x16x128xf32>
    %51 = arith.truncf %50 : vector<16x16x128xf32> to vector<16x16x128xbf16>
    %52 = vector.shape_cast %51 : vector<16x16x128xbf16> to vector<256x128xbf16>
    %c8_55 = arith.constant 8 : index
    %c7_56 = arith.constant 7 : index
    %c0_57 = arith.constant 0 : index
    %53 = vector.load %arg14[%c8_55, %c7_56, %c0_57] : memref<32x32x128xf32, #tpu.memory_space<vmem>>, vector<16x16x128xf32>
    %54 = arith.truncf %53 : vector<16x16x128xf32> to vector<16x16x128xbf16>
    %55 = vector.shape_cast %54 : vector<16x16x128xbf16> to vector<256x128xbf16>
    %c8_58 = arith.constant 8 : index
    %c8_59 = arith.constant 8 : index
    %c0_60 = arith.constant 0 : index
    %56 = vector.load %arg14[%c8_58, %c8_59, %c0_60] : memref<32x32x128xf32, #tpu.memory_space<vmem>>, vector<16x16x128xf32>
    %57 = arith.truncf %56 : vector<16x16x128xf32> to vector<16x16x128xbf16>
    %58 = vector.shape_cast %57 : vector<16x16x128xbf16> to vector<256x128xbf16>
    %c8_61 = arith.constant 8 : index
    %c9_62 = arith.constant 9 : index
    %c0_63 = arith.constant 0 : index
    %59 = vector.load %arg14[%c8_61, %c9_62, %c0_63] : memref<32x32x128xf32, #tpu.memory_space<vmem>>, vector<16x16x128xf32>
    %60 = arith.truncf %59 : vector<16x16x128xf32> to vector<16x16x128xbf16>
    %61 = vector.shape_cast %60 : vector<16x16x128xbf16> to vector<256x128xbf16>
    %c9_64 = arith.constant 9 : index
    %c7_65 = arith.constant 7 : index
    %c0_66 = arith.constant 0 : index
    %62 = vector.load %arg14[%c9_64, %c7_65, %c0_66] : memref<32x32x128xf32, #tpu.memory_space<vmem>>, vector<16x16x128xf32>
    %63 = arith.truncf %62 : vector<16x16x128xf32> to vector<16x16x128xbf16>
    %64 = vector.shape_cast %63 : vector<16x16x128xbf16> to vector<256x128xbf16>
    %c9_67 = arith.constant 9 : index
    %c8_68 = arith.constant 8 : index
    %c0_69 = arith.constant 0 : index
    %65 = vector.load %arg14[%c9_67, %c8_68, %c0_69] : memref<32x32x128xf32, #tpu.memory_space<vmem>>, vector<16x16x128xf32>
    %66 = arith.truncf %65 : vector<16x16x128xf32> to vector<16x16x128xbf16>
    %67 = vector.shape_cast %66 : vector<16x16x128xbf16> to vector<256x128xbf16>
    %c9_70 = arith.constant 9 : index
    %c9_71 = arith.constant 9 : index
    %c0_72 = arith.constant 0 : index
    %68 = vector.load %arg14[%c9_70, %c9_71, %c0_72] : memref<32x32x128xf32, #tpu.memory_space<vmem>>, vector<16x16x128xf32>
    %69 = arith.truncf %68 : vector<16x16x128xf32> to vector<16x16x128xbf16>
    %70 = vector.shape_cast %69 : vector<16x16x128xbf16> to vector<256x128xbf16>
    %71 = tpu.concatenate %46, %49, %52, %55, %58, %61, %64, %67, %70 in 1 : vector<256x128xbf16>, vector<256x128xbf16>, vector<256x128xbf16>, vector<256x128xbf16>, vector<256x128xbf16>, vector<256x128xbf16>, vector<256x128xbf16>, vector<256x128xbf16>, vector<256x128xbf16> -> vector<256x1152xbf16>
    %c0_73 = arith.constant 0 : index
    %c0_74 = arith.constant 0 : index
    %72 = vector.load %arg3[%c0_73, %c0_74] : memref<1152x128xbf16, #tpu.memory_space<vmem>>, vector<1152x128xbf16>
    %cst_75 = arith.constant dense<0.000000e+00> : vector<256x128xf32>
    %73 = tpu.matmul %71, %72, %cst_75 {dimension_numbers = #tpu.dot_dimension_numbers<[1], [0], [0], [1], [0, 0, 1, 1], [], []>} : vector<256x1152xbf16>, vector<1152x128xbf16>, vector<256x128xf32> -> vector<256x128xf32>
    %c0_76 = arith.constant 0 : index
    %c0_77 = arith.constant 0 : index
    %74 = vector.load %arg6[%c0_76, %c0_77] : memref<1x128xf32, #tpu.memory_space<vmem>>, vector<1x128xf32>
    %75 = vector.broadcast %74 : vector<1x128xf32> to vector<256x128xf32>
    %76 = arith.addf %73, %75 : vector<256x128xf32>
    %cst_78 = arith.constant 0.000000e+00 : f32
    %77 = vector.broadcast %cst_78 : f32 to vector<256x128xf32>
    %78 = arith.maximumf %76, %77 : vector<256x128xf32>
    %79 = vector.shape_cast %78 : vector<256x128xf32> to vector<1x16x16x128xf32>
    %c0_79 = arith.constant 0 : index
    %c0_80 = arith.constant 0 : index
    %c0_81 = arith.constant 0 : index
    %c0_82 = arith.constant 0 : index
    %80 = vector.load %arg11[%c0_79, %c0_80, %c0_81, %c0_82] : memref<1x16x16x128xf32, #tpu.memory_space<vmem>>, vector<1x16x16x128xf32>
    tpu.vector_store %arg11[%c0_79, %c0_80, %c0_81, %c0_82], %79 {strides = array<i32>} : memref<1x16x16x128xf32, #tpu.memory_space<vmem>>, vector<1x16x16x128xf32>,
    %81 = vector.shape_cast %78 : vector<256x128xf32> to vector<16x16x128xf32>
    %c8_83 = arith.constant 8 : index
    %c8_84 = arith.constant 8 : index
    %c0_85 = arith.constant 0 : index
    %82 = vector.load %arg14[%c8_83, %c8_84, %c0_85] : memref<32x32x128xf32, #tpu.memory_space<vmem>>, vector<16x16x128xf32>
    tpu.vector_store %arg14[%c8_83, %c8_84, %c0_85], %81 {strides = array<i32>} : memref<32x32x128xf32, #tpu.memory_space<vmem>>, vector<16x16x128xf32>,
    %c7_86 = arith.constant 7 : index
    %c7_87 = arith.constant 7 : index
    %c0_88 = arith.constant 0 : index
    %83 = vector.load %arg14[%c7_86, %c7_87, %c0_88] : memref<32x32x128xf32, #tpu.memory_space<vmem>>, vector<16x16x128xf32>
    %84 = arith.truncf %83 : vector<16x16x128xf32> to vector<16x16x128xbf16>
    %85 = vector.shape_cast %84 : vector<16x16x128xbf16> to vector<256x128xbf16>
    %c7_89 = arith.constant 7 : index
    %c8_90 = arith.constant 8 : index
    %c0_91 = arith.constant 0 : index
    %86 = vector.load %arg14[%c7_89, %c8_90, %c0_91] : memref<32x32x128xf32, #tpu.memory_space<vmem>>, vector<16x16x128xf32>
    %87 = arith.truncf %86 : vector<16x16x128xf32> to vector<16x16x128xbf16>
    %88 = vector.shape_cast %87 : vector<16x16x128xbf16> to vector<256x128xbf16>
    %c7_92 = arith.constant 7 : index
    %c9_93 = arith.constant 9 : index
    %c0_94 = arith.constant 0 : index
    %89 = vector.load %arg14[%c7_92, %c9_93, %c0_94] : memref<32x32x128xf32, #tpu.memory_space<vmem>>, vector<16x16x128xf32>
    %90 = arith.truncf %89 : vector<16x16x128xf32> to vector<16x16x128xbf16>
    %91 = vector.shape_cast %90 : vector<16x16x128xbf16> to vector<256x128xbf16>
    %c8_95 = arith.constant 8 : index
    %c7_96 = arith.constant 7 : index
    %c0_97 = arith.constant 0 : index
    %92 = vector.load %arg14[%c8_95, %c7_96, %c0_97] : memref<32x32x128xf32, #tpu.memory_space<vmem>>, vector<16x16x128xf32>
    %93 = arith.truncf %92 : vector<16x16x128xf32> to vector<16x16x128xbf16>
    %94 = vector.shape_cast %93 : vector<16x16x128xbf16> to vector<256x128xbf16>
    %c8_98 = arith.constant 8 : index
    %c8_99 = arith.constant 8 : index
    %c0_100 = arith.constant 0 : index
    %95 = vector.load %arg14[%c8_98, %c8_99, %c0_100] : memref<32x32x128xf32, #tpu.memory_space<vmem>>, vector<16x16x128xf32>
    %96 = arith.truncf %95 : vector<16x16x128xf32> to vector<16x16x128xbf16>
    %97 = vector.shape_cast %96 : vector<16x16x128xbf16> to vector<256x128xbf16>
    %c8_101 = arith.constant 8 : index
    %c9_102 = arith.constant 9 : index
    %c0_103 = arith.constant 0 : index
    %98 = vector.load %arg14[%c8_101, %c9_102, %c0_103] : memref<32x32x128xf32, #tpu.memory_space<vmem>>, vector<16x16x128xf32>
    %99 = arith.truncf %98 : vector<16x16x128xf32> to vector<16x16x128xbf16>
    %100 = vector.shape_cast %99 : vector<16x16x128xbf16> to vector<256x128xbf16>
    %c9_104 = arith.constant 9 : index
    %c7_105 = arith.constant 7 : index
    %c0_106 = arith.constant 0 : index
    %101 = vector.load %arg14[%c9_104, %c7_105, %c0_106] : memref<32x32x128xf32, #tpu.memory_space<vmem>>, vector<16x16x128xf32>
    %102 = arith.truncf %101 : vector<16x16x128xf32> to vector<16x16x128xbf16>
    %103 = vector.shape_cast %102 : vector<16x16x128xbf16> to vector<256x128xbf16>
    %c9_107 = arith.constant 9 : index
    %c8_108 = arith.constant 8 : index
    %c0_109 = arith.constant 0 : index
    %104 = vector.load %arg14[%c9_107, %c8_108, %c0_109] : memref<32x32x128xf32, #tpu.memory_space<vmem>>, vector<16x16x128xf32>
    %105 = arith.truncf %104 : vector<16x16x128xf32> to vector<16x16x128xbf16>
    %106 = vector.shape_cast %105 : vector<16x16x128xbf16> to vector<256x128xbf16>
    %c9_110 = arith.constant 9 : index
    %c9_111 = arith.constant 9 : index
    %c0_112 = arith.constant 0 : index
    %107 = vector.load %arg14[%c9_110, %c9_111, %c0_112] : memref<32x32x128xf32, #tpu.memory_space<vmem>>, vector<16x16x128xf32>
    %108 = arith.truncf %107 : vector<16x16x128xf32> to vector<16x16x128xbf16>
    %109 = vector.shape_cast %108 : vector<16x16x128xbf16> to vector<256x128xbf16>
    %110 = tpu.concatenate %85, %88, %91, %94, %97, %100, %103, %106, %109 in 1 : vector<256x128xbf16>, vector<256x128xbf16>, vector<256x128xbf16>, vector<256x128xbf16>, vector<256x128xbf16>, vector<256x128xbf16>, vector<256x128xbf16>, vector<256x128xbf16>, vector<256x128xbf16> -> vector<256x1152xbf16>
    %c0_113 = arith.constant 0 : index
    %c0_114 = arith.constant 0 : index
    %111 = vector.load %arg4[%c0_113, %c0_114] : memref<1152x128xbf16, #tpu.memory_space<vmem>>, vector<1152x128xbf16>
    %cst_115 = arith.constant dense<0.000000e+00> : vector<256x128xf32>
    %112 = tpu.matmul %110, %111, %cst_115 {dimension_numbers = #tpu.dot_dimension_numbers<[1], [0], [0], [1], [0, 0, 1, 1], [], []>} : vector<256x1152xbf16>, vector<1152x128xbf16>, vector<256x128xf32> -> vector<256x128xf32>
    %c0_116 = arith.constant 0 : index
    %c0_117 = arith.constant 0 : index
    %113 = vector.load %arg7[%c0_116, %c0_117] : memref<1x128xf32, #tpu.memory_space<vmem>>, vector<1x128xf32>
    %114 = vector.broadcast %113 : vector<1x128xf32> to vector<256x128xf32>
    %115 = arith.addf %112, %114 : vector<256x128xf32>
    %cst_118 = arith.constant 0.000000e+00 : f32
    %116 = vector.broadcast %cst_118 : f32 to vector<256x128xf32>
    %117 = arith.maximumf %115, %116 : vector<256x128xf32>
    %118 = vector.shape_cast %117 : vector<256x128xf32> to vector<1x16x16x128xf32>
    %c0_119 = arith.constant 0 : index
    %c0_120 = arith.constant 0 : index
    %c0_121 = arith.constant 0 : index
    %c0_122 = arith.constant 0 : index
    %119 = vector.load %arg12[%c0_119, %c0_120, %c0_121, %c0_122] : memref<1x16x16x128xf32, #tpu.memory_space<vmem>>, vector<1x16x16x128xf32>
    tpu.vector_store %arg12[%c0_119, %c0_120, %c0_121, %c0_122], %118 {strides = array<i32>} : memref<1x16x16x128xf32, #tpu.memory_space<vmem>>, vector<1x16x16x128xf32>,
    %cst_123 = arith.constant dense<0.000000e+00> : vector<128xf32>
    %120 = vector.multi_reduction <add>, %117, %cst_123 [0] : vector<256x128xf32> to vector<128xf32>
    %121 = vector.shape_cast %120 : vector<128xf32> to vector<1x128xf32>
    %cst_124 = arith.constant 2.560000e+02 : f32
    %122 = vector.broadcast %cst_124 : f32 to vector<1x128xf32>
    %123 = arith.divf %121, %122 : vector<1x128xf32>
    %124 = arith.truncf %123 : vector<1x128xf32> to vector<1x128xbf16>
    %c0_125 = arith.constant 0 : index
    %c0_126 = arith.constant 0 : index
    %125 = vector.load %arg8[%c0_125, %c0_126] : memref<128x128xbf16, #tpu.memory_space<vmem>>, vector<128x128xbf16>
    %cst_127 = arith.constant dense<0.000000e+00> : vector<1x128xf32>
    %126 = tpu.matmul %124, %125, %cst_127 {dimension_numbers = #tpu.dot_dimension_numbers<[1], [0], [0], [1], [0, 0, 1, 1], [], []>} : vector<1x128xbf16>, vector<128x128xbf16>, vector<1x128xf32> -> vector<1x128xf32>
    %c0_128 = arith.constant 0 : index
    %c0_129 = arith.constant 0 : index
    %127 = vector.load %arg9[%c0_128, %c0_129] : memref<1x128xf32, #tpu.memory_space<vmem>>, vector<1x128xf32>
    %128 = arith.addf %126, %127 : vector<1x128xf32>
    %129 = vector.shape_cast %128 : vector<1x128xf32> to vector<1x1x128xf32>
    %c0_130 = arith.constant 0 : index
    %c0_131 = arith.constant 0 : index
    %c0_132 = arith.constant 0 : index
    %130 = vector.load %arg13[%c0_130, %c0_131, %c0_132] : memref<1x1x128xf32, #tpu.memory_space<vmem>>, vector<1x1x128xf32>
    tpu.vector_store %arg13[%c0_130, %c0_131, %c0_132], %129 {strides = array<i32>} : memref<1x1x128xf32, #tpu.memory_space<vmem>>, vector<1x1x128xf32>,
    return
  }
  func.func @transform_0(%arg0: i32) -> (i32, i32, i32, i32) {
    %c0_i32 = arith.constant 0 : i32
    %c0_i32_0 = arith.constant 0 : i32
    %c0_i32_1 = arith.constant 0 : i32
    %c0_i32_2 = arith.constant 0 : i32
    return %arg0, %c0_i32, %c0_i32_0, %c0_i32_1 : i32, i32, i32, i32
  }
  func.func @transform_1(%arg0: i32) -> (i32, i32) {
    %c0_i32 = arith.constant 0 : i32
    %c0_i32_0 = arith.constant 0 : i32
    %c0_i32_1 = arith.constant 0 : i32
    return %c0_i32, %c0_i32_0 : i32, i32
  }
  func.func @transform_2(%arg0: i32) -> (i32, i32) {
    %c0_i32 = arith.constant 0 : i32
    %c0_i32_0 = arith.constant 0 : i32
    %c0_i32_1 = arith.constant 0 : i32
    return %c0_i32, %c0_i32_0 : i32, i32
  }
  func.func @transform_3(%arg0: i32) -> (i32, i32) {
    %c0_i32 = arith.constant 0 : i32
    %c0_i32_0 = arith.constant 0 : i32
    %c0_i32_1 = arith.constant 0 : i32
    return %c0_i32, %c0_i32_0 : i32, i32
  }
  func.func @transform_4(%arg0: i32) -> (i32, i32) {
    %c0_i32 = arith.constant 0 : i32
    %c0_i32_0 = arith.constant 0 : i32
    %c0_i32_1 = arith.constant 0 : i32
    return %c0_i32, %c0_i32_0 : i32, i32
  }
  func.func @transform_5(%arg0: i32) -> (i32, i32) {
    %c0_i32 = arith.constant 0 : i32
    %c0_i32_0 = arith.constant 0 : i32
    %c0_i32_1 = arith.constant 0 : i32
    return %c0_i32, %c0_i32_0 : i32, i32
  }
  func.func @transform_6(%arg0: i32) -> (i32, i32) {
    %c0_i32 = arith.constant 0 : i32
    %c0_i32_0 = arith.constant 0 : i32
    %c0_i32_1 = arith.constant 0 : i32
    return %c0_i32, %c0_i32_0 : i32, i32
  }
  func.func @transform_7(%arg0: i32) -> (i32, i32) {
    %c0_i32 = arith.constant 0 : i32
    %c0_i32_0 = arith.constant 0 : i32
    %c0_i32_1 = arith.constant 0 : i32
    return %c0_i32, %c0_i32_0 : i32, i32
  }
  func.func @transform_8(%arg0: i32) -> (i32, i32) {
    %c0_i32 = arith.constant 0 : i32
    %c0_i32_0 = arith.constant 0 : i32
    %c0_i32_1 = arith.constant 0 : i32
    return %c0_i32, %c0_i32_0 : i32, i32
  }
  func.func @transform_9(%arg0: i32) -> (i32, i32, i32, i32) {
    %c0_i32 = arith.constant 0 : i32
    %c0_i32_0 = arith.constant 0 : i32
    %c0_i32_1 = arith.constant 0 : i32
    %c0_i32_2 = arith.constant 0 : i32
    return %arg0, %c0_i32, %c0_i32_0, %c0_i32_1 : i32, i32, i32, i32
  }
  func.func @transform_10(%arg0: i32) -> (i32, i32, i32, i32) {
    %c0_i32 = arith.constant 0 : i32
    %c0_i32_0 = arith.constant 0 : i32
    %c0_i32_1 = arith.constant 0 : i32
    %c0_i32_2 = arith.constant 0 : i32
    return %arg0, %c0_i32, %c0_i32_0, %c0_i32_1 : i32, i32, i32, i32
  }
  func.func @transform_11(%arg0: i32) -> (i32, i32, i32, i32) {
    %c0_i32 = arith.constant 0 : i32
    %c0_i32_0 = arith.constant 0 : i32
    %c0_i32_1 = arith.constant 0 : i32
    %c0_i32_2 = arith.constant 0 : i32
    return %arg0, %c0_i32, %c0_i32_0, %c0_i32_1 : i32, i32, i32, i32
  }
  func.func @transform_12(%arg0: i32) -> (i32, i32, i32) {
    %c0_i32 = arith.constant 0 : i32
    %c0_i32_0 = arith.constant 0 : i32
    %c0_i32_1 = arith.constant 0 : i32
    return %arg0, %c0_i32, %c0_i32_0 : i32, i32, i32
  }
}

</mosaic_0001>

<bundles_post_ra>
// kernel: tpu_custom_call.1
= control target key start
LH: loop header
LB: loop body
LE: loop exit
PB: predicated region body
PF: predicated region fallthrough
CT: control target
= control target key end

     0   :  { %s11667_s0 = inlined_call_operand.hbm [shape: f32[2,16,16,128], index: 0, kind: input, shape index: {}]   ;;  %s11668_s1 = inlined_call_operand.hbm [shape: bf16[1152,128], index: 1, kind: input, shape index: {}]   ;;  %s11669_s2 = inlined_call_operand.hbm [shape: bf16[1152,128], index: 2, kind: input, shape index: {}]   ;;  %s11670_s3 = inlined_call_operand.hbm [shape: bf16[1152,128], index: 3, kind: input, shape index: {}]   ;;  %s11671_s4 = inlined_call_operand.vmem [shape: f32[1,128], index: 4, kind: input, shape index: {}]   ;;  %s11672_s5 = inlined_call_operand.vmem [shape: f32[1,128], index: 5, kind: input, shape index: {}]   ;;  %s11673_s6 = inlined_call_operand.vmem [shape: f32[1,128], index: 6, kind: input, shape index: {}]   ;;  %s11674_s7 = inlined_call_operand.hbm [shape: bf16[128,128], index: 7, kind: input, shape index: {}]   ;;  %s11675_s8 = inlined_call_operand.vmem [shape: f32[1,128], index: 8, kind: input, shape index: {}]   ;;  %s11676_s9 = inlined_call_operand.hbm [shape: f32[2,16,16,128], index: 9, kind: output, shape index: {0}]   ;;  %s11677_s10 = inlined_call_operand.hbm [shape: f32[2,16,16,128], index: 10, kind: output, shape index: {1}]   ;;  %s11678_s11 = inlined_call_operand.hbm [shape: f32[2,16,16,128], index: 11, kind: output, shape index: {2}]   ;;  %s11679_s12 = inlined_call_operand.hbm [shape: f32[2,1,128], index: 12, kind: output, shape index: {3}]  }
   0x1   :  { %11689 = sst [smem:[#allocation26_spill]] %s11667_s0 }
   0x2   :  { %11690 = sst [smem:[#allocation27_spill]] %s11668_s1 }
   0x3   :  { %11691 = sst [smem:[#allocation28_spill]] %s11669_s2 }
   0x4   :  { %11692 = sst [smem:[#allocation29_spill]] %s11670_s3 }
   0x5   :  { %11693 = sst [smem:[#allocation30_spill]] %s11671_s4 }
   0x6   :  { %11694 = sst [smem:[#allocation31_spill]] %s11675_s8 }
   0x7   :  { %11695 = sst [smem:[#allocation32_spill]] %s11676_s9 }
   0x8   :  { %11696 = sst [smem:[#allocation33_spill]] %s11678_s11 }
   0x9   :  { %11697 = sst [smem:[#allocation34_spill]] %s11679_s12 }
   0xa   :  { %18 = vsyncpa [#allocation4], 0 }
   0xb   :  { %20 = vsyncpa [#allocation4 + $0x1], 0 }
   0xc   :  { %21 = vsyncpa [#allocation7], 0 }
   0xd   :  { %22 = vsyncpa [#allocation10], 0 }
   0xe   :  { %23 = vsyncpa [#allocation5], 0 }
   0xf   :  { %25 = vsyncpa [#allocation5 + $0x1], 0 }
  0x10   :  { %26 = vsyncpa [#allocation14], 0 }
  0x11   :  { %28 = vsyncpa [#allocation14 + $0x1], 0 }
  0x12   :  { %29 = vsyncpa [#allocation17], 0 }
  0x13   :  { %31 = vsyncpa [#allocation17 + $0x1], 0  ;;  %s9446_s21 = smov 0   ;;  %s9448_s22 = smov 0  }
  0x14   :  { %s9450_s23 = smov 0   ;;  %s9452_s24 = smov 0  }
  0x15 LB: > { %11698 = sst [smem:[#allocation24_spill]] %s9349_s21  ;;  %s9467_s25 = sadd.s32 4294967295, %s9361_s24   ;;  %s9361_s24 = sphi %s9452_s24, %s11732_s24   ;;  %s9357_s23 = sphi %s9450_s23, %s11731_s23   ;;  %s9353_s22 = sphi %s9448_s22, %s11730_s22   ;;  %s9349_s21 = sphi %s9446_s21, %s11729_s21  }
  0x16   : > { %s11680_s26 = sadd.s32 4294967294, %s9361_s24   ;;  %p57_p0 = scmp.ne.s32.totalorder %s9353_s22, %s9349_s21 }
  0x17   : > { %p11683_p1 = scmp.eq.s32.totalorder %s9467_s25, 0  ;;  %p255_p3 = scmp.eq.s32.totalorder %s11680_s26, 1 }
  0x18   : > { %p6849_p5 = scmp.ge.s32.totalorder %s9361_s24, 1  ;;  %p340_p7 = scmp.lt.s32.totalorder %s9361_s24, 3 }
  0x19   : > { %p9478_p4 = por %p11683_p1, %p57_p0  ;;  %p9483_p6 = por %p255_p3, %p57_p0 }
  0x1a   : > { %p9488_p8 = pnand %p6849_p5, %p340_p7  ;;  %s9363_s30 = smov [#allocation6]  }
  0x1b   : > { %s11699_s27 = scalar_select %p9478_p4, 1, 0 }
  0x1c   : > { %s11700_s28 = scalar_select %p9483_p6, 1, 0 }
  0x1d   : > { %s11702_s29 = scalar_select %p9488_p8, 1, 0 }
  0x1e   : > { %11701 = sst [smem:[#allocation25_spill]] %s11700_s28  ;;  %s352_s13 = sshll.u32 %s9363_s30, 4  ;;  %s9492_s13 = int_to_ptr.vmem [resolvable:$true] %s352_s13 }
  0x1f   : > { %p8741_p9 = pneg %p9488_p8  ;;  %s9364_s15 = smov [#allocation9]  }
  0x20   : > { %s378_s16 = sshll.u32 %s9364_s15, 4  ;;  %s9365_s17 = smov [#allocation8]   ;;  %s9503_s16 = int_to_ptr.vmem [resolvable:$true] %s378_s16 }
  0x21   : > { %p9499_p11 = pnand %p8741_p9, %p11683_p1  ;;  %s9505_s18 = sshll.u32 %s9365_s17, 4  ;;  %s366_s18 = int_to_ptr.vmem [resolvable:$true] %s9505_s18 }
  0x22   : > { %s11704_s1 = sld [smem:[#allocation27_spill]] }
  0x23   : > { %p9515_p13 = pneg %p9499_p11 }
  0x28   : > { %s9053_s30 = scalar_lea.hbm %s11704_s1, 9216 }
  0x29   : > { %p9054_p12 = scmp.ne.s32.totalorder %s11704_s1, %s9053_s30  ;;  %p9060_p5 = scmp.lt.u32.totalorder %s9053_s30, %s11704_s1 }
  0x2b   : > { %p9056_p0 = pnand %p9515_p13, %p9054_p12 }
  0x2d   : > { %p9057_p3 = pneg %p9056_p0 }
  0x2f   : > { %p9062_p7 = pnand %p9060_p5, %p9057_p3 }
  0x31   : > { %9065 = shalt.err (!%p9062_p7)
}
  0x32   : > { %s9066_s26 = scalar_lea.vmem %s9492_s13, 9216  ;;  %p9074_p2 = scmp.lt.s32.totalorder %s9492_s13, %s9492_s13 }
  0x33   : > { %p9067_p9 = scmp.ne.s32.totalorder %s9492_s13, %s9066_s26  ;;  %p9075_p6 = scmp.lt.s32.totalorder %s9066_s26, %s9066_s26 }
  0x35   : > { %p9069_p10 = pnand %p9067_p9, %p9515_p13  ;;  %p9076_p12 = por %p9075_p6, %p9074_p2 }
  0x37   : > { %p9070_p1 = pneg %p9069_p10 }
  0x39   : > { %p9077_p0 = pnand %p9076_p12, %p9070_p1 }
  0x3b   : > { %9080 = shalt.err (!%p9077_p0)
}
  0x3c   : > { %s9366_s28 = smov 64   ;;  %s9367_s19 = smov 4  }
  0x3d   : > { %8744 = dma.hbm_to_vmem [thread:$0]  (!%p9499_p11), %s11704_s1, 9216, %s9492_s13, [#allocation7], %s9366_s28, %s9366_s28, %s9367_s19  }
  0x3e   : > { %s11706_s3 = sld [smem:[#allocation29_spill]] }
  0x44   : > { %s9081_s26 = scalar_lea.hbm %s11706_s3, 9216 }
  0x45   : > { %p9082_p1 = scmp.ne.s32.totalorder %s11706_s3, %s9081_s26  ;;  %p9088_p10 = scmp.lt.u32.totalorder %s9081_s26, %s11706_s3 }
  0x47   : > { %p9084_p2 = pnand %p9082_p1, %p9515_p13 }
  0x49   : > { %p9085_p6 = pneg %p9084_p2 }
  0x4b   : > { %p9090_p3 = pnand %p9088_p10, %p9085_p6 }
  0x4d   : > { %9093 = shalt.err (!%p9090_p3)
}
  0x4e   : > { %s9094_s13 = scalar_lea.vmem %s9503_s16, 9216  ;;  %p9102_p12 = scmp.lt.s32.totalorder %s9503_s16, %s9503_s16 }
  0x4f   : > { %p9095_p5 = scmp.ne.s32.totalorder %s9503_s16, %s9094_s13  ;;  %p9103_p0 = scmp.lt.s32.totalorder %s9094_s13, %s9094_s13 }
  0x51   : > { %p9097_p7 = pnand %p9095_p5, %p9515_p13  ;;  %p9104_p1 = por %p9103_p0, %p9102_p12 }
  0x53   : > { %p9098_p9 = pneg %p9097_p7 }
  0x55   : > { %p9105_p2 = pnand %p9104_p1, %p9098_p9 }
  0x57   : > { %9108 = shalt.err (!%p9105_p2)
}
  0x58   : > { %8750 = dma.hbm_to_vmem [thread:$0]  (!%p9499_p11), %s11706_s3, 9216, %s9503_s16, [#allocation10], %s9366_s28, %s9366_s28, %s9367_s19  }
  0x59   : > { %s11707_s2 = sld [smem:[#allocation28_spill]] }
  0x5f   : > { %s9109_s20 = scalar_lea.hbm %s11707_s2, 9216 }
  0x60   : > { %p9110_p6 = scmp.ne.s32.totalorder %s11707_s2, %s9109_s20  ;;  %p9116_p5 = scmp.lt.u32.totalorder %s9109_s20, %s11707_s2 }
  0x62   : > { %p9112_p10 = pnand %p9110_p6, %p9515_p13 }
  0x64   : > { %p9113_p3 = pneg %p9112_p10 }
  0x66   : > { %p9118_p7 = pnand %p9116_p5, %p9113_p3 }
  0x68   : > { %9121 = shalt.err (!%p9118_p7)
}
  0x69   : > { %s9122_s13 = scalar_lea.vmem %s366_s18, 9216  ;;  %p9130_p1 = scmp.lt.s32.totalorder %s366_s18, %s366_s18 }
  0x6a   : > { %p9123_p9 = scmp.ne.s32.totalorder %s366_s18, %s9122_s13  ;;  %p9131_p2 = scmp.lt.s32.totalorder %s9122_s13, %s9122_s13 }
  0x6c   : > { %p9125_p12 = pnand %p9123_p9, %p9515_p13  ;;  %p9132_p4 = por %p9131_p2, %p9130_p1 }
  0x6e   : > { %p9126_p0 = pneg %p9125_p12 }
  0x70   : > { %p9133_p8 = pnand %p9132_p4, %p9126_p0 }
  0x72   : > { %9136 = shalt.err (!%p9133_p8)
}
  0x73   : > { %8747 = dma.hbm_to_vmem [thread:$0]  (!%p9499_p11), %s11707_s2, 9216, %s366_s18, [#allocation7], %s9366_s28, %s9366_s28, %s9367_s19  }
  0x74   : > { %s9368_s9 = smov [#allocation11]   ;;  %s9137_s30 = scalar_lea.hbm %s11674_s7, 1024 }
  0x75   : > { %s400_s11 = sshll.u32 %s9368_s9, 4  ;;  %p9138_p4 = scmp.ne.s32.totalorder %s11674_s7, %s9137_s30  ;;  %s401_s11 = int_to_ptr.vmem [resolvable:$true] %s400_s11 }
  0x76   : > { %p9144_p10 = scmp.lt.u32.totalorder %s9137_s30, %s11674_s7 }
  0x77   : > { %p9140_p8 = pnand %p9138_p4, %p9515_p13 }
  0x79   : > { %p9141_p6 = pneg %p9140_p8 }
  0x7b   : > { %p9146_p3 = pnand %p9144_p10, %p9141_p6 }
  0x7d   : > { %9149 = shalt.err (!%p9146_p3)
}
  0x7e   : > { %s9150_s18 = scalar_lea.vmem %s401_s11, 1024  ;;  %p9158_p12 = scmp.lt.s32.totalorder %s401_s11, %s401_s11 }
  0x7f   : > { %p9151_p5 = scmp.ne.s32.totalorder %s401_s11, %s9150_s18  ;;  %p9159_p0 = scmp.lt.s32.totalorder %s9150_s18, %s9150_s18 }
  0x81   : > { %p9153_p7 = pnand %p9151_p5, %p9515_p13  ;;  %p9160_p1 = por %p9159_p0, %p9158_p12 }
  0x83   : > { %p9154_p9 = pneg %p9153_p7 }
  0x85   : > { %p9161_p2 = pnand %p9160_p1, %p9154_p9 }
  0x87   : > { %9164 = shalt.err (!%p9161_p2)
}
  0x88   : > { %8753 = dma.hbm_to_vmem [thread:$0]  (!%p9499_p11), %s11674_s7, 1024, %s401_s11, [#allocation10], %s9366_s28, %s9366_s28, %s9367_s19  }
  0x89   : > { %s9609_s21 = sadd.s32 1, %s9361_s24   ;;  %s44_s14 = sadd.s32 1, %s9357_s23 }
  0x8a   : > { %s41_s9 = ssub.s32 %s9361_s24, %s9609_s21  ;;  %p51_p13 = scmp.ne.s32.totalorder %s9357_s23, %s9353_s22 }
  0x8b   : > { %p42_p4 = scmp.eq.s32.totalorder %s41_s9, 0  ;;  %p52_p8 = scmp.eq.s32.totalorder %s9361_s24, 0 }
  0x8c   : > { %p11708_p6 = scmp.eq.s32.totalorder %s9467_s25, 1  ;;  %p8775_p3 = scmp.lt.s32.totalorder %s9361_s24, 2 }
  0x8d   : > { %s9625_s20 = scalar_select %p42_p4, %s9357_s23, %s44_s14  }
  0x8e   : > { %p9619_p10 = por %p11708_p6, %p51_p13  ;;  %p53_p5 = por %p52_p8, %p51_p13 }
  0x8f   : > { %s417_s30 = sand.u32 1, %s9357_s23   ;;  %s7106_s28 = sshll.u32 %s9361_s24, 12 }
  0x90   : > { %s6855_s15 = sshll.u32 %s417_s30, 8  ;;  %s11710_s0 = sld [smem:[#allocation26_spill]] }
  0x91   : > { %s421_s26 = scalar_lea.vmem [#allocation3], %s6855_s15  ;;  %p9636_p11 = pnand %p8775_p3, %p53_p5 }
  0x92   : > { %s428_s13 = sshll.u32 %s421_s26, 4  ;;  %s9640_s16 = scalar_lea.sflag [#allocation4], %s417_s30  ;;  %s9634_s13 = int_to_ptr.vmem [resolvable:$true] %s428_s13 }
  0x93   : > { %p9167_p9 = pneg %p9636_p11 }
  0x96   : > { %s9632_s17 = scalar_lea.hbm %s11710_s0, %s7106_s28  ;;  %s9170_s15 = scalar_lea.hbm %s11710_s0, 8192 }
  0x97   : > { %s9165_s8 = scalar_lea.hbm %s9632_s17, 4096  ;;  %p9171_p1 = scmp.lt.u32.totalorder %s9632_s17, %s11710_s0 }
  0x98   : > { %p9166_p7 = scmp.ne.s32.totalorder %s9632_s17, %s9165_s8  ;;  %p9172_p2 = scmp.lt.u32.totalorder %s9170_s15, %s9165_s8 }
  0x99   : > { %p9174_p4 = scmp.lt.u32.totalorder %s9165_s8, %s9632_s17 }
  0x9a   : > { %p9168_p12 = pnand %p9167_p9, %p9166_p7  ;;  %p9173_p13 = por %p9172_p2, %p9171_p1 }
  0x9c   : > { %p9169_p0 = pneg %p9168_p12  ;;  %p9175_p8 = por %p9174_p4, %p9173_p13 }
  0x9e   : > { %p9176_p6 = pnand %p9175_p8, %p9169_p0 }
  0xa0   : > { %9179 = shalt.err (!%p9176_p6)
}
  0xa1   : > { %s9180_s30 = scalar_lea.vmem %s9634_s13, 4096  ;;  %s9369_s11 = smov [#allocation3]  }
  0xa2   : > { %p9181_p3 = scmp.ne.s32.totalorder %s9634_s13, %s9180_s30  ;;  %s9185_s26 = sshll.u32 %s9369_s11, 4  ;;  %s9186_s26 = int_to_ptr.vmem [resolvable:$false] %s9185_s26 }
  0xa3   : > { %s9187_s14 = scalar_lea.vmem %s9186_s26, 8192  ;;  %p9188_p12 = scmp.lt.s32.totalorder %s9634_s13, %s9186_s26 }
  0xa4   : > { %p9183_p5 = pnand %p9181_p3, %p9167_p9  ;;  %p9189_p1 = scmp.lt.s32.totalorder %s9187_s14, %s9180_s30 }
  0xa6   : > { %p9184_p7 = pneg %p9183_p5  ;;  %p9190_p2 = por %p9189_p1, %p9188_p12 }
  0xa8   : > { %p9191_p13 = pnand %p9190_p2, %p9184_p7 }
  0xaa   : > { %9194 = shalt.err (!%p9191_p13)
}
  0xab   : > { %s9370_s8 = smov 128   ;;  %s9371_s9 = smov 8  }
  0xac   : > { %8757 = dma.hbm_to_vmem [thread:$0]  (!%p9636_p11), %s9632_s17, 4096, %s9634_s13, %s9640_s16, %s9370_s8, %s9370_s8, %s9371_s9  }
  0xad   : > { %p11712_p9 = scmp.ne.s32.totalorder %s11702_s29, 0 }
  0xae   : > { %s9671_s15 = sand.u32 (!%p11712_p9), 1, %s9353_s22   ;;  %p11713_p0 = scmp.ne.s32.totalorder (!%p11712_p9), %s11699_s27, 0 }
  0xaf   : > { %440 = sbr.rel (%p11712_p9) target bundleno = 1959 (0x7a7), region = 56  ;;  %s9674_s28 = sshll.u32 (!%p11712_p9), %s9671_s15, 8 }
  0xb0   : > { %s443_s19 = scalar_lea.sflag (!%p11712_p9), [#allocation4], %s9671_s15  ;;  %s9678_s30 = scalar_lea.vmem (!%p11712_p9), [#allocation3], %s9674_s28 }
  0xb6   : > { %9324 = dma.done.wait (%p11713_p0), %s443_s19, 4096  }
  0xb7   : > { %9326 = vsyncadd (%p11713_p0), %s443_s19, 4294963200  ;;  %p11714_p11 = scmp.eq.s32.totalorder %s9467_s25, 0 }
  0xb9   : > { %9328 = dma.done.wait (%p11714_p11), [#allocation7], 18432   ;;  %p11715_p4 = pmov %p11714_p11 }
  0xbb   : > { %9330 = vsyncadd (%p11715_p4), [#allocation7], 4294948864  ;;  %p11716_p8 = pmov %p11715_p4 }
  0xbc   : > { %p11717_p6 = pmov %p11715_p4 }
  0xbd   : > { %9332 = dma.done.wait (%p11716_p8), [#allocation10], 10240  }
  0xbe   : > { %9334 = vsyncadd (%p11717_p6), [#allocation10], 4294957056  ;;  %v9372_v0 = vmov 0.0   ;;  %v9373_v1 = vmov 0.0|0.0   ;;  %v8825_v2 = vld [vmem:[#allocation6 + $0x40] sm:$0xff]   ;;  %v8829_v6 = vld [vmem:[#allocation6 + $0x48] sm:$0xff]  }
  0xbf   : > { %518 = vst [vmem:[#allocation2] sm:$0xff] %v9372_v0  ;;  %546 = vst [vmem:[#allocation2 + $0xe0] sm:$0xff] %v9372_v0  ;;  %1760 = vmatprep.mubr.bf16.mxu0 %v9373_v1  ;;  %v8826_v3 = vld [vmem:[#allocation6 + $0xc0] sm:$0xff]   ;;  %7110 = vmatprep.subr.bf16.mxu0 %v8825_v2  ;;  %v8830_v7 = vld [vmem:[#allocation6 + $0xc8] sm:$0xff]   ;;  %s11718_s4 = sld [smem:[#allocation30_spill]]  ;;  %s10249_s17 = scalar_lea.vmem [#allocation12], %s9674_s28 }
  0xc0   : > { %547 = vst [vmem:[#allocation2 + $0xe8] sm:$0xff] %v9372_v0  ;;  %548 = vst [vmem:[#allocation2 + $0xf0] sm:$0xff] %v9372_v0  ;;  %v8827_v4 = vld [vmem:[#allocation6] sm:$0xff]   ;;  %7222 = vmatprep.subr.bf16.mxu1 %v8826_v3  ;;  %v8831_v8 = vld [vmem:[#allocation6 + $0x8] sm:$0xff]   ;;  %s10839_s16 = scalar_lea.vmem [#allocation13], %s9674_s28  ;;  %vm9374_vm0 = vmmov 0  }
  0xc1   : > { %549 = vst [vmem:[#allocation2 + $0xf8] sm:$0xff] %v9372_v0  ;;  %550 = vst [vmem:[#allocation2 + $0x100] sm:$0xff] %v9372_v0  ;;  %v8828_v5 = vld [vmem:[#allocation6 + $0x80] sm:$0xff]   ;;  %7111 = vmatpush3.bf16.msra.mxu0 %v8827_v4  ;;  %v8832_v9 = vld [vmem:[#allocation6 + $0x88] sm:$0xff]   ;;  %s11435_s14 = scalar_lea.vmem [#allocation15], %s9674_s28  ;;  %s6580_s8 = sand.u32 1, %s9467_s25  }
  0xc2   : > { %553 = vst [vmem:[#allocation2 + $0x118] sm:$0xff] %v9372_v0  ;;  %554 = vst [vmem:[#allocation2 + $0x120] sm:$0xff] %v9372_v0  ;;  %7223 = vmatpush3.bf16.msra.mxu1 %v8828_v5  ;;  %7112 = vmatprep.subr.bf16.mxu0 %v8829_v6  ;;  %v8833_v10 = vld [vmem:[#allocation6 + $0x50] sm:$0xff]   ;;  %v8837_v14 = vld [vmem:[#allocation6 + $0x58] sm:$0xff]   ;;  %s11503_s9 = sshll.u32 %s9467_s25, 12  ;;  %s6619_s27 = sshll.u32 %s10839_s16, 4  ;;  %s11518_s27 = int_to_ptr.vmem [resolvable:$true] %s6619_s27 }
  0xc3   : > { %557 = vst [vmem:[#allocation2 + $0x138] sm:$0xff] %v9372_v0  ;;  %558 = vst [vmem:[#allocation2 + $0x140] sm:$0xff] %v9372_v0  ;;  %7224 = vmatprep.subr.bf16.mxu1 %v8830_v7  ;;  %v8834_v11 = vld [vmem:[#allocation6 + $0xd0] sm:$0xff]   ;;  %v8838_v15 = vld [vmem:[#allocation6 + $0xd8] sm:$0xff]   ;;  %s11719_s18 = sld [smem:[#allocation33_spill]]  ;;  %s11520_s26 = scalar_lea.sflag [#allocation14], %s6580_s8 }
  0xc4   : > { %561 = vst [vmem:[#allocation2 + $0x158] sm:$0xff] %v9372_v0  ;;  %562 = vst [vmem:[#allocation2 + $0x160] sm:$0xff] %v9372_v0  ;;  %v8835_v12 = vld [vmem:[#allocation6 + $0x10] sm:$0xff]   ;;  %v8839_v16 = vld [vmem:[#allocation6 + $0x18] sm:$0xff]   ;;  %s9195_s0 = scalar_lea.vmem %s11518_s27, 4096  ;;  %s9375_s28 = smov [#allocation13]  }
  0xc5   : > { %565 = vst [vmem:[#allocation2 + $0x178] sm:$0xff] %v9372_v0  ;;  %566 = vst [vmem:[#allocation2 + $0x180] sm:$0xff] %v9372_v0  ;;  %7113 = vmatpush3.bf16.msra.mxu0 %v8831_v8  ;;  %v8836_v13 = vld [vmem:[#allocation6 + $0x90] sm:$0xff]   ;;  %v8840_v17 = vld [vmem:[#allocation6 + $0x98] sm:$0xff]   ;;  %p9196_p3 = scmp.ne.s32.totalorder %s11518_s27, %s9195_s0  ;;  %s9199_s19 = sshll.u32 %s9375_s28, 4  ;;  %s9200_s19 = int_to_ptr.vmem [resolvable:$false] %s9199_s19 }
  0xc6   : > { %569 = vst [vmem:[#allocation2 + $0x198] sm:$0xff] %v9372_v0  ;;  %570 = vst [vmem:[#allocation2 + $0x1a0] sm:$0xff] %v9372_v0  ;;  %7225 = vmatpush3.bf16.msra.mxu1 %v8832_v9  ;;  %7114 = vmatprep.subr.bf16.mxu0 %v8833_v10  ;;  %v8841_v18 = vld [vmem:[#allocation6 + $0x60] sm:$0xff]   ;;  %v8845_v22 = vld [vmem:[#allocation6 + $0x68] sm:$0xff]   ;;  %p9202_p12 = scmp.lt.s32.totalorder %s11518_s27, %s9200_s19 }
  0xc7   : > { %573 = vst [vmem:[#allocation2 + $0x1b8] sm:$0xff] %v9372_v0  ;;  %574 = vst [vmem:[#allocation2 + $0x1c0] sm:$0xff] %v9372_v0  ;;  %7226 = vmatprep.subr.bf16.mxu1 %v8834_v11  ;;  %v8842_v19 = vld [vmem:[#allocation6 + $0xe0] sm:$0xff]   ;;  %v8846_v23 = vld [vmem:[#allocation6 + $0xe8] sm:$0xff]   ;;  %p9197_p5 = pnand %p9196_p3, %p9619_p10 }
  0xc8   : > { %577 = vst [vmem:[#allocation2 + $0x1d8] sm:$0xff] %v9372_v0  ;;  %578 = vst [vmem:[#allocation2 + $0x1e0] sm:$0xff] %v9372_v0  ;;  %v8843_v20 = vld [vmem:[#allocation6 + $0x20] sm:$0xff]   ;;  %v8847_v24 = vld [vmem:[#allocation6 + $0x28] sm:$0xff]  }
  0xc9   : > { %581 = vst [vmem:[#allocation2 + $0x1f8] sm:$0xff] %v9372_v0  ;;  %582 = vst [vmem:[#allocation2 + $0x200] sm:$0xff] %v9372_v0  ;;  %7115 = vmatpush3.bf16.msra.mxu0 %v8835_v12  ;;  %v8844_v21 = vld [vmem:[#allocation6 + $0xa0] sm:$0xff]   ;;  %v8848_v25 = vld [vmem:[#allocation6 + $0xa8] sm:$0xff]   ;;  %s11516_s11 = scalar_lea.hbm %s11719_s18, %s11503_s9  ;;  %p9198_p7 = pneg %p9197_p5 }
  0xca   : > { %585 = vst [vmem:[#allocation2 + $0x218] sm:$0xff] %v9372_v0  ;;  %586 = vst [vmem:[#allocation2 + $0x220] sm:$0xff] %v9372_v0  ;;  %7227 = vmatpush3.bf16.msra.mxu1 %v8836_v13  ;;  %7116 = vmatprep.subr.bf16.mxu0 %v8837_v14  ;;  %v8849_v26 = vld [vmem:[#allocation6 + $0x70] sm:$0xff]   ;;  %v8853_v30 = vld [vmem:[#allocation6 + $0x78] sm:$0xff]  }
  0xcb   : > { %589 = vst [vmem:[#allocation2 + $0x238] sm:$0xff] %v9372_v0  ;;  %590 = vst [vmem:[#allocation2 + $0x240] sm:$0xff] %v9372_v0  ;;  %7228 = vmatprep.subr.bf16.mxu1 %v8838_v15  ;;  %v8850_v27 = vld [vmem:[#allocation6 + $0xf0] sm:$0xff]   ;;  %v8854_v31 = vld [vmem:[#allocation6 + $0xf8] sm:$0xff]  }
  0xcc   : > { %593 = vst [vmem:[#allocation2 + $0x258] sm:$0xff] %v9372_v0  ;;  %594 = vst [vmem:[#allocation2 + $0x260] sm:$0xff] %v9372_v0  ;;  %v8851_v28 = vld [vmem:[#allocation6 + $0x30] sm:$0xff]   ;;  %v8855_v32 = vld [vmem:[#allocation6 + $0x38] sm:$0xff]  }
  0xcd   : > { %597 = vst [vmem:[#allocation2 + $0x278] sm:$0xff] %v9372_v0  ;;  %598 = vst [vmem:[#allocation2 + $0x280] sm:$0xff] %v9372_v0  ;;  %7117 = vmatpush3.bf16.msra.mxu0 %v8839_v16  ;;  %v8852_v29 = vld [vmem:[#allocation6 + $0xb0] sm:$0xff]   ;;  %v8856_v33 = vld [vmem:[#allocation6 + $0xb8] sm:$0xff]  }
  0xce   : > { %601 = vst [vmem:[#allocation2 + $0x298] sm:$0xff] %v9372_v0  ;;  %602 = vst [vmem:[#allocation2 + $0x2a0] sm:$0xff] %v9372_v0  ;;  %7229 = vmatpush3.bf16.msra.mxu1 %v8840_v17  ;;  %7118 = vmatprep.subr.bf16.mxu0 %v8841_v18  ;;  %v646_v34 = vld [vmem:[%s9678_s30] sm:$0xff]  ;;  %v647_v35 = vld [vmem:[%s9678_s30 + $0x8] sm:$0xff] }
  0xcf   : > { %605 = vst [vmem:[#allocation2 + $0x2b8] sm:$0xff] %v9372_v0  ;;  %606 = vst [vmem:[#allocation2 + $0x2c0] sm:$0xff] %v9372_v0  ;;  %7230 = vmatprep.subr.bf16.mxu1 %v8842_v19  ;;  %v712_v36 = vld [vmem:[#allocation2 + $0xe7] sm:$0xff]  ;;  %v713_v37 = vld [vmem:[#allocation2 + $0xef] sm:$0xff]  ;;  %v9694_v38 = vpack.c.bf16 %v647_v35, %v646_v34 }
  0xd0   : > { %609 = vst [vmem:[#allocation2 + $0x2d8] sm:$0xff] %v9372_v0  ;;  %610 = vst [vmem:[#allocation2 + $0x2e0] sm:$0xff] %v9372_v0  ;;  %v744_v39 = vpack.c.bf16 %v713_v37, %v712_v36  ;;  %v8857_v40 = vld [vmem:[#allocation6 + $0x140] sm:$0xff]   ;;  %v808_v41 = vld [vmem:[#allocation2 + $0xe9] sm:$0xff] }
  0xd1   : > { %613 = vst [vmem:[#allocation2 + $0x2f8] sm:$0xff] %v9372_v0  ;;  %614 = vst [vmem:[#allocation2 + $0x300] sm:$0xff] %v9372_v0  ;;  %7119 = vmatpush3.bf16.msra.mxu0 %v8843_v20  ;;  %v809_v42 = vld [vmem:[#allocation2 + $0xf1] sm:$0xff]  ;;  %v8858_v43 = vld [vmem:[#allocation6 + $0x100] sm:$0xff]  }
  0xd2   : > { %615 = vst [vmem:[#allocation2 + $0x308] sm:$0xff] %v9372_v0  ;;  %616 = vst [vmem:[#allocation2 + $0x310] sm:$0xff] %v9372_v0  ;;  %7231 = vmatpush3.bf16.msra.mxu1 %v8844_v21  ;;  %7120 = vmatprep.subr.bf16.mxu0 %v8845_v22  ;;  %v648_v44 = vld [vmem:[%s9678_s30 + $0x10] sm:$0xff]  ;;  %v649_v45 = vld [vmem:[%s9678_s30 + $0x18] sm:$0xff]  ;;  %v840_v54 = vpack.c.bf16 %v809_v42, %v808_v41 }
  0xd3   : > { %617 = vst [vmem:[#allocation2 + $0x318] sm:$0xff] %v9372_v0  ;;  %7232 = vmatprep.subr.bf16.mxu1 %v8846_v23  ;;  %679 = vst [vmem:[#allocation2 + $0x108] sm:$0xff] %v646_v34  ;;  %v650_v46 = vld [vmem:[%s9678_s30 + $0x20] sm:$0xff]  ;;  %v651_v47 = vld [vmem:[%s9678_s30 + $0x28] sm:$0xff]  ;;  %v9709_v56 = vpack.c.bf16 %v649_v45, %v648_v44 }
  0xd4   : > { %680 = vst [vmem:[#allocation2 + $0x110] sm:$0xff] %v647_v35  ;;  %681 = vst [vmem:[#allocation2 + $0x128] sm:$0xff] %v648_v44  ;;  %v8859_v48 = vld [vmem:[#allocation6 + $0x148] sm:$0xff]   ;;  %v9702_v50 = vld [vmem:[%s9678_s30 + $0x30] sm:$0xff]  ;;  %v9737_v9 = vpack.c.bf16 %v651_v47, %v650_v46 }
  0xd5   : > { %7121 = vmatpush3.bf16.msra.mxu0 %v8847_v24  ;;  %682 = vst [vmem:[#allocation2 + $0x130] sm:$0xff] %v649_v45  ;;  %683 = vst [vmem:[#allocation2 + $0x148] sm:$0xff] %v650_v46  ;;  %v8860_v49 = vld [vmem:[#allocation6 + $0x108] sm:$0xff]   ;;  %v9705_v51 = vld [vmem:[%s9678_s30 + $0x38] sm:$0xff] }
  0xd6   : > { %7233 = vmatpush3.bf16.msra.mxu1 %v8848_v25  ;;  %7122 = vmatprep.subr.bf16.mxu0 %v8849_v26  ;;  %684 = vst [vmem:[#allocation2 + $0x150] sm:$0xff] %v651_v47  ;;  %685 = vst [vmem:[#allocation2 + $0x168] sm:$0xff] %v9702_v50  ;;  %v9712_v57 = vld [vmem:[%s9678_s30 + $0x40] sm:$0xff]  ;;  %v9715_v58 = vld [vmem:[%s9678_s30 + $0x48] sm:$0xff]  ;;  %v9771_v24 = vpack.c.bf16 %v9705_v51, %v9702_v50 }
  0xd7   : > { %7234 = vmatprep.subr.bf16.mxu1 %v8850_v27  ;;  %686 = vst [vmem:[#allocation2 + $0x170] sm:$0xff] %v9705_v51  ;;  %687 = vst [vmem:[#allocation2 + $0x188] sm:$0xff] %v9712_v57  ;;  %v8861_v59 = vld [vmem:[#allocation6 + $0x150] sm:$0xff]   ;;  %v9730_v6 = vld [vmem:[%s9678_s30 + $0x58] sm:$0xff] }
  0xd8   : > { %688 = vst [vmem:[#allocation2 + $0x190] sm:$0xff] %v9715_v58  ;;  %v8862_v60 = vld [vmem:[#allocation6 + $0x110] sm:$0xff]   ;;  %v9733_v7 = vld [vmem:[%s9678_s30 + $0x60] sm:$0xff]  ;;  %690 = vst [vmem:[#allocation2 + $0x1b0] sm:$0xff] %v9730_v6 }
  0xd9   : > { %7123 = vmatpush3.bf16.msra.mxu0 %v8851_v28  ;;  %v9723_v4 = vld [vmem:[%s9678_s30 + $0x50] sm:$0xff]  ;;  %691 = vst [vmem:[#allocation2 + $0x1c8] sm:$0xff] %v9733_v7  ;;  %v9742_v10 = vld [vmem:[%s9678_s30 + $0x68] sm:$0xff]  ;;  %v8863_v13 = vld [vmem:[#allocation6 + $0x158] sm:$0xff]  }
  0xda   : > { %7235 = vmatpush3.bf16.msra.mxu1 %v8852_v29  ;;  %7124 = vmatprep.subr.bf16.mxu0 %v8853_v30  ;;  %v856_v52 = vld [vmem:[#allocation2 + $0x107] sm:$0xff]  ;;  %689 = vst [vmem:[#allocation2 + $0x1a8] sm:$0xff] %v9723_v4  ;;  %692 = vst [vmem:[#allocation2 + $0x1d0] sm:$0xff] %v9742_v10  ;;  %v8864_v15 = vld [vmem:[#allocation6 + $0x118] sm:$0xff]  }
  0xdb   : > { %7236 = vmatprep.subr.bf16.mxu1 %v8854_v31  ;;  %v857_v53 = vld [vmem:[#allocation2 + $0x10f] sm:$0xff]  ;;  %v858_v61 = vld [vmem:[#allocation2 + $0x127] sm:$0xff]  ;;  %v9753_v17 = vld [vmem:[%s9678_s30 + $0x78] sm:$0xff] }
  0xdc   : > { %v888_v55 = vpack.c.bf16 %v857_v53, %v856_v52  ;;  %v859_v62 = vld [vmem:[#allocation2 + $0x12f] sm:$0xff]  ;;  %v860_v2 = vld [vmem:[#allocation2 + $0x147] sm:$0xff]  ;;  %694 = vst [vmem:[#allocation2 + $0x1f0] sm:$0xff] %v9753_v17 }
  0xdd   : > { %7125 = vmatpush3.bf16.msra.mxu0 %v8855_v32  ;;  %v9719_v63 = vpack.c.bf16 %v859_v62, %v858_v61  ;;  %v810_v0 = vld [vmem:[#allocation2 + $0x109] sm:$0xff]  ;;  %v811_v1 = vld [vmem:[#allocation2 + $0x111] sm:$0xff]  ;;  %v9757_v18 = vld [vmem:[%s9678_s30 + $0x80] sm:$0xff] }
  0xde   : > { %7237 = vmatpush3.bf16.msra.mxu1 %v8856_v33  ;;  %7334 = vmatprep.subr.bf16.mxu0 %v8857_v40  ;;  %v861_v3 = vld [vmem:[#allocation2 + $0x14f] sm:$0xff]  ;;  %v9727_v5 = vpack.c.bf16 %v811_v1, %v810_v0  ;;  %v862_v14 = vld [vmem:[#allocation2 + $0x167] sm:$0xff]  ;;  %695 = vst [vmem:[#allocation2 + $0x208] sm:$0xff] %v9757_v18  ;;  %v9781_v33 = vld [vmem:[%s9678_s30 + $0x98] sm:$0xff] }
  0xdf   : > { %1921 = vmatprep.mubr.bf16.mxu1 %v888_v55  ;;  %v9735_v8 = vpack.c.bf16 %v861_v3, %v860_v2  ;;  %v812_v11 = vld [vmem:[#allocation2 + $0x129] sm:$0xff]  ;;  %v813_v12 = vld [vmem:[#allocation2 + $0x131] sm:$0xff]  ;;  %v8865_v21 = vld [vmem:[#allocation6 + $0x160] sm:$0xff]   ;;  %698 = vst [vmem:[#allocation2 + $0x230] sm:$0xff] %v9781_v33 }
  0xe0   : > { %1761 = vmatmul.mubr.bf16.vlgmr.msra.gmra.mrb[0].mxu0 %v744_v39  ;;  %v9748_v16 = vld [vmem:[%s9678_s30 + $0x70] sm:$0xff]  ;;  %v9760_v19 = vld [vmem:[%s9678_s30 + $0x88] sm:$0xff]  ;;  %v9765_v22 = vpack.c.bf16 %v813_v12, %v812_v11  ;;  %v8866_v25 = vld [vmem:[#allocation6 + $0x1c0] sm:$0xff]   ;;  %v9797_v39 = vpack.c.bf16 %v9715_v58, %v9712_v57  ;;  %v9847_v11 = vpack.c.bf16 %v9742_v10, %v9733_v7 }
  0xe1   : > { %7335 = vmatpush3.bf16.msra.mxu0 %v8858_v43  ;;  %1768 = vmatprep.mubr.bf16.mxu0 %v9694_v38  ;;  %693 = vst [vmem:[#allocation2 + $0x1e8] sm:$0xff] %v9748_v16  ;;  %v863_v20 = vld [vmem:[#allocation2 + $0x16f] sm:$0xff]  ;;  %696 = vst [vmem:[#allocation2 + $0x210] sm:$0xff] %v9760_v19  ;;  %v8867_v26 = vld [vmem:[#allocation6 + $0x120] sm:$0xff]  }
  0xe2   : > { %7336 = vmatprep.subr.bf16.mxu0 %v8859_v48  ;;  %1922 = vmatmul.mubr.bf16.vlgmr.msra.gmra.mrb[0].mxu1 %v840_v54  ;;  %v9767_v23 = vpack.c.bf16 %v863_v20, %v862_v14  ;;  %v8868_v27 = vld [vmem:[#allocation6 + $0x180] sm:$0xff]   ;;  %v814_v28 = vld [vmem:[#allocation2 + $0x149] sm:$0xff]  ;;  %v815_v29 = vld [vmem:[#allocation2 + $0x151] sm:$0xff]  ;;  %v9827_v54 = vpack.c.bf16 %v9730_v6, %v9723_v4 }
  0xe3   : > { %1929 = vmatprep.mubr.bf16.mxu1 %v9719_v63  ;;  %7446 = vmatprep.subr.bf16.mxu1 %v8866_v25  ;;  %v864_v30 = vld [vmem:[#allocation2 + $0x187] sm:$0xff]  ;;  %v865_v31 = vld [vmem:[#allocation2 + $0x18f] sm:$0xff]  ;;  %v9784_v34 = vpack.c.bf16 %v815_v29, %v814_v28  ;;  %v9809_v48 = vld [vmem:[%s9678_s30 + $0xb8] sm:$0xff] }
  0xe4   : > { %7447 = vmatpush3.bf16.msra.mxu1 %v8868_v27  ;;  %v9778_v32 = vld [vmem:[%s9678_s30 + $0x90] sm:$0xff]  ;;  %v9788_v35 = vld [vmem:[%s9678_s30 + $0xa0] sm:$0xff]  ;;  %v9791_v36 = vld [vmem:[%s9678_s30 + $0xa8] sm:$0xff]  ;;  %v9793_v37 = vpack.c.bf16 %v865_v31, %v864_v30  ;;  %702 = vst [vmem:[#allocation2 + $0x270] sm:$0xff] %v9809_v48 }
  0xe5   : > { %7337 = vmatpush3.bf16.msra.mxu0 %v8860_v49  ;;  %697 = vst [vmem:[#allocation2 + $0x228] sm:$0xff] %v9778_v32  ;;  %699 = vst [vmem:[#allocation2 + $0x248] sm:$0xff] %v9788_v35  ;;  %v8869_v40 = vld [vmem:[#allocation6 + $0x168] sm:$0xff]   ;;  %v817_v43 = vld [vmem:[#allocation2 + $0x171] sm:$0xff] }
  0xe6   : > { %7338 = vmatprep.subr.bf16.mxu0 %v8861_v59  ;;  %700 = vst [vmem:[#allocation2 + $0x250] sm:$0xff] %v9791_v36  ;;  %v8870_v41 = vld [vmem:[#allocation6 + $0x1c8] sm:$0xff]   ;;  %v9804_v47 = vld [vmem:[%s9678_s30 + $0xb0] sm:$0xff]  ;;  %v9813_v49 = vld [vmem:[%s9678_s30 + $0xc0] sm:$0xff] }
  0xe7   : > { %v816_v42 = vld [vmem:[#allocation2 + $0x169] sm:$0xff]  ;;  %701 = vst [vmem:[#allocation2 + $0x268] sm:$0xff] %v9804_v47  ;;  %7448 = vmatprep.subr.bf16.mxu1 %v8870_v41  ;;  %703 = vst [vmem:[#allocation2 + $0x288] sm:$0xff] %v9813_v49  ;;  %v819_v61 = vld [vmem:[#allocation2 + $0x191] sm:$0xff] }
  0xe8   : > { %1769 = vmatmul.mubr.bf16.gmra.mrb[4].mxu0 %v888_v55  ;;  %v8871_v44 = vld [vmem:[#allocation6 + $0x128] sm:$0xff]   ;;  %v9821_v52 = vpack.c.bf16 %v817_v43, %v816_v42  ;;  %v8873_v55 = vld [vmem:[#allocation6 + $0x170] sm:$0xff]   ;;  %v9837_v2 = vld [vmem:[%s9678_s30 + $0xd8] sm:$0xff] }
  0xe9   : > { %1776 = vmatprep.mubr.bf16.mxu0 %v9709_v56  ;;  %7339 = vmatpush3.bf16.msra.mxu0 %v8862_v60  ;;  %v866_v45 = vld [vmem:[#allocation2 + $0x1a7] sm:$0xff]  ;;  %v867_v51 = vld [vmem:[#allocation2 + $0x1af] sm:$0xff]  ;;  %706 = vst [vmem:[#allocation2 + $0x2b0] sm:$0xff] %v9837_v2  ;;  %v8877_v4 = vld [vmem:[#allocation6 + $0x1d8] sm:$0xff]  }
  0xea   : > { %1930 = vmatmul.mubr.bf16.gmra.mrb[4].mxu1 %v9727_v5  ;;  %7340 = vmatprep.subr.bf16.mxu0 %v8863_v13  ;;  %v8872_v46 = vld [vmem:[#allocation6 + $0x188] sm:$0xff]   ;;  %v9823_v53 = vpack.c.bf16 %v867_v51, %v866_v45  ;;  %v8874_v57 = vld [vmem:[#allocation6 + $0x1d0] sm:$0xff]   ;;  %v8878_v12 = vld [vmem:[#allocation6 + $0x198] sm:$0xff]  }
  0xeb   : > { %1937 = vmatprep.mubr.bf16.mxu1 %v9735_v8  ;;  %v9816_v50 = vld [vmem:[%s9678_s30 + $0xc8] sm:$0xff]  ;;  %7449 = vmatpush3.bf16.msra.mxu1 %v8872_v46  ;;  %v8875_v58 = vld [vmem:[#allocation6 + $0x130] sm:$0xff]   ;;  %v674_v13 = vld [vmem:[%s9678_s30 + $0xe0] sm:$0xff] }
  0xec   : > { %704 = vst [vmem:[#allocation2 + $0x290] sm:$0xff] %v9816_v50  ;;  %v8876_v59 = vld [vmem:[#allocation6 + $0x190] sm:$0xff]   ;;  %v868_v62 = vld [vmem:[#allocation2 + $0x1c7] sm:$0xff]  ;;  %7450 = vmatprep.subr.bf16.mxu1 %v8874_v57  ;;  %707 = vst [vmem:[#allocation2 + $0x2c8] sm:$0xff] %v674_v13 }
  0xed   : > { %7341 = vmatpush3.bf16.msra.mxu0 %v8864_v15  ;;  %v818_v60 = vld [vmem:[#allocation2 + $0x189] sm:$0xff]  ;;  %v821_v20 = vld [vmem:[#allocation2 + $0x1b1] sm:$0xff]  ;;  %v8880_v27 = vld [vmem:[#allocation6 + $0x1e0] sm:$0xff]  }
  0xee   : > { %7342 = vmatprep.subr.bf16.mxu0 %v8865_v21  ;;  %v869_v0 = vld [vmem:[#allocation2 + $0x1cf] sm:$0xff]  ;;  %v9840_v3 = vpack.c.bf16 %v819_v61, %v818_v60  ;;  %v8879_v21 = vld [vmem:[#allocation6 + $0x178] sm:$0xff]   ;;  %v8882_v28 = vld [vmem:[#allocation6 + $0x1a0] sm:$0xff]   ;;  %v9885_v60 = vpack.c.bf16 %v9760_v19, %v9757_v18 }
  0xef   : > { %v9834_v1 = vld [vmem:[%s9678_s30 + $0xd0] sm:$0xff]  ;;  %7451 = vmatpush3.bf16.msra.mxu1 %v8876_v59  ;;  %v9843_v6 = vpack.c.bf16 %v869_v0, %v868_v62  ;;  %v675_v14 = vld [vmem:[%s9678_s30 + $0xe8] sm:$0xff]  ;;  %v8881_v7 = vld [vmem:[#allocation6 + $0x138] sm:$0xff]  }
  0xf0   : > { %1777 = vmatmul.mubr.bf16.gmra.mrb[8].mxu0 %v9719_v63  ;;  %705 = vst [vmem:[#allocation2 + $0x2a8] sm:$0xff] %v9834_v1  ;;  %7452 = vmatprep.subr.bf16.mxu1 %v8877_v4  ;;  %v820_v15 = vld [vmem:[#allocation2 + $0x1a9] sm:$0xff]  ;;  %708 = vst [vmem:[#allocation2 + $0x2d0] sm:$0xff] %v675_v14  ;;  %v9851_v25 = vpack.c.bf16 %v675_v14, %v674_v13  ;;  %v9869_v45 = vld [vmem:[%s9678_s30 + $0xf8] sm:$0xff]  ;;  %v9899_v13 = vpack.c.bf16 %v9781_v33, %v9778_v32 }
  0xf1   : > { %1784 = vmatprep.mubr.bf16.mxu0 %v9737_v9  ;;  %7343 = vmatpush3.bf16.msra.mxu0 %v8867_v26  ;;  %v870_v26 = vld [vmem:[#allocation2 + $0x1e7] sm:$0xff]  ;;  %v871_v10 = vld [vmem:[#allocation2 + $0x1ef] sm:$0xff]  ;;  %v9857_v29 = vpack.c.bf16 %v821_v20, %v820_v15  ;;  %710 = vst [vmem:[#allocation2 + $0x2f0] sm:$0xff] %v9869_v45  ;;  %v8888_v61 = vld [vmem:[#allocation6 + $0x1b8] sm:$0xff]   ;;  %v9911_v32 = vpack.c.bf16 %v9791_v36, %v9788_v35 }
  0xf2   : > { %1938 = vmatmul.mubr.bf16.gmra.mrb[8].mxu1 %v9765_v22  ;;  %7344 = vmatprep.subr.bf16.mxu0 %v8869_v40  ;;  %v8883_v30 = vld [vmem:[#allocation6 + $0x1e8] sm:$0xff]   ;;  %v9859_v31 = vpack.c.bf16 %v871_v10, %v870_v26  ;;  %v9863_v40 = vpack.c.bf16 %v9753_v17, %v9748_v16  ;;  %v9866_v42 = vld [vmem:[%s9678_s30 + $0xf0] sm:$0xff]  ;;  %v9923_v35 = vpack.c.bf16 %v9809_v48, %v9804_v47  ;;  %s11509_s30 = scalar_lea.hbm %s11677_s10, %s11503_s9 }
  0xf3   : > { %1945 = vmatprep.mubr.bf16.mxu1 %v9767_v23  ;;  %7453 = vmatpush3.bf16.msra.mxu1 %v8878_v12  ;;  %v8884_v41 = vld [vmem:[#allocation6 + $0x1a8] sm:$0xff]   ;;  %709 = vst [vmem:[#allocation2 + $0x2e8] sm:$0xff] %v9866_v42  ;;  %v8885_v51 = vld [vmem:[#allocation6 + $0x1f0] sm:$0xff]   ;;  %v9935_v47 = vpack.c.bf16 %v9816_v50, %v9813_v49  ;;  %v9947_v49 = vpack.c.bf16 %v9837_v2, %v9834_v1 }
  0xf4   : > { %7454 = vmatprep.subr.bf16.mxu1 %v8880_v27  ;;  %v822_v43 = vld [vmem:[#allocation2 + $0x1c9] sm:$0xff]  ;;  %v825_v0 = vld [vmem:[#allocation2 + $0x1f1] sm:$0xff] }
  0xf5   : > { %7345 = vmatpush3.bf16.msra.mxu0 %v8871_v44  ;;  %v823_v44 = vld [vmem:[#allocation2 + $0x1d1] sm:$0xff]  ;;  %v872_v46 = vld [vmem:[#allocation2 + $0x207] sm:$0xff] }
  0xf6   : > { %7346 = vmatprep.subr.bf16.mxu0 %v8873_v55  ;;  %v873_v16 = vld [vmem:[#allocation2 + $0x20f] sm:$0xff]  ;;  %v8887_v55 = vld [vmem:[#allocation6 + $0x1f8] sm:$0xff]   ;;  %v9877_v57 = vpack.c.bf16 %v823_v44, %v822_v43  ;;  %v874_v4 = vld [vmem:[#allocation2 + $0x227] sm:$0xff] }
  0xf7   : > { %7455 = vmatpush3.bf16.msra.mxu1 %v8882_v28  ;;  %v8886_v17 = vld [vmem:[#allocation6 + $0x1b0] sm:$0xff]   ;;  %v9881_v59 = vpack.c.bf16 %v873_v16, %v872_v46  ;;  %v876_v20 = vld [vmem:[#allocation2 + $0x247] sm:$0xff] }
  0xf8   : > { %1785 = vmatmul.mubr.bf16.gmra.mrb[12].mxu0 %v9735_v8  ;;  %7456 = vmatprep.subr.bf16.mxu1 %v8883_v30  ;;  %v824_v62 = vld [vmem:[#allocation2 + $0x1e9] sm:$0xff]  ;;  %v827_v15 = vld [vmem:[#allocation2 + $0x211] sm:$0xff] }
  0xf9   : > { %1792 = vmatprep.mubr.bf16.mxu0 %v9771_v24  ;;  %7347 = vmatpush3.bf16.msra.mxu0 %v8875_v58  ;;  %v9879_v58 = vld [vmem:[#allocation6 + $0x200] sm:$0xff]   ;;  %v875_v12 = vld [vmem:[#allocation2 + $0x22f] sm:$0xff]  ;;  %v9893_v18 = vpack.c.bf16 %v825_v0, %v824_v62 }
  0xfa   : > { %1946 = vmatmul.mubr.bf16.gmra.mrb[12].mxu1 %v9784_v34  ;;  %7348 = vmatprep.subr.bf16.mxu0 %v8879_v21  ;;  %v9895_v19 = vpack.c.bf16 %v875_v12, %v874_v4  ;;  %v826_v14 = vld [vmem:[#allocation2 + $0x209] sm:$0xff]  ;;  %v831_v43 = vld [vmem:[#allocation2 + $0x251] sm:$0xff] }
  0xfb   : > { %1953 = vmatprep.mubr.bf16.mxu1 %v9793_v37  ;;  %7457 = vmatpush3.bf16.msra.mxu1 %v8884_v41  ;;  %v877_v21 = vld [vmem:[#allocation2 + $0x24f] sm:$0xff]  ;;  %v9905_v26 = vpack.c.bf16 %v827_v15, %v826_v14  ;;  %v878_v10 = vld [vmem:[#allocation2 + $0x267] sm:$0xff] }
  0xfc   : > { %7458 = vmatprep.subr.bf16.mxu1 %v8885_v51  ;;  %v9907_v27 = vpack.c.bf16 %v877_v21, %v876_v20  ;;  %v828_v33 = vld [vmem:[#allocation2 + $0x229] sm:$0xff]  ;;  %v835_v4 = vld [vmem:[#allocation2 + $0x291] sm:$0xff] }
  0xfd   : > { %7349 = vmatpush3.bf16.msra.mxu0 %v8881_v7  ;;  %v829_v7 = vld [vmem:[#allocation2 + $0x231] sm:$0xff]  ;;  %v830_v36 = vld [vmem:[#allocation2 + $0x249] sm:$0xff] }
  0xfe   : > { %8535 = vmatprep.subr.bf16.mxu0 %v9879_v58  ;;  %v879_v28 = vld [vmem:[#allocation2 + $0x26f] sm:$0xff]  ;;  %v9917_v30 = vpack.c.bf16 %v829_v7, %v828_v33  ;;  %v880_v44 = vld [vmem:[#allocation2 + $0x287] sm:$0xff]  ;;  %v9929_v51 = vpack.c.bf16 %v831_v43, %v830_v36 }
  0xff   : > { %7459 = vmatpush3.bf16.msra.mxu1 %v8886_v17  ;;  %v9919_v41 = vpack.c.bf16 %v879_v28, %v878_v10  ;;  %v881_v46 = vld [vmem:[#allocation2 + $0x28f] sm:$0xff]  ;;  %v884_v12 = vld [vmem:[#allocation2 + $0x2c7] sm:$0xff]  ;;  %v9967_v28 = vpack.c.bf16 %v9869_v45, %v9866_v42  ;;  %v8892_v42 = vld [vmem:[#allocation6 + $0x218] sm:$0xff]  }
 0x100   : > { %1793 = vmatmul.mubr.bf16.gmra.mrb[16].mxu0 %v9767_v23  ;;  %7460 = vmatprep.subr.bf16.mxu1 %v8887_v55  ;;  %v9931_v16 = vpack.c.bf16 %v881_v46, %v880_v44  ;;  %v832_v48 = vld [vmem:[#allocation2 + $0x269] sm:$0xff]  ;;  %v833_v17 = vld [vmem:[#allocation2 + $0x271] sm:$0xff] }
 0x101   : > { %1800 = vmatprep.mubr.bf16.mxu0 %v9797_v39  ;;  %v882_v55 = vld [vmem:[#allocation2 + $0x2a7] sm:$0xff]  ;;  %v9941_v62 = vpack.c.bf16 %v833_v17, %v832_v48  ;;  %v885_v14 = vld [vmem:[#allocation2 + $0x2cf] sm:$0xff] }
 0x102   : > { %1954 = vmatmul.mubr.bf16.gmra.mrb[16].mxu1 %v9821_v52  ;;  %v834_v50 = vld [vmem:[#allocation2 + $0x289] sm:$0xff]  ;;  %v9955_v20 = vpack.c.bf16 %v885_v14, %v884_v12  ;;  %v837_v33 = vld [vmem:[#allocation2 + $0x2b1] sm:$0xff] }
 0x103   : > { %1961 = vmatprep.mubr.bf16.mxu1 %v9823_v53  ;;  %7461 = vmatpush3.bf16.msra.mxu1 %v8888_v61  ;;  %v883_v61 = vld [vmem:[#allocation2 + $0x2af] sm:$0xff]  ;;  %v9953_v15 = vpack.c.bf16 %v835_v4, %v834_v50  ;;  %v886_v1 = vld [vmem:[#allocation2 + $0x2e7] sm:$0xff] }
 0x104   : > { %8699 = vmatprep.subr.bf16.mxu1 %v9879_v58  ;;  %v9943_v0 = vpack.c.bf16 %v883_v61, %v882_v55  ;;  %v836_v21 = vld [vmem:[#allocation2 + $0x2a9] sm:$0xff]  ;;  %v839_v43 = vld [vmem:[#allocation2 + $0x2d1] sm:$0xff] }
 0x105   : > { %v887_v2 = vld [vmem:[#allocation2 + $0x2ef] sm:$0xff]  ;;  %v9961_v7 = vpack.c.bf16 %v837_v33, %v836_v21 }
 0x106   : > { %v9963_v10 = vpack.c.bf16 %v887_v2, %v886_v1  ;;  %v838_v36 = vld [vmem:[#allocation2 + $0x2c9] sm:$0xff]  ;;  %v983_v12 = vld [vmem:[#allocation2 + $0x2f1] sm:$0xff] }
 0x107   : > { %v9973_v44 = vpack.c.bf16 %v839_v43, %v838_v36  ;;  %v8890_v46 = vld [vmem:[#allocation6 + $0x208] sm:$0xff]   ;;  %v8891_v48 = vld [vmem:[#allocation6 + $0x210] sm:$0xff]  }
 0x108   : > { %1801 = vmatmul.mubr.bf16.gmra.mrb[20].mxu0 %v9793_v37  ;;  %v982_v4 = vld [vmem:[#allocation2 + $0x2e9] sm:$0xff] }
 0x109   : > { %1808 = vmatprep.mubr.bf16.mxu0 %v9827_v54  ;;  %v10052_v43 = vpack.c.bf16 %v983_v12, %v982_v4 }
 0x10a   : > { %1962 = vmatmul.mubr.bf16.gmra.mrb[20].mxu1 %v9840_v3 }
 0x10b   : > { %1969 = vmatprep.mubr.bf16.mxu1 %v9843_v6 }
 0x110   : > { %1809 = vmatmul.mubr.bf16.gmra.mrb[24].mxu0 %v9823_v53 }
 0x111   : > { %1816 = vmatprep.mubr.bf16.mxu0 %v9847_v11 }
 0x112   : > { %1970 = vmatmul.mubr.bf16.gmra.mrb[24].mxu1 %v9857_v29 }
 0x113   : > { %1977 = vmatprep.mubr.bf16.mxu1 %v9859_v31 }
 0x118   : > { %1817 = vmatmul.mubr.bf16.gmra.mrb[28].mxu0 %v9843_v6 }
 0x119   : > { %1824 = vmatprep.mubr.bf16.mxu0 %v9863_v40 }
 0x11a   : > { %1978 = vmatmul.mubr.bf16.gmra.mrb[28].mxu1 %v9877_v57 }
 0x11b   : > { %1985 = vmatprep.mubr.bf16.mxu1 %v9881_v59 }
 0x120   : > { %1825 = vmatmul.mubr.bf16.gmra.mrb[32].mxu0 %v9859_v31 }
 0x121   : > { %1832 = vmatprep.mubr.bf16.mxu0 %v9885_v60 }
 0x122   : > { %1986 = vmatmul.mubr.bf16.gmra.mrb[32].mxu1 %v9893_v18 }
 0x123   : > { %1993 = vmatprep.mubr.bf16.mxu1 %v9895_v19 }
 0x128   : > { %1833 = vmatmul.mubr.bf16.gmra.mrb[36].mxu0 %v9881_v59 }
 0x129   : > { %1840 = vmatprep.mubr.bf16.mxu0 %v9899_v13 }
 0x12a   : > { %1994 = vmatmul.mubr.bf16.gmra.mrb[36].mxu1 %v9905_v26 }
 0x12b   : > { %2001 = vmatprep.mubr.bf16.mxu1 %v9907_v27 }
 0x130   : > { %1841 = vmatmul.mubr.bf16.gmra.mrb[40].mxu0 %v9895_v19 }
 0x131   : > { %1848 = vmatprep.mubr.bf16.mxu0 %v9911_v32 }
 0x132   : > { %2002 = vmatmul.mubr.bf16.gmra.mrb[40].mxu1 %v9917_v30 }
 0x133   : > { %2009 = vmatprep.mubr.bf16.mxu1 %v9919_v41 }
 0x138   : > { %1849 = vmatmul.mubr.bf16.gmra.mrb[44].mxu0 %v9907_v27 }
 0x139   : > { %1856 = vmatprep.mubr.bf16.mxu0 %v9923_v35 }
 0x13a   : > { %2010 = vmatmul.mubr.bf16.gmra.mrb[44].mxu1 %v9929_v51 }
 0x13b   : > { %2017 = vmatprep.mubr.bf16.mxu1 %v9931_v16 }
 0x140   : > { %1857 = vmatmul.mubr.bf16.gmra.mrb[48].mxu0 %v9919_v41 }
 0x141   : > { %1864 = vmatprep.mubr.bf16.mxu0 %v9935_v47 }
 0x142   : > { %2018 = vmatmul.mubr.bf16.gmra.mrb[48].mxu1 %v9941_v62 }
 0x143   : > { %2025 = vmatprep.mubr.bf16.mxu1 %v9943_v0 }
 0x148   : > { %1865 = vmatmul.mubr.bf16.gmra.mrb[52].mxu0 %v9931_v16 }
 0x149   : > { %1872 = vmatprep.mubr.bf16.mxu0 %v9947_v49 }
 0x14a   : > { %2026 = vmatmul.mubr.bf16.gmra.mrb[52].mxu1 %v9953_v15 }
 0x14b   : > { %2033 = vmatprep.mubr.bf16.mxu1 %v9955_v20 }
 0x150   : > { %1873 = vmatmul.mubr.bf16.gmra.mrb[56].mxu0 %v9943_v0 }
 0x151   : > { %1880 = vmatprep.mubr.bf16.mxu0 %v9851_v25 }
 0x152   : > { %2034 = vmatmul.mubr.bf16.gmra.mrb[56].mxu1 %v9961_v7 }
 0x153   : > { %2041 = vmatprep.mubr.bf16.mxu1 %v9963_v10 }
 0x158   : > { %1881 = vmatmul.mubr.bf16.gmra.mrb[60].mxu0 %v9955_v20 }
 0x159   : > { %2082 = vmatprep.mubr.bf16.mxu0 %v9727_v5  ;;  %v8894_v5 = vld [vmem:[#allocation6 + $0x228] sm:$0xff]  }
 0x15a   : > { %2042 = vmatmul.mubr.bf16.gmra.mrb[60].mxu1 %v9973_v44 }
 0x15b   : > { %2243 = vmatprep.mubr.bf16.mxu1 %v9709_v56 }
 0x160   : > { %2083 = vmatmul.mubr.bf16.vlgmr.msra.gmra.mrb[64].mxu0 %v9694_v38  ;;  %v8893_v38 = vld [vmem:[#allocation6 + $0x220] sm:$0xff]  }
 0x161   : > { %8536 = vmatpush3.bf16.msra.mxu0 %v9879_v58  ;;  %2090 = vmatprep.mubr.bf16.mxu0 %v9765_v22 }
 0x162   : > { %8537 = vmatprep.subr.bf16.mxu0 %v8890_v46  ;;  %2244 = vmatmul.mubr.bf16.vlgmr.msra.gmra.mrb[64].mxu1 %v9719_v63  ;;  %v8896_v63 = vld [vmem:[#allocation6 + $0x238] sm:$0xff]  }
 0x163   : > { %2251 = vmatprep.mubr.bf16.mxu1 %v9737_v9  ;;  %8707 = vmatpush3.bf16.msra.mxu1 %v9879_v58 }
 0x164   : > { %8700 = vmatprep.subr.bf16.mxu1 %v8890_v46 }
 0x165   : > { %8538 = vmatpush3.bf16.msra.mxu0 %v8890_v46 }
 0x166   : > { %8539 = vmatprep.subr.bf16.mxu0 %v8891_v48 }
 0x167   : > { %8708 = vmatpush3.bf16.msra.mxu1 %v8890_v46 }
 0x168   : > { %2091 = vmatmul.mubr.bf16.gmra.mrb[68].mxu0 %v9709_v56  ;;  %8701 = vmatprep.subr.bf16.mxu1 %v8891_v48  ;;  %v8895_v56 = vld [vmem:[#allocation6 + $0x230] sm:$0xff]  }
 0x169   : > { %2098 = vmatprep.mubr.bf16.mxu0 %v9784_v34  ;;  %8540 = vmatpush3.bf16.msra.mxu0 %v8891_v48 }
 0x16a   : > { %8541 = vmatprep.subr.bf16.mxu0 %v8892_v42  ;;  %2252 = vmatmul.mubr.bf16.gmra.mrb[68].mxu1 %v9735_v8 }
 0x16b   : > { %2259 = vmatprep.mubr.bf16.mxu1 %v9771_v24  ;;  %8709 = vmatpush3.bf16.msra.mxu1 %v8891_v48 }
 0x16c   : > { %8702 = vmatprep.subr.bf16.mxu1 %v8892_v42 }
 0x16d   : > { %8542 = vmatpush3.bf16.msra.mxu0 %v8892_v42 }
 0x16e   : > { %8543 = vmatprep.subr.bf16.mxu0 %v8893_v38 }
 0x16f   : > { %8710 = vmatpush3.bf16.msra.mxu1 %v8892_v42 }
 0x170   : > { %2099 = vmatmul.mubr.bf16.gmra.mrb[72].mxu0 %v9737_v9  ;;  %8703 = vmatprep.subr.bf16.mxu1 %v8893_v38 }
 0x171   : > { %2106 = vmatprep.mubr.bf16.mxu0 %v9821_v52  ;;  %8544 = vmatpush3.bf16.msra.mxu0 %v8893_v38 }
 0x172   : > { %8545 = vmatprep.subr.bf16.mxu0 %v8894_v5  ;;  %2260 = vmatmul.mubr.bf16.gmra.mrb[72].mxu1 %v9767_v23 }
 0x173   : > { %2267 = vmatprep.mubr.bf16.mxu1 %v9797_v39  ;;  %8711 = vmatpush3.bf16.msra.mxu1 %v8893_v38 }
 0x174   : > { %8704 = vmatprep.subr.bf16.mxu1 %v8894_v5 }
 0x175   : > { %8546 = vmatpush3.bf16.msra.mxu0 %v8894_v5 }
 0x176   : > { %8547 = vmatprep.subr.bf16.mxu0 %v8895_v56 }
 0x177   : > { %8712 = vmatpush3.bf16.msra.mxu1 %v8894_v5 }
 0x178   : > { %2107 = vmatmul.mubr.bf16.gmra.mrb[76].mxu0 %v9771_v24  ;;  %8705 = vmatprep.subr.bf16.mxu1 %v8895_v56 }
 0x179   : > { %2114 = vmatprep.mubr.bf16.mxu0 %v9840_v3  ;;  %8548 = vmatpush3.bf16.msra.mxu0 %v8895_v56 }
 0x17a   : > { %8549 = vmatprep.subr.bf16.mxu0 %v8896_v63  ;;  %2268 = vmatmul.mubr.bf16.gmra.mrb[76].mxu1 %v9793_v37  ;;  %v10025_v37 = vld [vmem:[%s11718_s4] ss:$0 sm:$0xff] }
 0x17b   : > { %2275 = vmatprep.mubr.bf16.mxu1 %v9827_v54  ;;  %8713 = vmatpush3.bf16.msra.mxu1 %v8895_v56 }
 0x17c   : > { %8706 = vmatprep.subr.bf16.mxu1 %v8896_v63 }
 0x17d   : > { %8550 = vmatpush3.bf16.msra.mxu0 %v8896_v63 }
 0x17f   : > { %8714 = vmatpush3.bf16.msra.mxu1 %v8896_v63  ;;  %v1097_v63 = vld [vmem:[#allocation2 + $0x129] sm:$0xff] }
 0x180   : > { %2115 = vmatmul.mubr.bf16.gmra.mrb[80].mxu0 %v9797_v39 }
 0x181   : > { %2122 = vmatprep.mubr.bf16.mxu0 %v9857_v29 }
 0x182   : > { %2276 = vmatmul.mubr.bf16.gmra.mrb[80].mxu1 %v9823_v53 }
 0x183   : > { %2283 = vmatprep.mubr.bf16.mxu1 %v9847_v11 }
 0x188   : > { %2123 = vmatmul.mubr.bf16.gmra.mrb[84].mxu0 %v9827_v54 }
 0x189   : > { %2130 = vmatprep.mubr.bf16.mxu0 %v9877_v57 }
 0x18a   : > { %2284 = vmatmul.mubr.bf16.gmra.mrb[84].mxu1 %v9843_v6 }
 0x18b   : > { %2291 = vmatprep.mubr.bf16.mxu1 %v9863_v40 }
 0x190   : > { %2131 = vmatmul.mubr.bf16.gmra.mrb[88].mxu0 %v9847_v11 }
 0x191   : > { %2138 = vmatprep.mubr.bf16.mxu0 %v9893_v18 }
 0x192   : > { %2292 = vmatmul.mubr.bf16.gmra.mrb[88].mxu1 %v9859_v31 }
 0x193   : > { %2299 = vmatprep.mubr.bf16.mxu1 %v9885_v60 }
 0x198   : > { %2139 = vmatmul.mubr.bf16.gmra.mrb[92].mxu0 %v9863_v40 }
 0x199   : > { %2146 = vmatprep.mubr.bf16.mxu0 %v9905_v26 }
 0x19a   : > { %2300 = vmatmul.mubr.bf16.gmra.mrb[92].mxu1 %v9881_v59 }
 0x19b   : > { %2307 = vmatprep.mubr.bf16.mxu1 %v9899_v13 }
 0x1a0   : > { %2147 = vmatmul.mubr.bf16.gmra.mrb[96].mxu0 %v9885_v60 }
 0x1a1   : > { %2154 = vmatprep.mubr.bf16.mxu0 %v9917_v30 }
 0x1a2   : > { %2308 = vmatmul.mubr.bf16.gmra.mrb[96].mxu1 %v9895_v19 }
 0x1a3   : > { %2315 = vmatprep.mubr.bf16.mxu1 %v9911_v32 }
 0x1a8   : > { %2155 = vmatmul.mubr.bf16.gmra.mrb[100].mxu0 %v9899_v13 }
 0x1a9   : > { %2162 = vmatprep.mubr.bf16.mxu0 %v9929_v51 }
 0x1aa   : > { %2316 = vmatmul.mubr.bf16.gmra.mrb[100].mxu1 %v9907_v27 }
 0x1ab   : > { %2323 = vmatprep.mubr.bf16.mxu1 %v9923_v35 }
 0x1b0   : > { %2163 = vmatmul.mubr.bf16.gmra.mrb[104].mxu0 %v9911_v32 }
 0x1b1   : > { %2170 = vmatprep.mubr.bf16.mxu0 %v9941_v62 }
 0x1b2   : > { %2324 = vmatmul.mubr.bf16.gmra.mrb[104].mxu1 %v9919_v41 }
 0x1b3   : > { %v7126_v8 = vpop.f32.mrb[0].mxu0  ;;  %2331 = vmatprep.mubr.bf16.mxu1 %v9935_v47 }
 0x1b4   : > { %v7127_v9 = vpop.f32.mrb[1].mxu0 }
 0x1b5   : > { %v7128_v22 = vadd.f32 %v7127_v9, %v7126_v8  ;;  %v7129_v23 = vpop.f32.mrb[2].mxu0  ;;  %v7238_v52 = vpop.f32.mrb[0].mxu1  ;;  %v1098_v8 = vld [vmem:[#allocation2 + $0x131] sm:$0xff] }
 0x1b6   : > { %v7130_v24 = vpop.f32.mrb[3].mxu0  ;;  %v7239_v54 = vpop.f32.mrb[1].mxu1 }
 0x1b7   : > { %v7131_v34 = vadd.f32 %v7130_v24, %v7129_v23  ;;  %v1763_v39 = vadd.f32 %v7128_v22, %v10025_v37  ;;  %v7240_v11 = vadd.f32 %v7239_v54, %v7238_v52  ;;  %v7241_v29 = vpop.f32.mrb[2].mxu1 }
 0x1b8   : > { %2171 = vmatmul.mubr.bf16.gmra.mrb[108].mxu0 %v9923_v35  ;;  %v7242_v45 = vpop.f32.mrb[3].mxu1 }
 0x1b9   : > { %2178 = vmatprep.mubr.bf16.mxu0 %v9953_v15  ;;  %v1766_v6 = vadd.f32 %v7131_v34, %v10025_v37  ;;  %v10032_v58 = vadd.f32 %v7240_v11, %v1763_v39  ;;  %v7243_v59 = vadd.f32 %v7242_v45, %v7241_v29  ;;  %v9049_v39 = vld [vmem:[#allocation2] sm:$0xff] }
 0x1ba   : > { %2332 = vmatmul.mubr.bf16.gmra.mrb[108].mxu1 %v9931_v16  ;;  %v10063_v52 = vpack.c.bf16 %v9049_v39, %v9049_v39 }
 0x1bb   : > { %v7132_v53 = vpop.f32.mrb[4].mxu0  ;;  %v10036_v18 = vadd.f32 %v7243_v59, %v1766_v6  ;;  %2339 = vmatprep.mubr.bf16.mxu1 %v9947_v49  ;;  %v1129_v6 = vpack.c.bf16 %v1098_v8, %v1097_v63  ;;  %v1032_v59 = vld [vmem:[#allocation2 + $0x30f] sm:$0xff] }
 0x1bc   : > { %v7133_v3 = vpop.f32.mrb[5].mxu0  ;;  %v1105_v63 = vld [vmem:[#allocation2 + $0x1a9] sm:$0xff]  ;;  %v1106_v8 = vld [vmem:[#allocation2 + $0x1b1] sm:$0xff] }
 0x1bd   : > { %v7134_v31 = vadd.f32 %v7133_v3, %v7132_v53  ;;  %v7135_v40 = vpop.f32.mrb[6].mxu0  ;;  %v7244_v13 = vpop.f32.mrb[4].mxu1 }
 0x1be   : > { %v7136_v57 = vpop.f32.mrb[7].mxu0  ;;  %v7245_v27 = vpop.f32.mrb[5].mxu1 }
 0x1bf   : > { %v7137_v60 = vadd.f32 %v7136_v57, %v7135_v40  ;;  %v1771_v19 = vadd.f32 %v7134_v31, %v10025_v37  ;;  %v7246_v41 = vadd.f32 %v7245_v27, %v7244_v13  ;;  %v7247_v35 = vpop.f32.mrb[6].mxu1  ;;  %v1031_v57 = vld [vmem:[#allocation2 + $0x307] sm:$0xff]  ;;  %v1114_v13 = vld [vmem:[#allocation2 + $0x231] sm:$0xff] }
 0x1c0   : > { %2179 = vmatmul.mubr.bf16.gmra.mrb[112].mxu0 %v9935_v47  ;;  %v7248_v17 = vpop.f32.mrb[7].mxu1  ;;  %v1100_v27 = vld [vmem:[#allocation2 + $0x151] sm:$0xff] }
 0x1c1   : > { %2186 = vmatprep.mubr.bf16.mxu0 %v9961_v7  ;;  %v1774_v30 = vadd.f32 %v7137_v60, %v10025_v37  ;;  %v10042_v55 = vadd.f32 %v7246_v41, %v1771_v19  ;;  %v7249_v61 = vadd.f32 %v7248_v17, %v7247_v35  ;;  %v1113_v60 = vld [vmem:[#allocation2 + $0x229] sm:$0xff] }
 0x1c2   : > { %2340 = vmatmul.mubr.bf16.gmra.mrb[112].mxu1 %v9943_v0  ;;  %v1137_v17 = vpack.c.bf16 %v1114_v13, %v1113_v60  ;;  %v1119_v13 = vld [vmem:[#allocation2 + $0x289] sm:$0xff] }
 0x1c3   : > { %v7138_v26 = vpop.f32.mrb[8].mxu0  ;;  %v10046_v50 = vadd.f32 %v7249_v61, %v1774_v30  ;;  %2347 = vmatprep.mubr.bf16.mxu1 %v9851_v25  ;;  %v1102_v30 = vld [vmem:[#allocation2 + $0x171] sm:$0xff] }
 0x1c4   : > { %v7139_v32 = vpop.f32.mrb[9].mxu0 }
 0x1c5   : > { %v7140_v51 = vadd.f32 %v7139_v32, %v7138_v26  ;;  %v7141_v16 = vpop.f32.mrb[10].mxu0  ;;  %v7250_v15 = vpop.f32.mrb[8].mxu1  ;;  %v1099_v26 = vld [vmem:[#allocation2 + $0x149] sm:$0xff] }
 0x1c6   : > { %v7142_v47 = vpop.f32.mrb[11].mxu0  ;;  %v7251_v33 = vpop.f32.mrb[9].mxu1  ;;  %v1101_v32 = vld [vmem:[#allocation2 + $0x169] sm:$0xff] }
 0x1c7   : > { %v7143_v62 = vadd.f32 %v7142_v47, %v7141_v16  ;;  %v1779_v14 = vadd.f32 %v7140_v51, %v10025_v37  ;;  %v7252_v7 = vadd.f32 %v7251_v33, %v7250_v15  ;;  %v7253_v0 = vpop.f32.mrb[10].mxu1  ;;  %v1048_v16 = vpack.c.bf16 %v1032_v59, %v1031_v57 }
 0x1c8   : > { %2187 = vmatmul.mubr.bf16.gmra.mrb[116].mxu0 %v9947_v49  ;;  %v7254_v46 = vpop.f32.mrb[11].mxu1  ;;  %v1130_v47 = vpack.c.bf16 %v1100_v27, %v1099_v26  ;;  %v1131_v15 = vpack.c.bf16 %v1102_v30, %v1101_v32  ;;  %v1120_v26 = vld [vmem:[#allocation2 + $0x291] sm:$0xff]  ;;  %v1121_v27 = vld [vmem:[#allocation2 + $0x2a9] sm:$0xff] }
 0x1c9   : > { %2194 = vmatprep.mubr.bf16.mxu0 %v9973_v44  ;;  %v1782_v2 = vadd.f32 %v7143_v62, %v10025_v37  ;;  %v10054_v42 = vadd.f32 %v7252_v7, %v1779_v14  ;;  %v7255_v38 = vadd.f32 %v7254_v46, %v7253_v0  ;;  %v1115_v0 = vld [vmem:[#allocation2 + $0x249] sm:$0xff]  ;;  %v1122_v30 = vld [vmem:[#allocation2 + $0x2b1] sm:$0xff] }
 0x1ca   : > { %2348 = vmatmul.mubr.bf16.gmra.mrb[116].mxu1 %v9955_v20 }
 0x1cb   : > { %v7144_v21 = vpop.f32.mrb[12].mxu0  ;;  %v10058_v56 = vadd.f32 %v7255_v38, %v1782_v2  ;;  %2355 = vmatprep.mubr.bf16.mxu1 %v9967_v28  ;;  %v1103_v38 = vld [vmem:[#allocation2 + $0x189] sm:$0xff] }
 0x1cc   : > { %v7145_v1 = vpop.f32.mrb[13].mxu0 }
 0x1cd   : > { %v7146_v36 = vadd.f32 %v7145_v1, %v7144_v21  ;;  %v7147_v49 = vpop.f32.mrb[14].mxu0  ;;  %v7256_v22 = vpop.f32.mrb[12].mxu1 }
 0x1ce   : > { %v7148_v48 = vpop.f32.mrb[15].mxu0  ;;  %v7257_v24 = vpop.f32.mrb[13].mxu1 }
 0x1cf   : > { %v7149_v5 = vadd.f32 %v7148_v48, %v7147_v49  ;;  %v1787_v9 = vadd.f32 %v7146_v36, %v10025_v37  ;;  %v7259_v53 = vpop.f32.mrb[14].mxu1  ;;  %v1116_v36 = vld [vmem:[#allocation2 + $0x251] sm:$0xff]  ;;  %v1117_v49 = vld [vmem:[#allocation2 + $0x269] sm:$0xff] }
 0x1d0   : > { %2195 = vmatmul.mubr.bf16.gmra.mrb[120].mxu0 %v9851_v25  ;;  %v7258_v25 = vadd.f32 %v7257_v24, %v7256_v22  ;;  %v7260_v11 = vpop.f32.mrb[15].mxu1  ;;  %v1118_v48 = vld [vmem:[#allocation2 + $0x271] sm:$0xff] }
 0x1d1   : > { %2202 = vmatprep.mubr.bf16.mxu0 %v10052_v43  ;;  %v1790_v20 = vadd.f32 %v7149_v5, %v10025_v37  ;;  %v7261_v40 = vadd.f32 %v7260_v11, %v7259_v53  ;;  %v1104_v5 = vld [vmem:[#allocation2 + $0x191] sm:$0xff] }
 0x1d2   : > { %v10066_v31 = vadd.f32 %v7258_v25, %v1787_v9  ;;  %2356 = vmatmul.mubr.bf16.gmra.mrb[120].mxu1 %v9963_v10  ;;  %v1132_v25 = vpack.c.bf16 %v1104_v5, %v1103_v38 }
 0x1d3   : > { %v7150_v23 = vpop.f32.mrb[16].mxu0  ;;  %v10070_v19 = vadd.f32 %v7261_v40, %v1790_v20  ;;  %2363 = vmatprep.mubr.bf16.mxu1 %v10063_v52  ;;  %v1139_v20 = vpack.c.bf16 %v1118_v48, %v1117_v49 }
 0x1d4   : > { %v7151_v34 = vpop.f32.mrb[17].mxu0 }
 0x1d5   : > { %v7152_v54 = vadd.f32 %v7151_v34, %v7150_v23  ;;  %v7153_v3 = vpop.f32.mrb[18].mxu0  ;;  %v7262_v35 = vpop.f32.mrb[16].mxu1  ;;  %v1138_v34 = vpack.c.bf16 %v1116_v36, %v1115_v0 }
 0x1d6   : > { %v7154_v29 = vpop.f32.mrb[19].mxu0  ;;  %v7263_v10 = vpop.f32.mrb[17].mxu1 }
 0x1d7   : > { %v7155_v45 = vadd.f32 %v7154_v29, %v7153_v3  ;;  %v1795_v41 = vadd.f32 %v7152_v54, %v10025_v37  ;;  %v7264_v62 = vadd.f32 %v7263_v10, %v7262_v35  ;;  %v7265_v4 = vpop.f32.mrb[18].mxu1  ;;  %v1133_v29 = vpack.c.bf16 %v1106_v8, %v1105_v63  ;;  %v1108_v35 = vld [vmem:[#allocation2 + $0x1d1] sm:$0xff]  ;;  %v1111_v63 = vld [vmem:[#allocation2 + $0x209] sm:$0xff] }
 0x1d8   : > { %2203 = vmatmul.mubr.bf16.gmra.mrb[124].mxu0 %v9967_v28  ;;  %v7266_v21 = vpop.f32.mrb[19].mxu1  ;;  %v1110_v10 = vld [vmem:[#allocation2 + $0x1f1] sm:$0xff] }
 0x1d9   : > { %8551 = vmatprep.mubr.bf16.mxu0 %v1129_v6  ;;  %v1798_v61 = vadd.f32 %v7155_v45, %v10025_v37  ;;  %v10075_v1 = vadd.f32 %v7264_v62, %v1795_v41  ;;  %v7267_v2 = vadd.f32 %v7266_v21, %v7265_v4  ;;  %v1107_v41 = vld [vmem:[#allocation2 + $0x1c9] sm:$0xff]  ;;  %v1141_v4 = vpack.c.bf16 %v1122_v30, %v1121_v27  ;;  %v1112_v8 = vld [vmem:[#allocation2 + $0x211] sm:$0xff] }
 0x1da   : > { %2364 = vmatmul.mubr.bf16.gmra.mrb[124].mxu1 %v1048_v16 }
 0x1db   : > { %v7156_v51 = vpop.f32.mrb[20].mxu0  ;;  %v10077_v46 = vadd.f32 %v7267_v2, %v1798_v61  ;;  %8567 = vmatprep.mubr.bf16.mxu1 %v1137_v17  ;;  %v1140_v61 = vpack.c.bf16 %v1120_v26, %v1119_v13  ;;  %v1128_v13 = vld [vmem:[#allocation2 + $0x311] sm:$0xff] }
 0x1dc   : > { %v7157_v28 = vpop.f32.mrb[21].mxu0 }
 0x1dd   : > { %v7158_v12 = vadd.f32 %v7157_v28, %v7156_v51  ;;  %v7159_v14 = vpop.f32.mrb[22].mxu0  ;;  %v7268_v22 = vpop.f32.mrb[20].mxu1  ;;  %v1109_v51 = vld [vmem:[#allocation2 + $0x1e9] sm:$0xff] }
 0x1de   : > { %v7160_v33 = vpop.f32.mrb[23].mxu0  ;;  %v7269_v24 = vpop.f32.mrb[21].mxu1 }
 0x1df   : > { %v7161_v7 = vadd.f32 %v7160_v33, %v7159_v14  ;;  %v1803_v9 = vadd.f32 %v7158_v12, %v10025_v37  ;;  %v7270_v54 = vadd.f32 %v7269_v24, %v7268_v22  ;;  %v7271_v3 = vpop.f32.mrb[22].mxu1  ;;  %v1134_v12 = vpack.c.bf16 %v1108_v35, %v1107_v41 }
 0x1e0   : > { %8552 = vmatmul.mubr.bf16.vlgmr.msra.gmra.mrb[128].mxu0 %v1130_v47  ;;  %v7272_v40 = vpop.f32.mrb[23].mxu1 }
 0x1e1   : > { %8555 = vmatprep.mubr.bf16.mxu0 %v1131_v15  ;;  %v1806_v53 = vadd.f32 %v7161_v7, %v10025_v37  ;;  %v10081_v57 = vadd.f32 %v7270_v54, %v1803_v9  ;;  %v7273_v59 = vadd.f32 %v7272_v40, %v7271_v3  ;;  %v1135_v7 = vpack.c.bf16 %v1110_v10, %v1109_v51 }
 0x1e2   : > { %8568 = vmatmul.mubr.bf16.vlgmr.msra.gmra.mrb[128].mxu1 %v1138_v34 }
 0x1e3   : > { %v7162_v23 = vpop.f32.mrb[24].mxu0  ;;  %v10083_v32 = vadd.f32 %v7273_v59, %v1806_v53  ;;  %8571 = vmatprep.mubr.bf16.mxu1 %v1139_v20 }
 0x1e4   : > { %v7163_v39 = vpop.f32.mrb[25].mxu0 }
 0x1e5   : > { %v7164_v6 = vadd.f32 %v7163_v39, %v7162_v23  ;;  %v7165_v11 = vpop.f32.mrb[26].mxu0  ;;  %v7274_v28 = vpop.f32.mrb[24].mxu1  ;;  %v1136_v39 = vpack.c.bf16 %v1112_v8, %v1111_v63 }
 0x1e6   : > { %v7166_v45 = vpop.f32.mrb[27].mxu0  ;;  %v7275_v47 = vpop.f32.mrb[25].mxu1 }
 0x1e7   : > { %v7167_v60 = vadd.f32 %v7166_v45, %v7165_v11  ;;  %v1811_v16 = vadd.f32 %v7164_v6, %v10025_v37  ;;  %v7276_v15 = vadd.f32 %v7275_v47, %v7274_v28  ;;  %v7277_v21 = vpop.f32.mrb[26].mxu1 }
 0x1e8   : > { %8556 = vmatmul.mubr.bf16.gmra.mrb[132].mxu0 %v1132_v25  ;;  %v7278_v0 = vpop.f32.mrb[27].mxu1 }
 0x1e9   : > { %8559 = vmatprep.mubr.bf16.mxu0 %v1133_v29  ;;  %v1814_v14 = vadd.f32 %v7167_v60, %v10025_v37  ;;  %v10087_v49 = vadd.f32 %v7276_v15, %v1811_v16  ;;  %v7279_v48 = vadd.f32 %v7278_v0, %v7277_v21  ;;  %v1127_v60 = vld [vmem:[#allocation2 + $0x309] sm:$0xff] }
 0x1ea   : > { %8572 = vmatmul.mubr.bf16.gmra.mrb[132].mxu1 %v1140_v61  ;;  %v1144_v35 = vpack.c.bf16 %v1128_v13, %v1127_v60 }
 0x1eb   : > { %v7168_v17 = vpop.f32.mrb[28].mxu0  ;;  %v10089_v5 = vadd.f32 %v7279_v48, %v1814_v14  ;;  %8575 = vmatprep.mubr.bf16.mxu1 %v1141_v4 }
 0x1ec   : > { %v7169_v62 = vpop.f32.mrb[29].mxu0 }
 0x1ed   : > { %v7170_v33 = vadd.f32 %v7169_v62, %v7168_v17  ;;  %v7171_v2 = vpop.f32.mrb[30].mxu0  ;;  %v7280_v22 = vpop.f32.mrb[28].mxu1 }
 0x1ee   : > { %v7172_v36 = vpop.f32.mrb[31].mxu0  ;;  %v7281_v24 = vpop.f32.mrb[29].mxu1 }
 0x1ef   : > { %v7173_v38 = vadd.f32 %v7172_v36, %v7171_v2  ;;  %v1819_v9 = vadd.f32 %v7170_v33, %v10025_v37  ;;  %v7282_v25 = vadd.f32 %v7281_v24, %v7280_v22  ;;  %v7283_v53 = vpop.f32.mrb[30].mxu1 }
 0x1f0   : > { %8560 = vmatmul.mubr.bf16.gmra.mrb[136].mxu0 %v1134_v12  ;;  %v7284_v6 = vpop.f32.mrb[31].mxu1 }
 0x1f1   : > { %8563 = vmatprep.mubr.bf16.mxu0 %v1135_v7  ;;  %v1822_v20 = vadd.f32 %v7173_v38, %v10025_v37  ;;  %v10093_v29 = vadd.f32 %v7282_v25, %v1819_v9  ;;  %v7285_v40 = vadd.f32 %v7284_v6, %v7283_v53 }
 0x1f2   : > { %8576 = vmatmul.mubr.bf16.gmra.mrb[136].mxu1 %v9973_v44 }
 0x1f3   : > { %v7174_v23 = vpop.f32.mrb[32].mxu0  ;;  %v10096_v59 = vadd.f32 %v7285_v40, %v1822_v20  ;;  %8579 = vmatprep.mubr.bf16.mxu1 %v10052_v43 }
 0x1f4   : > { %v7175_v34 = vpop.f32.mrb[33].mxu0 }
 0x1f5   : > { %v7176_v54 = vadd.f32 %v7175_v34, %v7174_v23  ;;  %v7177_v3 = vpop.f32.mrb[34].mxu0  ;;  %v7286_v27 = vpop.f32.mrb[32].mxu1 }
 0x1f6   : > { %v7178_v11 = vpop.f32.mrb[35].mxu0  ;;  %v7287_v41 = vpop.f32.mrb[33].mxu1 }
 0x1f7   : > { %v7179_v45 = vadd.f32 %v7178_v11, %v7177_v3  ;;  %v1827_v26 = vadd.f32 %v7176_v54, %v10025_v37  ;;  %v7288_v16 = vadd.f32 %v7287_v41, %v7286_v27  ;;  %v7289_v28 = vpop.f32.mrb[34].mxu1 }
 0x1f8   : > { %8564 = vmatmul.mubr.bf16.gmra.mrb[140].mxu0 %v1136_v39  ;;  %v7290_v47 = vpop.f32.mrb[35].mxu1 }
 0x1f9   : > { %v1830_v10 = vadd.f32 %v7179_v45, %v10025_v37  ;;  %v10101_v62 = vadd.f32 %v7288_v16, %v1827_v26  ;;  %v7291_v43 = vadd.f32 %v7290_v47, %v7289_v28 }
 0x1fa   : > { %8580 = vmatmul.mubr.bf16.gmra.mrb[140].mxu1 %v1144_v35 }
 0x1fb   : > { %v7180_v30 = vpop.f32.mrb[36].mxu0  ;;  %v10103_v12 = vadd.f32 %v7291_v43, %v1830_v10  ;;  %3676 = vmatprep.mubr.bf16.mxu1 %v10063_v52 }
 0x1fc   : > { %v7181_v51 = vpop.f32.mrb[37].mxu0 }
 0x1fd   : > { %v7182_v17 = vadd.f32 %v7181_v51, %v7180_v30  ;;  %v7183_v44 = vpop.f32.mrb[38].mxu0  ;;  %v7292_v15 = vpop.f32.mrb[36].mxu1 }
 0x1fe   : > { %v7184_v61 = vpop.f32.mrb[39].mxu0  ;;  %v7293_v33 = vpop.f32.mrb[37].mxu1 }
 0x1ff   : > { %v7185_v4 = vadd.f32 %v7184_v61, %v7183_v44  ;;  %v1835_v14 = vadd.f32 %v7182_v17, %v10025_v37  ;;  %v7294_v0 = vadd.f32 %v7293_v33, %v7292_v15  ;;  %v7295_v36 = vpop.f32.mrb[38].mxu1 }
 0x200   : > { %v7296_v63 = vpop.f32.mrb[39].mxu1 }
 0x201   : > { %v1838_v7 = vadd.f32 %v7185_v4, %v10025_v37  ;;  %v10107_v9 = vadd.f32 %v7294_v0, %v1835_v14  ;;  %v7297_v22 = vadd.f32 %v7296_v63, %v7295_v36 }
 0x203   : > { %v7186_v21 = vpop.f32.mrb[40].mxu0  ;;  %v10109_v24 = vadd.f32 %v7297_v22, %v1838_v7 }
 0x204   : > { %v7187_v2 = vpop.f32.mrb[41].mxu0 }
 0x205   : > { %v7188_v48 = vadd.f32 %v7187_v2, %v7186_v21  ;;  %v7189_v38 = vpop.f32.mrb[42].mxu0  ;;  %v7298_v39 = vpop.f32.mrb[40].mxu1 }
 0x206   : > { %v7190_v8 = vpop.f32.mrb[43].mxu0  ;;  %v7299_v25 = vpop.f32.mrb[41].mxu1 }
 0x207   : > { %v7191_v23 = vadd.f32 %v7190_v8, %v7189_v38  ;;  %v1843_v34 = vadd.f32 %v7188_v48, %v10025_v37  ;;  %v7300_v3 = vadd.f32 %v7299_v25, %v7298_v39  ;;  %v7301_v6 = vpop.f32.mrb[42].mxu1 }
 0x208   : > { %v7302_v45 = vpop.f32.mrb[43].mxu1 }
 0x209   : > { %v1846_v54 = vadd.f32 %v7191_v23, %v10025_v37  ;;  %v10113_v13 = vadd.f32 %v7300_v3, %v1843_v34  ;;  %v7303_v26 = vadd.f32 %v7302_v45, %v7301_v6  ;;  %v8898_v6 = vld [vmem:[#allocation8] sm:$0xff]  }
 0x20b   : > { %v7192_v20 = vpop.f32.mrb[44].mxu0  ;;  %v10115_v30 = vadd.f32 %v7303_v26, %v1846_v54  ;;  %v8897_v54 = vld [vmem:[#allocation8 + $0x40] sm:$0xff]  }
 0x20c   : > { %v7193_v53 = vpop.f32.mrb[45].mxu0  ;;  %7582 = vmatprep.subr.bf16.mxu1 %v8897_v54 }
 0x20d   : > { %v7194_v11 = vadd.f32 %v7193_v53, %v7192_v20  ;;  %v7195_v40 = vpop.f32.mrb[46].mxu0  ;;  %v7304_v35 = vpop.f32.mrb[44].mxu1  ;;  %7583 = vmatpush3.bf16.msra.mxu1 %v8898_v6 }
 0x20e   : > { %v7196_v60 = vpop.f32.mrb[47].mxu0  ;;  %v7305_v10 = vpop.f32.mrb[45].mxu1 }
 0x20f   : > { %v7197_v27 = vadd.f32 %v7196_v60, %v7195_v40  ;;  %v1851_v41 = vadd.f32 %v7194_v11, %v10025_v37  ;;  %v7306_v17 = vadd.f32 %v7305_v10, %v7304_v35  ;;  %v7307_v44 = vpop.f32.mrb[46].mxu1 }
 0x210   : > { %v7308_v43 = vpop.f32.mrb[47].mxu1 }
 0x211   : > { %v1854_v28 = vadd.f32 %v7197_v27, %v10025_v37  ;;  %v10119_v14 = vadd.f32 %v7306_v17, %v1851_v41  ;;  %v7309_v15 = vadd.f32 %v7308_v43, %v7307_v44  ;;  %v8899_v27 = vld [vmem:[#allocation8 + $0x48] sm:$0xff]  }
 0x212   : > { %7584 = vmatprep.subr.bf16.mxu1 %v8899_v27  ;;  %v8909_v27 = vld [vmem:[#allocation8 + $0x60] sm:$0xff]  }
 0x213   : > { %v7198_v51 = vpop.f32.mrb[48].mxu0  ;;  %v10121_v33 = vadd.f32 %v7309_v15, %v1854_v28  ;;  %v8900_v28 = vld [vmem:[#allocation8 + $0x8] sm:$0xff]  }
 0x214   : > { %v7199_v16 = vpop.f32.mrb[49].mxu0  ;;  %7585 = vmatpush3.bf16.msra.mxu1 %v8900_v28 }
 0x215   : > { %v7200_v47 = vadd.f32 %v7199_v16, %v7198_v51  ;;  %v7201_v61 = vpop.f32.mrb[50].mxu0  ;;  %v7310_v7 = vpop.f32.mrb[48].mxu1 }
 0x216   : > { %v7202_v4 = vpop.f32.mrb[51].mxu0  ;;  %v7311_v36 = vpop.f32.mrb[49].mxu1 }
 0x217   : > { %v7203_v21 = vadd.f32 %v7202_v4, %v7201_v61  ;;  %v1859_v2 = vadd.f32 %v7200_v47, %v10025_v37  ;;  %v7312_v63 = vadd.f32 %v7311_v36, %v7310_v7  ;;  %v7313_v8 = vpop.f32.mrb[50].mxu1  ;;  %v8901_v4 = vld [vmem:[#allocation8 + $0x50] sm:$0xff]  }
 0x218   : > { %v7314_v34 = vpop.f32.mrb[51].mxu1  ;;  %7586 = vmatprep.subr.bf16.mxu1 %v8901_v4 }
 0x219   : > { %v1862_v38 = vadd.f32 %v7203_v21, %v10025_v37  ;;  %v10125_v20 = vadd.f32 %v7312_v63, %v1859_v2  ;;  %v7315_v25 = vadd.f32 %v7314_v34, %v7313_v8  ;;  %v8902_v21 = vld [vmem:[#allocation8 + $0x10] sm:$0xff]   ;;  %v8905_v63 = vld [vmem:[#allocation8 + $0x58] sm:$0xff]  }
 0x21a   : > { %7587 = vmatpush3.bf16.msra.mxu1 %v8902_v21 }
 0x21b   : > { %v7204_v0 = vpop.f32.mrb[52].mxu0  ;;  %v10127_v3 = vadd.f32 %v7315_v25, %v1862_v38  ;;  %v8903_v38 = vld [vmem:[#allocation8 + $0xc0] sm:$0xff]   ;;  %7588 = vmatprep.subr.bf16.mxu1 %v8905_v63 }
 0x21c   : > { %v7205_v48 = vpop.f32.mrb[53].mxu0  ;;  %v8904_v25 = vld [vmem:[#allocation8 + $0x80] sm:$0xff]   ;;  %7694 = vmatprep.subr.bf16.mxu0 %v8903_v38 }
 0x21d   : > { %v7206_v22 = vadd.f32 %v7205_v48, %v7204_v0  ;;  %v7207_v23 = vpop.f32.mrb[54].mxu0  ;;  %v7316_v40 = vpop.f32.mrb[52].mxu1  ;;  %7695 = vmatpush3.bf16.msra.mxu0 %v8904_v25 }
 0x21e   : > { %v7208_v39 = vpop.f32.mrb[55].mxu0  ;;  %v7317_v60 = vpop.f32.mrb[53].mxu1 }
 0x21f   : > { %v7209_v53 = vadd.f32 %v7208_v39, %v7207_v23  ;;  %v1867_v11 = vadd.f32 %v7206_v22, %v10025_v37  ;;  %v7318_v35 = vadd.f32 %v7317_v60, %v7316_v40  ;;  %v7319_v51 = vpop.f32.mrb[54].mxu1  ;;  %v8907_v60 = vld [vmem:[#allocation8 + $0xc8] sm:$0xff]  }
 0x220   : > { %v7320_v17 = vpop.f32.mrb[55].mxu1  ;;  %7696 = vmatprep.subr.bf16.mxu0 %v8907_v60 }
 0x221   : > { %v1870_v41 = vadd.f32 %v7209_v53, %v10025_v37  ;;  %v10131_v47 = vadd.f32 %v7318_v35, %v1867_v11  ;;  %v7321_v61 = vadd.f32 %v7320_v17, %v7319_v51  ;;  %v8906_v53 = vld [vmem:[#allocation8 + $0x18] sm:$0xff]   ;;  %v8910_v35 = vld [vmem:[#allocation8 + $0x20] sm:$0xff]  }
 0x222   : > { %7589 = vmatpush3.bf16.msra.mxu1 %v8906_v53  ;;  %v8916_v53 = vld [vmem:[#allocation8 + $0x98] sm:$0xff]  }
 0x223   : > { %v7210_v45 = vpop.f32.mrb[56].mxu0  ;;  %v10133_v15 = vadd.f32 %v7321_v61, %v1870_v41  ;;  %7590 = vmatprep.subr.bf16.mxu1 %v8909_v27  ;;  %v8913_v61 = vld [vmem:[#allocation8 + $0x68] sm:$0xff]  }
 0x224   : > { %v7211_v26 = vpop.f32.mrb[57].mxu0 }
 0x225   : > { %v7212_v10 = vadd.f32 %v7211_v26, %v7210_v45  ;;  %v7213_v16 = vpop.f32.mrb[58].mxu0  ;;  %v7322_v7 = vpop.f32.mrb[56].mxu1  ;;  %v8908_v26 = vld [vmem:[#allocation8 + $0x88] sm:$0xff]  }
 0x226   : > { %v7214_v44 = vpop.f32.mrb[59].mxu0  ;;  %v7323_v36 = vpop.f32.mrb[57].mxu1  ;;  %7697 = vmatpush3.bf16.msra.mxu0 %v8908_v26  ;;  %7591 = vmatpush3.bf16.msra.mxu1 %v8910_v35  ;;  %v8921_v26 = vld [vmem:[#allocation8 + $0x78] sm:$0xff]  }
 0x227   : > { %v7215_v43 = vadd.f32 %v7214_v44, %v7213_v16  ;;  %v1875_v2 = vadd.f32 %v7212_v10, %v10025_v37  ;;  %v7324_v22 = vadd.f32 %v7323_v36, %v7322_v7  ;;  %v7325_v23 = vpop.f32.mrb[58].mxu1  ;;  %v8911_v44 = vld [vmem:[#allocation8 + $0xd0] sm:$0xff]   ;;  %v8914_v36 = vld [vmem:[#allocation8 + $0x28] sm:$0xff]   ;;  %7592 = vmatprep.subr.bf16.mxu1 %v8913_v61 }
 0x228   : > { %v7326_v54 = vpop.f32.mrb[59].mxu1  ;;  %7698 = vmatprep.subr.bf16.mxu0 %v8911_v44 }
 0x229   : > { %v1878_v8 = vadd.f32 %v7215_v43, %v10025_v37  ;;  %v10137_v11 = vadd.f32 %v7324_v22, %v1875_v2  ;;  %v7327_v40 = vadd.f32 %v7326_v54, %v7325_v23  ;;  %v8918_v54 = vld [vmem:[#allocation8 + $0x30] sm:$0xff]  }
 0x22a   : > { %7593 = vmatpush3.bf16.msra.mxu1 %v8914_v36 }
 0x22b   : > { %v7216_v0 = vpop.f32.mrb[60].mxu0  ;;  %v10139_v41 = vadd.f32 %v7327_v40, %v1878_v8 }
 0x22c   : > { %v7217_v48 = vpop.f32.mrb[61].mxu0 }
 0x22d   : > { %v7218_v34 = vadd.f32 %v7217_v48, %v7216_v0  ;;  %v7219_v39 = vpop.f32.mrb[62].mxu0  ;;  %v7328_v10 = vpop.f32.mrb[60].mxu1  ;;  %v8912_v0 = vld [vmem:[#allocation8 + $0x90] sm:$0xff]  }
 0x22e   : > { %v7220_v6 = vpop.f32.mrb[63].mxu0  ;;  %v7329_v28 = vpop.f32.mrb[61].mxu1  ;;  %7699 = vmatpush3.bf16.msra.mxu0 %v8912_v0 }
 0x22f   : > { %v7221_v45 = vadd.f32 %v7220_v6, %v7219_v39  ;;  %v1883_v51 = vadd.f32 %v7218_v34, %v10025_v37  ;;  %v7330_v4 = vadd.f32 %v7329_v28, %v7328_v10  ;;  %v7331_v21 = vpop.f32.mrb[62].mxu1  ;;  %v8915_v34 = vld [vmem:[#allocation8 + $0xd8] sm:$0xff]  }
 0x230   : > { %v7332_v48 = vpop.f32.mrb[63].mxu1  ;;  %7700 = vmatprep.subr.bf16.mxu0 %v8915_v34  ;;  %v8922_v28 = vld [vmem:[#allocation8 + $0x38] sm:$0xff]   ;;  %v8925_v34 = vld [vmem:[#allocation8 + $0xf0] sm:$0xff]  }
 0x231   : > { %v1886_v43 = vadd.f32 %v7221_v45, %v10025_v37  ;;  %v10143_v63 = vadd.f32 %v7330_v4, %v1883_v51  ;;  %v7333_v8 = vadd.f32 %v7332_v48, %v7331_v21  ;;  %v8917_v37 = vld [vmem:[#allocation8 + $0x70] sm:$0xff]   ;;  %v2629_v21 = vld [vmem:[#allocation2 + $0xe7] sm:$0xff] }
 0x232   : > { %7594 = vmatprep.subr.bf16.mxu1 %v8917_v37  ;;  %7701 = vmatpush3.bf16.msra.mxu0 %v8916_v53 }
 0x233   : > { %v7350_v16 = vpop.f32.mrb[64].mxu0  ;;  %v10146_v39 = vadd.f32 %v7333_v8, %v1886_v43  ;;  %7595 = vmatpush3.bf16.msra.mxu1 %v8918_v54 }
 0x234   : > { %v7351_v17 = vpop.f32.mrb[65].mxu0  ;;  %7596 = vmatprep.subr.bf16.mxu1 %v8921_v26  ;;  %v8929_v26 = vld [vmem:[#allocation8 + $0xf8] sm:$0xff]  }
 0x235   : > { %v7352_v2 = vadd.f32 %v7351_v17, %v7350_v16  ;;  %v7353_v7 = vpop.f32.mrb[66].mxu0  ;;  %v7462_v6 = vpop.f32.mrb[64].mxu1  ;;  %v8920_v16 = vld [vmem:[#allocation8 + $0xa0] sm:$0xff]  }
 0x236   : > { %v7354_v38 = vpop.f32.mrb[67].mxu0  ;;  %v7463_v45 = vpop.f32.mrb[65].mxu1 }
 0x237   : > { %v2085_v22 = vadd.f32 %v7352_v2, %v10032_v58  ;;  %v7355_v23 = vadd.f32 %v7354_v38, %v7353_v7  ;;  %v8919_v58 = vld [vmem:[#allocation8 + $0xe0] sm:$0xff]   ;;  %v7464_v27 = vadd.f32 %v7463_v45, %v7462_v6  ;;  %v7465_v35 = vpop.f32.mrb[66].mxu1  ;;  %v2630_v2 = vld [vmem:[#allocation2 + $0xef] sm:$0xff]  ;;  %7597 = vmatpush3.bf16.msra.mxu1 %v8922_v28 }
 0x238   : > { %v7466_v17 = vpop.f32.mrb[67].mxu1  ;;  %7702 = vmatprep.subr.bf16.mxu0 %v8919_v58  ;;  %v8923_v7 = vld [vmem:[#allocation8 + $0xe8] sm:$0xff]   ;;  %v2661_v0 = vpack.c.bf16 %v2630_v2, %v2629_v21  ;;  %v8926_v28 = vld [vmem:[#allocation8 + $0x140] sm:$0xff]  }
 0x239   : > { %v2088_v25 = vadd.f32 %v7355_v23, %v10036_v18  ;;  %v7467_v44 = vadd.f32 %v7466_v17, %v7465_v35  ;;  %v10150_v4 = vadd.f32 %v7464_v27, %v2085_v22  ;;  %7703 = vmatpush3.bf16.msra.mxu0 %v8920_v16  ;;  %v8924_v38 = vld [vmem:[#allocation8 + $0xa8] sm:$0xff]   ;;  %v8928_v17 = vld [vmem:[#allocation8 + $0x100] sm:$0xff]   ;;  %7806 = vmatprep.subr.bf16.mxu1 %v8926_v28 }
 0x23a   : > { %7704 = vmatprep.subr.bf16.mxu0 %v8923_v7  ;;  %3677 = vmatmul.mubr.bf16.vlgmr.msra.gmra.mrb[144].mxu1 %v2661_v0 }
 0x23b   : > { %v7356_v40 = vpop.f32.mrb[68].mxu0  ;;  %v10153_v48 = vadd.f32 %v7467_v44, %v2088_v25  ;;  %7807 = vmatpush3.bf16.msra.mxu1 %v8928_v17 }
 0x23c   : > { %v7357_v60 = vpop.f32.mrb[69].mxu0 }
 0x23d   : > { %v7358_v51 = vadd.f32 %v7357_v60, %v7356_v40  ;;  %v7359_v10 = vpop.f32.mrb[70].mxu0  ;;  %v7468_v8 = vpop.f32.mrb[68].mxu1  ;;  %7705 = vmatpush3.bf16.msra.mxu0 %v8924_v38  ;;  %v8927_v40 = vld [vmem:[#allocation8 + $0xb0] sm:$0xff]  }
 0x23e   : > { %v7360_v18 = vpop.f32.mrb[71].mxu0  ;;  %7706 = vmatprep.subr.bf16.mxu0 %v8925_v34 }
 0x23f   : > { %v2093_v61 = vadd.f32 %v7358_v51, %v10042_v55  ;;  %v7361_v43 = vadd.f32 %v7360_v18, %v7359_v10  ;;  %v7469_v55 = vpop.f32.mrb[69].mxu1  ;;  %v8930_v51 = vld [vmem:[#allocation8 + $0xb8] sm:$0xff]  }
 0x240   : > { %v7470_v37 = vadd.f32 %v7469_v55, %v7468_v8  ;;  %v7471_v53 = vpop.f32.mrb[70].mxu1 }
 0x241   : > { %v2096_v36 = vadd.f32 %v7361_v43, %v10046_v50  ;;  %v7472_v45 = vpop.f32.mrb[71].mxu1  ;;  %7707 = vmatpush3.bf16.msra.mxu0 %v8927_v40 }
 0x242   : > { %v7473_v25 = vadd.f32 %v7472_v45, %v7471_v53  ;;  %v10157_v52 = vadd.f32 %v7470_v37, %v2093_v61  ;;  %7708 = vmatprep.subr.bf16.mxu0 %v8929_v26 }
 0x243   : > { %v7362_v23 = vpop.f32.mrb[72].mxu0 }
 0x244   : > { %v7363_v22 = vpop.f32.mrb[73].mxu0  ;;  %v10160_v35 = vadd.f32 %v7473_v25, %v2096_v36 }
 0x245   : > { %v7364_v54 = vadd.f32 %v7363_v22, %v7362_v23  ;;  %v7365_v6 = vpop.f32.mrb[74].mxu0  ;;  %v7474_v10 = vpop.f32.mrb[72].mxu1  ;;  %7709 = vmatpush3.bf16.msra.mxu0 %v8930_v51 }
 0x246   : > { %v7366_v50 = vpop.f32.mrb[75].mxu0  ;;  %v7475_v18 = vpop.f32.mrb[73].mxu1 }
 0x247   : > { %v2101_v60 = vadd.f32 %v7364_v54, %v10054_v42  ;;  %v7367_v58 = vadd.f32 %v7366_v50, %v7365_v6  ;;  %v7476_v43 = vadd.f32 %v7475_v18, %v7474_v10  ;;  %v7477_v42 = vpop.f32.mrb[74].mxu1  ;;  %v8931_v10 = vld [vmem:[#allocation8 + $0x148] sm:$0xff]  }
 0x248   : > { %v7478_v2 = vpop.f32.mrb[75].mxu1  ;;  %7808 = vmatprep.subr.bf16.mxu1 %v8931_v10 }
 0x249   : > { %v2104_v27 = vadd.f32 %v7367_v58, %v10058_v56  ;;  %v7479_v56 = vadd.f32 %v7478_v2, %v7477_v42  ;;  %v10163_v38 = vadd.f32 %v7476_v43, %v2101_v60 }
 0x24b   : > { %v7368_v16 = vpop.f32.mrb[76].mxu0  ;;  %v10166_v23 = vadd.f32 %v7479_v56, %v2104_v27 }
 0x24c   : > { %v7369_v44 = vpop.f32.mrb[77].mxu0 }
 0x24d   : > { %v7370_v21 = vadd.f32 %v7369_v44, %v7368_v16  ;;  %v7371_v61 = vpop.f32.mrb[78].mxu0  ;;  %v7480_v55 = vpop.f32.mrb[76].mxu1  ;;  %v8932_v16 = vld [vmem:[#allocation8 + $0x108] sm:$0xff]  }
 0x24e   : > { %v7372_v7 = vpop.f32.mrb[79].mxu0  ;;  %v7481_v34 = vpop.f32.mrb[77].mxu1  ;;  %7809 = vmatpush3.bf16.msra.mxu1 %v8932_v16 }
 0x24f   : > { %v2109_v0 = vadd.f32 %v7370_v21, %v10066_v31  ;;  %v7373_v36 = vadd.f32 %v7372_v7, %v7371_v61  ;;  %v7482_v53 = vadd.f32 %v7481_v34, %v7480_v55  ;;  %v7483_v54 = vpop.f32.mrb[78].mxu1  ;;  %v8933_v61 = vld [vmem:[#allocation8 + $0x150] sm:$0xff]  }
 0x250   : > { %v7484_v45 = vpop.f32.mrb[79].mxu1  ;;  %7810 = vmatprep.subr.bf16.mxu1 %v8933_v61 }
 0x251   : > { %v2112_v8 = vadd.f32 %v7373_v36, %v10070_v19  ;;  %v7485_v25 = vadd.f32 %v7484_v45, %v7483_v54  ;;  %v10169_v60 = vadd.f32 %v7482_v53, %v2109_v0  ;;  %v8934_v0 = vld [vmem:[#allocation8 + $0x110] sm:$0xff]  }
 0x252   : > { %7811 = vmatpush3.bf16.msra.mxu1 %v8934_v0 }
 0x253   : > { %v7374_v22 = vpop.f32.mrb[80].mxu0  ;;  %v10172_v26 = vadd.f32 %v7485_v25, %v2112_v8 }
 0x254   : > { %v7375_v37 = vpop.f32.mrb[81].mxu0 }
 0x255   : > { %v7376_v6 = vadd.f32 %v7375_v37, %v7374_v22  ;;  %v7377_v40 = vpop.f32.mrb[82].mxu0  ;;  %v7486_v27 = vpop.f32.mrb[80].mxu1 }
 0x256   : > { %v7378_v50 = vpop.f32.mrb[83].mxu0  ;;  %v7487_v28 = vpop.f32.mrb[81].mxu1 }
 0x257   : > { %v2117_v31 = vadd.f32 %v7376_v6, %v10075_v1  ;;  %v7379_v58 = vadd.f32 %v7378_v50, %v7377_v40  ;;  %v7488_v18 = vadd.f32 %v7487_v28, %v7486_v27  ;;  %v7489_v44 = vpop.f32.mrb[82].mxu1 }
 0x258   : > { %v7490_v21 = vpop.f32.mrb[83].mxu1 }
 0x259   : > { %v2120_v19 = vadd.f32 %v7379_v58, %v10077_v46  ;;  %v7491_v2 = vadd.f32 %v7490_v21, %v7489_v44  ;;  %v10175_v56 = vadd.f32 %v7488_v18, %v2117_v31  ;;  %v8935_v21 = vld [vmem:[#allocation8 + $0x158] sm:$0xff]  }
 0x25a   : > { %7812 = vmatprep.subr.bf16.mxu1 %v8935_v21 }
 0x25b   : > { %v7380_v51 = vpop.f32.mrb[84].mxu0  ;;  %v10178_v8 = vadd.f32 %v7491_v2, %v2120_v19 }
 0x25c   : > { %v7381_v17 = vpop.f32.mrb[85].mxu0 }
 0x25d   : > { %v7382_v43 = vadd.f32 %v7381_v17, %v7380_v51  ;;  %v7383_v42 = vpop.f32.mrb[86].mxu0  ;;  %v7492_v55 = vpop.f32.mrb[84].mxu1 }
 0x25e   : > { %v7384_v1 = vpop.f32.mrb[87].mxu0  ;;  %v7493_v34 = vpop.f32.mrb[85].mxu1 }
 0x25f   : > { %v2125_v46 = vadd.f32 %v7382_v43, %v10081_v57  ;;  %v7385_v7 = vadd.f32 %v7384_v1, %v7383_v42  ;;  %v7494_v53 = vadd.f32 %v7493_v34, %v7492_v55  ;;  %v7495_v54 = vpop.f32.mrb[86].mxu1 }
 0x260   : > { %v7496_v45 = vpop.f32.mrb[87].mxu1 }
 0x261   : > { %v2128_v36 = vadd.f32 %v7385_v7, %v10083_v32  ;;  %v7497_v50 = vadd.f32 %v7496_v45, %v7495_v54  ;;  %v10181_v58 = vadd.f32 %v7494_v53, %v2125_v46 }
 0x263   : > { %v7386_v22 = vpop.f32.mrb[88].mxu0  ;;  %v10184_v19 = vadd.f32 %v7497_v50, %v2128_v36 }
 0x264   : > { %v7387_v37 = vpop.f32.mrb[89].mxu0 }
 0x265   : > { %v7388_v6 = vadd.f32 %v7387_v37, %v7386_v22  ;;  %v7389_v40 = vpop.f32.mrb[90].mxu0  ;;  %v7498_v27 = vpop.f32.mrb[88].mxu1 }
 0x266   : > { %v7390_v57 = vpop.f32.mrb[91].mxu0  ;;  %v7499_v10 = vpop.f32.mrb[89].mxu1 }
 0x267   : > { %v2133_v25 = vadd.f32 %v7388_v6, %v10087_v49  ;;  %v7391_v31 = vadd.f32 %v7390_v57, %v7389_v40  ;;  %v7500_v28 = vadd.f32 %v7499_v10, %v7498_v27  ;;  %v7501_v17 = vpop.f32.mrb[90].mxu1 }
 0x268   : > { %v7502_v43 = vpop.f32.mrb[91].mxu1 }
 0x269   : > { %v2136_v32 = vadd.f32 %v7391_v31, %v10089_v5  ;;  %v7503_v1 = vadd.f32 %v7502_v43, %v7501_v17  ;;  %v10187_v2 = vadd.f32 %v7500_v28, %v2133_v25  ;;  %v8936_v5 = vld [vmem:[#allocation8 + $0x118] sm:$0xff]   ;;  %v8937_v43 = vld [vmem:[#allocation8 + $0x160] sm:$0xff]  }
 0x26a   : > { %7813 = vmatpush3.bf16.msra.mxu1 %v8936_v5 }
 0x26b   : > { %v7392_v51 = vpop.f32.mrb[92].mxu0  ;;  %v10190_v7 = vadd.f32 %v7503_v1, %v2136_v32  ;;  %7814 = vmatprep.subr.bf16.mxu1 %v8937_v43 }
 0x26c   : > { %v7393_v16 = vpop.f32.mrb[93].mxu0 }
 0x26d   : > { %v7394_v18 = vadd.f32 %v7393_v16, %v7392_v51  ;;  %v7395_v44 = vpop.f32.mrb[94].mxu0  ;;  %v7504_v0 = vpop.f32.mrb[92].mxu1 }
 0x26e   : > { %v7396_v42 = vpop.f32.mrb[95].mxu0  ;;  %v7505_v55 = vpop.f32.mrb[93].mxu1 }
 0x26f   : > { %v2141_v49 = vadd.f32 %v7394_v18, %v10093_v29  ;;  %v7397_v61 = vadd.f32 %v7396_v42, %v7395_v44  ;;  %v7506_v34 = vadd.f32 %v7505_v55, %v7504_v0  ;;  %v7507_v37 = vpop.f32.mrb[94].mxu1 }
 0x270   : > { %v7508_v6 = vpop.f32.mrb[95].mxu1 }
 0x271   : > { %v2144_v46 = vadd.f32 %v7397_v61, %v10096_v59  ;;  %v7509_v40 = vadd.f32 %v7508_v6, %v7507_v37  ;;  %v10193_v50 = vadd.f32 %v7506_v34, %v2141_v49 }
 0x273   : > { %v7398_v36 = vpop.f32.mrb[96].mxu0  ;;  %v10196_v25 = vadd.f32 %v7509_v40, %v2144_v46 }
 0x274   : > { %v7399_v22 = vpop.f32.mrb[97].mxu0 }
 0x275   : > { %v7400_v53 = vadd.f32 %v7399_v22, %v7398_v36  ;;  %v7401_v54 = vpop.f32.mrb[98].mxu0  ;;  %v7510_v31 = vpop.f32.mrb[96].mxu1 }
 0x276   : > { %v7402_v29 = vpop.f32.mrb[99].mxu0  ;;  %v7511_v27 = vpop.f32.mrb[97].mxu1 }
 0x277   : > { %v2149_v45 = vadd.f32 %v7400_v53, %v10101_v62  ;;  %v7403_v57 = vadd.f32 %v7402_v29, %v7401_v54  ;;  %v7512_v10 = vadd.f32 %v7511_v27, %v7510_v31  ;;  %v7513_v16 = vpop.f32.mrb[98].mxu1 }
 0x278   : > { %v7514_v18 = vpop.f32.mrb[99].mxu1 }
 0x279   : > { %v2152_v59 = vadd.f32 %v7403_v57, %v10103_v12  ;;  %v7515_v42 = vadd.f32 %v7514_v18, %v7513_v16  ;;  %v10199_v1 = vadd.f32 %v7512_v10, %v2149_v45  ;;  %v8938_v12 = vld [vmem:[#allocation8 + $0x120] sm:$0xff]   ;;  %v8939_v18 = vld [vmem:[#allocation8 + $0x168] sm:$0xff]  }
 0x27a   : > { %7815 = vmatpush3.bf16.msra.mxu1 %v8938_v12 }
 0x27b   : > { %v7404_v32 = vpop.f32.mrb[100].mxu0  ;;  %v10202_v61 = vadd.f32 %v7515_v42, %v2152_v59  ;;  %7816 = vmatprep.subr.bf16.mxu1 %v8939_v18 }
 0x27c   : > { %v7405_v51 = vpop.f32.mrb[101].mxu0 }
 0x27d   : > { %v7406_v28 = vadd.f32 %v7405_v51, %v7404_v32  ;;  %v7407_v17 = vpop.f32.mrb[102].mxu0  ;;  %v7516_v5 = vpop.f32.mrb[100].mxu1 }
 0x27e   : > { %v7408_v44 = vpop.f32.mrb[103].mxu0  ;;  %v7517_v0 = vpop.f32.mrb[101].mxu1 }
 0x27f   : > { %v2157_v62 = vadd.f32 %v7406_v28, %v10107_v9  ;;  %v7409_v21 = vadd.f32 %v7408_v44, %v7407_v17  ;;  %v7518_v55 = vadd.f32 %v7517_v0, %v7516_v5  ;;  %v7519_v22 = vpop.f32.mrb[102].mxu1 }
 0x280   : > { %v7520_v53 = vpop.f32.mrb[103].mxu1 }
 0x281   : > { %v2160_v49 = vadd.f32 %v7409_v21, %v10109_v24  ;;  %v7521_v54 = vadd.f32 %v7520_v53, %v7519_v22  ;;  %v10205_v40 = vadd.f32 %v7518_v55, %v2157_v62 }
 0x283   : > { %v7410_v46 = vpop.f32.mrb[104].mxu0  ;;  %v10208_v45 = vadd.f32 %v7521_v54, %v2160_v49 }
 0x284   : > { %v7411_v36 = vpop.f32.mrb[105].mxu0 }
 0x285   : > { %v7412_v34 = vadd.f32 %v7411_v36, %v7410_v46  ;;  %v7413_v37 = vpop.f32.mrb[106].mxu0  ;;  %v7522_v57 = vpop.f32.mrb[104].mxu1 }
 0x286   : > { %v7414_v9 = vpop.f32.mrb[107].mxu0  ;;  %v7523_v31 = vpop.f32.mrb[105].mxu1 }
 0x287   : > { %v2165_v6 = vadd.f32 %v7412_v34, %v10113_v13  ;;  %v7415_v29 = vadd.f32 %v7414_v9, %v7413_v37  ;;  %v7524_v27 = vadd.f32 %v7523_v31, %v7522_v57  ;;  %v7525_v51 = vpop.f32.mrb[106].mxu1 }
 0x288   : > { %v7526_v28 = vpop.f32.mrb[107].mxu1 }
 0x289   : > { %v2168_v24 = vadd.f32 %v7415_v29, %v10115_v30  ;;  %v7527_v44 = vadd.f32 %v7526_v28, %v7525_v51  ;;  %v10211_v42 = vadd.f32 %v7524_v27, %v2165_v6  ;;  %v8940_v30 = vld [vmem:[#allocation8 + $0x128] sm:$0xff]   ;;  %v8941_v28 = vld [vmem:[#allocation8 + $0x170] sm:$0xff]  }
 0x28a   : > { %7817 = vmatpush3.bf16.msra.mxu1 %v8940_v30 }
 0x28b   : > { %v7416_v59 = vpop.f32.mrb[108].mxu0  ;;  %v10214_v21 = vadd.f32 %v7527_v44, %v2168_v24  ;;  %7818 = vmatprep.subr.bf16.mxu1 %v8941_v28 }
 0x28c   : > { %v7417_v32 = vpop.f32.mrb[109].mxu0 }
 0x28d   : > { %v7418_v10 = vadd.f32 %v7417_v32, %v7416_v59  ;;  %v7419_v16 = vpop.f32.mrb[110].mxu0  ;;  %v7528_v12 = vpop.f32.mrb[108].mxu1 }
 0x28e   : > { %v7420_v17 = vpop.f32.mrb[111].mxu0  ;;  %v7529_v5 = vpop.f32.mrb[109].mxu1 }
 0x28f   : > { %v2173_v13 = vadd.f32 %v7418_v10, %v10119_v14  ;;  %v7421_v43 = vadd.f32 %v7420_v17, %v7419_v16  ;;  %v7530_v0 = vadd.f32 %v7529_v5, %v7528_v12  ;;  %v7531_v36 = vpop.f32.mrb[110].mxu1 }
 0x290   : > { %v7532_v34 = vpop.f32.mrb[111].mxu1 }
 0x291   : > { %v2176_v62 = vadd.f32 %v7421_v43, %v10121_v33  ;;  %v7533_v37 = vadd.f32 %v7532_v34, %v7531_v36  ;;  %v10217_v54 = vadd.f32 %v7530_v0, %v2173_v13 }
 0x293   : > { %v7422_v49 = vpop.f32.mrb[112].mxu0  ;;  %v10220_v6 = vadd.f32 %v7533_v37, %v2176_v62 }
 0x294   : > { %v7423_v46 = vpop.f32.mrb[113].mxu0 }
 0x295   : > { %v7424_v55 = vadd.f32 %v7423_v46, %v7422_v49  ;;  %v7425_v22 = vpop.f32.mrb[114].mxu0  ;;  %v7534_v29 = vpop.f32.mrb[112].mxu1 }
 0x296   : > { %v7426_v14 = vpop.f32.mrb[115].mxu0  ;;  %v7535_v57 = vpop.f32.mrb[113].mxu1 }
 0x297   : > { %v2181_v53 = vadd.f32 %v7424_v55, %v10125_v20  ;;  %v7427_v9 = vadd.f32 %v7426_v14, %v7425_v22  ;;  %v7536_v31 = vadd.f32 %v7535_v57, %v7534_v29  ;;  %v7537_v32 = vpop.f32.mrb[114].mxu1  ;;  %v8943_v22 = vld [vmem:[#allocation8 + $0x1c0] sm:$0xff]  }
 0x298   : > { %v7538_v10 = vpop.f32.mrb[115].mxu1  ;;  %7918 = vmatprep.subr.bf16.mxu0 %v8943_v22 }
 0x299   : > { %v2184_v33 = vadd.f32 %v7427_v9, %v10127_v3  ;;  %v7539_v17 = vadd.f32 %v7538_v10, %v7537_v32  ;;  %v10223_v44 = vadd.f32 %v7536_v31, %v2181_v53  ;;  %v8942_v3 = vld [vmem:[#allocation8 + $0x130] sm:$0xff]  }
 0x29a   : > { %7819 = vmatpush3.bf16.msra.mxu1 %v8942_v3 }
 0x29b   : > { %v7428_v24 = vpop.f32.mrb[116].mxu0  ;;  %v10226_v43 = vadd.f32 %v7539_v17, %v2184_v33 }
 0x29c   : > { %v7429_v59 = vpop.f32.mrb[117].mxu0 }
 0x29d   : > { %v7430_v27 = vadd.f32 %v7429_v59, %v7428_v24  ;;  %v7431_v51 = vpop.f32.mrb[118].mxu0  ;;  %v7540_v30 = vpop.f32.mrb[116].mxu1 }
 0x29e   : > { %v7432_v16 = vpop.f32.mrb[119].mxu0  ;;  %v7541_v12 = vpop.f32.mrb[117].mxu1 }
 0x29f   : > { %v2189_v20 = vadd.f32 %v7430_v27, %v10131_v47  ;;  %v7433_v18 = vadd.f32 %v7432_v16, %v7431_v51  ;;  %v7542_v5 = vadd.f32 %v7541_v12, %v7540_v30  ;;  %v7543_v46 = vpop.f32.mrb[118].mxu1  ;;  %v8947_v16 = vld [vmem:[#allocation8 + $0x178] sm:$0xff]  }
 0x2a0   : > { %v7544_v55 = vpop.f32.mrb[119].mxu1  ;;  %7820 = vmatprep.subr.bf16.mxu1 %v8947_v16 }
 0x2a1   : > { %v2192_v13 = vadd.f32 %v7433_v18, %v10133_v15  ;;  %v7545_v34 = vadd.f32 %v7544_v55, %v7543_v46  ;;  %v10229_v53 = vadd.f32 %v7542_v5, %v2189_v20 }
 0x2a3   : > { %v7434_v62 = vpop.f32.mrb[120].mxu0  ;;  %v10232_v9 = vadd.f32 %v7545_v34, %v2192_v13 }
 0x2a4   : > { %v7435_v49 = vpop.f32.mrb[121].mxu0 }
 0x2a5   : > { %v7436_v0 = vadd.f32 %v7435_v49, %v7434_v62  ;;  %v7437_v36 = vpop.f32.mrb[122].mxu0  ;;  %v7546_v33 = vpop.f32.mrb[120].mxu1 }
 0x2a6   : > { %v7438_v47 = vpop.f32.mrb[123].mxu0  ;;  %v7547_v24 = vpop.f32.mrb[121].mxu1 }
 0x2a7   : > { %v2197_v14 = vadd.f32 %v7436_v0, %v10137_v11  ;;  %v7439_v37 = vadd.f32 %v7438_v47, %v7437_v36  ;;  %v7548_v59 = vadd.f32 %v7547_v24, %v7546_v33  ;;  %v7549_v31 = vpop.f32.mrb[122].mxu1 }
 0x2a8   : > { %v7550_v51 = vpop.f32.mrb[123].mxu1 }
 0x2a9   : > { %v2200_v15 = vadd.f32 %v7439_v37, %v10139_v41  ;;  %v7551_v11 = vadd.f32 %v7550_v51, %v7549_v31  ;;  %v10235_v20 = vadd.f32 %v7548_v59, %v2197_v14  ;;  %v8949_v41 = vld [vmem:[#allocation8 + $0x138] sm:$0xff]  }
 0x2aa   : > { %7821 = vmatpush3.bf16.msra.mxu1 %v8949_v41  ;;  %v10275_v41 = vld [vmem:[#allocation8 + $0x200] sm:$0xff]  }
 0x2ab   : > { %v7440_v29 = vpop.f32.mrb[124].mxu0  ;;  %v10238_v3 = vadd.f32 %v7551_v11, %v2200_v15  ;;  %8583 = vmatprep.subr.bf16.mxu1 %v10275_v41 }
 0x2ac   : > { %v7441_v57 = vpop.f32.mrb[125].mxu0 }
 0x2ad   : > { %v7442_v32 = vadd.f32 %v7441_v57, %v7440_v29  ;;  %v7443_v27 = vpop.f32.mrb[126].mxu0  ;;  %v7552_v13 = vpop.f32.mrb[124].mxu1 }
 0x2ae   : > { %v7444_v10 = vpop.f32.mrb[127].mxu0  ;;  %v7553_v62 = vpop.f32.mrb[125].mxu1 }
 0x2af   : > { %v2205_v28 = vadd.f32 %v7442_v32, %v10143_v63  ;;  %v7445_v17 = vadd.f32 %v7444_v10, %v7443_v27  ;;  %v7554_v5 = vadd.f32 %v7553_v62, %v7552_v13  ;;  %v7555_v46 = vpop.f32.mrb[126].mxu1 }
 0x2b0   : > { %v7556_v36 = vpop.f32.mrb[127].mxu1 }
 0x2b1   : > { %v2208_v18 = vadd.f32 %v7445_v17, %v10146_v39  ;;  %v7557_v22 = vadd.f32 %v7556_v36, %v7555_v46  ;;  %v10246_v37 = vadd.f32 %v7554_v5, %v2205_v28 }
 0x2b3   : > { %v8553_v30 = vpop.f32.mrb[128].mxu0 }
 0x2b4   : > { %v2415_v12 = vadd.f32 %v8553_v30, %v10157_v52  ;;  %v2406_v49 = vpop.f32.mrb[129].mxu0  ;;  %v2726_v30 = vld [vmem:[#allocation2 + $0xf1] sm:$0xff] }
 0x2b5   : > { %v2407_v63 = vadd.f32 %v2406_v49, %v10150_v4  ;;  %v8554_v0 = vpop.f32.mrb[130].mxu0  ;;  %v8569_v15 = vpop.f32.mrb[128].mxu1 }
 0x2b6   : > { %v10242_v55 = vmax.f32 %v2415_v12, 0.0  ;;  %v2418_v39 = vadd.f32 %v8554_v0, %v10160_v35  ;;  %v2409_v47 = vpop.f32.mrb[131].mxu0  ;;  %v10257_v35 = vadd.f32 %v7557_v22, %v2208_v18  ;;  %v2479_v24 = vadd.f32 %v8569_v15, %v10205_v40  ;;  %v2470_v57 = vpop.f32.mrb[129].mxu1 }
 0x2b7   : > { %v2533_v34 = vmax.f32 %v2407_v63, 0.0  ;;  %v2410_v14 = vadd.f32 %v2409_v47, %v10153_v48  ;;  %v2471_v32 = vadd.f32 %v2470_v57, %v10199_v1  ;;  %v8570_v27 = vpop.f32.mrb[130].mxu1  ;;  %v8945_v57 = vld [vmem:[#allocation8 + $0x1c8] sm:$0xff]  }
 0x2b8   : > { %2567 = vst [vmem:[%s10249_s17 + $0x10] sm:$0xff] %v10242_v55  ;;  %2599 = vst [vmem:[#allocation2 + $0x128] sm:$0xff] %v10242_v55  ;;  %v10254_v4 = vmax.f32 %v2418_v39, 0.0  ;;  %v10269_v16 = vmax.f32 %v2479_v24, 0.0  ;;  %v2482_v11 = vadd.f32 %v8570_v27, %v10208_v45  ;;  %v2473_v28 = vpop.f32.mrb[131].mxu1  ;;  %v2725_v45 = vld [vmem:[#allocation2 + $0xe9] sm:$0xff] }
 0x2b9   : > { %2565 = vst [vmem:[%s10249_s17] sm:$0xff] %v2533_v34  ;;  %2597 = vst [vmem:[#allocation2 + $0x108] sm:$0xff] %v2533_v34  ;;  %v2534_v52 = vmax.f32 %v2410_v14, 0.0  ;;  %v10277_v1 = vmax.f32 %v2471_v32, 0.0  ;;  %v2757_v5 = vpack.c.bf16 %v2726_v30, %v2725_v45  ;;  %v8944_v14 = vld [vmem:[#allocation8 + $0x180] sm:$0xff]  }
 0x2ba   : > { %2568 = vst [vmem:[%s10249_s17 + $0x18] sm:$0xff] %v10254_v4  ;;  %2600 = vst [vmem:[#allocation2 + $0x130] sm:$0xff] %v10254_v4  ;;  %v2711_v48 = vpack.c.bf16 %v10254_v4, %v10242_v55 }
 0x2bb   : > { %2566 = vst [vmem:[%s10249_s17 + $0x8] sm:$0xff] %v2534_v52  ;;  %2598 = vst [vmem:[#allocation2 + $0x110] sm:$0xff] %v2534_v52  ;;  %v8557_v33 = vpop.f32.mrb[132].mxu0  ;;  %v2710_v29 = vpack.c.bf16 %v2534_v52, %v2533_v34 }
 0x2bc   : > { %v2431_v59 = vadd.f32 %v8557_v33, %v10169_v60  ;;  %v2422_v31 = vpop.f32.mrb[133].mxu0  ;;  %2583 = vst [vmem:[%s10249_s17 + $0x90] sm:$0xff] %v10269_v16  ;;  %2615 = vst [vmem:[#allocation2 + $0x228] sm:$0xff] %v10269_v16 }
 0x2bd   : > { %v2423_v51 = vadd.f32 %v2422_v31, %v10163_v38  ;;  %v8558_v10 = vpop.f32.mrb[134].mxu0  ;;  %3684 = vmatprep.mubr.bf16.mxu1 %v2710_v29  ;;  %v2474_v38 = vadd.f32 %v2473_v28, %v10202_v61  ;;  %2581 = vst [vmem:[%s10249_s17 + $0x80] sm:$0xff] %v10277_v1  ;;  %2613 = vst [vmem:[#allocation2 + $0x208] sm:$0xff] %v10277_v1  ;;  %v8573_v36 = vpop.f32.mrb[132].mxu1 }
 0x2be   : > { %v10272_v17 = vmax.f32 %v2431_v59, 0.0  ;;  %v2434_v40 = vadd.f32 %v8558_v10, %v10172_v26  ;;  %v2425_v60 = vpop.f32.mrb[135].mxu0  ;;  %v10286_v26 = vmax.f32 %v2482_v11, 0.0  ;;  %v2495_v52 = vadd.f32 %v8573_v36, %v10217_v54  ;;  %v2486_v15 = vpop.f32.mrb[133].mxu1 }
 0x2bf   : > { %v10280_v18 = vmax.f32 %v2423_v51, 0.0  ;;  %v2426_v13 = vadd.f32 %v2425_v60, %v10166_v23  ;;  %v10297_v23 = vmax.f32 %v2474_v38, 0.0  ;;  %v2775_v24 = vld [vmem:[#allocation2 + $0x127] sm:$0xff]  ;;  %v2487_v59 = vadd.f32 %v2486_v15, %v10211_v42  ;;  %v8574_v31 = vpop.f32.mrb[134].mxu1 }
 0x2c0   : > { %2571 = vst [vmem:[%s10249_s17 + $0x30] sm:$0xff] %v10272_v17  ;;  %2603 = vst [vmem:[#allocation2 + $0x168] sm:$0xff] %v10272_v17  ;;  %v10291_v62 = vmax.f32 %v2434_v40, 0.0  ;;  %v2773_v12 = vld [vmem:[#allocation2 + $0x107] sm:$0xff]  ;;  %v2719_v0 = vpack.c.bf16 %v10286_v26, %v10269_v16  ;;  %v10330_v10 = vmax.f32 %v2495_v52, 0.0  ;;  %v2498_v54 = vadd.f32 %v8574_v31, %v10220_v6  ;;  %v2489_v11 = vpop.f32.mrb[135].mxu1 }
 0x2c1   : > { %2569 = vst [vmem:[%s10249_s17 + $0x20] sm:$0xff] %v10280_v18  ;;  %2601 = vst [vmem:[#allocation2 + $0x148] sm:$0xff] %v10280_v18  ;;  %v10302_v61 = vmax.f32 %v2426_v13, 0.0  ;;  %v2776_v46 = vld [vmem:[#allocation2 + $0x12f] sm:$0xff]  ;;  %v2718_v34 = vpack.c.bf16 %v10297_v23, %v10277_v1  ;;  %v2490_v40 = vadd.f32 %v2489_v11, %v10214_v21 }
 0x2c2   : > { %2584 = vst [vmem:[%s10249_s17 + $0x98] sm:$0xff] %v10286_v26  ;;  %2616 = vst [vmem:[#allocation2 + $0x230] sm:$0xff] %v10286_v26  ;;  %v2774_v49 = vld [vmem:[#allocation2 + $0x10f] sm:$0xff]  ;;  %v2713_v63 = vpack.c.bf16 %v10291_v62, %v10272_v17  ;;  %v10328_v51 = vpack.c.bf16 %v2776_v46, %v2775_v24  ;;  %v10349_v55 = vmax.f32 %v2498_v54, 0.0  ;;  %v8951_v24 = vld [vmem:[#allocation8 + $0x1d8] sm:$0xff]  }
 0x2c3   : > { %2572 = vst [vmem:[%s10249_s17 + $0x38] sm:$0xff] %v10291_v62  ;;  %2604 = vst [vmem:[#allocation2 + $0x170] sm:$0xff] %v10291_v62  ;;  %v8561_v39 = vpop.f32.mrb[136].mxu0  ;;  %v2805_v47 = vpack.c.bf16 %v2774_v49, %v2773_v12  ;;  %v2712_v22 = vpack.c.bf16 %v10302_v61, %v10280_v18  ;;  %v10359_v4 = vmax.f32 %v2490_v40, 0.0  ;;  %v2727_v38 = vld [vmem:[#allocation2 + $0x109] sm:$0xff]  ;;  %v2728_v13 = vld [vmem:[#allocation2 + $0x111] sm:$0xff] }
 0x2c4   : > { %2582 = vst [vmem:[%s10249_s17 + $0x88] sm:$0xff] %v10297_v23  ;;  %2614 = vst [vmem:[#allocation2 + $0x210] sm:$0xff] %v10297_v23  ;;  %v2447_v33 = vadd.f32 %v8561_v39, %v10181_v58  ;;  %v2438_v29 = vpop.f32.mrb[137].mxu0  ;;  %v2721_v12 = vpack.c.bf16 %v10349_v55, %v10330_v10  ;;  %v8950_v39 = vld [vmem:[#allocation8 + $0x190] sm:$0xff]  }
 0x2c5   : > { %2570 = vst [vmem:[%s10249_s17 + $0x28] sm:$0xff] %v10302_v61  ;;  %2602 = vst [vmem:[#allocation2 + $0x150] sm:$0xff] %v10302_v61  ;;  %v2439_v32 = vadd.f32 %v2438_v29, %v10175_v56  ;;  %v8562_v27 = vpop.f32.mrb[138].mxu0  ;;  %3837 = vmatprep.mubr.bf16.mxu0 %v2805_v47  ;;  %3685 = vmatmul.mubr.bf16.gmra.mrb[148].mxu1 %v2805_v47  ;;  %v10339_v56 = vmax.f32 %v2487_v59, 0.0  ;;  %v8577_v49 = vpop.f32.mrb[136].mxu1 }
 0x2c6   : > { %v10333_v58 = vmax.f32 %v2447_v33, 0.0  ;;  %v2450_v28 = vadd.f32 %v8562_v27, %v10184_v19  ;;  %v2441_v42 = vpop.f32.mrb[139].mxu0  ;;  %3838 = vmatmul.mubr.bf16.vlgmr.msra.gmra.mrb[144].mxu0 %v2757_v5  ;;  %3692 = vmatprep.mubr.bf16.mxu1 %v2711_v48  ;;  %v8946_v19 = vld [vmem:[#allocation8 + $0x188] sm:$0xff]   ;;  %2587 = vst [vmem:[%s10249_s17 + $0xb0] sm:$0xff] %v10330_v10  ;;  %2619 = vst [vmem:[#allocation2 + $0x268] sm:$0xff] %v10330_v10  ;;  %v2511_v47 = vadd.f32 %v8577_v49, %v10229_v53 }
 0x2c7   : > { %v10342_v60 = vmax.f32 %v2439_v32, 0.0  ;;  %v2442_v6 = vadd.f32 %v2441_v42, %v10178_v8  ;;  %3845 = vmatprep.mubr.bf16.mxu0 %v10328_v51  ;;  %7919 = vmatpush3.bf16.msra.mxu0 %v8944_v14  ;;  %v8948_v8 = vld [vmem:[#allocation8 + $0x1d0] sm:$0xff]   ;;  %2585 = vst [vmem:[%s10249_s17 + $0xa0] sm:$0xff] %v10339_v56  ;;  %2617 = vst [vmem:[#allocation2 + $0x248] sm:$0xff] %v10339_v56  ;;  %v2720_v36 = vpack.c.bf16 %v10359_v4, %v10339_v56  ;;  %v2502_v14 = vpop.f32.mrb[137].mxu1 }
 0x2c8   : > { %2575 = vst [vmem:[%s10249_s17 + $0x50] sm:$0xff] %v10333_v58  ;;  %2607 = vst [vmem:[#allocation2 + $0x1a8] sm:$0xff] %v10333_v58  ;;  %v10354_v21 = vmax.f32 %v2450_v28, 0.0  ;;  %7920 = vmatprep.subr.bf16.mxu0 %v8945_v57  ;;  %v10388_v33 = vpack.c.bf16 %v2728_v13, %v2727_v38  ;;  %v2777_v29 = vld [vmem:[#allocation2 + $0x147] sm:$0xff]  ;;  %v2503_v57 = vadd.f32 %v2502_v14, %v10223_v44  ;;  %v8578_v59 = vpop.f32.mrb[138].mxu1  ;;  %v10395_v53 = vmax.f32 %v2511_v47, 0.0 }
 0x2c9   : > { %2573 = vst [vmem:[%s10249_s17 + $0x40] sm:$0xff] %v10342_v60  ;;  %2605 = vst [vmem:[#allocation2 + $0x188] sm:$0xff] %v10342_v60  ;;  %v10364_v48 = vmax.f32 %v2442_v6, 0.0  ;;  %v2505_v54 = vpop.f32.mrb[139].mxu1  ;;  %v2729_v6 = vld [vmem:[#allocation2 + $0x129] sm:$0xff]  ;;  %v2746_v26 = vld [vmem:[#allocation2 + $0x231] sm:$0xff] }
 0x2ca   : > { %2588 = vst [vmem:[%s10249_s17 + $0xb8] sm:$0xff] %v10349_v55  ;;  %2620 = vst [vmem:[#allocation2 + $0x270] sm:$0xff] %v10349_v55  ;;  %v2715_v30 = vpack.c.bf16 %v10354_v21, %v10333_v58  ;;  %v2506_v42 = vadd.f32 %v2505_v54, %v10226_v43  ;;  %v8956_v54 = vld [vmem:[#allocation8 + $0x1a8] sm:$0xff]  }
 0x2cb   : > { %2576 = vst [vmem:[%s10249_s17 + $0x58] sm:$0xff] %v10354_v21  ;;  %2608 = vst [vmem:[#allocation2 + $0x1b0] sm:$0xff] %v10354_v21  ;;  %v8565_v5 = vpop.f32.mrb[140].mxu0  ;;  %v2714_v46 = vpack.c.bf16 %v10364_v48, %v10342_v60  ;;  %7921 = vmatpush3.bf16.msra.mxu0 %v8946_v19  ;;  %v2730_v19 = vld [vmem:[#allocation2 + $0x131] sm:$0xff]  ;;  %v2743_v1 = vld [vmem:[#allocation2 + $0x209] sm:$0xff] }
 0x2cc   : > { %v2778_v45 = vld [vmem:[#allocation2 + $0x14f] sm:$0xff]  ;;  %2586 = vst [vmem:[%s10249_s17 + $0xa8] sm:$0xff] %v10359_v4  ;;  %2618 = vst [vmem:[#allocation2 + $0x250] sm:$0xff] %v10359_v4  ;;  %v2463_v52 = vadd.f32 %v8565_v5, %v10193_v50  ;;  %v2454_v15 = vpop.f32.mrb[141].mxu0  ;;  %7922 = vmatprep.subr.bf16.mxu0 %v8948_v8  ;;  %v2514_v50 = vadd.f32 %v8578_v59, %v10232_v9  ;;  %v10423_v61 = vmax.f32 %v2506_v42, 0.0 }
 0x2cd   : > { %2574 = vst [vmem:[%s10249_s17 + $0x48] sm:$0xff] %v10364_v48  ;;  %2606 = vst [vmem:[#allocation2 + $0x190] sm:$0xff] %v10364_v48  ;;  %v2455_v31 = vadd.f32 %v2454_v15, %v10187_v2  ;;  %v8566_v32 = vpop.f32.mrb[142].mxu0  ;;  %3693 = vmatmul.mubr.bf16.gmra.mrb[152].mxu1 %v10328_v51  ;;  %v10393_v27 = vpack.c.bf16 %v2778_v45, %v2777_v29  ;;  %v10405_v2 = vmax.f32 %v2503_v57, 0.0  ;;  %v2780_v8 = vld [vmem:[#allocation2 + $0x16f] sm:$0xff]  ;;  %v8581_v45 = vpop.f32.mrb[140].mxu1 }
 0x2ce   : > { %v10398_v11 = vmax.f32 %v2463_v52, 0.0  ;;  %v2466_v28 = vadd.f32 %v8566_v32, %v10196_v25  ;;  %v2457_v44 = vpop.f32.mrb[143].mxu0  ;;  %3846 = vmatmul.mubr.bf16.gmra.mrb[148].mxu0 %v10388_v33  ;;  %3700 = vmatprep.mubr.bf16.mxu1 %v2712_v22  ;;  %v8952_v25 = vld [vmem:[#allocation8 + $0x198] sm:$0xff]   ;;  %2591 = vst [vmem:[%s10249_s17 + $0xd0] sm:$0xff] %v10395_v53  ;;  %2623 = vst [vmem:[#allocation2 + $0x2a8] sm:$0xff] %v10395_v53  ;;  %v10413_v18 = vmax.f32 %v2514_v50, 0.0 }
 0x2cf   : > { %v2545_v40 = vmax.f32 %v2455_v31, 0.0  ;;  %v2458_v9 = vadd.f32 %v2457_v44, %v10190_v7  ;;  %3853 = vmatprep.mubr.bf16.mxu0 %v10393_v27  ;;  %7923 = vmatpush3.bf16.msra.mxu0 %v8950_v39  ;;  %v8953_v7 = vld [vmem:[#allocation8 + $0x1e0] sm:$0xff]   ;;  %2589 = vst [vmem:[%s10249_s17 + $0xc0] sm:$0xff] %v10405_v2  ;;  %2621 = vst [vmem:[#allocation2 + $0x288] sm:$0xff] %v10405_v2  ;;  %v2722_v5 = vpack.c.bf16 %v10423_v61, %v10405_v2  ;;  %v2518_v14 = vpop.f32.mrb[141].mxu1  ;;  %v8955_v29 = vld [vmem:[#allocation8 + $0x1e8] sm:$0xff]  }
 0x2d0   : > { %2579 = vst [vmem:[%s10249_s17 + $0x70] sm:$0xff] %v10398_v11  ;;  %2611 = vst [vmem:[#allocation2 + $0x1e8] sm:$0xff] %v10398_v11  ;;  %v10418_v43 = vmax.f32 %v2466_v28, 0.0  ;;  %7924 = vmatprep.subr.bf16.mxu0 %v8951_v24  ;;  %v2723_v13 = vpack.c.bf16 %v10413_v18, %v10395_v53  ;;  %v8954_v39 = vld [vmem:[#allocation8 + $0x1a0] sm:$0xff]   ;;  %v2527_v47 = vadd.f32 %v8581_v45, %v10246_v37  ;;  %v8582_v57 = vpop.f32.mrb[142].mxu1  ;;  %v8957_v28 = vld [vmem:[#allocation8 + $0x1f0] sm:$0xff]  }
 0x2d1   : > { %2577 = vst [vmem:[%s10249_s17 + $0x60] sm:$0xff] %v2545_v40  ;;  %2609 = vst [vmem:[#allocation2 + $0x1c8] sm:$0xff] %v2545_v40  ;;  %v2546_v22 = vmax.f32 %v2458_v9, 0.0  ;;  %v10445_v52 = vpack.c.bf16 %v2730_v19, %v2729_v6  ;;  %v2779_v15 = vld [vmem:[#allocation2 + $0x167] sm:$0xff]  ;;  %v2519_v24 = vadd.f32 %v2518_v14, %v10235_v20  ;;  %v2530_v32 = vadd.f32 %v8582_v57, %v10257_v35  ;;  %v2521_v50 = vpop.f32.mrb[143].mxu1  ;;  %v8959_v42 = vld [vmem:[#allocation8 + $0x1b0] sm:$0xff]  }
 0x2d2   : > { %2592 = vst [vmem:[%s10249_s17 + $0xd8] sm:$0xff] %v10413_v18  ;;  %2624 = vst [vmem:[#allocation2 + $0x2b0] sm:$0xff] %v10413_v18  ;;  %v2717_v38 = vpack.c.bf16 %v10418_v43, %v10398_v11  ;;  %v10449_v59 = vpack.c.bf16 %v2780_v8, %v2779_v15  ;;  %v2563_v31 = vmax.f32 %v2527_v47, 0.0  ;;  %v2522_v20 = vadd.f32 %v2521_v50, %v10238_v3  ;;  %v2731_v62 = vld [vmem:[#allocation2 + $0x149] sm:$0xff]  ;;  %v2734_v19 = vld [vmem:[#allocation2 + $0x171] sm:$0xff] }
 0x2d3   : > { %2580 = vst [vmem:[%s10249_s17 + $0x78] sm:$0xff] %v10418_v43  ;;  %2612 = vst [vmem:[#allocation2 + $0x1f0] sm:$0xff] %v10418_v43  ;;  %v10440_v49 = vpack.c.bf16 %v2546_v22, %v2545_v40  ;;  %7925 = vmatpush3.bf16.msra.mxu0 %v8952_v25  ;;  %v10456_v37 = vmax.f32 %v2519_v24, 0.0  ;;  %v2564_v35 = vmax.f32 %v2530_v32, 0.0  ;;  %v2781_v9 = vld [vmem:[#allocation2 + $0x187] sm:$0xff]  ;;  %v8960_v25 = vld [vmem:[#allocation8 + $0x1f8] sm:$0xff]  }
 0x2d4   : > { %2590 = vst [vmem:[%s10249_s17 + $0xc8] sm:$0xff] %v10423_v61  ;;  %2622 = vst [vmem:[#allocation2 + $0x290] sm:$0xff] %v10423_v61  ;;  %7926 = vmatprep.subr.bf16.mxu0 %v8953_v7  ;;  %v10464_v17 = vmax.f32 %v2522_v20, 0.0  ;;  %v2782_v3 = vld [vmem:[#allocation2 + $0x18f] sm:$0xff] }
 0x2d5   : > { %2578 = vst [vmem:[%s10249_s17 + $0x68] sm:$0xff] %v2546_v22  ;;  %2610 = vst [vmem:[#allocation2 + $0x1d0] sm:$0xff] %v2546_v22  ;;  %3701 = vmatmul.mubr.bf16.gmra.mrb[156].mxu1 %v10393_v27  ;;  %v10475_v7 = vpack.c.bf16 %v2782_v3, %v2781_v9  ;;  %v8961_v22 = vld [vmem:[#allocation8 + $0x1b8] sm:$0xff]   ;;  %v2733_v6 = vld [vmem:[#allocation2 + $0x169] sm:$0xff] }
 0x2d6   : > { %3854 = vmatmul.mubr.bf16.gmra.mrb[152].mxu0 %v10445_v52  ;;  %3708 = vmatprep.mubr.bf16.mxu1 %v2713_v63  ;;  %2595 = vst [vmem:[%s10249_s17 + $0xf0] sm:$0xff] %v2563_v31  ;;  %2627 = vst [vmem:[#allocation2 + $0x2e8] sm:$0xff] %v2563_v31  ;;  %v2732_v63 = vld [vmem:[#allocation2 + $0x151] sm:$0xff]  ;;  %v2724_v44 = vpack.c.bf16 %v10464_v17, %v10456_v37  ;;  %v10482_v45 = vpack.c.bf16 %v2734_v19, %v2733_v6  ;;  %v2735_v60 = vld [vmem:[#allocation2 + $0x189] sm:$0xff] }
 0x2d7   : > { %3861 = vmatprep.mubr.bf16.mxu0 %v10449_v59  ;;  %7927 = vmatpush3.bf16.msra.mxu0 %v8954_v39  ;;  %2593 = vst [vmem:[%s10249_s17 + $0xe0] sm:$0xff] %v10456_v37  ;;  %2625 = vst [vmem:[#allocation2 + $0x2c8] sm:$0xff] %v10456_v37  ;;  %v10472_v40 = vpack.c.bf16 %v2732_v63, %v2731_v62  ;;  %v2784_v8 = vld [vmem:[#allocation2 + $0x1af] sm:$0xff]  ;;  %v2783_v39 = vld [vmem:[#allocation2 + $0x1a7] sm:$0xff] }
 0x2d8   : > { %7928 = vmatprep.subr.bf16.mxu0 %v8955_v29  ;;  %2596 = vst [vmem:[%s10249_s17 + $0xf8] sm:$0xff] %v2564_v35  ;;  %2628 = vst [vmem:[#allocation2 + $0x2f0] sm:$0xff] %v2564_v35  ;;  %v10485_v47 = vpack.c.bf16 %v2784_v8, %v2783_v39  ;;  %v2785_v29 = vld [vmem:[#allocation2 + $0x1c7] sm:$0xff]  ;;  %v2738_v21 = vld [vmem:[#allocation2 + $0x1b1] sm:$0xff] }
 0x2d9   : > { %2594 = vst [vmem:[%s10249_s17 + $0xe8] sm:$0xff] %v10464_v17  ;;  %2626 = vst [vmem:[#allocation2 + $0x2d0] sm:$0xff] %v10464_v17  ;;  %v2737_v58 = vld [vmem:[#allocation2 + $0x1a9] sm:$0xff]  ;;  %v2744_v23 = vld [vmem:[#allocation2 + $0x211] sm:$0xff] }
 0x2da   : > { %v10500_v57 = vpack.c.bf16 %v2738_v21, %v2737_v58  ;;  %v2787_v31 = vld [vmem:[#allocation2 + $0x1e7] sm:$0xff]  ;;  %v2792_v63 = vld [vmem:[#allocation2 + $0x22f] sm:$0xff] }
 0x2db   : > { %7929 = vmatpush3.bf16.msra.mxu0 %v8956_v54  ;;  %v2790_v54 = vld [vmem:[#allocation2 + $0x20f] sm:$0xff]  ;;  %v2795_v8 = vld [vmem:[#allocation2 + $0x267] sm:$0xff] }
 0x2dc   : > { %7930 = vmatprep.subr.bf16.mxu0 %v8957_v28  ;;  %v2786_v14 = vld [vmem:[#allocation2 + $0x1cf] sm:$0xff]  ;;  %v2789_v28 = vld [vmem:[#allocation2 + $0x207] sm:$0xff] }
 0x2dd   : > { %3709 = vmatmul.mubr.bf16.gmra.mrb[160].mxu1 %v10449_v59  ;;  %v10495_v24 = vpack.c.bf16 %v2786_v14, %v2785_v29  ;;  %v2739_v50 = vld [vmem:[#allocation2 + $0x1c9] sm:$0xff]  ;;  %v2740_v20 = vld [vmem:[#allocation2 + $0x1d1] sm:$0xff]  ;;  %v10513_v62 = vpack.c.bf16 %v2790_v54, %v2789_v28 }
 0x2de   : > { %3862 = vmatmul.mubr.bf16.gmra.mrb[156].mxu0 %v10472_v40  ;;  %3716 = vmatprep.mubr.bf16.mxu1 %v2714_v46  ;;  %v2736_v46 = vld [vmem:[#allocation2 + $0x191] sm:$0xff]  ;;  %v10510_v35 = vpack.c.bf16 %v2740_v20, %v2739_v50  ;;  %v2741_v11 = vld [vmem:[#allocation2 + $0x1e9] sm:$0xff] }
 0x2df   : > { %3869 = vmatprep.mubr.bf16.mxu0 %v10475_v7  ;;  %7931 = vmatpush3.bf16.msra.mxu0 %v8959_v42  ;;  %v10492_v15 = vpack.c.bf16 %v2736_v46, %v2735_v60  ;;  %v2791_v42 = vld [vmem:[#allocation2 + $0x227] sm:$0xff]  ;;  %v2748_v14 = vld [vmem:[#allocation2 + $0x251] sm:$0xff] }
 0x2e0   : > { %7932 = vmatprep.subr.bf16.mxu0 %v8960_v25  ;;  %v10523_v9 = vpack.c.bf16 %v2792_v63, %v2791_v42  ;;  %v10530_v25 = vpack.c.bf16 %v2744_v23, %v2743_v1  ;;  %v2745_v16 = vld [vmem:[#allocation2 + $0x229] sm:$0xff]  ;;  %v2752_v61 = vld [vmem:[#allocation2 + $0x291] sm:$0xff] }
 0x2e1   : > { %v10540_v19 = vpack.c.bf16 %v2746_v26, %v2745_v16  ;;  %v2747_v46 = vld [vmem:[#allocation2 + $0x249] sm:$0xff]  ;;  %v2754_v18 = vld [vmem:[#allocation2 + $0x2b1] sm:$0xff] }
 0x2e2   : > { %v2798_v58 = vld [vmem:[#allocation2 + $0x28f] sm:$0xff]  ;;  %v2799_v54 = vld [vmem:[#allocation2 + $0x2a7] sm:$0xff] }
 0x2e3   : > { %7933 = vmatpush3.bf16.msra.mxu0 %v8961_v22  ;;  %v2793_v22 = vld [vmem:[#allocation2 + $0x247] sm:$0xff]  ;;  %v2800_v50 = vld [vmem:[#allocation2 + $0x2af] sm:$0xff] }
 0x2e4   : > { %v2749_v55 = vld [vmem:[#allocation2 + $0x269] sm:$0xff]  ;;  %v10567_v28 = vpack.c.bf16 %v2800_v50, %v2799_v54 }
 0x2e5   : > { %3717 = vmatmul.mubr.bf16.gmra.mrb[164].mxu1 %v10475_v7  ;;  %v2751_v2 = vld [vmem:[#allocation2 + $0x289] sm:$0xff] }
 0x2e6   : > { %3870 = vmatmul.mubr.bf16.gmra.mrb[160].mxu0 %v10482_v45  ;;  %3724 = vmatprep.mubr.bf16.mxu1 %v2715_v30  ;;  %v2788_v30 = vld [vmem:[#allocation2 + $0x1ef] sm:$0xff]  ;;  %v2803_v1 = vld [vmem:[#allocation2 + $0x2e7] sm:$0xff] }
 0x2e7   : > { %3877 = vmatprep.mubr.bf16.mxu0 %v10485_v47  ;;  %v10503_v32 = vpack.c.bf16 %v2788_v30, %v2787_v31  ;;  %v10554_v30 = vpack.c.bf16 %v2748_v14, %v2747_v46  ;;  %v2797_v31 = vld [vmem:[#allocation2 + $0x287] sm:$0xff]  ;;  %v2822_v37 = vld [vmem:[#allocation2 + $0x110] sm:$0xff]  ;;  %v8964_v46 = vld [vmem:[#allocation8 + $0x218] sm:$0xff]  }
 0x2e8   : > { %v10557_v10 = vpack.c.bf16 %v2798_v58, %v2797_v31  ;;  %v2753_v53 = vld [vmem:[#allocation2 + $0x2a9] sm:$0xff] }
 0x2e9   : > { %v10584_v42 = vpack.c.bf16 %v2754_v18, %v2753_v53  ;;  %v2755_v17 = vld [vmem:[#allocation2 + $0x2c9] sm:$0xff] }
 0x2ea   : > { %v8966_v58 = vld [vmem:[#allocation8 + $0x228] sm:$0xff]   ;;  %v2990_v53 = vld [vmem:[#allocation2 + $0x2b0] sm:$0xff] }
 0x2ed   : > { %3725 = vmatmul.mubr.bf16.gmra.mrb[168].mxu1 %v10485_v47 }
 0x2ee   : > { %3878 = vmatmul.mubr.bf16.gmra.mrb[164].mxu0 %v10492_v15  ;;  %3732 = vmatprep.mubr.bf16.mxu1 %v10440_v49 }
 0x2ef   : > { %3885 = vmatprep.mubr.bf16.mxu0 %v10495_v24 }
 0x2f5   : > { %3733 = vmatmul.mubr.bf16.gmra.mrb[172].mxu1 %v10495_v24 }
 0x2f6   : > { %3886 = vmatmul.mubr.bf16.gmra.mrb[168].mxu0 %v10500_v57  ;;  %3740 = vmatprep.mubr.bf16.mxu1 %v2717_v38  ;;  %v2742_v38 = vld [vmem:[#allocation2 + $0x1f1] sm:$0xff] }
 0x2f7   : > { %3893 = vmatprep.mubr.bf16.mxu0 %v10503_v32  ;;  %v10520_v3 = vpack.c.bf16 %v2742_v38, %v2741_v11  ;;  %v10574_v11 = vpack.c.bf16 %v2752_v61, %v2751_v2  ;;  %v2801_v38 = vld [vmem:[#allocation2 + $0x2c7] sm:$0xff] }
 0x2fd   : > { %3741 = vmatmul.mubr.bf16.gmra.mrb[176].mxu1 %v10503_v32 }
 0x2fe   : > { %3894 = vmatmul.mubr.bf16.gmra.mrb[172].mxu0 %v10510_v35  ;;  %3748 = vmatprep.mubr.bf16.mxu1 %v2718_v34  ;;  %v2794_v34 = vld [vmem:[#allocation2 + $0x24f] sm:$0xff] }
 0x2ff   : > { %3901 = vmatprep.mubr.bf16.mxu0 %v10513_v62  ;;  %v10533_v6 = vpack.c.bf16 %v2794_v34, %v2793_v22  ;;  %v2821_v34 = vld [vmem:[#allocation2 + $0x108] sm:$0xff]  ;;  %v2966_v22 = vld [vmem:[#allocation2 + $0x130] sm:$0xff] }
 0x300   : > { %v2853_v16 = vpack.c.bf16 %v2822_v37, %v2821_v34 }
 0x305   : > { %3749 = vmatmul.mubr.bf16.gmra.mrb[180].mxu1 %v10513_v62 }
 0x306   : > { %3902 = vmatmul.mubr.bf16.gmra.mrb[176].mxu0 %v10520_v3  ;;  %3756 = vmatprep.mubr.bf16.mxu1 %v2719_v0  ;;  %v2796_v0 = vld [vmem:[#allocation2 + $0x26f] sm:$0xff] }
 0x307   : > { %3909 = vmatprep.mubr.bf16.mxu0 %v10523_v9  ;;  %v10543_v39 = vpack.c.bf16 %v2796_v0, %v2795_v8  ;;  %v2965_v0 = vld [vmem:[#allocation2 + $0x128] sm:$0xff] }
 0x308   : > { %v8962_v8 = vld [vmem:[#allocation8 + $0x208] sm:$0xff]  }
 0x30d   : > { %3757 = vmatmul.mubr.bf16.gmra.mrb[184].mxu1 %v10523_v9  ;;  %v7598_v56 = vpop.f32.mrb[144].mxu1 }
 0x30e   : > { %3910 = vmatmul.mubr.bf16.gmra.mrb[180].mxu0 %v10530_v25  ;;  %3764 = vmatprep.mubr.bf16.mxu1 %v2720_v36  ;;  %v7599_v4 = vpop.f32.mrb[145].mxu1 }
 0x30f   : > { %3917 = vmatprep.mubr.bf16.mxu0 %v10533_v6  ;;  %v10550_v36 = vadd.f32 %v7599_v4, %v7598_v56  ;;  %v7601_v60 = vpop.f32.mrb[146].mxu1  ;;  %v2997_v56 = vpack.c.bf16 %v2966_v22, %v2965_v0  ;;  %v2968_v4 = vld [vmem:[#allocation2 + $0x150] sm:$0xff]  ;;  %v8969_v0 = vld [vmem:[#allocation9 + $0x40] sm:$0xff]  }
 0x310   : > { %v7602_v29 = vpop.f32.mrb[147].mxu1  ;;  %8054 = vmatprep.subr.bf16.mxu0 %v8969_v0 }
 0x311   : > { %v10552_v21 = vadd.f32 %v7602_v29, %v7601_v60  ;;  %v2967_v60 = vld [vmem:[#allocation2 + $0x148] sm:$0xff]  ;;  %v2970_v29 = vld [vmem:[#allocation2 + $0x170] sm:$0xff] }
 0x312   : > { %v2998_v14 = vpack.c.bf16 %v2968_v4, %v2967_v60 }
 0x315   : > { %3765 = vmatmul.mubr.bf16.gmra.mrb[188].mxu1 %v10533_v6 }
 0x316   : > { %3918 = vmatmul.mubr.bf16.gmra.mrb[184].mxu0 %v10540_v19  ;;  %3772 = vmatprep.mubr.bf16.mxu1 %v2721_v12  ;;  %v2750_v12 = vld [vmem:[#allocation2 + $0x271] sm:$0xff] }
 0x317   : > { %3925 = vmatprep.mubr.bf16.mxu0 %v10543_v39  ;;  %v10564_v20 = vpack.c.bf16 %v2750_v12, %v2749_v55  ;;  %v8968_v55 = vld [vmem:[#allocation8 + $0x238] sm:$0xff]  }
 0x31d   : > { %3773 = vmatmul.mubr.bf16.gmra.mrb[192].mxu1 %v10543_v39 }
 0x31e   : > { %3926 = vmatmul.mubr.bf16.gmra.mrb[188].mxu0 %v10554_v30  ;;  %3780 = vmatprep.mubr.bf16.mxu1 %v2722_v5  ;;  %v2802_v5 = vld [vmem:[#allocation2 + $0x2cf] sm:$0xff] }
 0x31f   : > { %3933 = vmatprep.mubr.bf16.mxu0 %v10557_v10  ;;  %v10577_v63 = vpack.c.bf16 %v2802_v5, %v2801_v38 }
 0x325   : > { %3781 = vmatmul.mubr.bf16.gmra.mrb[196].mxu1 %v10557_v10 }
 0x326   : > { %3934 = vmatmul.mubr.bf16.gmra.mrb[192].mxu0 %v10564_v20  ;;  %3788 = vmatprep.mubr.bf16.mxu1 %v2723_v13  ;;  %v2804_v13 = vld [vmem:[#allocation2 + $0x2ef] sm:$0xff] }
 0x327   : > { %3941 = vmatprep.mubr.bf16.mxu0 %v10567_v28  ;;  %v10587_v23 = vpack.c.bf16 %v2804_v13, %v2803_v1 }
 0x32d   : > { %3789 = vmatmul.mubr.bf16.gmra.mrb[200].mxu1 %v10567_v28 }
 0x32e   : > { %3942 = vmatmul.mubr.bf16.gmra.mrb[196].mxu0 %v10574_v11  ;;  %3796 = vmatprep.mubr.bf16.mxu1 %v2724_v44  ;;  %v2756_v44 = vld [vmem:[#allocation2 + $0x2d1] sm:$0xff] }
 0x32f   : > { %3949 = vmatprep.mubr.bf16.mxu0 %v10577_v63  ;;  %v10592_v26 = vpack.c.bf16 %v2756_v44, %v2755_v17  ;;  %v2989_v17 = vld [vmem:[#allocation2 + $0x2a8] sm:$0xff] }
 0x330   : > { %v3009_v22 = vpack.c.bf16 %v2990_v53, %v2989_v17  ;;  %v3013_v53 = vld [vmem:[#allocation2 + $0x129] sm:$0xff] }
 0x335   : > { %3797 = vmatmul.mubr.bf16.gmra.mrb[204].mxu1 %v10577_v63 }
 0x336   : > { %3950 = vmatmul.mubr.bf16.gmra.mrb[200].mxu0 %v10584_v42  ;;  %3998 = vmatprep.mubr.bf16.mxu1 %v10388_v33  ;;  %v8963_v33 = vld [vmem:[#allocation8 + $0x210] sm:$0xff]  }
 0x337   : > { %3957 = vmatprep.mubr.bf16.mxu0 %v10587_v23 }
 0x33d   : > { %3999 = vmatmul.mubr.bf16.vlgmr.msra.gmra.mrb[208].mxu1 %v2853_v16 }
 0x33e   : > { %3958 = vmatmul.mubr.bf16.gmra.mrb[204].mxu0 %v10592_v26  ;;  %4006 = vmatprep.mubr.bf16.mxu1 %v10445_v52  ;;  %v8965_v52 = vld [vmem:[#allocation8 + $0x220] sm:$0xff]  }
 0x33f   : > { %4159 = vmatprep.mubr.bf16.mxu0 %v2997_v56  ;;  %8584 = vmatpush3.bf16.msra.mxu1 %v10275_v41  ;;  %v2969_v41 = vld [vmem:[#allocation2 + $0x168] sm:$0xff] }
 0x340   : > { %8585 = vmatprep.subr.bf16.mxu1 %v8962_v8  ;;  %v2999_v31 = vpack.c.bf16 %v2970_v29, %v2969_v41 }
 0x343   : > { %8586 = vmatpush3.bf16.msra.mxu1 %v8962_v8 }
 0x344   : > { %8587 = vmatprep.subr.bf16.mxu1 %v8963_v33 }
 0x345   : > { %4007 = vmatmul.mubr.bf16.gmra.mrb[212].mxu1 %v2997_v56 }
 0x346   : > { %4160 = vmatmul.mubr.bf16.vlgmr.msra.gmra.mrb[208].mxu0 %v10328_v51  ;;  %4014 = vmatprep.mubr.bf16.mxu1 %v10472_v40  ;;  %v8967_v51 = vld [vmem:[#allocation8 + $0x230] sm:$0xff]   ;;  %v2971_v40 = vld [vmem:[#allocation2 + $0x188] sm:$0xff] }
 0x347   : > { %4167 = vmatprep.mubr.bf16.mxu0 %v2998_v14  ;;  %8588 = vmatpush3.bf16.msra.mxu1 %v8963_v33  ;;  %v3000_v12 = vpack.c.bf16 %v10364_v48, %v2971_v40  ;;  %v2977_v48 = vld [vmem:[#allocation2 + $0x1e8] sm:$0xff] }
 0x348   : > { %8589 = vmatprep.subr.bf16.mxu1 %v8964_v46 }
 0x34b   : > { %8590 = vmatpush3.bf16.msra.mxu1 %v8964_v46 }
 0x34c   : > { %8591 = vmatprep.subr.bf16.mxu1 %v8965_v52 }
 0x34d   : > { %4015 = vmatmul.mubr.bf16.gmra.mrb[216].mxu1 %v2998_v14  ;;  %v2992_v14 = vld [vmem:[#allocation2 + $0x2d0] sm:$0xff] }
 0x34e   : > { %4168 = vmatmul.mubr.bf16.gmra.mrb[212].mxu0 %v10393_v27  ;;  %4022 = vmatprep.mubr.bf16.mxu1 %v10482_v45  ;;  %v2974_v27 = vld [vmem:[#allocation2 + $0x1b0] sm:$0xff]  ;;  %v2973_v45 = vld [vmem:[#allocation2 + $0x1a8] sm:$0xff] }
 0x34f   : > { %4175 = vmatprep.mubr.bf16.mxu0 %v2999_v31  ;;  %8592 = vmatpush3.bf16.msra.mxu1 %v8965_v52  ;;  %v3001_v50 = vpack.c.bf16 %v2974_v27, %v2973_v45 }
 0x350   : > { %8593 = vmatprep.subr.bf16.mxu1 %v8966_v58 }
 0x353   : > { %8594 = vmatpush3.bf16.msra.mxu1 %v8966_v58 }
 0x354   : > { %8595 = vmatprep.subr.bf16.mxu1 %v8967_v51 }
 0x355   : > { %4023 = vmatmul.mubr.bf16.gmra.mrb[220].mxu1 %v2999_v31  ;;  %v2991_v31 = vld [vmem:[#allocation2 + $0x2c8] sm:$0xff] }
 0x356   : > { %4176 = vmatmul.mubr.bf16.gmra.mrb[216].mxu0 %v10449_v59  ;;  %4030 = vmatprep.mubr.bf16.mxu1 %v10492_v15  ;;  %v3003_v59 = vpack.c.bf16 %v10418_v43, %v2977_v48  ;;  %v2979_v15 = vld [vmem:[#allocation2 + $0x208] sm:$0xff]  ;;  %v2984_v43 = vld [vmem:[#allocation2 + $0x250] sm:$0xff] }
 0x357   : > { %4183 = vmatprep.mubr.bf16.mxu0 %v3000_v12  ;;  %8596 = vmatpush3.bf16.msra.mxu1 %v8967_v51 }
 0x358   : > { %8597 = vmatprep.subr.bf16.mxu1 %v8968_v55 }
 0x35b   : > { %8598 = vmatpush3.bf16.msra.mxu1 %v8968_v55  ;;  %v3010_v55 = vpack.c.bf16 %v2992_v14, %v2991_v31 }
 0x35d   : > { %4031 = vmatmul.mubr.bf16.gmra.mrb[224].mxu1 %v3000_v12 }
 0x35e   : > { %4184 = vmatmul.mubr.bf16.gmra.mrb[220].mxu0 %v10475_v7  ;;  %4038 = vmatprep.mubr.bf16.mxu1 %v10500_v57  ;;  %v2980_v7 = vld [vmem:[#allocation2 + $0x210] sm:$0xff] }
 0x35f   : > { %4191 = vmatprep.mubr.bf16.mxu0 %v3001_v50  ;;  %v3004_v57 = vpack.c.bf16 %v2980_v7, %v2979_v15  ;;  %v2900_v7 = vld [vmem:[#allocation2 + $0x2f1] sm:$0xff] }
 0x365   : > { %4039 = vmatmul.mubr.bf16.gmra.mrb[228].mxu1 %v3001_v50 }
 0x366   : > { %4192 = vmatmul.mubr.bf16.gmra.mrb[224].mxu0 %v10485_v47  ;;  %4046 = vmatprep.mubr.bf16.mxu1 %v10510_v35  ;;  %v2982_v47 = vld [vmem:[#allocation2 + $0x230] sm:$0xff]  ;;  %v2981_v35 = vld [vmem:[#allocation2 + $0x228] sm:$0xff] }
 0x367   : > { %4199 = vmatprep.mubr.bf16.mxu0 %v10440_v49 }
 0x36d   : > { %4047 = vmatmul.mubr.bf16.gmra.mrb[232].mxu1 %v10440_v49  ;;  %v3005_v49 = vpack.c.bf16 %v2982_v47, %v2981_v35  ;;  %v2994_v35 = vld [vmem:[#allocation2 + $0x2f0] sm:$0xff] }
 0x36e   : > { %4200 = vmatmul.mubr.bf16.gmra.mrb[228].mxu0 %v10495_v24  ;;  %4054 = vmatprep.mubr.bf16.mxu1 %v10520_v3  ;;  %v2983_v24 = vld [vmem:[#allocation2 + $0x248] sm:$0xff] }
 0x36f   : > { %4207 = vmatprep.mubr.bf16.mxu0 %v3003_v59  ;;  %v3006_v3 = vpack.c.bf16 %v2984_v43, %v2983_v24 }
 0x375   : > { %4055 = vmatmul.mubr.bf16.gmra.mrb[236].mxu1 %v3003_v59  ;;  %v2899_v59 = vld [vmem:[#allocation2 + $0x2e9] sm:$0xff] }
 0x376   : > { %4208 = vmatmul.mubr.bf16.gmra.mrb[232].mxu0 %v10503_v32  ;;  %4062 = vmatprep.mubr.bf16.mxu1 %v10530_v25  ;;  %v2986_v32 = vld [vmem:[#allocation2 + $0x270] sm:$0xff]  ;;  %v2985_v25 = vld [vmem:[#allocation2 + $0x268] sm:$0xff] }
 0x377   : > { %4215 = vmatprep.mubr.bf16.mxu0 %v3004_v57  ;;  %v3007_v54 = vpack.c.bf16 %v2986_v32, %v2985_v25  ;;  %v2993_v25 = vld [vmem:[#allocation2 + $0x2e8] sm:$0xff] }
 0x37d   : > { %4063 = vmatmul.mubr.bf16.gmra.mrb[240].mxu1 %v3004_v57 }
 0x37e   : > { %4216 = vmatmul.mubr.bf16.gmra.mrb[236].mxu0 %v10513_v62  ;;  %4070 = vmatprep.mubr.bf16.mxu1 %v10540_v19  ;;  %v2988_v62 = vld [vmem:[#allocation2 + $0x290] sm:$0xff]  ;;  %v2987_v19 = vld [vmem:[#allocation2 + $0x288] sm:$0xff] }
 0x37f   : > { %4223 = vmatprep.mubr.bf16.mxu0 %v3005_v49  ;;  %v3008_v2 = vpack.c.bf16 %v2988_v62, %v2987_v19  ;;  %v3011_v19 = vpack.c.bf16 %v2994_v35, %v2993_v25  ;;  %v3020_v25 = vld [vmem:[#allocation2 + $0x191] sm:$0xff] }
 0x385   : > { %4071 = vmatmul.mubr.bf16.gmra.mrb[244].mxu1 %v3005_v49 }
 0x386   : > { %4224 = vmatmul.mubr.bf16.gmra.mrb[240].mxu0 %v10523_v9  ;;  %4078 = vmatprep.mubr.bf16.mxu1 %v10554_v30  ;;  %v10626_v9 = vld [vmem:[%s11672_s5] ss:$0 sm:$0xff] }
 0x387   : > { %4231 = vmatprep.mubr.bf16.mxu0 %v3006_v3  ;;  %v3679_v18 = vadd.f32 %v10550_v36, %v10626_v9  ;;  %v3682_v44 = vadd.f32 %v10552_v21, %v10626_v9  ;;  %v8970_v36 = vld [vmem:[#allocation9] sm:$0xff]  }
 0x388   : > { %8055 = vmatpush3.bf16.msra.mxu0 %v8970_v36 }
 0x38d   : > { %4079 = vmatmul.mubr.bf16.gmra.mrb[248].mxu1 %v3006_v3 }
 0x38e   : > { %4232 = vmatmul.mubr.bf16.gmra.mrb[244].mxu0 %v10533_v6  ;;  %4086 = vmatprep.mubr.bf16.mxu1 %v10564_v20 }
 0x38f   : > { %4239 = vmatprep.mubr.bf16.mxu0 %v3007_v54 }
 0x395   : > { %4087 = vmatmul.mubr.bf16.gmra.mrb[252].mxu1 %v3007_v54 }
 0x396   : > { %4240 = vmatmul.mubr.bf16.gmra.mrb[248].mxu0 %v10543_v39  ;;  %4094 = vmatprep.mubr.bf16.mxu1 %v10574_v11 }
 0x397   : > { %4247 = vmatprep.mubr.bf16.mxu0 %v3008_v2 }
 0x398   : > { %v7604_v30 = vpop.f32.mrb[148].mxu1 }
 0x399   : > { %v7710_v61 = vpop.f32.mrb[144].mxu0  ;;  %v7605_v6 = vpop.f32.mrb[149].mxu1 }
 0x39a   : > { %v7606_v5 = vadd.f32 %v7605_v6, %v7604_v30  ;;  %v7711_v20 = vpop.f32.mrb[145].mxu0  ;;  %v7607_v38 = vpop.f32.mrb[150].mxu1  ;;  %v8971_v30 = vld [vmem:[#allocation9 + $0x48] sm:$0xff]  }
 0x39b   : > { %v7712_v13 = vadd.f32 %v7711_v20, %v7710_v61  ;;  %v7713_v39 = vpop.f32.mrb[146].mxu0  ;;  %v7608_v1 = vpop.f32.mrb[151].mxu1  ;;  %v8972_v61 = vld [vmem:[#allocation9 + $0x8] sm:$0xff]   ;;  %8056 = vmatprep.subr.bf16.mxu0 %v8971_v30  ;;  %v3022_v30 = vld [vmem:[#allocation2 + $0x1b1] sm:$0xff] }
 0x39c   : > { %v7609_v11 = vadd.f32 %v7608_v1, %v7607_v38  ;;  %v7714_v37 = vpop.f32.mrb[147].mxu0  ;;  %v3687_v52 = vadd.f32 %v7606_v5, %v10626_v9  ;;  %8057 = vmatpush3.bf16.msra.mxu0 %v8972_v61 }
 0x39d   : > { %v7715_v34 = vadd.f32 %v7714_v37, %v7713_v39  ;;  %4095 = vmatmul.mubr.bf16.gmra.mrb[0].mxu1 %v3008_v2  ;;  %v10632_v16 = vadd.f32 %v7712_v13, %v3679_v18  ;;  %v3014_v18 = vld [vmem:[#allocation2 + $0x131] sm:$0xff] }
 0x39e   : > { %4248 = vmatmul.mubr.bf16.gmra.mrb[252].mxu0 %v10557_v10  ;;  %4102 = vmatprep.mubr.bf16.mxu1 %v10584_v42  ;;  %v3690_v51 = vadd.f32 %v7609_v11, %v10626_v9  ;;  %v3045_v36 = vpack.c.bf16 %v3014_v18, %v3013_v53 }
 0x39f   : > { %4255 = vmatprep.mubr.bf16.mxu0 %v3009_v22  ;;  %v10636_v8 = vadd.f32 %v7715_v34, %v3682_v44  ;;  %v9050_v44 = vld [vmem:[#allocation2] sm:$0xff] }
 0x3a0   : > { %v7610_v56 = vpop.f32.mrb[152].mxu1  ;;  %v10657_v34 = vpack.c.bf16 %v9050_v44, %v9050_v44 }
 0x3a1   : > { %v7716_v33 = vpop.f32.mrb[148].mxu0  ;;  %v7611_v4 = vpop.f32.mrb[153].mxu1 }
 0x3a2   : > { %v7612_v21 = vadd.f32 %v7611_v4, %v7610_v56  ;;  %v7717_v60 = vpop.f32.mrb[149].mxu0  ;;  %v7613_v46 = vpop.f32.mrb[154].mxu1 }
 0x3a3   : > { %v7718_v29 = vadd.f32 %v7717_v60, %v7716_v33  ;;  %v7719_v10 = vpop.f32.mrb[150].mxu0  ;;  %v7614_v41 = vpop.f32.mrb[155].mxu1  ;;  %v2948_v60 = vld [vmem:[#allocation2 + $0x30f] sm:$0xff] }
 0x3a4   : > { %v7615_v42 = vadd.f32 %v7614_v41, %v7613_v46  ;;  %v7720_v58 = vpop.f32.mrb[151].mxu0  ;;  %v3695_v49 = vadd.f32 %v7612_v21, %v10626_v9  ;;  %v2947_v21 = vld [vmem:[#allocation2 + $0x307] sm:$0xff] }
 0x3a5   : > { %v7721_v40 = vadd.f32 %v7720_v58, %v7719_v10  ;;  %4103 = vmatmul.mubr.bf16.gmra.mrb[4].mxu1 %v3009_v22  ;;  %v10640_v12 = vadd.f32 %v7718_v29, %v3687_v52  ;;  %v3015_v52 = vld [vmem:[#allocation2 + $0x149] sm:$0xff]  ;;  %v3016_v29 = vld [vmem:[#allocation2 + $0x151] sm:$0xff] }
 0x3a6   : > { %4256 = vmatmul.mubr.bf16.gmra.mrb[0].mxu0 %v10567_v28  ;;  %4110 = vmatprep.mubr.bf16.mxu1 %v10592_v26  ;;  %v10647_v26 = vpack.c.bf16 %v2900_v7, %v2899_v59  ;;  %v3698_v54 = vadd.f32 %v7615_v42, %v10626_v9  ;;  %v3017_v42 = vld [vmem:[#allocation2 + $0x169] sm:$0xff]  ;;  %v3018_v58 = vld [vmem:[#allocation2 + $0x171] sm:$0xff]  ;;  %v3046_v59 = vpack.c.bf16 %v3016_v29, %v3015_v52 }
 0x3a7   : > { %4263 = vmatprep.mubr.bf16.mxu0 %v3010_v55  ;;  %v10644_v27 = vadd.f32 %v7721_v40, %v3690_v51 }
 0x3a8   : > { %v7616_v45 = vpop.f32.mrb[156].mxu1 }
 0x3a9   : > { %v7722_v50 = vpop.f32.mrb[152].mxu0  ;;  %v7617_v48 = vpop.f32.mrb[157].mxu1 }
 0x3aa   : > { %v7618_v15 = vadd.f32 %v7617_v48, %v7616_v45  ;;  %v7723_v57 = vpop.f32.mrb[153].mxu0  ;;  %v7619_v47 = vpop.f32.mrb[158].mxu1 }
 0x3ab   : > { %v7724_v43 = vadd.f32 %v7723_v57, %v7722_v50  ;;  %v7725_v24 = vpop.f32.mrb[154].mxu0  ;;  %v7620_v3 = vpop.f32.mrb[159].mxu1  ;;  %v3047_v57 = vpack.c.bf16 %v3018_v58, %v3017_v42 }
 0x3ac   : > { %v7621_v28 = vadd.f32 %v7620_v3, %v7619_v47  ;;  %v7726_v32 = vpop.f32.mrb[155].mxu0  ;;  %v3703_v11 = vadd.f32 %v7618_v15, %v10626_v9 }
 0x3ad   : > { %v7727_v62 = vadd.f32 %v7726_v32, %v7725_v24  ;;  %4111 = vmatmul.mubr.bf16.gmra.mrb[8].mxu1 %v3010_v55  ;;  %v10650_v2 = vadd.f32 %v7724_v43, %v3695_v49  ;;  %v2964_v55 = vpack.c.bf16 %v2948_v60, %v2947_v21  ;;  %v8973_v43 = vld [vmem:[#allocation9 + $0x50] sm:$0xff]  }
 0x3ae   : > { %4264 = vmatmul.mubr.bf16.gmra.mrb[4].mxu0 %v10577_v63  ;;  %4118 = vmatprep.mubr.bf16.mxu1 %v10647_v26  ;;  %v3706_v56 = vadd.f32 %v7621_v28, %v10626_v9  ;;  %v8974_v24 = vld [vmem:[#allocation9 + $0x10] sm:$0xff]  }
 0x3af   : > { %4271 = vmatprep.mubr.bf16.mxu0 %v3011_v19  ;;  %v10654_v6 = vadd.f32 %v7727_v62, %v3698_v54  ;;  %v3019_v32 = vld [vmem:[#allocation2 + $0x189] sm:$0xff]  ;;  %8058 = vmatprep.subr.bf16.mxu0 %v8973_v43 }
 0x3b0   : > { %v7622_v5 = vpop.f32.mrb[160].mxu1  ;;  %8059 = vmatpush3.bf16.msra.mxu0 %v8974_v24  ;;  %v3025_v60 = vld [vmem:[#allocation2 + $0x1e9] sm:$0xff] }
 0x3b1   : > { %v7728_v20 = vpop.f32.mrb[156].mxu0  ;;  %v7623_v38 = vpop.f32.mrb[161].mxu1 }
 0x3b2   : > { %v7624_v13 = vadd.f32 %v7623_v38, %v7622_v5  ;;  %v7729_v39 = vpop.f32.mrb[157].mxu0  ;;  %v7625_v1 = vpop.f32.mrb[162].mxu1 }
 0x3b3   : > { %v7730_v63 = vadd.f32 %v7729_v39, %v7728_v20  ;;  %v7731_v37 = vpop.f32.mrb[158].mxu0  ;;  %v7626_v17 = vpop.f32.mrb[163].mxu1  ;;  %v3048_v39 = vpack.c.bf16 %v3020_v25, %v3019_v32  ;;  %v3030_v32 = vld [vmem:[#allocation2 + $0x231] sm:$0xff] }
 0x3b4   : > { %v7627_v22 = vadd.f32 %v7626_v17, %v7625_v1  ;;  %v7732_v0 = vpop.f32.mrb[159].mxu0 }
 0x3b5   : > { %v7733_v33 = vadd.f32 %v7732_v0, %v7731_v37  ;;  %4119 = vmatmul.mubr.bf16.gmra.mrb[12].mxu1 %v3011_v19  ;;  %v10660_v4 = vadd.f32 %v7730_v63, %v3703_v11  ;;  %v3021_v19 = vld [vmem:[#allocation2 + $0x1a9] sm:$0xff] }
 0x3b6   : > { %4272 = vmatmul.mubr.bf16.gmra.mrb[8].mxu0 %v10587_v23  ;;  %8599 = vmatprep.mubr.bf16.mxu1 %v3045_v36  ;;  %v3711_v23 = vadd.f32 %v7624_v13, %v10626_v9  ;;  %v3714_v47 = vadd.f32 %v7627_v22, %v10626_v9  ;;  %v3049_v63 = vpack.c.bf16 %v3022_v30, %v3021_v19  ;;  %v3023_v36 = vld [vmem:[#allocation2 + $0x1c9] sm:$0xff] }
 0x3b7   : > { %4279 = vmatprep.mubr.bf16.mxu0 %v10657_v34  ;;  %v10664_v46 = vadd.f32 %v7733_v33, %v3706_v56  ;;  %v3024_v56 = vld [vmem:[#allocation2 + $0x1d1] sm:$0xff] }
 0x3b8   : > { %v7628_v14 = vpop.f32.mrb[164].mxu1 }
 0x3b9   : > { %v7734_v10 = vpop.f32.mrb[160].mxu0  ;;  %v7629_v41 = vpop.f32.mrb[165].mxu1 }
 0x3ba   : > { %v7630_v31 = vadd.f32 %v7629_v41, %v7628_v14  ;;  %v7735_v51 = vpop.f32.mrb[161].mxu0  ;;  %v7631_v40 = vpop.f32.mrb[166].mxu1  ;;  %v3026_v14 = vld [vmem:[#allocation2 + $0x1f1] sm:$0xff] }
 0x3bb   : > { %v7736_v45 = vadd.f32 %v7735_v51, %v7734_v10  ;;  %v7737_v50 = vpop.f32.mrb[162].mxu0  ;;  %v7632_v48 = vpop.f32.mrb[167].mxu1  ;;  %v3050_v51 = vpack.c.bf16 %v3024_v56, %v3023_v36  ;;  %v3033_v56 = vld [vmem:[#allocation2 + $0x269] sm:$0xff] }
 0x3bc   : > { %v7633_v7 = vadd.f32 %v7632_v48, %v7631_v40  ;;  %v7738_v15 = vpop.f32.mrb[163].mxu0  ;;  %v3719_v38 = vadd.f32 %v7630_v31, %v10626_v9 }
 0x3bd   : > { %v7739_v35 = vadd.f32 %v7738_v15, %v7737_v50  ;;  %8600 = vmatmul.mubr.bf16.vlgmr.msra.gmra.mrb[16].mxu1 %v3046_v59  ;;  %v10668_v49 = vadd.f32 %v7736_v45, %v3711_v23  ;;  %v3051_v23 = vpack.c.bf16 %v3026_v14, %v3025_v60  ;;  %v8975_v59 = vld [vmem:[#allocation9 + $0x58] sm:$0xff]  }
 0x3be   : > { %4280 = vmatmul.mubr.bf16.gmra.mrb[12].mxu0 %v2964_v55  ;;  %8603 = vmatprep.mubr.bf16.mxu1 %v3047_v57  ;;  %v3722_v37 = vadd.f32 %v7633_v7, %v10626_v9  ;;  %v8976_v7 = vld [vmem:[#allocation9 + $0x18] sm:$0xff]  }
 0x3bf   : > { %v10670_v3 = vadd.f32 %v7739_v35, %v3714_v47  ;;  %v3027_v47 = vld [vmem:[#allocation2 + $0x209] sm:$0xff]  ;;  %v3028_v35 = vld [vmem:[#allocation2 + $0x211] sm:$0xff]  ;;  %8060 = vmatprep.subr.bf16.mxu0 %v8975_v59  ;;  %5592 = vmatprep.mubr.bf16.mxu0 %v10657_v34 }
 0x3c0   : > { %v7634_v28 = vpop.f32.mrb[168].mxu1  ;;  %8061 = vmatpush3.bf16.msra.mxu0 %v8976_v7 }
 0x3c1   : > { %v7740_v54 = vpop.f32.mrb[164].mxu0  ;;  %v7635_v62 = vpop.f32.mrb[169].mxu1 }
 0x3c2   : > { %v7636_v61 = vadd.f32 %v7635_v62, %v7634_v28  ;;  %v7741_v5 = vpop.f32.mrb[165].mxu0  ;;  %v7637_v20 = vpop.f32.mrb[170].mxu1  ;;  %v3029_v28 = vld [vmem:[#allocation2 + $0x229] sm:$0xff] }
 0x3c3   : > { %v7742_v53 = vadd.f32 %v7741_v5, %v7740_v54  ;;  %v7743_v18 = vpop.f32.mrb[166].mxu0  ;;  %v7638_v13 = vpop.f32.mrb[171].mxu1 }
 0x3c4   : > { %v7639_v1 = vadd.f32 %v7638_v13, %v7637_v20  ;;  %v7744_v11 = vpop.f32.mrb[167].mxu0  ;;  %v3727_v41 = vadd.f32 %v7636_v61, %v10626_v9  ;;  %v3052_v20 = vpack.c.bf16 %v3028_v35, %v3027_v47  ;;  %v3036_v47 = vld [vmem:[#allocation2 + $0x291] sm:$0xff] }
 0x3c5   : > { %v7745_v17 = vadd.f32 %v7744_v11, %v7743_v18  ;;  %8604 = vmatmul.mubr.bf16.gmra.mrb[20].mxu1 %v3048_v39  ;;  %v10674_v44 = vadd.f32 %v7742_v53, %v3719_v38  ;;  %v3053_v18 = vpack.c.bf16 %v3030_v32, %v3029_v28  ;;  %v3038_v28 = vld [vmem:[#allocation2 + $0x2b1] sm:$0xff] }
 0x3c6   : > { %8607 = vmatprep.mubr.bf16.mxu1 %v3049_v63  ;;  %v3730_v45 = vadd.f32 %v7639_v1, %v10626_v9 }
 0x3c7   : > { %v10676_v22 = vadd.f32 %v7745_v17, %v3722_v37  ;;  %v3031_v37 = vld [vmem:[#allocation2 + $0x249] sm:$0xff]  ;;  %v3032_v17 = vld [vmem:[#allocation2 + $0x251] sm:$0xff] }
 0x3c8   : > { %v7640_v0 = vpop.f32.mrb[172].mxu1 }
 0x3c9   : > { %v7746_v33 = vpop.f32.mrb[168].mxu0  ;;  %v7641_v21 = vpop.f32.mrb[173].mxu1 }
 0x3ca   : > { %v7642_v52 = vadd.f32 %v7641_v21, %v7640_v0  ;;  %v7747_v29 = vpop.f32.mrb[169].mxu0  ;;  %v7643_v10 = vpop.f32.mrb[174].mxu1 }
 0x3cb   : > { %v7748_v42 = vadd.f32 %v7747_v29, %v7746_v33  ;;  %v7749_v58 = vpop.f32.mrb[170].mxu0  ;;  %v7644_v31 = vpop.f32.mrb[175].mxu1  ;;  %v3034_v33 = vld [vmem:[#allocation2 + $0x271] sm:$0xff] }
 0x3cc   : > { %v7645_v40 = vadd.f32 %v7644_v31, %v7643_v10  ;;  %v7750_v55 = vpop.f32.mrb[171].mxu0  ;;  %v3735_v19 = vadd.f32 %v7642_v52, %v10626_v9 }
 0x3cd   : > { %v7751_v50 = vadd.f32 %v7750_v55, %v7749_v58  ;;  %8608 = vmatmul.mubr.bf16.gmra.mrb[24].mxu1 %v3050_v51  ;;  %v10680_v48 = vadd.f32 %v7748_v42, %v3727_v41  ;;  %v3054_v42 = vpack.c.bf16 %v3032_v17, %v3031_v37  ;;  %v3055_v51 = vpack.c.bf16 %v3034_v33, %v3033_v56  ;;  %v3039_v17 = vld [vmem:[#allocation2 + $0x2c9] sm:$0xff] }
 0x3ce   : > { %8611 = vmatprep.mubr.bf16.mxu1 %v3051_v23  ;;  %v3738_v13 = vadd.f32 %v7645_v40, %v10626_v9 }
 0x3cf   : > { %v10682_v15 = vadd.f32 %v7751_v50, %v3730_v45  ;;  %v8977_v45 = vld [vmem:[#allocation9 + $0x60] sm:$0xff]  }
 0x3d0   : > { %v7646_v57 = vpop.f32.mrb[176].mxu1  ;;  %v8978_v50 = vld [vmem:[#allocation9 + $0x20] sm:$0xff]   ;;  %8062 = vmatprep.subr.bf16.mxu0 %v8977_v45  ;;  %v3044_v45 = vld [vmem:[#allocation2 + $0x311] sm:$0xff] }
 0x3d1   : > { %v7752_v43 = vpop.f32.mrb[172].mxu0  ;;  %v7647_v24 = vpop.f32.mrb[177].mxu1  ;;  %8063 = vmatpush3.bf16.msra.mxu0 %v8978_v50  ;;  %v8979_v50 = vld [vmem:[#allocation9 + $0x68] sm:$0xff]  }
 0x3d2   : > { %v7648_v25 = vadd.f32 %v7647_v24, %v7646_v57  ;;  %v7753_v54 = vpop.f32.mrb[173].mxu0  ;;  %v7649_v62 = vpop.f32.mrb[178].mxu1  ;;  %v3035_v57 = vld [vmem:[#allocation2 + $0x289] sm:$0xff]  ;;  %8064 = vmatprep.subr.bf16.mxu0 %v8979_v50 }
 0x3d3   : > { %v7754_v30 = vadd.f32 %v7753_v54, %v7752_v43  ;;  %v7755_v61 = vpop.f32.mrb[174].mxu0  ;;  %v7650_v5 = vpop.f32.mrb[179].mxu1  ;;  %v3037_v24 = vld [vmem:[#allocation2 + $0x2a9] sm:$0xff] }
 0x3d4   : > { %v7651_v38 = vadd.f32 %v7650_v5, %v7649_v62  ;;  %v7756_v53 = vpop.f32.mrb[175].mxu0  ;;  %v3743_v52 = vadd.f32 %v7648_v25, %v10626_v9  ;;  %v3056_v5 = vpack.c.bf16 %v3036_v47, %v3035_v57 }
 0x3d5   : > { %v7757_v39 = vadd.f32 %v7756_v53, %v7755_v61  ;;  %8612 = vmatmul.mubr.bf16.gmra.mrb[28].mxu1 %v3052_v20  ;;  %v10686_v1 = vadd.f32 %v7754_v30, %v3735_v19  ;;  %v3057_v53 = vpack.c.bf16 %v3038_v28, %v3037_v24 }
 0x3d6   : > { %8615 = vmatprep.mubr.bf16.mxu1 %v3053_v18  ;;  %v3746_v55 = vadd.f32 %v7651_v38, %v10626_v9 }
 0x3d7   : > { %v10688_v11 = vadd.f32 %v7757_v39, %v3738_v13 }
 0x3d8   : > { %v7652_v63 = vpop.f32.mrb[180].mxu1 }
 0x3d9   : > { %v7758_v0 = vpop.f32.mrb[176].mxu0  ;;  %v7653_v36 = vpop.f32.mrb[181].mxu1 }
 0x3da   : > { %v7654_v21 = vadd.f32 %v7653_v36, %v7652_v63  ;;  %v7759_v60 = vpop.f32.mrb[177].mxu0  ;;  %v7655_v14 = vpop.f32.mrb[182].mxu1 }
 0x3db   : > { %v7760_v29 = vadd.f32 %v7759_v60, %v7758_v0  ;;  %v7761_v10 = vpop.f32.mrb[178].mxu0  ;;  %v7656_v41 = vpop.f32.mrb[183].mxu1  ;;  %v3040_v0 = vld [vmem:[#allocation2 + $0x2d1] sm:$0xff] }
 0x3dc   : > { %v7657_v58 = vadd.f32 %v7656_v41, %v7655_v14  ;;  %v7762_v31 = vpop.f32.mrb[179].mxu0  ;;  %v3751_v62 = vadd.f32 %v7654_v21, %v10626_v9  ;;  %v3058_v41 = vpack.c.bf16 %v3040_v0, %v3039_v17 }
 0x3dd   : > { %v10691_v40 = vadd.f32 %v7760_v29, %v3743_v52  ;;  %v7763_v23 = vadd.f32 %v7762_v31, %v7761_v10  ;;  %8616 = vmatmul.mubr.bf16.gmra.mrb[32].mxu1 %v3054_v42 }
 0x3de   : > { %8619 = vmatprep.mubr.bf16.mxu1 %v3055_v51  ;;  %v3754_v18 = vadd.f32 %v7657_v58, %v10626_v9 }
 0x3df   : > { %v10694_v59 = vadd.f32 %v7763_v23, %v3746_v55  ;;  %v3043_v23 = vld [vmem:[#allocation2 + $0x309] sm:$0xff] }
 0x3e0   : > { %v7658_v7 = vpop.f32.mrb[184].mxu1  ;;  %v3060_v24 = vpack.c.bf16 %v3044_v45, %v3043_v23 }
 0x3e1   : > { %v7764_v35 = vpop.f32.mrb[180].mxu0  ;;  %v7659_v43 = vpop.f32.mrb[185].mxu1 }
 0x3e2   : > { %v7660_v32 = vadd.f32 %v7659_v43, %v7658_v7  ;;  %v7765_v25 = vpop.f32.mrb[181].mxu0  ;;  %v7661_v54 = vpop.f32.mrb[186].mxu1  ;;  %v8980_v7 = vld [vmem:[#allocation9 + $0x28] sm:$0xff]  }
 0x3e3   : > { %v7766_v19 = vadd.f32 %v7765_v25, %v7764_v35  ;;  %v7767_v30 = vpop.f32.mrb[182].mxu0  ;;  %v7662_v61 = vpop.f32.mrb[187].mxu1  ;;  %8065 = vmatpush3.bf16.msra.mxu0 %v8980_v7 }
 0x3e4   : > { %v7663_v20 = vadd.f32 %v7662_v61, %v7661_v54  ;;  %v7768_v38 = vpop.f32.mrb[183].mxu0  ;;  %v3759_v14 = vadd.f32 %v7660_v32, %v10626_v9 }
 0x3e5   : > { %v10698_v13 = vadd.f32 %v7766_v19, %v3751_v62  ;;  %v7769_v39 = vadd.f32 %v7768_v38, %v7767_v30  ;;  %8620 = vmatmul.mubr.bf16.gmra.mrb[36].mxu1 %v3056_v5 }
 0x3e6   : > { %8623 = vmatprep.mubr.bf16.mxu1 %v3057_v53  ;;  %v3762_v31 = vadd.f32 %v7663_v20, %v10626_v9 }
 0x3e7   : > { %v10700_v63 = vadd.f32 %v7769_v39, %v3754_v18 }
 0x3e8   : > { %v7664_v37 = vpop.f32.mrb[188].mxu1 }
 0x3e9   : > { %v7770_v36 = vpop.f32.mrb[184].mxu0  ;;  %v7665_v56 = vpop.f32.mrb[189].mxu1 }
 0x3ea   : > { %v7666_v33 = vadd.f32 %v7665_v56, %v7664_v37  ;;  %v7771_v21 = vpop.f32.mrb[185].mxu0  ;;  %v7667_v60 = vpop.f32.mrb[190].mxu1 }
 0x3eb   : > { %v7772_v52 = vadd.f32 %v7771_v21, %v7770_v36  ;;  %v7773_v29 = vpop.f32.mrb[186].mxu0  ;;  %v7668_v10 = vpop.f32.mrb[191].mxu1 }
 0x3ec   : > { %v7669_v42 = vadd.f32 %v7668_v10, %v7667_v60  ;;  %v7774_v58 = vpop.f32.mrb[187].mxu0  ;;  %v3767_v54 = vadd.f32 %v7666_v33, %v10626_v9 }
 0x3ed   : > { %v10704_v51 = vadd.f32 %v7772_v52, %v3759_v14  ;;  %v7775_v55 = vadd.f32 %v7774_v58, %v7773_v29  ;;  %8624 = vmatmul.mubr.bf16.gmra.mrb[40].mxu1 %v3058_v41  ;;  %v8982_v58 = vld [vmem:[#allocation9 + $0x30] sm:$0xff]  }
 0x3ee   : > { %8627 = vmatprep.mubr.bf16.mxu1 %v10647_v26  ;;  %v3770_v5 = vadd.f32 %v7669_v42, %v10626_v9  ;;  %v8981_v42 = vld [vmem:[#allocation9 + $0x70] sm:$0xff]  }
 0x3ef   : > { %v10707_v57 = vadd.f32 %v7775_v55, %v3762_v31  ;;  %8066 = vmatprep.subr.bf16.mxu0 %v8981_v42 }
 0x3f0   : > { %v7670_v47 = vpop.f32.mrb[192].mxu1  ;;  %8067 = vmatpush3.bf16.msra.mxu0 %v8982_v58  ;;  %v8987_v58 = vld [vmem:[#allocation9 + $0x78] sm:$0xff]  }
 0x3f1   : > { %v7776_v35 = vpop.f32.mrb[188].mxu0  ;;  %v7671_v43 = vpop.f32.mrb[193].mxu1  ;;  %8068 = vmatprep.subr.bf16.mxu0 %v8987_v58 }
 0x3f2   : > { %v7672_v28 = vadd.f32 %v7671_v43, %v7670_v47  ;;  %v7777_v32 = vpop.f32.mrb[189].mxu0  ;;  %v7673_v25 = vpop.f32.mrb[194].mxu1 }
 0x3f3   : > { %v7778_v62 = vadd.f32 %v7777_v32, %v7776_v35  ;;  %v7779_v19 = vpop.f32.mrb[190].mxu0  ;;  %v7674_v30 = vpop.f32.mrb[195].mxu1 }
 0x3f4   : > { %v7675_v26 = vadd.f32 %v7674_v30, %v7673_v25  ;;  %v7780_v61 = vpop.f32.mrb[191].mxu0  ;;  %v3775_v56 = vadd.f32 %v7672_v28, %v10626_v9  ;;  %v8983_v30 = vld [vmem:[#allocation9 + $0xc0] sm:$0xff]  }
 0x3f5   : > { %v10711_v20 = vadd.f32 %v7778_v62, %v3767_v54  ;;  %v7781_v38 = vadd.f32 %v7780_v61, %v7779_v19  ;;  %8628 = vmatmul.mubr.bf16.gmra.mrb[44].mxu1 %v3060_v24  ;;  %v8985_v61 = vld [vmem:[#allocation9 + $0xc8] sm:$0xff]   ;;  %8166 = vmatprep.subr.bf16.mxu1 %v8983_v30 }
 0x3f6   : > { %v3778_v29 = vadd.f32 %v7675_v26, %v10626_v9  ;;  %v8984_v26 = vld [vmem:[#allocation9 + $0x80] sm:$0xff]  }
 0x3f7   : > { %v10713_v53 = vadd.f32 %v7781_v38, %v3770_v5  ;;  %8167 = vmatpush3.bf16.msra.mxu1 %v8984_v26 }
 0x3f8   : > { %v7676_v18 = vpop.f32.mrb[196].mxu1  ;;  %8168 = vmatprep.subr.bf16.mxu1 %v8985_v61 }
 0x3f9   : > { %v7782_v39 = vpop.f32.mrb[192].mxu0  ;;  %v7677_v37 = vpop.f32.mrb[197].mxu1 }
 0x3fa   : > { %v7678_v17 = vadd.f32 %v7677_v37, %v7676_v18  ;;  %v7783_v0 = vpop.f32.mrb[193].mxu0  ;;  %v7679_v36 = vpop.f32.mrb[198].mxu1  ;;  %v8986_v37 = vld [vmem:[#allocation9 + $0x88] sm:$0xff]  }
 0x3fb   : > { %v7784_v33 = vadd.f32 %v7783_v0, %v7782_v39  ;;  %v7785_v21 = vpop.f32.mrb[194].mxu0  ;;  %v7680_v60 = vpop.f32.mrb[199].mxu1  ;;  %8169 = vmatpush3.bf16.msra.mxu1 %v8986_v37 }
 0x3fc   : > { %v7681_v14 = vadd.f32 %v7680_v60, %v7679_v36  ;;  %v7786_v52 = vpop.f32.mrb[195].mxu0  ;;  %v3783_v35 = vadd.f32 %v7678_v17, %v10626_v9 }
 0x3fd   : > { %v10717_v10 = vadd.f32 %v7784_v33, %v3775_v56  ;;  %v7787_v41 = vadd.f32 %v7786_v52, %v7785_v21 }
 0x3fe   : > { %v3786_v54 = vadd.f32 %v7681_v14, %v10626_v9 }
 0x3ff   : > { %v10719_v31 = vadd.f32 %v7787_v41, %v3778_v29 }
 0x400   : > { %v7682_v55 = vpop.f32.mrb[200].mxu1 }
 0x401   : > { %v7788_v23 = vpop.f32.mrb[196].mxu0  ;;  %v7683_v45 = vpop.f32.mrb[201].mxu1 }
 0x402   : > { %v7684_v50 = vadd.f32 %v7683_v45, %v7682_v55  ;;  %v7789_v7 = vpop.f32.mrb[197].mxu0  ;;  %v7685_v47 = vpop.f32.mrb[202].mxu1  ;;  %v8988_v55 = vld [vmem:[#allocation9 + $0xd0] sm:$0xff]  }
 0x403   : > { %v7790_v43 = vadd.f32 %v7789_v7, %v7788_v23  ;;  %v7791_v24 = vpop.f32.mrb[198].mxu0  ;;  %v7686_v28 = vpop.f32.mrb[203].mxu1  ;;  %v8989_v23 = vld [vmem:[#allocation9 + $0x38] sm:$0xff]   ;;  %v8990_v7 = vld [vmem:[#allocation9 + $0x90] sm:$0xff]   ;;  %8170 = vmatprep.subr.bf16.mxu1 %v8988_v55 }
 0x404   : > { %v7687_v32 = vadd.f32 %v7686_v28, %v7685_v47  ;;  %v7792_v25 = vpop.f32.mrb[199].mxu0  ;;  %v3791_v56 = vadd.f32 %v7684_v50, %v10626_v9  ;;  %v8991_v47 = vld [vmem:[#allocation9 + $0xd8] sm:$0xff]   ;;  %8069 = vmatpush3.bf16.msra.mxu0 %v8989_v23  ;;  %8171 = vmatpush3.bf16.msra.mxu1 %v8990_v7 }
 0x405   : > { %v10723_v62 = vadd.f32 %v7790_v43, %v3783_v35  ;;  %v7793_v19 = vadd.f32 %v7792_v25, %v7791_v24  ;;  %8172 = vmatprep.subr.bf16.mxu1 %v8991_v47 }
 0x406   : > { %v3794_v29 = vadd.f32 %v7687_v32, %v10626_v9 }
 0x407   : > { %v10725_v5 = vadd.f32 %v7793_v19, %v3786_v54 }
 0x408   : > { %v7688_v38 = vpop.f32.mrb[204].mxu1 }
 0x409   : > { %v7794_v18 = vpop.f32.mrb[200].mxu0  ;;  %v7689_v39 = vpop.f32.mrb[205].mxu1 }
 0x40a   : > { %v7690_v17 = vadd.f32 %v7689_v39, %v7688_v38  ;;  %v7795_v0 = vpop.f32.mrb[201].mxu0  ;;  %v7691_v36 = vpop.f32.mrb[206].mxu1 }
 0x40b   : > { %v7796_v33 = vadd.f32 %v7795_v0, %v7794_v18  ;;  %v7797_v21 = vpop.f32.mrb[202].mxu0  ;;  %v7692_v60 = vpop.f32.mrb[207].mxu1  ;;  %v8992_v0 = vld [vmem:[#allocation9 + $0x98] sm:$0xff]  }
 0x40c   : > { %v7693_v14 = vadd.f32 %v7692_v60, %v7691_v36  ;;  %v7798_v52 = vpop.f32.mrb[203].mxu0  ;;  %v3799_v25 = vadd.f32 %v7690_v17, %v10626_v9  ;;  %8173 = vmatpush3.bf16.msra.mxu1 %v8992_v0  ;;  %v8993_v17 = vld [vmem:[#allocation9 + $0xe0] sm:$0xff]   ;;  %v8995_v60 = vld [vmem:[#allocation9 + $0xe8] sm:$0xff]  }
 0x40d   : > { %v10729_v41 = vadd.f32 %v7796_v33, %v3791_v56  ;;  %v7799_v42 = vadd.f32 %v7798_v52, %v7797_v21  ;;  %v8994_v21 = vld [vmem:[#allocation9 + $0xa0] sm:$0xff]   ;;  %8174 = vmatprep.subr.bf16.mxu1 %v8993_v17 }
 0x40e   : > { %v3802_v18 = vadd.f32 %v7693_v14, %v10626_v9 }
 0x40f   : > { %v10731_v45 = vadd.f32 %v7799_v42, %v3794_v29 }
 0x410   : > { %v7822_v35 = vpop.f32.mrb[208].mxu1  ;;  %8175 = vmatpush3.bf16.msra.mxu1 %v8994_v21 }
 0x411   : > { %v7800_v50 = vpop.f32.mrb[204].mxu0  ;;  %v7823_v43 = vpop.f32.mrb[209].mxu1  ;;  %8176 = vmatprep.subr.bf16.mxu1 %v8995_v60 }
 0x412   : > { %v7801_v24 = vpop.f32.mrb[205].mxu0  ;;  %v7824_v28 = vadd.f32 %v7823_v43, %v7822_v35  ;;  %v7825_v32 = vpop.f32.mrb[210].mxu1 }
 0x413   : > { %v7802_v54 = vadd.f32 %v7801_v24, %v7800_v50  ;;  %v7803_v19 = vpop.f32.mrb[206].mxu0  ;;  %v7826_v30 = vpop.f32.mrb[211].mxu1  ;;  %v8996_v50 = vld [vmem:[#allocation9 + $0xa8] sm:$0xff]  }
 0x414   : > { %v4001_v26 = vadd.f32 %v7824_v28, %v10632_v16  ;;  %v7804_v61 = vpop.f32.mrb[207].mxu0  ;;  %v7827_v38 = vadd.f32 %v7826_v30, %v7825_v32  ;;  %v4545_v24 = vld [vmem:[#allocation2 + $0xe7] sm:$0xff]  ;;  %v4546_v28 = vld [vmem:[#allocation2 + $0xef] sm:$0xff]  ;;  %8177 = vmatpush3.bf16.msra.mxu1 %v8996_v50 }
 0x415   : > { %v10736_v39 = vadd.f32 %v7802_v54, %v3799_v25  ;;  %v7805_v37 = vadd.f32 %v7804_v61, %v7803_v19  ;;  %v4577_v25 = vpack.c.bf16 %v4546_v28, %v4545_v24  ;;  %v8997_v19 = vld [vmem:[#allocation9 + $0xf0] sm:$0xff]  }
 0x416   : > { %v4004_v36 = vadd.f32 %v7827_v38, %v10636_v8  ;;  %v8999_v30 = vld [vmem:[#allocation9 + $0xb0] sm:$0xff]   ;;  %8178 = vmatprep.subr.bf16.mxu1 %v8997_v19 }
 0x417   : > { %v10739_v56 = vadd.f32 %v7805_v37, %v3802_v18  ;;  %5593 = vmatmul.mubr.bf16.vlgmr.msra.gmra.mrb[16].mxu0 %v4577_v25  ;;  %v9001_v18 = vld [vmem:[#allocation9 + $0xf8] sm:$0xff]  }
 0x418   : > { %v7828_v33 = vpop.f32.mrb[212].mxu1  ;;  %8179 = vmatpush3.bf16.msra.mxu1 %v8999_v30  ;;  %v9003_v30 = vld [vmem:[#allocation9 + $0x148] sm:$0xff]  }
 0x419   : > { %v7934_v52 = vpop.f32.mrb[208].mxu0  ;;  %v7829_v29 = vpop.f32.mrb[213].mxu1  ;;  %8180 = vmatprep.subr.bf16.mxu1 %v9001_v18 }
 0x41a   : > { %v7830_v16 = vadd.f32 %v7829_v29, %v7828_v33  ;;  %v7935_v42 = vpop.f32.mrb[209].mxu0  ;;  %v7831_v58 = vpop.f32.mrb[214].mxu1 }
 0x41b   : > { %v7936_v9 = vadd.f32 %v7935_v42, %v7934_v52  ;;  %v7937_v14 = vpop.f32.mrb[210].mxu0  ;;  %v7832_v55 = vpop.f32.mrb[215].mxu1 }
 0x41c   : > { %v4009_v23 = vadd.f32 %v7830_v16, %v10640_v12  ;;  %v7833_v8 = vadd.f32 %v7832_v55, %v7831_v58  ;;  %v7938_v7 = vpop.f32.mrb[211].mxu0  ;;  %v8998_v12 = vld [vmem:[#allocation9 + $0x140] sm:$0xff]   ;;  %v9002_v16 = vld [vmem:[#allocation9 + $0xb8] sm:$0xff]  }
 0x41d   : > { %v7939_v47 = vadd.f32 %v7938_v7, %v7937_v14  ;;  %v10742_v35 = vadd.f32 %v7936_v9, %v4001_v26  ;;  %v9000_v26 = vld [vmem:[#allocation9 + $0x100] sm:$0xff]   ;;  %8278 = vmatprep.subr.bf16.mxu0 %v8998_v12  ;;  %8181 = vmatpush3.bf16.msra.mxu1 %v9002_v16 }
 0x41e   : > { %v4012_v43 = vadd.f32 %v7833_v8, %v10644_v27  ;;  %8279 = vmatpush3.bf16.msra.mxu0 %v9000_v26 }
 0x41f   : > { %v10745_v32 = vadd.f32 %v7939_v47, %v4004_v36  ;;  %8280 = vmatprep.subr.bf16.mxu0 %v9003_v30 }
 0x420   : > { %v7834_v54 = vpop.f32.mrb[216].mxu1 }
 0x421   : > { %v7940_v61 = vpop.f32.mrb[212].mxu0  ;;  %v7835_v38 = vpop.f32.mrb[217].mxu1 }
 0x422   : > { %v7836_v37 = vadd.f32 %v7835_v38, %v7834_v54  ;;  %v7941_v0 = vpop.f32.mrb[213].mxu0  ;;  %v7837_v27 = vpop.f32.mrb[218].mxu1 }
 0x423   : > { %v7942_v36 = vadd.f32 %v7941_v0, %v7940_v61  ;;  %v7943_v33 = vpop.f32.mrb[214].mxu0  ;;  %v7838_v17 = vpop.f32.mrb[219].mxu1  ;;  %v9004_v61 = vld [vmem:[#allocation9 + $0x108] sm:$0xff]  }
 0x424   : > { %v4017_v34 = vadd.f32 %v7836_v37, %v10650_v2  ;;  %v7839_v21 = vadd.f32 %v7838_v17, %v7837_v27  ;;  %v7944_v60 = vpop.f32.mrb[215].mxu0  ;;  %8281 = vmatpush3.bf16.msra.mxu0 %v9004_v61 }
 0x425   : > { %v7945_v52 = vadd.f32 %v7944_v60, %v7943_v33  ;;  %v10749_v29 = vadd.f32 %v7942_v36, %v4009_v23 }
 0x426   : > { %v4020_v42 = vadd.f32 %v7839_v21, %v10654_v6 }
 0x427   : > { %v10752_v58 = vadd.f32 %v7945_v52, %v4012_v43 }
 0x428   : > { %v7840_v9 = vpop.f32.mrb[220].mxu1 }
 0x429   : > { %v7946_v14 = vpop.f32.mrb[216].mxu0  ;;  %v7841_v55 = vpop.f32.mrb[221].mxu1 }
 0x42a   : > { %v7842_v8 = vadd.f32 %v7841_v55, %v7840_v9  ;;  %v7947_v7 = vpop.f32.mrb[217].mxu0  ;;  %v7843_v47 = vpop.f32.mrb[222].mxu1 }
 0x42b   : > { %v7948_v50 = vadd.f32 %v7947_v7, %v7946_v14  ;;  %v7949_v2 = vpop.f32.mrb[218].mxu0  ;;  %v7844_v24 = vpop.f32.mrb[223].mxu1 }
 0x42c   : > { %v4025_v28 = vadd.f32 %v7842_v8, %v10660_v4  ;;  %v7845_v25 = vadd.f32 %v7844_v24, %v7843_v47  ;;  %v7950_v23 = vpop.f32.mrb[219].mxu0 }
 0x42d   : > { %v7951_v54 = vadd.f32 %v7950_v23, %v7949_v2  ;;  %v10755_v19 = vadd.f32 %v7948_v50, %v4017_v34 }
 0x42e   : > { %v4028_v6 = vadd.f32 %v7845_v25, %v10664_v46 }
 0x42f   : > { %v10758_v43 = vadd.f32 %v7951_v54, %v4020_v42 }
 0x430   : > { %v7846_v12 = vpop.f32.mrb[224].mxu1 }
 0x431   : > { %v7952_v38 = vpop.f32.mrb[220].mxu0  ;;  %v7847_v26 = vpop.f32.mrb[225].mxu1 }
 0x432   : > { %v7848_v18 = vadd.f32 %v7847_v26, %v7846_v12  ;;  %v7953_v37 = vpop.f32.mrb[221].mxu0  ;;  %v7849_v0 = vpop.f32.mrb[226].mxu1  ;;  %v9006_v12 = vld [vmem:[#allocation9 + $0x110] sm:$0xff]  }
 0x433   : > { %v7954_v27 = vadd.f32 %v7953_v37, %v7952_v38  ;;  %v7955_v4 = vpop.f32.mrb[222].mxu0  ;;  %v7850_v36 = vpop.f32.mrb[227].mxu1 }
 0x434   : > { %v4033_v33 = vadd.f32 %v7848_v18, %v10668_v49  ;;  %v7851_v17 = vadd.f32 %v7850_v36, %v7849_v0  ;;  %v7956_v34 = vpop.f32.mrb[223].mxu0 }
 0x435   : > { %v7957_v46 = vadd.f32 %v7956_v34, %v7955_v4  ;;  %v10761_v21 = vadd.f32 %v7954_v27, %v4025_v28 }
 0x436   : > { %v4036_v60 = vadd.f32 %v7851_v17, %v10670_v3 }
 0x437   : > { %v10764_v52 = vadd.f32 %v7957_v46, %v4028_v6  ;;  %v9005_v6 = vld [vmem:[#allocation9 + $0x150] sm:$0xff]  }
 0x438   : > { %v7852_v16 = vpop.f32.mrb[228].mxu1  ;;  %8282 = vmatprep.subr.bf16.mxu0 %v9005_v6 }
 0x439   : > { %v7958_v42 = vpop.f32.mrb[224].mxu0  ;;  %v7853_v9 = vpop.f32.mrb[229].mxu1  ;;  %8283 = vmatpush3.bf16.msra.mxu0 %v9006_v12 }
 0x43a   : > { %v7854_v14 = vadd.f32 %v7853_v9, %v7852_v16  ;;  %v7959_v55 = vpop.f32.mrb[225].mxu0  ;;  %v7855_v8 = vpop.f32.mrb[230].mxu1 }
 0x43b   : > { %v7960_v7 = vadd.f32 %v7959_v55, %v7958_v42  ;;  %v7961_v47 = vpop.f32.mrb[226].mxu0  ;;  %v7856_v50 = vpop.f32.mrb[231].mxu1 }
 0x43c   : > { %v4041_v49 = vadd.f32 %v7854_v14, %v10674_v44  ;;  %v7857_v2 = vadd.f32 %v7856_v50, %v7855_v8  ;;  %v7962_v24 = vpop.f32.mrb[227].mxu0 }
 0x43d   : > { %v7963_v25 = vadd.f32 %v7962_v24, %v7961_v47  ;;  %v10767_v28 = vadd.f32 %v7960_v7, %v4033_v33 }
 0x43e   : > { %v4044_v3 = vadd.f32 %v7857_v2, %v10676_v22 }
 0x43f   : > { %v10770_v23 = vadd.f32 %v7963_v25, %v4036_v60 }
 0x440   : > { %v7858_v54 = vpop.f32.mrb[232].mxu1 }
 0x441   : > { %v7964_v30 = vpop.f32.mrb[228].mxu0  ;;  %v7859_v61 = vpop.f32.mrb[233].mxu1 }
 0x442   : > { %v7860_v38 = vadd.f32 %v7859_v61, %v7858_v54  ;;  %v7965_v26 = vpop.f32.mrb[229].mxu0  ;;  %v7861_v18 = vpop.f32.mrb[234].mxu1  ;;  %v9008_v54 = vld [vmem:[#allocation9 + $0x118] sm:$0xff]  }
 0x443   : > { %v7966_v37 = vadd.f32 %v7965_v26, %v7964_v30  ;;  %v7967_v44 = vpop.f32.mrb[230].mxu0  ;;  %v7862_v0 = vpop.f32.mrb[235].mxu1 }
 0x444   : > { %v4049_v27 = vadd.f32 %v7860_v38, %v10680_v48  ;;  %v7863_v4 = vadd.f32 %v7862_v0, %v7861_v18  ;;  %v7968_v36 = vpop.f32.mrb[231].mxu0 }
 0x445   : > { %v7969_v22 = vadd.f32 %v7968_v36, %v7967_v44  ;;  %v10773_v33 = vadd.f32 %v7966_v37, %v4041_v49 }
 0x446   : > { %v4052_v17 = vadd.f32 %v7863_v4, %v10682_v15 }
 0x447   : > { %v10776_v34 = vadd.f32 %v7969_v22, %v4044_v3  ;;  %v9007_v3 = vld [vmem:[#allocation9 + $0x158] sm:$0xff]  }
 0x448   : > { %v7864_v46 = vpop.f32.mrb[236].mxu1  ;;  %8284 = vmatprep.subr.bf16.mxu0 %v9007_v3 }
 0x449   : > { %v7970_v60 = vpop.f32.mrb[232].mxu0  ;;  %v7865_v16 = vpop.f32.mrb[237].mxu1  ;;  %8285 = vmatpush3.bf16.msra.mxu0 %v9008_v54 }
 0x44a   : > { %v7866_v42 = vadd.f32 %v7865_v16, %v7864_v46  ;;  %v7971_v9 = vpop.f32.mrb[233].mxu0  ;;  %v7867_v14 = vpop.f32.mrb[238].mxu1 }
 0x44b   : > { %v7972_v55 = vadd.f32 %v7971_v9, %v7970_v60  ;;  %v7973_v8 = vpop.f32.mrb[234].mxu0  ;;  %v7868_v7 = vpop.f32.mrb[239].mxu1 }
 0x44c   : > { %v4057_v48 = vadd.f32 %v7866_v42, %v10686_v1  ;;  %v7869_v47 = vadd.f32 %v7868_v7, %v7867_v14  ;;  %v7974_v50 = vpop.f32.mrb[235].mxu0 }
 0x44d   : > { %v7975_v2 = vadd.f32 %v7974_v50, %v7973_v8  ;;  %v10779_v49 = vadd.f32 %v7972_v55, %v4049_v27  ;;  %v9009_v8 = vld [vmem:[#allocation9 + $0x160] sm:$0xff]  }
 0x44e   : > { %v4060_v15 = vadd.f32 %v7869_v47, %v10688_v11  ;;  %v9011_v50 = vld [vmem:[#allocation9 + $0x120] sm:$0xff]   ;;  %8286 = vmatprep.subr.bf16.mxu0 %v9009_v8 }
 0x44f   : > { %v10782_v24 = vadd.f32 %v7975_v2, %v4052_v17  ;;  %8287 = vmatpush3.bf16.msra.mxu0 %v9011_v50 }
 0x450   : > { %v7870_v25 = vpop.f32.mrb[240].mxu1 }
 0x451   : > { %v7976_v6 = vpop.f32.mrb[236].mxu0  ;;  %v7871_v12 = vpop.f32.mrb[241].mxu1 }
 0x452   : > { %v7872_v30 = vadd.f32 %v7871_v12, %v7870_v25  ;;  %v7977_v61 = vpop.f32.mrb[237].mxu0  ;;  %v7873_v38 = vpop.f32.mrb[242].mxu1 }
 0x453   : > { %v7978_v26 = vadd.f32 %v7977_v61, %v7976_v6  ;;  %v7979_v1 = vpop.f32.mrb[238].mxu0  ;;  %v7874_v18 = vpop.f32.mrb[243].mxu1 }
 0x454   : > { %v4065_v37 = vadd.f32 %v7872_v30, %v10691_v40  ;;  %v7875_v44 = vadd.f32 %v7874_v18, %v7873_v38  ;;  %v7980_v0 = vpop.f32.mrb[239].mxu0  ;;  %v9010_v40 = vld [vmem:[#allocation9 + $0x1c0] sm:$0xff]  }
 0x455   : > { %v7981_v11 = vadd.f32 %v7980_v0, %v7979_v1  ;;  %v10785_v27 = vadd.f32 %v7978_v26, %v4057_v48  ;;  %8390 = vmatprep.subr.bf16.mxu1 %v9010_v40 }
 0x456   : > { %v4068_v4 = vadd.f32 %v7875_v44, %v10694_v59 }
 0x457   : > { %v10788_v36 = vadd.f32 %v7981_v11, %v4060_v15 }
 0x458   : > { %v7876_v22 = vpop.f32.mrb[244].mxu1 }
 0x459   : > { %v7982_v17 = vpop.f32.mrb[240].mxu0  ;;  %v7877_v46 = vpop.f32.mrb[245].mxu1 }
 0x45a   : > { %v7878_v60 = vadd.f32 %v7877_v46, %v7876_v22  ;;  %v7983_v16 = vpop.f32.mrb[241].mxu0  ;;  %v7879_v42 = vpop.f32.mrb[246].mxu1 }
 0x45b   : > { %v7984_v9 = vadd.f32 %v7983_v16, %v7982_v17  ;;  %v7985_v14 = vpop.f32.mrb[242].mxu0  ;;  %v7880_v55 = vpop.f32.mrb[247].mxu1 }
 0x45c   : > { %v4073_v7 = vadd.f32 %v7878_v60, %v10698_v13  ;;  %v7881_v47 = vadd.f32 %v7880_v55, %v7879_v42  ;;  %v7986_v48 = vpop.f32.mrb[243].mxu0  ;;  %v9013_v55 = vld [vmem:[#allocation9 + $0x168] sm:$0xff]  }
 0x45d   : > { %v7987_v2 = vadd.f32 %v7986_v48, %v7985_v14  ;;  %v10791_v59 = vadd.f32 %v7984_v9, %v4065_v37  ;;  %8288 = vmatprep.subr.bf16.mxu0 %v9013_v55 }
 0x45e   : > { %v4076_v15 = vadd.f32 %v7881_v47, %v10700_v63 }
 0x45f   : > { %v10794_v25 = vadd.f32 %v7987_v2, %v4068_v4 }
 0x460   : > { %v7882_v3 = vpop.f32.mrb[248].mxu1 }
 0x461   : > { %v7988_v54 = vpop.f32.mrb[244].mxu0  ;;  %v7883_v6 = vpop.f32.mrb[249].mxu1 }
 0x462   : > { %v7884_v12 = vadd.f32 %v7883_v6, %v7882_v3  ;;  %v7989_v30 = vpop.f32.mrb[245].mxu0  ;;  %v7885_v61 = vpop.f32.mrb[250].mxu1 }
 0x463   : > { %v7990_v13 = vadd.f32 %v7989_v30, %v7988_v54  ;;  %v7991_v38 = vpop.f32.mrb[246].mxu0  ;;  %v7886_v26 = vpop.f32.mrb[251].mxu1 }
 0x464   : > { %v4081_v1 = vadd.f32 %v7884_v12, %v10704_v51  ;;  %v7887_v18 = vadd.f32 %v7886_v26, %v7885_v61  ;;  %v7992_v37 = vpop.f32.mrb[247].mxu0 }
 0x465   : > { %v7993_v44 = vadd.f32 %v7992_v37, %v7991_v38  ;;  %v10797_v0 = vadd.f32 %v7990_v13, %v4073_v7  ;;  %v9015_v7 = vld [vmem:[#allocation9 + $0x128] sm:$0xff]  }
 0x466   : > { %v4084_v63 = vadd.f32 %v7887_v18, %v10707_v57  ;;  %8289 = vmatpush3.bf16.msra.mxu0 %v9015_v7 }
 0x467   : > { %v10800_v11 = vadd.f32 %v7993_v44, %v4076_v15 }
 0x468   : > { %v7888_v4 = vpop.f32.mrb[252].mxu1 }
 0x469   : > { %v7994_v22 = vpop.f32.mrb[248].mxu0  ;;  %v7889_v17 = vpop.f32.mrb[253].mxu1 }
 0x46a   : > { %v7890_v46 = vadd.f32 %v7889_v17, %v7888_v4  ;;  %v7995_v60 = vpop.f32.mrb[249].mxu0  ;;  %v7891_v16 = vpop.f32.mrb[254].mxu1 }
 0x46b   : > { %v7996_v42 = vadd.f32 %v7995_v60, %v7994_v22  ;;  %v7997_v9 = vpop.f32.mrb[250].mxu0  ;;  %v7892_v14 = vpop.f32.mrb[255].mxu1 }
 0x46c   : > { %v4089_v51 = vadd.f32 %v7890_v46, %v10711_v20  ;;  %v7893_v8 = vadd.f32 %v7892_v14, %v7891_v16  ;;  %v7998_v40 = vpop.f32.mrb[251].mxu0 }
 0x46d   : > { %v7999_v47 = vadd.f32 %v7998_v40, %v7997_v9  ;;  %v10803_v48 = vadd.f32 %v7996_v42, %v4081_v1  ;;  %v9017_v9 = vld [vmem:[#allocation9 + $0x170] sm:$0xff]  }
 0x46e   : > { %v4092_v57 = vadd.f32 %v7893_v8, %v10713_v53  ;;  %8290 = vmatprep.subr.bf16.mxu0 %v9017_v9 }
 0x46f   : > { %v10806_v50 = vadd.f32 %v7999_v47, %v4084_v63 }
 0x470   : > { %v7894_v2 = vpop.f32.mrb[0].mxu1 }
 0x471   : > { %v8000_v15 = vpop.f32.mrb[252].mxu0  ;;  %v7895_v3 = vpop.f32.mrb[1].mxu1 }
 0x472   : > { %v7896_v54 = vadd.f32 %v7895_v3, %v7894_v2  ;;  %v8001_v6 = vpop.f32.mrb[253].mxu0  ;;  %v7897_v12 = vpop.f32.mrb[2].mxu1 }
 0x473   : > { %v8002_v30 = vadd.f32 %v8001_v6, %v8000_v15  ;;  %v8003_v20 = vpop.f32.mrb[254].mxu0  ;;  %v7898_v61 = vpop.f32.mrb[3].mxu1 }
 0x474   : > { %v4097_v13 = vadd.f32 %v7896_v54, %v10717_v10  ;;  %v7899_v38 = vadd.f32 %v7898_v61, %v7897_v12  ;;  %v8004_v26 = vpop.f32.mrb[255].mxu0 }
 0x475   : > { %v8005_v1 = vadd.f32 %v8004_v26, %v8003_v20  ;;  %v10809_v18 = vadd.f32 %v8002_v30, %v4089_v51  ;;  %v9019_v51 = vld [vmem:[#allocation9 + $0x130] sm:$0xff]  }
 0x476   : > { %v4100_v53 = vadd.f32 %v7899_v38, %v10719_v31  ;;  %8291 = vmatpush3.bf16.msra.mxu0 %v9019_v51 }
 0x477   : > { %v10812_v37 = vadd.f32 %v8005_v1, %v4092_v57 }
 0x478   : > { %v7900_v44 = vpop.f32.mrb[4].mxu1 }
 0x479   : > { %v8006_v63 = vpop.f32.mrb[0].mxu0  ;;  %v7901_v4 = vpop.f32.mrb[5].mxu1 }
 0x47a   : > { %v7902_v22 = vadd.f32 %v7901_v4, %v7900_v44  ;;  %v8007_v17 = vpop.f32.mrb[1].mxu0  ;;  %v7903_v46 = vpop.f32.mrb[6].mxu1 }
 0x47b   : > { %v8008_v60 = vadd.f32 %v8007_v17, %v8006_v63  ;;  %v8009_v16 = vpop.f32.mrb[2].mxu0  ;;  %v7904_v42 = vpop.f32.mrb[7].mxu1 }
 0x47c   : > { %v4105_v10 = vadd.f32 %v7902_v22, %v10723_v62  ;;  %v7905_v14 = vadd.f32 %v7904_v42, %v7903_v46  ;;  %v8010_v55 = vpop.f32.mrb[3].mxu0 }
 0x47d   : > { %v8011_v8 = vadd.f32 %v8010_v55, %v8009_v16  ;;  %v10815_v40 = vadd.f32 %v8008_v60, %v4097_v13  ;;  %v9021_v16 = vld [vmem:[#allocation9 + $0x178] sm:$0xff]  }
 0x47e   : > { %v4108_v31 = vadd.f32 %v7905_v14, %v10725_v5  ;;  %8292 = vmatprep.subr.bf16.mxu0 %v9021_v16 }
 0x47f   : > { %v10818_v7 = vadd.f32 %v8011_v8, %v4100_v53 }
 0x480   : > { %v7906_v47 = vpop.f32.mrb[8].mxu1 }
 0x481   : > { %v8012_v57 = vpop.f32.mrb[4].mxu0  ;;  %v7907_v2 = vpop.f32.mrb[9].mxu1 }
 0x482   : > { %v7908_v15 = vadd.f32 %v7907_v2, %v7906_v47  ;;  %v8013_v3 = vpop.f32.mrb[5].mxu0  ;;  %v7909_v54 = vpop.f32.mrb[10].mxu1 }
 0x483   : > { %v8014_v6 = vadd.f32 %v8013_v3, %v8012_v57  ;;  %v8015_v62 = vpop.f32.mrb[6].mxu0  ;;  %v7910_v12 = vpop.f32.mrb[11].mxu1 }
 0x484   : > { %v4113_v30 = vadd.f32 %v7908_v15, %v10729_v41  ;;  %v7911_v20 = vadd.f32 %v7910_v12, %v7909_v54  ;;  %v8016_v61 = vpop.f32.mrb[7].mxu0 }
 0x485   : > { %v8017_v13 = vadd.f32 %v8016_v61, %v8015_v62  ;;  %v10821_v38 = vadd.f32 %v8014_v6, %v4105_v10  ;;  %v9023_v10 = vld [vmem:[#allocation9 + $0x138] sm:$0xff]  }
 0x486   : > { %v4116_v5 = vadd.f32 %v7911_v20, %v10731_v45  ;;  %8293 = vmatpush3.bf16.msra.mxu0 %v9023_v10 }
 0x487   : > { %v10824_v26 = vadd.f32 %v8017_v13, %v4108_v31 }
 0x488   : > { %v7912_v1 = vpop.f32.mrb[12].mxu1 }
 0x489   : > { %v8018_v53 = vpop.f32.mrb[8].mxu0  ;;  %v7913_v44 = vpop.f32.mrb[13].mxu1 }
 0x48a   : > { %v7914_v63 = vadd.f32 %v7913_v44, %v7912_v1  ;;  %v8019_v4 = vpop.f32.mrb[9].mxu0  ;;  %v7915_v22 = vpop.f32.mrb[14].mxu1 }
 0x48b   : > { %v8020_v17 = vadd.f32 %v8019_v4, %v8018_v53  ;;  %v8021_v46 = vpop.f32.mrb[10].mxu0  ;;  %v7916_v60 = vpop.f32.mrb[15].mxu1 }
 0x48c   : > { %v4121_v41 = vadd.f32 %v7914_v63, %v10736_v39  ;;  %v7917_v42 = vadd.f32 %v7916_v60, %v7915_v22  ;;  %v8022_v9 = vpop.f32.mrb[11].mxu0  ;;  %v10857_v60 = vld [vmem:[#allocation9 + $0x200] sm:$0xff]  }
 0x48d   : > { %v8023_v14 = vadd.f32 %v8022_v9, %v8021_v46  ;;  %v10827_v55 = vadd.f32 %v8020_v17, %v4113_v30  ;;  %8631 = vmatprep.subr.bf16.mxu0 %v10857_v60 }
 0x48e   : > { %v4124_v45 = vadd.f32 %v7917_v42, %v10739_v56  ;;  %v4641_v42 = vld [vmem:[#allocation2 + $0xe9] sm:$0xff] }
 0x48f   : > { %v10830_v51 = vadd.f32 %v8023_v14, %v4116_v5 }
 0x490   : > { %v8601_v8 = vpop.f32.mrb[16].mxu1 }
 0x491   : > { %v8024_v31 = vpop.f32.mrb[12].mxu0  ;;  %v4331_v47 = vadd.f32 %v8601_v8, %v10749_v29  ;;  %v4322_v57 = vpop.f32.mrb[17].mxu1 }
 0x492   : > { %v8025_v2 = vpop.f32.mrb[13].mxu0  ;;  %v4323_v39 = vadd.f32 %v4322_v57, %v10742_v35  ;;  %v8602_v15 = vpop.f32.mrb[18].mxu1  ;;  %v9012_v57 = vld [vmem:[#allocation9 + $0x180] sm:$0xff]  }
 0x493   : > { %v10834_v3 = vmax.f32 %v4331_v47, 0.0  ;;  %v8026_v54 = vadd.f32 %v8025_v2, %v8024_v31  ;;  %v8027_v6 = vpop.f32.mrb[14].mxu0  ;;  %v4334_v62 = vadd.f32 %v8602_v15, %v10752_v58  ;;  %v4325_v56 = vpop.f32.mrb[19].mxu1 }
 0x494   : > { %v4449_v12 = vmax.f32 %v4323_v39, 0.0  ;;  %v8028_v30 = vpop.f32.mrb[15].mxu0  ;;  %v4326_v20 = vadd.f32 %v4325_v56, %v10745_v32 }
 0x495   : > { %4483 = vst [vmem:[%s10839_s16 + $0x10] sm:$0xff] %v10834_v3  ;;  %4515 = vst [vmem:[#allocation2 + $0x128] sm:$0xff] %v10834_v3  ;;  %v4452_v35 = vmax.f32 %v4334_v62, 0.0  ;;  %v8029_v29 = vadd.f32 %v8028_v30, %v8027_v6  ;;  %v10844_v61 = vadd.f32 %v8026_v54, %v4121_v41 }
 0x496   : > { %4481 = vst [vmem:[%s10839_s16] sm:$0xff] %v4449_v12  ;;  %4513 = vst [vmem:[#allocation2 + $0x108] sm:$0xff] %v4449_v12  ;;  %v4450_v58 = vmax.f32 %v4326_v20, 0.0 }
 0x497   : > { %4484 = vst [vmem:[%s10839_s16 + $0x18] sm:$0xff] %v4452_v35  ;;  %4516 = vst [vmem:[#allocation2 + $0x130] sm:$0xff] %v4452_v35  ;;  %v4627_v32 = vpack.c.bf16 %v4452_v35, %v10834_v3  ;;  %v10849_v13 = vadd.f32 %v8029_v29, %v4124_v45  ;;  %v9014_v3 = vld [vmem:[#allocation9 + $0x1c8] sm:$0xff]  }
 0x498   : > { %4482 = vst [vmem:[%s10839_s16 + $0x8] sm:$0xff] %v4450_v58  ;;  %4514 = vst [vmem:[#allocation2 + $0x110] sm:$0xff] %v4450_v58  ;;  %v8605_v5 = vpop.f32.mrb[20].mxu1  ;;  %v4626_v1 = vpack.c.bf16 %v4450_v58, %v4449_v12 }
 0x499   : > { %v4347_v53 = vadd.f32 %v8605_v5, %v10761_v21  ;;  %v4338_v44 = vpop.f32.mrb[21].mxu1  ;;  %v4642_v21 = vld [vmem:[#allocation2 + $0xf1] sm:$0xff] }
 0x49a   : > { %v4339_v63 = vadd.f32 %v4338_v44, %v10755_v19  ;;  %v8606_v4 = vpop.f32.mrb[22].mxu1  ;;  %5600 = vmatprep.mubr.bf16.mxu0 %v4626_v1  ;;  %v4673_v10 = vpack.c.bf16 %v4642_v21, %v4641_v42  ;;  %v9020_v44 = vld [vmem:[#allocation9 + $0x190] sm:$0xff]  }
 0x49b   : > { %v10854_v22 = vmax.f32 %v4347_v53, 0.0  ;;  %v4350_v17 = vadd.f32 %v8606_v4, %v10764_v52  ;;  %v4341_v46 = vpop.f32.mrb[23].mxu1 }
 0x49c   : > { %v10859_v16 = vmax.f32 %v4339_v63, 0.0  ;;  %v4342_v41 = vadd.f32 %v4341_v46, %v10758_v43  ;;  %v4691_v15 = vld [vmem:[#allocation2 + $0x127] sm:$0xff] }
 0x49d   : > { %4487 = vst [vmem:[%s10839_s16 + $0x30] sm:$0xff] %v10854_v22  ;;  %4519 = vst [vmem:[#allocation2 + $0x168] sm:$0xff] %v10854_v22  ;;  %v10865_v19 = vmax.f32 %v4350_v17, 0.0  ;;  %v4689_v43 = vld [vmem:[#allocation2 + $0x107] sm:$0xff] }
 0x49e   : > { %4485 = vst [vmem:[%s10839_s16 + $0x20] sm:$0xff] %v10859_v16  ;;  %4517 = vst [vmem:[#allocation2 + $0x148] sm:$0xff] %v10859_v16  ;;  %v10871_v52 = vmax.f32 %v4342_v41, 0.0  ;;  %v4692_v14 = vld [vmem:[#allocation2 + $0x12f] sm:$0xff] }
 0x49f   : > { %4488 = vst [vmem:[%s10839_s16 + $0x38] sm:$0xff] %v10865_v19  ;;  %4520 = vst [vmem:[#allocation2 + $0x170] sm:$0xff] %v10865_v19  ;;  %v4690_v9 = vld [vmem:[#allocation2 + $0x10f] sm:$0xff]  ;;  %v4629_v45 = vpack.c.bf16 %v10865_v19, %v10854_v22  ;;  %v10885_v62 = vpack.c.bf16 %v4692_v14, %v4691_v15  ;;  %v9026_v15 = vld [vmem:[#allocation9 + $0x1a0] sm:$0xff]  }
 0x4a0   : > { %4486 = vst [vmem:[%s10839_s16 + $0x28] sm:$0xff] %v10871_v52  ;;  %4518 = vst [vmem:[#allocation2 + $0x150] sm:$0xff] %v10871_v52  ;;  %v8609_v8 = vpop.f32.mrb[24].mxu1  ;;  %v4721_v31 = vpack.c.bf16 %v4690_v9, %v4689_v43  ;;  %v4628_v47 = vpack.c.bf16 %v10871_v52, %v10859_v16  ;;  %v4644_v58 = vld [vmem:[#allocation2 + $0x111] sm:$0xff] }
 0x4a1   : > { %v4363_v2 = vadd.f32 %v8609_v8, %v10773_v33  ;;  %v4354_v39 = vpop.f32.mrb[25].mxu1  ;;  %v9022_v16 = vld [vmem:[#allocation9 + $0x1d8] sm:$0xff]  }
 0x4a2   : > { %v4355_v54 = vadd.f32 %v4354_v39, %v10767_v28  ;;  %v8610_v6 = vpop.f32.mrb[26].mxu1  ;;  %5753 = vmatprep.mubr.bf16.mxu1 %v4721_v31  ;;  %5601 = vmatmul.mubr.bf16.gmra.mrb[20].mxu0 %v4721_v31  ;;  %v9016_v28 = vld [vmem:[#allocation9 + $0x188] sm:$0xff]   ;;  %v4646_v31 = vld [vmem:[#allocation2 + $0x131] sm:$0xff] }
 0x4a3   : > { %v10887_v56 = vmax.f32 %v4363_v2, 0.0  ;;  %v4366_v12 = vadd.f32 %v8610_v6, %v10776_v34  ;;  %v4357_v30 = vpop.f32.mrb[27].mxu1  ;;  %5754 = vmatmul.mubr.bf16.vlgmr.msra.gmra.mrb[48].mxu1 %v4673_v10  ;;  %5608 = vmatprep.mubr.bf16.mxu0 %v4627_v32  ;;  %v9018_v34 = vld [vmem:[#allocation9 + $0x1d0] sm:$0xff]  }
 0x4a4   : > { %v10890_v33 = vmax.f32 %v4355_v54, 0.0  ;;  %v4358_v20 = vadd.f32 %v4357_v30, %v10770_v23  ;;  %5761 = vmatprep.mubr.bf16.mxu1 %v10885_v62  ;;  %8391 = vmatpush3.bf16.msra.mxu1 %v9012_v57  ;;  %v4643_v23 = vld [vmem:[#allocation2 + $0x109] sm:$0xff] }
 0x4a5   : > { %4491 = vst [vmem:[%s10839_s16 + $0x50] sm:$0xff] %v10887_v56  ;;  %4523 = vst [vmem:[#allocation2 + $0x1a8] sm:$0xff] %v10887_v56  ;;  %v10897_v35 = vmax.f32 %v4366_v12, 0.0  ;;  %8392 = vmatprep.subr.bf16.mxu1 %v9014_v3  ;;  %v10915_v17 = vpack.c.bf16 %v4644_v58, %v4643_v23  ;;  %v4693_v46 = vld [vmem:[#allocation2 + $0x147] sm:$0xff] }
 0x4a6   : > { %4489 = vst [vmem:[%s10839_s16 + $0x40] sm:$0xff] %v10890_v33  ;;  %4521 = vst [vmem:[#allocation2 + $0x188] sm:$0xff] %v10890_v33  ;;  %v10902_v29 = vmax.f32 %v4358_v20, 0.0  ;;  %v4695_v12 = vld [vmem:[#allocation2 + $0x167] sm:$0xff] }
 0x4a7   : > { %4492 = vst [vmem:[%s10839_s16 + $0x58] sm:$0xff] %v10897_v35  ;;  %4524 = vst [vmem:[#allocation2 + $0x1b0] sm:$0xff] %v10897_v35  ;;  %v4694_v32 = vld [vmem:[#allocation2 + $0x14f] sm:$0xff]  ;;  %v4631_v5 = vpack.c.bf16 %v10897_v35, %v10887_v56 }
 0x4a8   : > { %4490 = vst [vmem:[%s10839_s16 + $0x48] sm:$0xff] %v10902_v29  ;;  %4522 = vst [vmem:[#allocation2 + $0x190] sm:$0xff] %v10902_v29  ;;  %v8613_v1 = vpop.f32.mrb[28].mxu1  ;;  %v4630_v53 = vpack.c.bf16 %v10902_v29, %v10890_v33  ;;  %8393 = vmatpush3.bf16.msra.mxu1 %v9016_v28  ;;  %v10919_v21 = vpack.c.bf16 %v4694_v32, %v4693_v46  ;;  %v9027_v30 = vld [vmem:[#allocation9 + $0x1e8] sm:$0xff]   ;;  %v4648_v19 = vld [vmem:[#allocation2 + $0x151] sm:$0xff] }
 0x4a9   : > { %v4379_v63 = vadd.f32 %v8613_v1, %v10785_v27  ;;  %v4370_v4 = vpop.f32.mrb[29].mxu1  ;;  %8394 = vmatprep.subr.bf16.mxu1 %v9018_v34  ;;  %v9028_v1 = vld [vmem:[#allocation9 + $0x1a8] sm:$0xff]  }
 0x4aa   : > { %v4371_v41 = vadd.f32 %v4370_v4, %v10779_v49  ;;  %v8614_v42 = vpop.f32.mrb[30].mxu1  ;;  %5609 = vmatmul.mubr.bf16.gmra.mrb[24].mxu0 %v10885_v62  ;;  %v9024_v49 = vld [vmem:[#allocation9 + $0x198] sm:$0xff]   ;;  %v4649_v29 = vld [vmem:[#allocation2 + $0x169] sm:$0xff] }
 0x4ab   : > { %v10921_v52 = vmax.f32 %v4379_v63, 0.0  ;;  %v4382_v43 = vadd.f32 %v8614_v42, %v10788_v36  ;;  %v4373_v27 = vpop.f32.mrb[31].mxu1  ;;  %5762 = vmatmul.mubr.bf16.gmra.mrb[52].mxu1 %v10915_v17  ;;  %5616 = vmatprep.mubr.bf16.mxu0 %v4628_v47  ;;  %v9025_v36 = vld [vmem:[#allocation9 + $0x1e0] sm:$0xff]   ;;  %v4696_v47 = vld [vmem:[#allocation2 + $0x16f] sm:$0xff] }
 0x4ac   : > { %v10925_v9 = vmax.f32 %v4371_v41, 0.0  ;;  %v4374_v10 = vadd.f32 %v4373_v27, %v10782_v24  ;;  %5769 = vmatprep.mubr.bf16.mxu1 %v10919_v21  ;;  %8395 = vmatpush3.bf16.msra.mxu1 %v9020_v44  ;;  %v4645_v24 = vld [vmem:[#allocation2 + $0x129] sm:$0xff]  ;;  %v10954_v34 = vpack.c.bf16 %v4696_v47, %v4695_v12 }
 0x4ad   : > { %4495 = vst [vmem:[%s10839_s16 + $0x70] sm:$0xff] %v10921_v52  ;;  %4527 = vst [vmem:[#allocation2 + $0x1e8] sm:$0xff] %v10921_v52  ;;  %v10932_v14 = vmax.f32 %v4382_v43, 0.0  ;;  %8396 = vmatprep.subr.bf16.mxu1 %v9022_v16  ;;  %v10950_v6 = vpack.c.bf16 %v4646_v31, %v4645_v24  ;;  %v9029_v44 = vld [vmem:[#allocation9 + $0x1f0] sm:$0xff]   ;;  %v4697_v27 = vld [vmem:[#allocation2 + $0x187] sm:$0xff] }
 0x4ae   : > { %4493 = vst [vmem:[%s10839_s16 + $0x60] sm:$0xff] %v10925_v9  ;;  %4525 = vst [vmem:[#allocation2 + $0x1c8] sm:$0xff] %v10925_v9  ;;  %v10937_v8 = vmax.f32 %v4374_v10, 0.0  ;;  %v9031_v16 = vld [vmem:[#allocation9 + $0x1b0] sm:$0xff]   ;;  %v9032_v10 = vld [vmem:[#allocation9 + $0x1f8] sm:$0xff]  }
 0x4af   : > { %4496 = vst [vmem:[%s10839_s16 + $0x78] sm:$0xff] %v10932_v14  ;;  %4528 = vst [vmem:[#allocation2 + $0x1f0] sm:$0xff] %v10932_v14  ;;  %v4633_v57 = vpack.c.bf16 %v10932_v14, %v10921_v52  ;;  %v4651_v56 = vld [vmem:[#allocation2 + $0x189] sm:$0xff]  ;;  %v4652_v35 = vld [vmem:[#allocation2 + $0x191] sm:$0xff] }
 0x4b0   : > { %4494 = vst [vmem:[%s10839_s16 + $0x68] sm:$0xff] %v10937_v8  ;;  %4526 = vst [vmem:[#allocation2 + $0x1d0] sm:$0xff] %v10937_v8  ;;  %v8617_v2 = vpop.f32.mrb[32].mxu1  ;;  %v4632_v39 = vpack.c.bf16 %v10937_v8, %v10925_v9  ;;  %8397 = vmatpush3.bf16.msra.mxu1 %v9024_v49 }
 0x4b1   : > { %v4395_v3 = vadd.f32 %v8617_v2, %v10797_v0  ;;  %v4386_v54 = vpop.f32.mrb[33].mxu1  ;;  %8398 = vmatprep.subr.bf16.mxu1 %v9025_v36 }
 0x4b2   : > { %v4387_v20 = vadd.f32 %v4386_v54, %v10791_v59  ;;  %v8618_v28 = vpop.f32.mrb[34].mxu1  ;;  %5617 = vmatmul.mubr.bf16.gmra.mrb[28].mxu0 %v10919_v21 }
 0x4b3   : > { %v10956_v23 = vmax.f32 %v4395_v3, 0.0  ;;  %v4398_v58 = vadd.f32 %v8618_v28, %v10800_v11  ;;  %v4389_v0 = vpop.f32.mrb[35].mxu1  ;;  %5770 = vmatmul.mubr.bf16.gmra.mrb[56].mxu1 %v10950_v6  ;;  %5624 = vmatprep.mubr.bf16.mxu0 %v4629_v45  ;;  %v4698_v45 = vld [vmem:[#allocation2 + $0x18f] sm:$0xff] }
 0x4b4   : > { %v10963_v32 = vmax.f32 %v4387_v20, 0.0  ;;  %v4390_v59 = vadd.f32 %v4389_v0, %v10794_v25  ;;  %5777 = vmatprep.mubr.bf16.mxu1 %v10954_v34  ;;  %8399 = vmatpush3.bf16.msra.mxu1 %v9026_v15  ;;  %v4647_v25 = vld [vmem:[#allocation2 + $0x149] sm:$0xff]  ;;  %v10992_v24 = vpack.c.bf16 %v4698_v45, %v4697_v27  ;;  %v9033_v15 = vld [vmem:[#allocation9 + $0x1b8] sm:$0xff]   ;;  %v11028_v0 = vld [vmem:[#allocation2] sm:$0xff] }
 0x4b5   : > { %4499 = vst [vmem:[%s10839_s16 + $0x90] sm:$0xff] %v10956_v23  ;;  %4531 = vst [vmem:[#allocation2 + $0x228] sm:$0xff] %v10956_v23  ;;  %v10970_v11 = vmax.f32 %v4398_v58, 0.0  ;;  %8400 = vmatprep.subr.bf16.mxu1 %v9027_v30  ;;  %v10988_v43 = vpack.c.bf16 %v4648_v19, %v4647_v25  ;;  %v4699_v58 = vld [vmem:[#allocation2 + $0x1a7] sm:$0xff] }
 0x4b6   : > { %4497 = vst [vmem:[%s10839_s16 + $0x80] sm:$0xff] %v10963_v32  ;;  %4529 = vst [vmem:[#allocation2 + $0x208] sm:$0xff] %v10963_v32  ;;  %v10975_v22 = vmax.f32 %v4390_v59, 0.0  ;;  %v4704_v9 = vld [vmem:[#allocation2 + $0x1ef] sm:$0xff] }
 0x4b7   : > { %4500 = vst [vmem:[%s10839_s16 + $0x98] sm:$0xff] %v10970_v11  ;;  %4532 = vst [vmem:[#allocation2 + $0x230] sm:$0xff] %v10970_v11  ;;  %v4635_v63 = vpack.c.bf16 %v10970_v11, %v10956_v23  ;;  %v4657_v52 = vld [vmem:[#allocation2 + $0x1e9] sm:$0xff]  ;;  %v4658_v14 = vld [vmem:[#allocation2 + $0x1f1] sm:$0xff] }
 0x4b8   : > { %4498 = vst [vmem:[%s10839_s16 + $0x88] sm:$0xff] %v10975_v22  ;;  %4530 = vst [vmem:[#allocation2 + $0x210] sm:$0xff] %v10975_v22  ;;  %v8621_v4 = vpop.f32.mrb[36].mxu1  ;;  %v4634_v46 = vpack.c.bf16 %v10975_v22, %v10963_v32  ;;  %8401 = vmatpush3.bf16.msra.mxu1 %v9028_v1 }
 0x4b9   : > { %v4411_v41 = vadd.f32 %v8621_v4, %v10809_v18  ;;  %v4402_v42 = vpop.f32.mrb[37].mxu1  ;;  %8402 = vmatprep.subr.bf16.mxu1 %v9029_v44 }
 0x4ba   : > { %v4403_v49 = vadd.f32 %v4402_v42, %v10803_v48  ;;  %v8622_v36 = vpop.f32.mrb[38].mxu1  ;;  %5625 = vmatmul.mubr.bf16.gmra.mrb[32].mxu0 %v10954_v34 }
 0x4bb   : > { %v10994_v31 = vmax.f32 %v4411_v41, 0.0  ;;  %v4414_v47 = vadd.f32 %v8622_v36, %v10812_v37  ;;  %v4405_v18 = vpop.f32.mrb[39].mxu1  ;;  %5778 = vmatmul.mubr.bf16.gmra.mrb[60].mxu1 %v10988_v43  ;;  %5632 = vmatprep.mubr.bf16.mxu0 %v4630_v53  ;;  %v4700_v53 = vld [vmem:[#allocation2 + $0x1af] sm:$0xff] }
 0x4bc   : > { %v11001_v2 = vmax.f32 %v4403_v49, 0.0  ;;  %v4406_v48 = vadd.f32 %v4405_v18, %v10806_v50  ;;  %5785 = vmatprep.mubr.bf16.mxu1 %v10992_v24  ;;  %8403 = vmatpush3.bf16.msra.mxu1 %v9031_v16  ;;  %v4650_v50 = vld [vmem:[#allocation2 + $0x171] sm:$0xff]  ;;  %v11033_v44 = vpack.c.bf16 %v4700_v53, %v4699_v58  ;;  %v4701_v49 = vld [vmem:[#allocation2 + $0x1c7] sm:$0xff] }
 0x4bd   : > { %4503 = vst [vmem:[%s10839_s16 + $0xb0] sm:$0xff] %v10994_v31  ;;  %4535 = vst [vmem:[#allocation2 + $0x268] sm:$0xff] %v10994_v31  ;;  %v11008_v37 = vmax.f32 %v4414_v47, 0.0  ;;  %8404 = vmatprep.subr.bf16.mxu1 %v9032_v10  ;;  %v11026_v28 = vpack.c.bf16 %v4650_v50, %v4649_v29  ;;  %v11067_v10 = vpack.c.bf16 %v4652_v35, %v4651_v56  ;;  %v4653_v53 = vld [vmem:[#allocation2 + $0x1a9] sm:$0xff]  ;;  %v4656_v58 = vld [vmem:[#allocation2 + $0x1d1] sm:$0xff] }
 0x4be   : > { %4501 = vst [vmem:[%s10839_s16 + $0xa0] sm:$0xff] %v11001_v2  ;;  %4533 = vst [vmem:[#allocation2 + $0x248] sm:$0xff] %v11001_v2  ;;  %v11013_v33 = vmax.f32 %v4406_v48, 0.0  ;;  %v4707_v56 = vld [vmem:[#allocation2 + $0x227] sm:$0xff]  ;;  %v4662_v11 = vld [vmem:[#allocation2 + $0x231] sm:$0xff] }
 0x4bf   : > { %4504 = vst [vmem:[%s10839_s16 + $0xb8] sm:$0xff] %v11008_v37  ;;  %4536 = vst [vmem:[#allocation2 + $0x270] sm:$0xff] %v11008_v37  ;;  %v4637_v3 = vpack.c.bf16 %v11008_v37, %v10994_v31  ;;  %v4659_v32 = vld [vmem:[#allocation2 + $0x209] sm:$0xff]  ;;  %v4660_v22 = vld [vmem:[#allocation2 + $0x211] sm:$0xff] }
 0x4c0   : > { %4502 = vst [vmem:[%s10839_s16 + $0xa8] sm:$0xff] %v11013_v33  ;;  %4534 = vst [vmem:[#allocation2 + $0x250] sm:$0xff] %v11013_v33  ;;  %v8625_v54 = vpop.f32.mrb[40].mxu1  ;;  %v4636_v12 = vpack.c.bf16 %v11013_v33, %v11001_v2  ;;  %8405 = vmatpush3.bf16.msra.mxu1 %v9033_v15  ;;  %v4661_v23 = vld [vmem:[#allocation2 + $0x229] sm:$0xff] }
 0x4c1   : > { %v4427_v30 = vadd.f32 %v8625_v54, %v10821_v38  ;;  %v4418_v20 = vpop.f32.mrb[41].mxu1  ;;  %8679 = vmatprep.subr.bf16.mxu1 %v11028_v0  ;;  %v4654_v54 = vld [vmem:[#allocation2 + $0x1b1] sm:$0xff] }
 0x4c2   : > { %v4419_v59 = vadd.f32 %v4418_v20, %v10815_v40  ;;  %v8626_v1 = vpop.f32.mrb[42].mxu1  ;;  %5633 = vmatmul.mubr.bf16.gmra.mrb[36].mxu0 %v10992_v24  ;;  %v11094_v8 = vpack.c.bf16 %v4654_v54, %v4653_v53  ;;  %v4655_v20 = vld [vmem:[#allocation2 + $0x1c9] sm:$0xff] }
 0x4c3   : > { %v11035_v25 = vmax.f32 %v4427_v30, 0.0  ;;  %v4430_v38 = vadd.f32 %v8626_v1, %v10824_v26  ;;  %v4421_v19 = vpop.f32.mrb[43].mxu1  ;;  %5786 = vmatmul.mubr.bf16.gmra.mrb[64].mxu1 %v11026_v28  ;;  %5640 = vmatprep.mubr.bf16.mxu0 %v4631_v5  ;;  %v11104_v1 = vpack.c.bf16 %v4656_v58, %v4655_v20 }
 0x4c4   : > { %v11042_v45 = vmax.f32 %v4419_v59, 0.0  ;;  %v4422_v40 = vadd.f32 %v4421_v19, %v10818_v7  ;;  %5793 = vmatprep.mubr.bf16.mxu1 %v11033_v44  ;;  %v4702_v7 = vld [vmem:[#allocation2 + $0x1cf] sm:$0xff] }
 0x4c5   : > { %4507 = vst [vmem:[%s10839_s16 + $0xd0] sm:$0xff] %v11035_v25  ;;  %4539 = vst [vmem:[#allocation2 + $0x2a8] sm:$0xff] %v11035_v25  ;;  %v11049_v4 = vmax.f32 %v4430_v38, 0.0  ;;  %v11071_v18 = vpack.c.bf16 %v4702_v7, %v4701_v49  ;;  %v4706_v59 = vld [vmem:[#allocation2 + $0x20f] sm:$0xff]  ;;  %v4705_v38 = vld [vmem:[#allocation2 + $0x207] sm:$0xff]  ;;  %v11124_v7 = vpack.c.bf16 %v4660_v22, %v4659_v32 }
 0x4c6   : > { %4505 = vst [vmem:[%s10839_s16 + $0xc0] sm:$0xff] %v11042_v45  ;;  %4537 = vst [vmem:[#allocation2 + $0x288] sm:$0xff] %v11042_v45  ;;  %v11054_v26 = vmax.f32 %v4422_v40, 0.0  ;;  %v11107_v19 = vpack.c.bf16 %v4706_v59, %v4705_v38  ;;  %v11114_v40 = vpack.c.bf16 %v4658_v14, %v4657_v52  ;;  %v4711_v49 = vld [vmem:[#allocation2 + $0x267] sm:$0xff]  ;;  %v4882_v22 = vld [vmem:[#allocation2 + $0x130] sm:$0xff] }
 0x4c7   : > { %4508 = vst [vmem:[%s10839_s16 + $0xd8] sm:$0xff] %v11049_v4  ;;  %4540 = vst [vmem:[#allocation2 + $0x2b0] sm:$0xff] %v11049_v4  ;;  %v4639_v5 = vpack.c.bf16 %v11049_v4, %v11035_v25  ;;  %v4665_v37 = vld [vmem:[#allocation2 + $0x269] sm:$0xff] }
 0x4c8   : > { %4506 = vst [vmem:[%s10839_s16 + $0xc8] sm:$0xff] %v11054_v26  ;;  %4538 = vst [vmem:[#allocation2 + $0x290] sm:$0xff] %v11054_v26  ;;  %v8629_v16 = vpop.f32.mrb[44].mxu1  ;;  %v4638_v41 = vpack.c.bf16 %v11054_v26, %v11042_v45  ;;  %v4737_v32 = vld [vmem:[#allocation2 + $0x108] sm:$0xff] }
 0x4c9   : > { %v4443_v42 = vadd.f32 %v8629_v16, %v10844_v61  ;;  %v4434_v27 = vpop.f32.mrb[45].mxu1  ;;  %v4709_v16 = vld [vmem:[#allocation2 + $0x247] sm:$0xff] }
 0x4ca   : > { %v4435_v36 = vadd.f32 %v4434_v27, %v10827_v55  ;;  %v8630_v47 = vpop.f32.mrb[46].mxu1  ;;  %5641 = vmatmul.mubr.bf16.gmra.mrb[40].mxu0 %v11033_v44  ;;  %v11134_v27 = vpack.c.bf16 %v4662_v11, %v4661_v23  ;;  %v4881_v23 = vld [vmem:[#allocation2 + $0x128] sm:$0xff] }
 0x4cb   : > { %v4479_v48 = vmax.f32 %v4443_v42, 0.0  ;;  %v4446_v15 = vadd.f32 %v8630_v47, %v10849_v13  ;;  %v4437_v29 = vpop.f32.mrb[47].mxu1  ;;  %5794 = vmatmul.mubr.bf16.gmra.mrb[68].mxu1 %v11067_v10  ;;  %5648 = vmatprep.mubr.bf16.mxu0 %v4632_v39  ;;  %v4703_v39 = vld [vmem:[#allocation2 + $0x1e7] sm:$0xff]  ;;  %v4664_v47 = vld [vmem:[#allocation2 + $0x251] sm:$0xff] }
 0x4cc   : > { %v11078_v61 = vmax.f32 %v4435_v36, 0.0  ;;  %v4438_v55 = vadd.f32 %v4437_v29, %v10830_v51  ;;  %5801 = vmatprep.mubr.bf16.mxu1 %v11071_v18  ;;  %v11097_v30 = vpack.c.bf16 %v4704_v9, %v4703_v39  ;;  %v4715_v20 = vld [vmem:[#allocation2 + $0x2a7] sm:$0xff] }
 0x4cd   : > { %4511 = vst [vmem:[%s10839_s16 + $0xf0] sm:$0xff] %v4479_v48  ;;  %4543 = vst [vmem:[#allocation2 + $0x2e8] sm:$0xff] %v4479_v48  ;;  %v4480_v50 = vmax.f32 %v4446_v15, 0.0  ;;  %v4713_v54 = vld [vmem:[#allocation2 + $0x287] sm:$0xff] }
 0x4ce   : > { %4509 = vst [vmem:[%s10839_s16 + $0xe0] sm:$0xff] %v11078_v61  ;;  %4541 = vst [vmem:[#allocation2 + $0x2c8] sm:$0xff] %v11078_v61  ;;  %v11086_v13 = vmax.f32 %v4438_v55, 0.0  ;;  %v4716_v9 = vld [vmem:[#allocation2 + $0x2af] sm:$0xff] }
 0x4cf   : > { %4512 = vst [vmem:[%s10839_s16 + $0xf8] sm:$0xff] %v4480_v50  ;;  %4544 = vst [vmem:[#allocation2 + $0x2f0] sm:$0xff] %v4480_v50  ;;  %v4714_v29 = vld [vmem:[#allocation2 + $0x28f] sm:$0xff]  ;;  %v11161_v58 = vpack.c.bf16 %v4716_v9, %v4715_v20 }
 0x4d0   : > { %4510 = vst [vmem:[%s10839_s16 + $0xe8] sm:$0xff] %v11086_v13  ;;  %4542 = vst [vmem:[#allocation2 + $0x2d0] sm:$0xff] %v11086_v13  ;;  %v4640_v51 = vpack.c.bf16 %v11086_v13, %v11078_v61  ;;  %v11151_v31 = vpack.c.bf16 %v4714_v29, %v4713_v54  ;;  %v4667_v45 = vld [vmem:[#allocation2 + $0x289] sm:$0xff]  ;;  %v4668_v26 = vld [vmem:[#allocation2 + $0x291] sm:$0xff]  ;;  %s9201_s16 = scalar_lea.vmem %s9200_s19, 8192 }
 0x4d1   : > { %v11168_v59 = vpack.c.bf16 %v4668_v26, %v4667_v45  ;;  %v4669_v25 = vld [vmem:[#allocation2 + $0x2a9] sm:$0xff]  ;;  %v4670_v4 = vld [vmem:[#allocation2 + $0x2b1] sm:$0xff]  ;;  %p9203_p1 = scmp.lt.s32.totalorder %s9201_s16, %s9195_s0 }
 0x4d2   : > { %5649 = vmatmul.mubr.bf16.gmra.mrb[44].mxu0 %v11071_v18  ;;  %v11178_v14 = vpack.c.bf16 %v4670_v4, %v4669_v25  ;;  %v4738_v61 = vld [vmem:[#allocation2 + $0x110] sm:$0xff]  ;;  %v9034_v11 = vld [vmem:[#allocation9 + $0x208] sm:$0xff]   ;;  %v9040_v54 = vld [vmem:[#allocation9 + $0x238] sm:$0xff]  }
 0x4d3   : > { %5802 = vmatmul.mubr.bf16.gmra.mrb[72].mxu1 %v11094_v8  ;;  %5656 = vmatprep.mubr.bf16.mxu0 %v4633_v57  ;;  %v4708_v57 = vld [vmem:[#allocation2 + $0x22f] sm:$0xff]  ;;  %p9204_p2 = por %p9203_p1, %p9202_p12 }
 0x4d4   : > { %5809 = vmatprep.mubr.bf16.mxu1 %v11097_v30  ;;  %v11117_v35 = vpack.c.bf16 %v4708_v57, %v4707_v56  ;;  %v4719_v57 = vld [vmem:[#allocation2 + $0x2e7] sm:$0xff]  ;;  %v4892_v9 = vld [vmem:[#allocation2 + $0x1d0] sm:$0xff] }
 0x4d5   : > { %v4717_v38 = vld [vmem:[#allocation2 + $0x2c7] sm:$0xff]  ;;  %p9205_p13 = pnand %p9204_p2, %p9198_p7 }
 0x4d6   : > { %v4891_v20 = vld [vmem:[#allocation2 + $0x1c8] sm:$0xff] }
 0x4d7   : > { %v4671_v13 = vld [vmem:[#allocation2 + $0x2c9] sm:$0xff]  ;;  %v4918_v45 = vpack.c.bf16 %v4892_v9, %v4891_v20 }
 0x4da   : > { %5657 = vmatmul.mubr.bf16.gmra.mrb[48].mxu0 %v11097_v30 }
 0x4db   : > { %5810 = vmatmul.mubr.bf16.gmra.mrb[76].mxu1 %v11104_v1  ;;  %5664 = vmatprep.mubr.bf16.mxu0 %v4634_v46  ;;  %v4710_v46 = vld [vmem:[#allocation2 + $0x24f] sm:$0xff] }
 0x4dc   : > { %5817 = vmatprep.mubr.bf16.mxu1 %v11107_v19  ;;  %v11127_v42 = vpack.c.bf16 %v4710_v46, %v4709_v16  ;;  %v4769_v46 = vpack.c.bf16 %v4738_v61, %v4737_v32 }
 0x4e2   : > { %5665 = vmatmul.mubr.bf16.gmra.mrb[52].mxu0 %v11107_v19 }
 0x4e3   : > { %5818 = vmatmul.mubr.bf16.gmra.mrb[80].mxu1 %v11114_v40  ;;  %5672 = vmatprep.mubr.bf16.mxu0 %v4635_v63  ;;  %v4712_v63 = vld [vmem:[#allocation2 + $0x26f] sm:$0xff] }
 0x4e4   : > { %5825 = vmatprep.mubr.bf16.mxu1 %v11117_v35  ;;  %v11137_v36 = vpack.c.bf16 %v4712_v63, %v4711_v49  ;;  %v4913_v63 = vpack.c.bf16 %v4882_v22, %v4881_v23  ;;  %v4884_v49 = vld [vmem:[#allocation2 + $0x150] sm:$0xff] }
 0x4ea   : > { %5673 = vmatmul.mubr.bf16.gmra.mrb[56].mxu0 %v11117_v35  ;;  %v8070_v2 = vpop.f32.mrb[16].mxu0 }
 0x4eb   : > { %5826 = vmatmul.mubr.bf16.gmra.mrb[84].mxu1 %v11124_v7  ;;  %5680 = vmatprep.mubr.bf16.mxu0 %v4636_v12  ;;  %v8071_v33 = vpop.f32.mrb[17].mxu0  ;;  %v4663_v12 = vld [vmem:[#allocation2 + $0x249] sm:$0xff] }
 0x4ec   : > { %5833 = vmatprep.mubr.bf16.mxu1 %v11127_v42  ;;  %v11144_v48 = vadd.f32 %v8071_v33, %v8070_v2  ;;  %v8073_v15 = vpop.f32.mrb[18].mxu0  ;;  %v11148_v53 = vpack.c.bf16 %v4664_v47, %v4663_v12  ;;  %v4883_v2 = vld [vmem:[#allocation2 + $0x148] sm:$0xff]  ;;  %v9036_v33 = vld [vmem:[#allocation9 + $0x218] sm:$0xff]   ;;  %v4886_v47 = vld [vmem:[#allocation2 + $0x170] sm:$0xff] }
 0x4ed   : > { %v8074_v55 = vpop.f32.mrb[19].mxu0  ;;  %v4914_v12 = vpack.c.bf16 %v4884_v49, %v4883_v2 }
 0x4ee   : > { %v11146_v50 = vadd.f32 %v8074_v55, %v8073_v15  ;;  %v9038_v15 = vld [vmem:[#allocation9 + $0x228] sm:$0xff]  }
 0x4ef   : > { %v4887_v55 = vld [vmem:[#allocation2 + $0x188] sm:$0xff] }
 0x4f2   : > { %5681 = vmatmul.mubr.bf16.gmra.mrb[60].mxu0 %v11127_v42 }
 0x4f3   : > { %5834 = vmatmul.mubr.bf16.gmra.mrb[88].mxu1 %v11134_v27  ;;  %5688 = vmatprep.mubr.bf16.mxu0 %v4637_v3  ;;  %v4666_v3 = vld [vmem:[#allocation2 + $0x271] sm:$0xff] }
 0x4f4   : > { %5841 = vmatprep.mubr.bf16.mxu1 %v11137_v36  ;;  %v11158_v39 = vpack.c.bf16 %v4666_v3, %v4665_v37 }
 0x4fa   : > { %5689 = vmatmul.mubr.bf16.gmra.mrb[64].mxu0 %v11137_v36 }
 0x4fb   : > { %5842 = vmatmul.mubr.bf16.gmra.mrb[92].mxu1 %v11148_v53  ;;  %5696 = vmatprep.mubr.bf16.mxu0 %v4638_v41  ;;  %v4718_v41 = vld [vmem:[#allocation2 + $0x2cf] sm:$0xff] }
 0x4fc   : > { %5849 = vmatprep.mubr.bf16.mxu1 %v11151_v31  ;;  %v11171_v52 = vpack.c.bf16 %v4718_v41, %v4717_v38 }
 0x502   : > { %5697 = vmatmul.mubr.bf16.gmra.mrb[68].mxu0 %v11151_v31 }
 0x503   : > { %5850 = vmatmul.mubr.bf16.gmra.mrb[96].mxu1 %v11158_v39  ;;  %5704 = vmatprep.mubr.bf16.mxu0 %v4639_v5  ;;  %v4720_v5 = vld [vmem:[#allocation2 + $0x2ef] sm:$0xff] }
 0x504   : > { %5857 = vmatprep.mubr.bf16.mxu1 %v11161_v58  ;;  %v11181_v56 = vpack.c.bf16 %v4720_v5, %v4719_v57 }
 0x50a   : > { %5705 = vmatmul.mubr.bf16.gmra.mrb[72].mxu0 %v11161_v58 }
 0x50b   : > { %5858 = vmatmul.mubr.bf16.gmra.mrb[100].mxu1 %v11168_v59  ;;  %5712 = vmatprep.mubr.bf16.mxu0 %v4640_v51  ;;  %v4672_v51 = vld [vmem:[#allocation2 + $0x2d1] sm:$0xff] }
 0x50c   : > { %5865 = vmatprep.mubr.bf16.mxu1 %v11171_v52  ;;  %v11186_v16 = vpack.c.bf16 %v4672_v51, %v4671_v13  ;;  %v4906_v51 = vld [vmem:[#allocation2 + $0x2b0] sm:$0xff] }
 0x512   : > { %5713 = vmatmul.mubr.bf16.gmra.mrb[76].mxu0 %v11171_v52 }
 0x513   : > { %5866 = vmatmul.mubr.bf16.gmra.mrb[104].mxu1 %v11178_v14  ;;  %5914 = vmatprep.mubr.bf16.mxu0 %v10915_v17  ;;  %v9035_v17 = vld [vmem:[#allocation9 + $0x210] sm:$0xff]  }
 0x514   : > { %5873 = vmatprep.mubr.bf16.mxu1 %v11181_v56 }
 0x51a   : > { %5915 = vmatmul.mubr.bf16.vlgmr.msra.gmra.mrb[80].mxu0 %v4769_v46 }
 0x51b   : > { %5874 = vmatmul.mubr.bf16.gmra.mrb[108].mxu1 %v11186_v16  ;;  %5922 = vmatprep.mubr.bf16.mxu0 %v10950_v6  ;;  %v9037_v6 = vld [vmem:[#allocation9 + $0x220] sm:$0xff]  }
 0x51c   : > { %6075 = vmatprep.mubr.bf16.mxu1 %v4913_v63  ;;  %8632 = vmatpush3.bf16.msra.mxu0 %v10857_v60  ;;  %v4885_v60 = vld [vmem:[#allocation2 + $0x168] sm:$0xff] }
 0x51d   : > { %8633 = vmatprep.subr.bf16.mxu0 %v9034_v11  ;;  %v4915_v29 = vpack.c.bf16 %v4886_v47, %v4885_v60 }
 0x520   : > { %8634 = vmatpush3.bf16.msra.mxu0 %v9034_v11  ;;  %v4905_v11 = vld [vmem:[#allocation2 + $0x2a8] sm:$0xff] }
 0x521   : > { %8635 = vmatprep.subr.bf16.mxu0 %v9035_v17  ;;  %v4925_v2 = vpack.c.bf16 %v4906_v51, %v4905_v11 }
 0x522   : > { %5923 = vmatmul.mubr.bf16.gmra.mrb[84].mxu0 %v4913_v63 }
 0x523   : > { %6076 = vmatmul.mubr.bf16.vlgmr.msra.gmra.mrb[112].mxu1 %v10885_v62  ;;  %5930 = vmatprep.mubr.bf16.mxu0 %v10988_v43  ;;  %v9039_v62 = vld [vmem:[#allocation9 + $0x230] sm:$0xff]  }
 0x524   : > { %6083 = vmatprep.mubr.bf16.mxu1 %v4914_v12  ;;  %8636 = vmatpush3.bf16.msra.mxu0 %v9035_v17  ;;  %v4888_v43 = vld [vmem:[#allocation2 + $0x190] sm:$0xff] }
 0x525   : > { %8637 = vmatprep.subr.bf16.mxu0 %v9036_v33  ;;  %v4916_v37 = vpack.c.bf16 %v4888_v43, %v4887_v55 }
 0x528   : > { %8638 = vmatpush3.bf16.msra.mxu0 %v9036_v33 }
 0x529   : > { %8639 = vmatprep.subr.bf16.mxu0 %v9037_v6 }
 0x52a   : > { %5931 = vmatmul.mubr.bf16.gmra.mrb[88].mxu0 %v4914_v12 }
 0x52b   : > { %6084 = vmatmul.mubr.bf16.gmra.mrb[116].mxu1 %v10919_v21  ;;  %5938 = vmatprep.mubr.bf16.mxu0 %v11026_v28  ;;  %v4890_v21 = vld [vmem:[#allocation2 + $0x1b0] sm:$0xff]  ;;  %v4889_v28 = vld [vmem:[#allocation2 + $0x1a8] sm:$0xff] }
 0x52c   : > { %6091 = vmatprep.mubr.bf16.mxu1 %v4915_v29  ;;  %8640 = vmatpush3.bf16.msra.mxu0 %v9037_v6  ;;  %v4917_v3 = vpack.c.bf16 %v4890_v21, %v4889_v28 }
 0x52d   : > { %8641 = vmatprep.subr.bf16.mxu0 %v9038_v15 }
 0x530   : > { %8642 = vmatpush3.bf16.msra.mxu0 %v9038_v15 }
 0x531   : > { %8643 = vmatprep.subr.bf16.mxu0 %v9039_v62 }
 0x532   : > { %5939 = vmatmul.mubr.bf16.gmra.mrb[92].mxu0 %v4915_v29  ;;  %v4908_v29 = vld [vmem:[#allocation2 + $0x2d0] sm:$0xff] }
 0x533   : > { %6092 = vmatmul.mubr.bf16.gmra.mrb[120].mxu1 %v10954_v34  ;;  %5946 = vmatprep.mubr.bf16.mxu0 %v11067_v10  ;;  %v4894_v34 = vld [vmem:[#allocation2 + $0x1f0] sm:$0xff]  ;;  %v4893_v10 = vld [vmem:[#allocation2 + $0x1e8] sm:$0xff] }
 0x534   : > { %6099 = vmatprep.mubr.bf16.mxu1 %v4916_v37  ;;  %8644 = vmatpush3.bf16.msra.mxu0 %v9039_v62  ;;  %v4919_v26 = vpack.c.bf16 %v4894_v34, %v4893_v10  ;;  %v4815_v10 = vld [vmem:[#allocation2 + $0x2e9] sm:$0xff] }
 0x535   : > { %8645 = vmatprep.subr.bf16.mxu0 %v9040_v54 }
 0x538   : > { %8646 = vmatpush3.bf16.msra.mxu0 %v9040_v54 }
 0x53a   : > { %5947 = vmatmul.mubr.bf16.gmra.mrb[96].mxu0 %v4916_v37 }
 0x53b   : > { %6100 = vmatmul.mubr.bf16.gmra.mrb[124].mxu1 %v10992_v24  ;;  %5954 = vmatprep.mubr.bf16.mxu0 %v11094_v8  ;;  %v4896_v24 = vld [vmem:[#allocation2 + $0x210] sm:$0xff]  ;;  %v4895_v8 = vld [vmem:[#allocation2 + $0x208] sm:$0xff] }
 0x53c   : > { %6107 = vmatprep.mubr.bf16.mxu1 %v4917_v3  ;;  %v4920_v41 = vpack.c.bf16 %v4896_v24, %v4895_v8 }
 0x542   : > { %5955 = vmatmul.mubr.bf16.gmra.mrb[100].mxu0 %v4917_v3 }
 0x543   : > { %6108 = vmatmul.mubr.bf16.gmra.mrb[128].mxu1 %v11033_v44  ;;  %5962 = vmatprep.mubr.bf16.mxu0 %v11104_v1  ;;  %v4898_v44 = vld [vmem:[#allocation2 + $0x230] sm:$0xff]  ;;  %v4897_v1 = vld [vmem:[#allocation2 + $0x228] sm:$0xff] }
 0x544   : > { %6115 = vmatprep.mubr.bf16.mxu1 %v4918_v45  ;;  %v4921_v38 = vpack.c.bf16 %v4898_v44, %v4897_v1  ;;  %v4910_v44 = vld [vmem:[#allocation2 + $0x2f0] sm:$0xff] }
 0x54a   : > { %5963 = vmatmul.mubr.bf16.gmra.mrb[104].mxu0 %v4918_v45 }
 0x54b   : > { %6116 = vmatmul.mubr.bf16.gmra.mrb[132].mxu1 %v11071_v18  ;;  %5970 = vmatprep.mubr.bf16.mxu0 %v11114_v40  ;;  %v4900_v18 = vld [vmem:[#allocation2 + $0x250] sm:$0xff]  ;;  %v4899_v40 = vld [vmem:[#allocation2 + $0x248] sm:$0xff] }
 0x54c   : > { %6123 = vmatprep.mubr.bf16.mxu1 %v4919_v26  ;;  %v4922_v25 = vpack.c.bf16 %v4900_v18, %v4899_v40 }
 0x552   : > { %5971 = vmatmul.mubr.bf16.gmra.mrb[108].mxu0 %v4919_v26  ;;  %v4816_v26 = vld [vmem:[#allocation2 + $0x2f1] sm:$0xff] }
 0x553   : > { %6124 = vmatmul.mubr.bf16.gmra.mrb[136].mxu1 %v11097_v30  ;;  %5978 = vmatprep.mubr.bf16.mxu0 %v11124_v7  ;;  %v4902_v30 = vld [vmem:[#allocation2 + $0x270] sm:$0xff]  ;;  %v4901_v7 = vld [vmem:[#allocation2 + $0x268] sm:$0xff] }
 0x554   : > { %6131 = vmatprep.mubr.bf16.mxu1 %v4920_v41  ;;  %v4923_v4 = vpack.c.bf16 %v4902_v30, %v4901_v7  ;;  %v4909_v30 = vld [vmem:[#allocation2 + $0x2e8] sm:$0xff] }
 0x55a   : > { %5979 = vmatmul.mubr.bf16.gmra.mrb[112].mxu0 %v4920_v41 }
 0x55b   : > { %6132 = vmatmul.mubr.bf16.gmra.mrb[140].mxu1 %v11107_v19  ;;  %5986 = vmatprep.mubr.bf16.mxu0 %v11134_v27  ;;  %v4904_v19 = vld [vmem:[#allocation2 + $0x290] sm:$0xff]  ;;  %v4903_v27 = vld [vmem:[#allocation2 + $0x288] sm:$0xff] }
 0x55c   : > { %6139 = vmatprep.mubr.bf16.mxu1 %v4921_v38  ;;  %v4924_v5 = vpack.c.bf16 %v4904_v19, %v4903_v27  ;;  %v4927_v27 = vpack.c.bf16 %v4910_v44, %v4909_v30 }
 0x562   : > { %5987 = vmatmul.mubr.bf16.gmra.mrb[116].mxu0 %v4921_v38 }
 0x563   : > { %6140 = vmatmul.mubr.bf16.gmra.mrb[144].mxu1 %v11117_v35  ;;  %5994 = vmatprep.mubr.bf16.mxu0 %v11148_v53  ;;  %v11216_v35 = vld [vmem:[%s11673_s6] ss:$0 sm:$0xff] }
 0x564   : > { %6147 = vmatprep.mubr.bf16.mxu1 %v4922_v25  ;;  %v5595_v32 = vadd.f32 %v11144_v48, %v11216_v35  ;;  %v5598_v63 = vadd.f32 %v11146_v50, %v11216_v35 }
 0x56a   : > { %5995 = vmatmul.mubr.bf16.gmra.mrb[120].mxu0 %v4922_v25 }
 0x56b   : > { %6148 = vmatmul.mubr.bf16.gmra.mrb[148].mxu1 %v11127_v42  ;;  %6002 = vmatprep.mubr.bf16.mxu0 %v11158_v39 }
 0x56c   : > { %6155 = vmatprep.mubr.bf16.mxu1 %v4923_v4 }
 0x572   : > { %6003 = vmatmul.mubr.bf16.gmra.mrb[124].mxu0 %v4923_v4 }
 0x573   : > { %6156 = vmatmul.mubr.bf16.gmra.mrb[152].mxu1 %v11137_v36  ;;  %6010 = vmatprep.mubr.bf16.mxu0 %v11168_v59 }
 0x574   : > { %6163 = vmatprep.mubr.bf16.mxu1 %v4924_v5 }
 0x575   : > { %v8076_v53 = vpop.f32.mrb[20].mxu0 }
 0x576   : > { %v8182_v57 = vpop.f32.mrb[48].mxu1  ;;  %v8077_v42 = vpop.f32.mrb[21].mxu0 }
 0x577   : > { %v8078_v61 = vadd.f32 %v8077_v42, %v8076_v53  ;;  %v8183_v39 = vpop.f32.mrb[49].mxu1  ;;  %v8079_v13 = vpop.f32.mrb[22].mxu0 }
 0x578   : > { %v8184_v22 = vadd.f32 %v8183_v39, %v8182_v57  ;;  %v8185_v36 = vpop.f32.mrb[50].mxu1  ;;  %v8080_v46 = vpop.f32.mrb[23].mxu0  ;;  %v4930_v39 = vld [vmem:[#allocation2 + $0x131] sm:$0xff] }
 0x579   : > { %v8081_v59 = vadd.f32 %v8080_v46, %v8079_v13  ;;  %v8186_v23 = vpop.f32.mrb[51].mxu1  ;;  %v5603_v50 = vadd.f32 %v8078_v61, %v11216_v35  ;;  %v4929_v61 = vld [vmem:[#allocation2 + $0x129] sm:$0xff] }
 0x57a   : > { %v11222_v17 = vadd.f32 %v8184_v22, %v5595_v32  ;;  %v8187_v49 = vadd.f32 %v8186_v23, %v8185_v36  ;;  %6011 = vmatmul.mubr.bf16.gmra.mrb[128].mxu0 %v4924_v5 }
 0x57b   : > { %6164 = vmatmul.mubr.bf16.gmra.mrb[156].mxu1 %v11151_v31  ;;  %6018 = vmatprep.mubr.bf16.mxu0 %v11178_v14  ;;  %v4907_v31 = vld [vmem:[#allocation2 + $0x2c8] sm:$0xff]  ;;  %v5606_v14 = vadd.f32 %v8081_v59, %v11216_v35 }
 0x57c   : > { %v11226_v33 = vadd.f32 %v8187_v49, %v5598_v63  ;;  %6171 = vmatprep.mubr.bf16.mxu1 %v4925_v2  ;;  %v4926_v3 = vpack.c.bf16 %v4908_v29, %v4907_v31  ;;  %v4961_v63 = vpack.c.bf16 %v4930_v39, %v4929_v61 }
 0x57d   : > { %v8082_v48 = vpop.f32.mrb[24].mxu0 }
 0x57e   : > { %v8188_v12 = vpop.f32.mrb[52].mxu1  ;;  %v8083_v6 = vpop.f32.mrb[25].mxu0 }
 0x57f   : > { %v8084_v47 = vadd.f32 %v8083_v6, %v8082_v48  ;;  %v8189_v60 = vpop.f32.mrb[53].mxu1  ;;  %v8085_v15 = vpop.f32.mrb[26].mxu0  ;;  %v4863_v6 = vld [vmem:[#allocation2 + $0x307] sm:$0xff] }
 0x580   : > { %v8190_v62 = vadd.f32 %v8189_v60, %v8188_v12  ;;  %v8191_v43 = vpop.f32.mrb[54].mxu1  ;;  %v8086_v55 = vpop.f32.mrb[27].mxu0 }
 0x581   : > { %v8087_v54 = vadd.f32 %v8086_v55, %v8085_v15  ;;  %v8192_v37 = vpop.f32.mrb[55].mxu1  ;;  %v5611_v1 = vadd.f32 %v8084_v47, %v11216_v35  ;;  %v4864_v47 = vld [vmem:[#allocation2 + $0x30f] sm:$0xff] }
 0x582   : > { %v11230_v21 = vadd.f32 %v8190_v62, %v5603_v50  ;;  %v8193_v28 = vadd.f32 %v8192_v37, %v8191_v43  ;;  %6019 = vmatmul.mubr.bf16.gmra.mrb[132].mxu0 %v4925_v2  ;;  %v4931_v15 = vld [vmem:[#allocation2 + $0x149] sm:$0xff]  ;;  %v4934_v43 = vld [vmem:[#allocation2 + $0x171] sm:$0xff]  ;;  %v4880_v31 = vpack.c.bf16 %v4864_v47, %v4863_v6 }
 0x583   : > { %6172 = vmatmul.mubr.bf16.gmra.mrb[160].mxu1 %v11161_v58  ;;  %6026 = vmatprep.mubr.bf16.mxu0 %v11186_v16  ;;  %v11237_v16 = vpack.c.bf16 %v4816_v26, %v4815_v10  ;;  %v5614_v7 = vadd.f32 %v8087_v54, %v11216_v35  ;;  %v4933_v62 = vld [vmem:[#allocation2 + $0x169] sm:$0xff] }
 0x584   : > { %v11234_v9 = vadd.f32 %v8193_v28, %v5606_v14  ;;  %6179 = vmatprep.mubr.bf16.mxu1 %v4926_v3  ;;  %v4963_v10 = vpack.c.bf16 %v4934_v43, %v4933_v62 }
 0x585   : > { %v8088_v20 = vpop.f32.mrb[28].mxu0 }
 0x586   : > { %v8194_v45 = vpop.f32.mrb[56].mxu1  ;;  %v8089_v34 = vpop.f32.mrb[29].mxu0 }
 0x587   : > { %v8090_v24 = vadd.f32 %v8089_v34, %v8088_v20  ;;  %v8195_v8 = vpop.f32.mrb[57].mxu1  ;;  %v8091_v41 = vpop.f32.mrb[30].mxu0 }
 0x588   : > { %v8196_v38 = vadd.f32 %v8195_v8, %v8194_v45  ;;  %v8197_v18 = vpop.f32.mrb[58].mxu1  ;;  %v8092_v40 = vpop.f32.mrb[31].mxu0 }
 0x589   : > { %v8093_v58 = vadd.f32 %v8092_v40, %v8091_v41  ;;  %v8198_v25 = vpop.f32.mrb[59].mxu1  ;;  %v5619_v22 = vadd.f32 %v8090_v24, %v11216_v35 }
 0x58a   : > { %v11240_v4 = vadd.f32 %v8196_v38, %v5611_v1  ;;  %v8199_v19 = vadd.f32 %v8198_v25, %v8197_v18  ;;  %6027 = vmatmul.mubr.bf16.gmra.mrb[136].mxu0 %v4926_v3  ;;  %v4935_v1 = vld [vmem:[#allocation2 + $0x189] sm:$0xff]  ;;  %v4936_v38 = vld [vmem:[#allocation2 + $0x191] sm:$0xff] }
 0x58b   : > { %6180 = vmatmul.mubr.bf16.gmra.mrb[164].mxu1 %v11171_v52  ;;  %6034 = vmatprep.mubr.bf16.mxu0 %v11237_v16  ;;  %v4928_v52 = vpack.c.bf16 %v11028_v0, %v11028_v0  ;;  %v5622_v49 = vadd.f32 %v8093_v58, %v11216_v35  ;;  %v4932_v0 = vld [vmem:[#allocation2 + $0x151] sm:$0xff]  ;;  %v4937_v58 = vld [vmem:[#allocation2 + $0x1a9] sm:$0xff]  ;;  %v4964_v61 = vpack.c.bf16 %v4936_v38, %v4935_v1 }
 0x58c   : > { %v11244_v5 = vadd.f32 %v8199_v19, %v5614_v7  ;;  %6187 = vmatprep.mubr.bf16.mxu1 %v4927_v27  ;;  %v4962_v20 = vpack.c.bf16 %v4932_v0, %v4931_v15  ;;  %v4938_v25 = vld [vmem:[#allocation2 + $0x1b1] sm:$0xff] }
 0x58d   : > { %v8094_v53 = vpop.f32.mrb[32].mxu0 }
 0x58e   : > { %v8200_v57 = vpop.f32.mrb[60].mxu1  ;;  %v8095_v42 = vpop.f32.mrb[33].mxu0 }
 0x58f   : > { %v8096_v13 = vadd.f32 %v8095_v42, %v8094_v53  ;;  %v8201_v51 = vpop.f32.mrb[61].mxu1  ;;  %v8097_v32 = vpop.f32.mrb[34].mxu0 }
 0x590   : > { %v8202_v36 = vadd.f32 %v8201_v51, %v8200_v57  ;;  %v8203_v46 = vpop.f32.mrb[62].mxu1  ;;  %v8098_v59 = vpop.f32.mrb[35].mxu0  ;;  %v4965_v51 = vpack.c.bf16 %v4938_v25, %v4937_v58 }
 0x591   : > { %v8099_v23 = vadd.f32 %v8098_v59, %v8097_v32  ;;  %v8204_v11 = vpop.f32.mrb[63].mxu1  ;;  %v5627_v14 = vadd.f32 %v8096_v13, %v11216_v35 }
 0x592   : > { %v11250_v2 = vadd.f32 %v8202_v36, %v5619_v22  ;;  %v8205_v48 = vadd.f32 %v8204_v11, %v8203_v46  ;;  %6035 = vmatmul.mubr.bf16.gmra.mrb[140].mxu0 %v4927_v27 }
 0x593   : > { %6188 = vmatmul.mubr.bf16.gmra.mrb[168].mxu1 %v11181_v56  ;;  %8647 = vmatprep.mubr.bf16.mxu0 %v4961_v63  ;;  %v5630_v26 = vadd.f32 %v8099_v23, %v11216_v35  ;;  %v4940_v23 = vld [vmem:[#allocation2 + $0x1d1] sm:$0xff] }
 0x594   : > { %v11253_v12 = vadd.f32 %v8205_v48, %v5622_v49  ;;  %6195 = vmatprep.mubr.bf16.mxu1 %v4928_v52  ;;  %v4939_v52 = vld [vmem:[#allocation2 + $0x1c9] sm:$0xff]  ;;  %v4942_v48 = vld [vmem:[#allocation2 + $0x1f1] sm:$0xff] }
 0x595   : > { %v8100_v60 = vpop.f32.mrb[36].mxu0  ;;  %v4941_v49 = vld [vmem:[#allocation2 + $0x1e9] sm:$0xff]  ;;  %v4966_v62 = vpack.c.bf16 %v4940_v23, %v4939_v52 }
 0x596   : > { %v8206_v29 = vpop.f32.mrb[64].mxu1  ;;  %v8101_v50 = vpop.f32.mrb[37].mxu0 }
 0x597   : > { %v8102_v55 = vadd.f32 %v8101_v50, %v8100_v60  ;;  %v8207_v54 = vpop.f32.mrb[65].mxu1  ;;  %v8103_v37 = vpop.f32.mrb[38].mxu0 }
 0x598   : > { %v8208_v56 = vadd.f32 %v8207_v54, %v8206_v29  ;;  %v8209_v28 = vpop.f32.mrb[66].mxu1  ;;  %v8104_v3 = vpop.f32.mrb[39].mxu0  ;;  %v4967_v54 = vpack.c.bf16 %v4942_v48, %v4941_v49 }
 0x599   : > { %v8105_v45 = vadd.f32 %v8104_v3, %v8103_v37  ;;  %v8210_v34 = vpop.f32.mrb[67].mxu1  ;;  %v5635_v27 = vadd.f32 %v8102_v55, %v11216_v35  ;;  %v4943_v3 = vld [vmem:[#allocation2 + $0x209] sm:$0xff] }
 0x59a   : > { %v11257_v24 = vadd.f32 %v8208_v56, %v5627_v14  ;;  %v8211_v8 = vadd.f32 %v8210_v34, %v8209_v28  ;;  %8648 = vmatmul.mubr.bf16.vlgmr.msra.gmra.mrb[144].mxu0 %v4962_v20  ;;  %v4944_v20 = vld [vmem:[#allocation2 + $0x211] sm:$0xff] }
 0x59b   : > { %6196 = vmatmul.mubr.bf16.gmra.mrb[172].mxu1 %v4880_v31  ;;  %8651 = vmatprep.mubr.bf16.mxu0 %v4963_v10  ;;  %v5638_v32 = vadd.f32 %v8105_v45, %v11216_v35  ;;  %v4945_v10 = vld [vmem:[#allocation2 + $0x229] sm:$0xff]  ;;  %v4968_v25 = vpack.c.bf16 %v4944_v20, %v4943_v3  ;;  %v4954_v20 = vld [vmem:[#allocation2 + $0x2b1] sm:$0xff] }
 0x59c   : > { %v11259_v41 = vadd.f32 %v8211_v8, %v5630_v26  ;;  %v4946_v26 = vld [vmem:[#allocation2 + $0x231] sm:$0xff]  ;;  %v4953_v3 = vld [vmem:[#allocation2 + $0x2a9] sm:$0xff] }
 0x59d   : > { %v8106_v44 = vpop.f32.mrb[40].mxu0 }
 0x59e   : > { %v8212_v18 = vpop.f32.mrb[68].mxu1  ;;  %v8107_v40 = vpop.f32.mrb[41].mxu0 }
 0x59f   : > { %v8108_v30 = vadd.f32 %v8107_v40, %v8106_v44  ;;  %v8213_v7 = vpop.f32.mrb[69].mxu1  ;;  %v8109_v19 = vpop.f32.mrb[42].mxu0 }
 0x5a0   : > { %v8214_v53 = vadd.f32 %v8213_v7, %v8212_v18  ;;  %v8215_v57 = vpop.f32.mrb[70].mxu1  ;;  %v8110_v42 = vpop.f32.mrb[43].mxu0 }
 0x5a1   : > { %v8111_v39 = vadd.f32 %v8110_v42, %v8109_v19  ;;  %v8216_v13 = vpop.f32.mrb[71].mxu1  ;;  %v5643_v15 = vadd.f32 %v8108_v30, %v11216_v35  ;;  %v4969_v19 = vpack.c.bf16 %v4946_v26, %v4945_v10 }
 0x5a2   : > { %v11263_v22 = vadd.f32 %v8214_v53, %v5635_v27  ;;  %v8217_v36 = vadd.f32 %v8216_v13, %v8215_v57  ;;  %8652 = vmatmul.mubr.bf16.gmra.mrb[148].mxu0 %v4964_v61  ;;  %v4948_v13 = vld [vmem:[#allocation2 + $0x251] sm:$0xff] }
 0x5a3   : > { %8655 = vmatprep.mubr.bf16.mxu0 %v4965_v51  ;;  %v5646_v37 = vadd.f32 %v8111_v39, %v11216_v35  ;;  %v4947_v39 = vld [vmem:[#allocation2 + $0x249] sm:$0xff] }
 0x5a4   : > { %v11265_v46 = vadd.f32 %v8217_v36, %v5638_v32  ;;  %v4949_v36 = vld [vmem:[#allocation2 + $0x269] sm:$0xff] }
 0x5a5   : > { %v8112_v59 = vpop.f32.mrb[44].mxu0 }
 0x5a6   : > { %v8218_v11 = vpop.f32.mrb[72].mxu1  ;;  %v8113_v63 = vpop.f32.mrb[45].mxu0 }
 0x5a7   : > { %v8114_v6 = vadd.f32 %v8113_v63, %v8112_v59  ;;  %v8219_v47 = vpop.f32.mrb[73].mxu1  ;;  %v8115_v60 = vpop.f32.mrb[46].mxu0  ;;  %v4950_v59 = vld [vmem:[#allocation2 + $0x271] sm:$0xff] }
 0x5a8   : > { %v8220_v0 = vadd.f32 %v8219_v47, %v8218_v11  ;;  %v8221_v29 = vpop.f32.mrb[74].mxu1  ;;  %v8116_v50 = vpop.f32.mrb[47].mxu0  ;;  %v4970_v47 = vpack.c.bf16 %v4948_v13, %v4947_v39  ;;  %v4956_v39 = vld [vmem:[#allocation2 + $0x2d1] sm:$0xff] }
 0x5a9   : > { %v8117_v43 = vadd.f32 %v8116_v50, %v8115_v60  ;;  %v8222_v55 = vpop.f32.mrb[75].mxu1  ;;  %v5651_v38 = vadd.f32 %v8114_v6, %v11216_v35 }
 0x5aa   : > { %v11269_v31 = vadd.f32 %v8220_v0, %v5643_v15  ;;  %v8223_v14 = vadd.f32 %v8222_v55, %v8221_v29  ;;  %8656 = vmatmul.mubr.bf16.gmra.mrb[152].mxu0 %v4966_v62  ;;  %v4971_v0 = vpack.c.bf16 %v4950_v59, %v4949_v36 }
 0x5ab   : > { %8659 = vmatprep.mubr.bf16.mxu0 %v4967_v54  ;;  %v5654_v27 = vadd.f32 %v8117_v43, %v11216_v35  ;;  %v4951_v54 = vld [vmem:[#allocation2 + $0x289] sm:$0xff] }
 0x5ac   : > { %v11271_v56 = vadd.f32 %v8223_v14, %v5646_v37  ;;  %v4952_v37 = vld [vmem:[#allocation2 + $0x291] sm:$0xff] }
 0x5ad   : > { %v8118_v28 = vpop.f32.mrb[48].mxu0 }
 0x5ae   : > { %v8224_v45 = vpop.f32.mrb[76].mxu1  ;;  %v8119_v34 = vpop.f32.mrb[49].mxu0 }
 0x5af   : > { %v8120_v8 = vadd.f32 %v8119_v34, %v8118_v28  ;;  %v8225_v44 = vpop.f32.mrb[77].mxu1  ;;  %v8121_v1 = vpop.f32.mrb[50].mxu0 }
 0x5b0   : > { %v8226_v18 = vadd.f32 %v8225_v44, %v8224_v45  ;;  %v8227_v40 = vpop.f32.mrb[78].mxu1  ;;  %v8122_v58 = vpop.f32.mrb[51].mxu0 }
 0x5b1   : > { %v8123_v30 = vadd.f32 %v8122_v58, %v8121_v1  ;;  %v8228_v7 = vpop.f32.mrb[79].mxu1  ;;  %v5659_v63 = vadd.f32 %v8120_v8, %v11216_v35  ;;  %v4973_v58 = vpack.c.bf16 %v4954_v20, %v4953_v3 }
 0x5b2   : > { %v11275_v53 = vadd.f32 %v8226_v18, %v5651_v38  ;;  %v8229_v57 = vadd.f32 %v8228_v7, %v8227_v40  ;;  %8660 = vmatmul.mubr.bf16.gmra.mrb[156].mxu0 %v4968_v25  ;;  %v4972_v38 = vpack.c.bf16 %v4952_v37, %v4951_v54 }
 0x5b3   : > { %8663 = vmatprep.mubr.bf16.mxu0 %v4969_v19  ;;  %v5662_v29 = vadd.f32 %v8123_v30, %v11216_v35  ;;  %v9041_v19 = vld [vmem:[#allocation11] sm:$0xff]  }
 0x5b4   : > { %v11277_v42 = vadd.f32 %v8229_v57, %v5654_v27  ;;  %8680 = vmatpush3.bf16.msra.mxu1 %v9041_v19 }
 0x5b5   : > { %v8124_v61 = vpop.f32.mrb[52].mxu0 }
 0x5b6   : > { %v8230_v51 = vpop.f32.mrb[80].mxu1  ;;  %v8125_v32 = vpop.f32.mrb[53].mxu0 }
 0x5b7   : > { %v8126_v52 = vadd.f32 %v8125_v32, %v8124_v61  ;;  %v8231_v23 = vpop.f32.mrb[81].mxu1  ;;  %v8127_v11 = vpop.f32.mrb[54].mxu0  ;;  %v4955_v61 = vld [vmem:[#allocation2 + $0x2c9] sm:$0xff]  ;;  %v11291_v32 = vld [vmem:[#allocation2] sm:$0xff] }
 0x5b8   : > { %v8232_v49 = vadd.f32 %v8231_v23, %v8230_v51  ;;  %v8233_v48 = vpop.f32.mrb[82].mxu1  ;;  %v8128_v6 = vpop.f32.mrb[55].mxu0  ;;  %8681 = vmatprep.subr.bf16.mxu1 %v11291_v32  ;;  %8695 = vmatprep.mubr.msk.bf16.mxu1 %vm9374_vm0, %v11291_v32 }
 0x5b9   : > { %v8129_v60 = vadd.f32 %v8128_v6, %v8127_v11  ;;  %v8234_v15 = vpop.f32.mrb[83].mxu1  ;;  %v5667_v26 = vadd.f32 %v8126_v52, %v11216_v35 }
 0x5ba   : > { %v11281_v50 = vadd.f32 %v8232_v49, %v5659_v63  ;;  %v8235_v62 = vadd.f32 %v8234_v15, %v8233_v48  ;;  %8664 = vmatmul.mubr.bf16.gmra.mrb[160].mxu0 %v4970_v47  ;;  %v4974_v48 = vpack.c.bf16 %v4956_v39, %v4955_v61 }
 0x5bb   : > { %8667 = vmatprep.mubr.bf16.mxu0 %v4971_v0  ;;  %v5670_v25 = vadd.f32 %v8129_v60, %v11216_v35 }
 0x5bc   : > { %v11283_v43 = vadd.f32 %v8235_v62, %v5662_v29  ;;  %v4959_v29 = vld [vmem:[#allocation2 + $0x309] sm:$0xff]  ;;  %v4960_v62 = vld [vmem:[#allocation2 + $0x311] sm:$0xff] }
 0x5bd   : > { %v8130_v55 = vpop.f32.mrb[56].mxu0 }
 0x5be   : > { %v8236_v14 = vpop.f32.mrb[84].mxu1  ;;  %v8131_v28 = vpop.f32.mrb[57].mxu0 }
 0x5bf   : > { %v8132_v45 = vadd.f32 %v8131_v28, %v8130_v55  ;;  %v8237_v34 = vpop.f32.mrb[85].mxu1  ;;  %v8133_v10 = vpop.f32.mrb[58].mxu0  ;;  %v4976_v28 = vpack.c.bf16 %v4960_v62, %v4959_v29 }
 0x5c0   : > { %v8238_v8 = vadd.f32 %v8237_v34, %v8236_v14  ;;  %v8239_v44 = vpop.f32.mrb[86].mxu1  ;;  %v8134_v1 = vpop.f32.mrb[59].mxu0 }
 0x5c1   : > { %v8135_v18 = vadd.f32 %v8134_v1, %v8133_v10  ;;  %v8240_v40 = vpop.f32.mrb[87].mxu1  ;;  %v5675_v23 = vadd.f32 %v8132_v45, %v11216_v35 }
 0x5c2   : > { %v11287_v30 = vadd.f32 %v8238_v8, %v5667_v26  ;;  %v8241_v7 = vadd.f32 %v8240_v40, %v8239_v44  ;;  %8668 = vmatmul.mubr.bf16.gmra.mrb[164].mxu0 %v4972_v38  ;;  %v9042_v40 = vld [vmem:[#allocation11 + $0x8] sm:$0xff]  }
 0x5c3   : > { %8671 = vmatprep.mubr.bf16.mxu0 %v4973_v58  ;;  %v5678_v60 = vadd.f32 %v8135_v18, %v11216_v35  ;;  %8682 = vmatpush3.bf16.msra.mxu1 %v9042_v40 }
 0x5c4   : > { %v11289_v27 = vadd.f32 %v8241_v7, %v5670_v25  ;;  %8683 = vmatprep.subr.bf16.mxu1 %v11291_v32 }
 0x5c5   : > { %v8136_v57 = vpop.f32.mrb[60].mxu0 }
 0x5c6   : > { %v8242_v13 = vpop.f32.mrb[88].mxu1  ;;  %v8137_v51 = vpop.f32.mrb[61].mxu0 }
 0x5c7   : > { %v8138_v36 = vadd.f32 %v8137_v51, %v8136_v57  ;;  %v8243_v59 = vpop.f32.mrb[89].mxu1  ;;  %v8139_v52 = vpop.f32.mrb[62].mxu0 }
 0x5c8   : > { %v8244_v11 = vadd.f32 %v8243_v59, %v8242_v13  ;;  %v8245_v63 = vpop.f32.mrb[90].mxu1  ;;  %v8140_v49 = vpop.f32.mrb[63].mxu0 }
 0x5c9   : > { %v8141_v6 = vadd.f32 %v8140_v49, %v8139_v52  ;;  %v8246_v47 = vpop.f32.mrb[91].mxu1  ;;  %v5683_v34 = vadd.f32 %v8138_v36, %v11216_v35 }
 0x5ca   : > { %v11296_v15 = vadd.f32 %v8244_v11, %v5675_v23  ;;  %v8247_v0 = vadd.f32 %v8246_v47, %v8245_v63  ;;  %8672 = vmatmul.mubr.bf16.gmra.mrb[168].mxu0 %v4974_v48 }
 0x5cb   : > { %8675 = vmatprep.mubr.bf16.mxu0 %v11237_v16  ;;  %v5686_v16 = vadd.f32 %v8141_v6, %v11216_v35 }
 0x5cc   : > { %v11299_v55 = vadd.f32 %v8247_v0, %v5678_v60 }
 0x5cd   : > { %v8142_v54 = vpop.f32.mrb[64].mxu0 }
 0x5ce   : > { %v8248_v37 = vpop.f32.mrb[92].mxu1  ;;  %v8143_v14 = vpop.f32.mrb[65].mxu0 }
 0x5cf   : > { %v8144_v3 = vadd.f32 %v8143_v14, %v8142_v54  ;;  %v8249_v20 = vpop.f32.mrb[93].mxu1  ;;  %v8145_v45 = vpop.f32.mrb[66].mxu0 }
 0x5d0   : > { %v8250_v10 = vadd.f32 %v8249_v20, %v8248_v37  ;;  %v8251_v26 = vpop.f32.mrb[94].mxu1  ;;  %v8146_v8 = vpop.f32.mrb[67].mxu0 }
 0x5d1   : > { %v8147_v44 = vadd.f32 %v8146_v8, %v8145_v45  ;;  %v8252_v1 = vpop.f32.mrb[95].mxu1  ;;  %v5691_v13 = vadd.f32 %v8144_v3, %v11216_v35 }
 0x5d2   : > { %v11303_v38 = vadd.f32 %v8250_v10, %v5683_v34  ;;  %v8253_v18 = vadd.f32 %v8252_v1, %v8251_v26  ;;  %8676 = vmatmul.mubr.bf16.gmra.mrb[172].mxu0 %v4976_v28  ;;  %v9043_v26 = vld [vmem:[#allocation11 + $0x10] sm:$0xff]  }
 0x5d3   : > { %v5694_v11 = vadd.f32 %v8147_v44, %v11216_v35  ;;  %8684 = vmatpush3.bf16.msra.mxu1 %v9043_v26 }
 0x5d4   : > { %v11305_v58 = vadd.f32 %v8253_v18, %v5686_v16  ;;  %8685 = vmatprep.subr.bf16.mxu1 %v11291_v32 }
 0x5d5   : > { %v8148_v25 = vpop.f32.mrb[68].mxu0 }
 0x5d6   : > { %v8254_v7 = vpop.f32.mrb[96].mxu1  ;;  %v8149_v19 = vpop.f32.mrb[69].mxu0 }
 0x5d7   : > { %v8150_v57 = vadd.f32 %v8149_v19, %v8148_v25  ;;  %v8255_v61 = vpop.f32.mrb[97].mxu1  ;;  %v8151_v39 = vpop.f32.mrb[70].mxu0 }
 0x5d8   : > { %v8256_v51 = vadd.f32 %v8255_v61, %v8254_v7  ;;  %v8257_v36 = vpop.f32.mrb[98].mxu1  ;;  %v8152_v59 = vpop.f32.mrb[71].mxu0 }
 0x5d9   : > { %v8153_v52 = vadd.f32 %v8152_v59, %v8151_v39  ;;  %v8258_v23 = vpop.f32.mrb[99].mxu1  ;;  %v5699_v54 = vadd.f32 %v8150_v57, %v11216_v35 }
 0x5da   : > { %v11310_v63 = vadd.f32 %v8256_v51, %v5691_v13  ;;  %v8259_v49 = vadd.f32 %v8258_v23, %v8257_v36 }
 0x5db   : > { %v5702_v45 = vadd.f32 %v8153_v52, %v11216_v35 }
 0x5dc   : > { %v11312_v48 = vadd.f32 %v8259_v49, %v5694_v11 }
 0x5dd   : > { %v8154_v6 = vpop.f32.mrb[72].mxu0 }
 0x5de   : > { %v8260_v47 = vpop.f32.mrb[100].mxu1  ;;  %v8155_v60 = vpop.f32.mrb[73].mxu0 }
 0x5df   : > { %v8156_v0 = vadd.f32 %v8155_v60, %v8154_v6  ;;  %v8261_v29 = vpop.f32.mrb[101].mxu1  ;;  %v8157_v62 = vpop.f32.mrb[74].mxu0 }
 0x5e0   : > { %v8262_v37 = vadd.f32 %v8261_v29, %v8260_v47  ;;  %v8263_v14 = vpop.f32.mrb[102].mxu1  ;;  %v8158_v28 = vpop.f32.mrb[75].mxu0 }
 0x5e1   : > { %v8159_v3 = vadd.f32 %v8158_v28, %v8157_v62  ;;  %v8264_v20 = vpop.f32.mrb[103].mxu1  ;;  %v5707_v7 = vadd.f32 %v8156_v0, %v11216_v35 }
 0x5e2   : > { %v11316_v34 = vadd.f32 %v8262_v37, %v5699_v54  ;;  %v8265_v10 = vadd.f32 %v8264_v20, %v8263_v14 }
 0x5e3   : > { %v5710_v51 = vadd.f32 %v8159_v3, %v11216_v35 }
 0x5e4   : > { %v11318_v8 = vadd.f32 %v8265_v10, %v5702_v45 }
 0x5e5   : > { %v8160_v44 = vpop.f32.mrb[76].mxu0 }
 0x5e6   : > { %v8266_v1 = vpop.f32.mrb[104].mxu1  ;;  %v8161_v16 = vpop.f32.mrb[77].mxu0 }
 0x5e7   : > { %v8162_v18 = vadd.f32 %v8161_v16, %v8160_v44  ;;  %v8267_v40 = vpop.f32.mrb[105].mxu1  ;;  %v8163_v25 = vpop.f32.mrb[78].mxu0 }
 0x5e8   : > { %v8268_v19 = vadd.f32 %v8267_v40, %v8266_v1  ;;  %v8269_v57 = vpop.f32.mrb[106].mxu1  ;;  %v8164_v61 = vpop.f32.mrb[79].mxu0 }
 0x5e9   : > { %v8165_v39 = vadd.f32 %v8164_v61, %v8163_v25  ;;  %v8270_v13 = vpop.f32.mrb[107].mxu1  ;;  %v5715_v0 = vadd.f32 %v8162_v18, %v11216_v35 }
 0x5ea   : > { %v11323_v36 = vadd.f32 %v8268_v19, %v5707_v7  ;;  %v8271_v59 = vadd.f32 %v8270_v13, %v8269_v57  ;;  %v9044_v7 = vld [vmem:[#allocation11 + $0x18] sm:$0xff]  }
 0x5eb   : > { %v5718_v3 = vadd.f32 %v8165_v39, %v11216_v35  ;;  %8686 = vmatpush3.bf16.msra.mxu1 %v9044_v7 }
 0x5ec   : > { %v11325_v52 = vadd.f32 %v8271_v59, %v5710_v51  ;;  %8687 = vmatprep.subr.bf16.mxu1 %v11291_v32 }
 0x5ed   : > { %v8294_v23 = vpop.f32.mrb[80].mxu0 }
 0x5ee   : > { %v8272_v11 = vpop.f32.mrb[108].mxu1  ;;  %v8295_v49 = vpop.f32.mrb[81].mxu0 }
 0x5ef   : > { %v8273_v6 = vpop.f32.mrb[109].mxu1  ;;  %v8296_v47 = vadd.f32 %v8295_v49, %v8294_v23  ;;  %v8297_v60 = vpop.f32.mrb[82].mxu0 }
 0x5f0   : > { %v8274_v29 = vadd.f32 %v8273_v6, %v8272_v11  ;;  %v8275_v62 = vpop.f32.mrb[110].mxu1  ;;  %v8298_v54 = vpop.f32.mrb[83].mxu0 }
 0x5f1   : > { %v5917_v37 = vadd.f32 %v8296_v47, %v11222_v17  ;;  %v8276_v14 = vpop.f32.mrb[111].mxu1  ;;  %v8299_v28 = vadd.f32 %v8298_v54, %v8297_v60 }
 0x5f2   : > { %v11330_v20 = vadd.f32 %v8274_v29, %v5715_v0  ;;  %v8277_v45 = vadd.f32 %v8276_v14, %v8275_v62 }
 0x5f3   : > { %v5920_v10 = vadd.f32 %v8299_v28, %v11226_v33 }
 0x5f4   : > { %v11333_v26 = vadd.f32 %v8277_v45, %v5718_v3 }
 0x5f5   : > { %v8300_v44 = vpop.f32.mrb[84].mxu0 }
 0x5f6   : > { %v8406_v1 = vpop.f32.mrb[112].mxu1  ;;  %v8301_v16 = vpop.f32.mrb[85].mxu0 }
 0x5f7   : > { %v8302_v18 = vadd.f32 %v8301_v16, %v8300_v44  ;;  %v8407_v40 = vpop.f32.mrb[113].mxu1  ;;  %v8303_v25 = vpop.f32.mrb[86].mxu0 }
 0x5f8   : > { %v8408_v19 = vadd.f32 %v8407_v40, %v8406_v1  ;;  %v8409_v17 = vpop.f32.mrb[114].mxu1  ;;  %v8304_v57 = vpop.f32.mrb[87].mxu0  ;;  %v9045_v40 = vld [vmem:[#allocation11 + $0x20] sm:$0xff]  }
 0x5f9   : > { %v5925_v61 = vadd.f32 %v8302_v18, %v11230_v21  ;;  %v8305_v35 = vadd.f32 %v8304_v57, %v8303_v25  ;;  %v8410_v39 = vpop.f32.mrb[115].mxu1  ;;  %8688 = vmatpush3.bf16.msra.mxu1 %v9045_v40 }
 0x5fa   : > { %v8411_v13 = vadd.f32 %v8410_v39, %v8409_v17  ;;  %v11336_v51 = vadd.f32 %v8408_v19, %v5917_v37  ;;  %8689 = vmatprep.subr.bf16.mxu1 %v11291_v32 }
 0x5fb   : > { %v5928_v33 = vadd.f32 %v8305_v35, %v11234_v9 }
 0x5fc   : > { %v11340_v59 = vadd.f32 %v8411_v13, %v5920_v10 }
 0x5fd   : > { %v8306_v23 = vpop.f32.mrb[88].mxu0 }
 0x5fe   : > { %v8412_v11 = vpop.f32.mrb[116].mxu1  ;;  %v8307_v49 = vpop.f32.mrb[89].mxu0 }
 0x5ff   : > { %v8308_v6 = vadd.f32 %v8307_v49, %v8306_v23  ;;  %v8413_v47 = vpop.f32.mrb[117].mxu1  ;;  %v8309_v60 = vpop.f32.mrb[90].mxu0 }
 0x600   : > { %v8414_v0 = vadd.f32 %v8413_v47, %v8412_v11  ;;  %v8415_v21 = vpop.f32.mrb[118].mxu1  ;;  %v8310_v29 = vpop.f32.mrb[91].mxu0 }
 0x601   : > { %v5933_v62 = vadd.f32 %v8308_v6, %v11240_v4  ;;  %v8311_v54 = vadd.f32 %v8310_v29, %v8309_v60  ;;  %v8416_v37 = vpop.f32.mrb[119].mxu1 }
 0x602   : > { %v8417_v14 = vadd.f32 %v8416_v37, %v8415_v21  ;;  %v11343_v28 = vadd.f32 %v8414_v0, %v5925_v61 }
 0x603   : > { %v5936_v9 = vadd.f32 %v8311_v54, %v11244_v5 }
 0x604   : > { %v11346_v3 = vadd.f32 %v8417_v14, %v5928_v33 }
 0x605   : > { %v8312_v45 = vpop.f32.mrb[92].mxu0 }
 0x606   : > { %v8418_v10 = vpop.f32.mrb[120].mxu1  ;;  %v8313_v44 = vpop.f32.mrb[93].mxu0 }
 0x607   : > { %v8314_v1 = vadd.f32 %v8313_v44, %v8312_v45  ;;  %v8419_v16 = vpop.f32.mrb[121].mxu1  ;;  %v8315_v18 = vpop.f32.mrb[94].mxu0 }
 0x608   : > { %v8420_v25 = vadd.f32 %v8419_v16, %v8418_v10  ;;  %v8421_v7 = vpop.f32.mrb[122].mxu1  ;;  %v8316_v19 = vpop.f32.mrb[95].mxu0  ;;  %v9046_v16 = vld [vmem:[#allocation11 + $0x28] sm:$0xff]  }
 0x609   : > { %v5941_v4 = vadd.f32 %v8314_v1, %v11250_v2  ;;  %v8317_v17 = vadd.f32 %v8316_v19, %v8315_v18  ;;  %v8422_v57 = vpop.f32.mrb[123].mxu1  ;;  %8690 = vmatpush3.bf16.msra.mxu1 %v9046_v16 }
 0x60a   : > { %v8423_v61 = vadd.f32 %v8422_v57, %v8421_v7  ;;  %v11349_v35 = vadd.f32 %v8420_v25, %v5933_v62  ;;  %8691 = vmatprep.subr.bf16.mxu1 %v11291_v32 }
 0x60b   : > { %v5944_v5 = vadd.f32 %v8317_v17, %v11253_v12 }
 0x60c   : > { %v11353_v39 = vadd.f32 %v8423_v61, %v5936_v9 }
 0x60d   : > { %v8318_v13 = vpop.f32.mrb[96].mxu0 }
 0x60e   : > { %v8424_v33 = vpop.f32.mrb[124].mxu1  ;;  %v8319_v23 = vpop.f32.mrb[97].mxu0 }
 0x60f   : > { %v8320_v11 = vadd.f32 %v8319_v23, %v8318_v13  ;;  %v8425_v49 = vpop.f32.mrb[125].mxu1  ;;  %v8321_v6 = vpop.f32.mrb[98].mxu0 }
 0x610   : > { %v8426_v47 = vadd.f32 %v8425_v49, %v8424_v33  ;;  %v8427_v2 = vpop.f32.mrb[126].mxu1  ;;  %v8322_v60 = vpop.f32.mrb[99].mxu0 }
 0x611   : > { %v5949_v0 = vadd.f32 %v8320_v11, %v11257_v24  ;;  %v8323_v21 = vadd.f32 %v8322_v60, %v8321_v6  ;;  %v8428_v29 = vpop.f32.mrb[127].mxu1 }
 0x612   : > { %v8429_v62 = vadd.f32 %v8428_v29, %v8427_v2  ;;  %v11356_v54 = vadd.f32 %v8426_v47, %v5941_v4 }
 0x613   : > { %v5952_v12 = vadd.f32 %v8323_v21, %v11259_v41 }
 0x614   : > { %v11359_v37 = vadd.f32 %v8429_v62, %v5944_v5 }
 0x615   : > { %v8324_v14 = vpop.f32.mrb[100].mxu0 }
 0x616   : > { %v8430_v9 = vpop.f32.mrb[128].mxu1  ;;  %v8325_v45 = vpop.f32.mrb[101].mxu0 }
 0x617   : > { %v8326_v10 = vadd.f32 %v8325_v45, %v8324_v14  ;;  %v8431_v44 = vpop.f32.mrb[129].mxu1  ;;  %v8327_v1 = vpop.f32.mrb[102].mxu0 }
 0x618   : > { %v8432_v18 = vadd.f32 %v8431_v44, %v8430_v9  ;;  %v8433_v40 = vpop.f32.mrb[130].mxu1  ;;  %v8328_v25 = vpop.f32.mrb[103].mxu0  ;;  %v9047_v44 = vld [vmem:[#allocation11 + $0x30] sm:$0xff]  }
 0x619   : > { %v5957_v24 = vadd.f32 %v8326_v10, %v11263_v22  ;;  %v8329_v7 = vadd.f32 %v8328_v25, %v8327_v1  ;;  %v8434_v19 = vpop.f32.mrb[131].mxu1  ;;  %8692 = vmatpush3.bf16.msra.mxu1 %v9047_v44 }
 0x61a   : > { %v8435_v4 = vadd.f32 %v8434_v19, %v8433_v40  ;;  %v11362_v17 = vadd.f32 %v8432_v18, %v5949_v0  ;;  %8693 = vmatprep.subr.bf16.mxu1 %v11291_v32 }
 0x61b   : > { %v5960_v41 = vadd.f32 %v8329_v7, %v11265_v46 }
 0x61c   : > { %v11366_v57 = vadd.f32 %v8435_v4, %v5952_v12 }
 0x61d   : > { %v8330_v61 = vpop.f32.mrb[104].mxu0 }
 0x61e   : > { %v8436_v5 = vpop.f32.mrb[132].mxu1  ;;  %v8331_v13 = vpop.f32.mrb[105].mxu0 }
 0x61f   : > { %v8332_v33 = vadd.f32 %v8331_v13, %v8330_v61  ;;  %v8437_v23 = vpop.f32.mrb[133].mxu1  ;;  %v8333_v11 = vpop.f32.mrb[106].mxu0 }
 0x620   : > { %v8438_v49 = vadd.f32 %v8437_v23, %v8436_v5  ;;  %v8439_v22 = vpop.f32.mrb[134].mxu1  ;;  %v8334_v6 = vpop.f32.mrb[107].mxu0 }
 0x621   : > { %v5965_v47 = vadd.f32 %v8332_v33, %v11269_v31  ;;  %v8335_v2 = vadd.f32 %v8334_v6, %v8333_v11  ;;  %v8440_v60 = vpop.f32.mrb[135].mxu1 }
 0x622   : > { %v8441_v0 = vadd.f32 %v8440_v60, %v8439_v22  ;;  %v11369_v21 = vadd.f32 %v8438_v49, %v5957_v24 }
 0x623   : > { %v5968_v46 = vadd.f32 %v8335_v2, %v11271_v56 }
 0x624   : > { %v11372_v29 = vadd.f32 %v8441_v0, %v5960_v41 }
 0x625   : > { %v8336_v62 = vpop.f32.mrb[108].mxu0 }
 0x626   : > { %v8442_v12 = vpop.f32.mrb[136].mxu1  ;;  %v8337_v14 = vpop.f32.mrb[109].mxu0 }
 0x627   : > { %v8338_v9 = vadd.f32 %v8337_v14, %v8336_v62  ;;  %v8443_v45 = vpop.f32.mrb[137].mxu1  ;;  %v8339_v10 = vpop.f32.mrb[110].mxu0 }
 0x628   : > { %v8444_v1 = vadd.f32 %v8443_v45, %v8442_v12  ;;  %v8445_v16 = vpop.f32.mrb[138].mxu1  ;;  %v8340_v18 = vpop.f32.mrb[111].mxu0 }
 0x629   : > { %v5973_v31 = vadd.f32 %v8338_v9, %v11275_v53  ;;  %v8341_v40 = vadd.f32 %v8340_v18, %v8339_v10  ;;  %v8446_v25 = vpop.f32.mrb[139].mxu1 }
 0x62a   : > { %v8447_v24 = vadd.f32 %v8446_v25, %v8445_v16  ;;  %v11375_v7 = vadd.f32 %v8444_v1, %v5965_v47 }
 0x62b   : > { %v5976_v56 = vadd.f32 %v8341_v40, %v11277_v42 }
 0x62c   : > { %v11379_v19 = vadd.f32 %v8447_v24, %v5968_v46 }
 0x62d   : > { %v8342_v4 = vpop.f32.mrb[112].mxu0 }
 0x62e   : > { %v8448_v41 = vpop.f32.mrb[140].mxu1  ;;  %v8343_v61 = vpop.f32.mrb[113].mxu0 }
 0x62f   : > { %v8344_v5 = vadd.f32 %v8343_v61, %v8342_v4  ;;  %v8449_v13 = vpop.f32.mrb[141].mxu1  ;;  %v8345_v33 = vpop.f32.mrb[114].mxu0 }
 0x630   : > { %v8450_v23 = vadd.f32 %v8449_v13, %v8448_v41  ;;  %v8451_v53 = vpop.f32.mrb[142].mxu1  ;;  %v8346_v11 = vpop.f32.mrb[115].mxu0 }
 0x631   : > { %v5981_v49 = vadd.f32 %v8344_v5, %v11281_v50  ;;  %v8347_v22 = vadd.f32 %v8346_v11, %v8345_v33  ;;  %v8452_v6 = vpop.f32.mrb[143].mxu1  ;;  %v9048_v11 = vld [vmem:[#allocation11 + $0x38] sm:$0xff]  }
 0x632   : > { %v8453_v47 = vadd.f32 %v8452_v6, %v8451_v53  ;;  %v11382_v2 = vadd.f32 %v8450_v23, %v5973_v31  ;;  %8694 = vmatpush3.bf16.msra.mxu1 %v9048_v11 }
 0x633   : > { %v5984_v42 = vadd.f32 %v8347_v22, %v11283_v43 }
 0x634   : > { %v11385_v60 = vadd.f32 %v8453_v47, %v5976_v56 }
 0x635   : > { %v8348_v0 = vpop.f32.mrb[116].mxu0 }
 0x636   : > { %v8454_v46 = vpop.f32.mrb[144].mxu1  ;;  %v8349_v62 = vpop.f32.mrb[117].mxu0 }
 0x637   : > { %v8350_v12 = vadd.f32 %v8349_v62, %v8348_v0  ;;  %v8455_v14 = vpop.f32.mrb[145].mxu1  ;;  %v8351_v9 = vpop.f32.mrb[118].mxu0 }
 0x638   : > { %v8456_v45 = vadd.f32 %v8455_v14, %v8454_v46  ;;  %v8457_v10 = vpop.f32.mrb[146].mxu1  ;;  %v8352_v44 = vpop.f32.mrb[119].mxu0 }
 0x639   : > { %v5989_v50 = vadd.f32 %v8350_v12, %v11287_v30  ;;  %v8353_v1 = vadd.f32 %v8352_v44, %v8351_v9  ;;  %v8458_v16 = vpop.f32.mrb[147].mxu1 }
 0x63a   : > { %v8459_v18 = vadd.f32 %v8458_v16, %v8457_v10  ;;  %v11388_v31 = vadd.f32 %v8456_v45, %v5981_v49 }
 0x63b   : > { %v5992_v43 = vadd.f32 %v8353_v1, %v11289_v27 }
 0x63c   : > { %v11391_v40 = vadd.f32 %v8459_v18, %v5984_v42 }
 0x63d   : > { %v8354_v25 = vpop.f32.mrb[120].mxu0 }
 0x63e   : > { %v8460_v24 = vpop.f32.mrb[148].mxu1  ;;  %v8355_v56 = vpop.f32.mrb[121].mxu0 }
 0x63f   : > { %v8356_v4 = vadd.f32 %v8355_v56, %v8354_v25  ;;  %v8461_v41 = vpop.f32.mrb[149].mxu1  ;;  %v8357_v61 = vpop.f32.mrb[122].mxu0 }
 0x640   : > { %v8462_v5 = vadd.f32 %v8461_v41, %v8460_v24  ;;  %v8463_v13 = vpop.f32.mrb[150].mxu1  ;;  %v8358_v33 = vpop.f32.mrb[123].mxu0 }
 0x641   : > { %v5997_v30 = vadd.f32 %v8356_v4, %v11296_v15  ;;  %v8359_v23 = vadd.f32 %v8358_v33, %v8357_v61  ;;  %v8464_v53 = vpop.f32.mrb[151].mxu1 }
 0x642   : > { %v8465_v49 = vadd.f32 %v8464_v53, %v8463_v13  ;;  %v11394_v22 = vadd.f32 %v8462_v5, %v5989_v50 }
 0x643   : > { %v6000_v27 = vadd.f32 %v8359_v23, %v11299_v55 }
 0x644   : > { %v11398_v6 = vadd.f32 %v8465_v49, %v5992_v43 }
 0x645   : > { %v8360_v47 = vpop.f32.mrb[124].mxu0 }
 0x646   : > { %v8466_v42 = vpop.f32.mrb[152].mxu1  ;;  %v8361_v0 = vpop.f32.mrb[125].mxu0 }
 0x647   : > { %v8362_v46 = vadd.f32 %v8361_v0, %v8360_v47  ;;  %v8467_v62 = vpop.f32.mrb[153].mxu1  ;;  %v8363_v15 = vpop.f32.mrb[126].mxu0 }
 0x648   : > { %v8468_v12 = vadd.f32 %v8467_v62, %v8466_v42  ;;  %v8469_v14 = vpop.f32.mrb[154].mxu1  ;;  %v8364_v9 = vpop.f32.mrb[127].mxu0 }
 0x649   : > { %v6005_v45 = vadd.f32 %v8362_v46, %v11303_v38  ;;  %v8365_v10 = vadd.f32 %v8364_v9, %v8363_v15  ;;  %v8470_v44 = vpop.f32.mrb[155].mxu1 }
 0x64a   : > { %v8471_v50 = vadd.f32 %v8470_v44, %v8469_v14  ;;  %v11401_v32 = vadd.f32 %v8468_v12, %v5997_v30 }
 0x64b   : > { %v6008_v55 = vadd.f32 %v8365_v10, %v11305_v58 }
 0x64c   : > { %v11404_v1 = vadd.f32 %v8471_v50, %v6000_v27 }
 0x64d   : > { %v8366_v16 = vpop.f32.mrb[128].mxu0 }
 0x64e   : > { %v8472_v18 = vpop.f32.mrb[156].mxu1  ;;  %v8367_v43 = vpop.f32.mrb[129].mxu0 }
 0x64f   : > { %v8368_v25 = vadd.f32 %v8367_v43, %v8366_v16  ;;  %v8473_v24 = vpop.f32.mrb[157].mxu1  ;;  %v8369_v56 = vpop.f32.mrb[130].mxu0 }
 0x650   : > { %v8474_v4 = vadd.f32 %v8473_v24, %v8472_v18  ;;  %v8475_v41 = vpop.f32.mrb[158].mxu1  ;;  %v8370_v61 = vpop.f32.mrb[131].mxu0 }
 0x651   : > { %v6013_v38 = vadd.f32 %v8368_v25, %v11310_v63  ;;  %v8371_v5 = vadd.f32 %v8370_v61, %v8369_v56  ;;  %v8476_v13 = vpop.f32.mrb[159].mxu1 }
 0x652   : > { %v8477_v33 = vadd.f32 %v8476_v13, %v8475_v41  ;;  %v11407_v30 = vadd.f32 %v8474_v4, %v6005_v45 }
 0x653   : > { %v6016_v58 = vadd.f32 %v8371_v5, %v11312_v48 }
 0x654   : > { %v11410_v23 = vadd.f32 %v8477_v33, %v6008_v55 }
 0x655   : > { %v8372_v53 = vpop.f32.mrb[132].mxu0 }
 0x656   : > { %v8478_v11 = vpop.f32.mrb[160].mxu1  ;;  %v8373_v49 = vpop.f32.mrb[133].mxu0 }
 0x657   : > { %v8374_v27 = vadd.f32 %v8373_v49, %v8372_v53  ;;  %v8479_v47 = vpop.f32.mrb[161].mxu1  ;;  %v8375_v42 = vpop.f32.mrb[134].mxu0 }
 0x658   : > { %v8480_v0 = vadd.f32 %v8479_v47, %v8478_v11  ;;  %v8481_v46 = vpop.f32.mrb[162].mxu1  ;;  %v8376_v62 = vpop.f32.mrb[135].mxu0 }
 0x659   : > { %v6021_v63 = vadd.f32 %v8374_v27, %v11316_v34  ;;  %v8377_v15 = vadd.f32 %v8376_v62, %v8375_v42  ;;  %v8482_v12 = vpop.f32.mrb[163].mxu1 }
 0x65a   : > { %v8483_v14 = vadd.f32 %v8482_v12, %v8481_v46  ;;  %v11413_v9 = vadd.f32 %v8480_v0, %v6013_v38 }
 0x65b   : > { %v6024_v48 = vadd.f32 %v8377_v15, %v11318_v8 }
 0x65c   : > { %v11416_v45 = vadd.f32 %v8483_v14, %v6016_v58 }
 0x65d   : > { %v8378_v10 = vpop.f32.mrb[136].mxu0 }
 0x65e   : > { %v8484_v44 = vpop.f32.mrb[164].mxu1  ;;  %v8379_v50 = vpop.f32.mrb[137].mxu0 }
 0x65f   : > { %v8380_v55 = vadd.f32 %v8379_v50, %v8378_v10  ;;  %v8485_v16 = vpop.f32.mrb[165].mxu1  ;;  %v8381_v18 = vpop.f32.mrb[138].mxu0 }
 0x660   : > { %v8486_v43 = vadd.f32 %v8485_v16, %v8484_v44  ;;  %v8487_v25 = vpop.f32.mrb[166].mxu1  ;;  %v8382_v24 = vpop.f32.mrb[139].mxu0 }
 0x661   : > { %v6029_v34 = vadd.f32 %v8380_v55, %v11323_v36  ;;  %v8383_v56 = vadd.f32 %v8382_v24, %v8381_v18  ;;  %v8488_v4 = vpop.f32.mrb[167].mxu1 }
 0x662   : > { %v8489_v41 = vadd.f32 %v8488_v4, %v8487_v25  ;;  %v11419_v61 = vadd.f32 %v8486_v43, %v6021_v63 }
 0x663   : > { %v6032_v8 = vadd.f32 %v8383_v56, %v11325_v52 }
 0x664   : > { %v11422_v38 = vadd.f32 %v8489_v41, %v6024_v48 }
 0x665   : > { %v8384_v5 = vpop.f32.mrb[140].mxu0 }
 0x666   : > { %v8490_v13 = vpop.f32.mrb[168].mxu1  ;;  %v8385_v33 = vpop.f32.mrb[141].mxu0 }
 0x667   : > { %v8386_v58 = vadd.f32 %v8385_v33, %v8384_v5  ;;  %v8491_v53 = vpop.f32.mrb[169].mxu1  ;;  %v8387_v11 = vpop.f32.mrb[142].mxu0 }
 0x668   : > { %v8492_v49 = vadd.f32 %v8491_v53, %v8490_v13  ;;  %v8493_v27 = vpop.f32.mrb[170].mxu1  ;;  %v8388_v47 = vpop.f32.mrb[143].mxu0 }
 0x669   : > { %v6037_v36 = vadd.f32 %v8386_v58, %v11330_v20  ;;  %v8389_v42 = vadd.f32 %v8388_v47, %v8387_v11  ;;  %v8494_v0 = vpop.f32.mrb[171].mxu1 }
 0x66a   : > { %v8495_v46 = vadd.f32 %v8494_v0, %v8493_v27  ;;  %v11425_v62 = vadd.f32 %v8492_v49, %v6029_v34 }
 0x66b   : > { %v6040_v52 = vadd.f32 %v8389_v42, %v11333_v26 }
 0x66c   : > { %v11428_v63 = vadd.f32 %v8495_v46, %v6032_v8 }
 0x66d   : > { %v8649_v15 = vpop.f32.mrb[144].mxu0 }
 0x66e   : > { %v8496_v12 = vpop.f32.mrb[172].mxu1  ;;  %v6247_v14 = vadd.f32 %v8649_v15, %v11343_v28  ;;  %v6238_v48 = vpop.f32.mrb[145].mxu0 }
 0x66f   : > { %v8497_v10 = vpop.f32.mrb[173].mxu1  ;;  %v6239_v44 = vadd.f32 %v6238_v48, %v11336_v51  ;;  %v8650_v50 = vpop.f32.mrb[146].mxu0 }
 0x670   : > { %v6367_v20 = vmax.f32 %v6247_v14, 0.0  ;;  %v8498_v55 = vadd.f32 %v8497_v10, %v8496_v12  ;;  %v8499_v16 = vpop.f32.mrb[174].mxu1  ;;  %v6250_v18 = vadd.f32 %v8650_v50, %v11346_v3  ;;  %v6241_v43 = vpop.f32.mrb[147].mxu0 }
 0x671   : > { %v6365_v25 = vmax.f32 %v6239_v44, 0.0  ;;  %v8500_v26 = vpop.f32.mrb[175].mxu1  ;;  %v6242_v24 = vadd.f32 %v6241_v43, %v11340_v59 }
 0x672   : > { %6399 = vst [vmem:[%s11435_s14 + $0x10] sm:$0xff] %v6367_v20  ;;  %v6368_v28 = vmax.f32 %v6250_v18, 0.0  ;;  %v8501_v51 = vadd.f32 %v8500_v26, %v8499_v16  ;;  %v11438_v34 = vadd.f32 %v8498_v55, %v6037_v36 }
 0x673   : > { %6397 = vst [vmem:[%s11435_s14] sm:$0xff] %v6365_v25  ;;  %v6366_v56 = vmax.f32 %v6242_v24, 0.0 }
 0x674   : > { %6400 = vst [vmem:[%s11435_s14 + $0x18] sm:$0xff] %v6368_v28  ;;  %v11442_v3 = vadd.f32 %v8501_v51, %v6040_v52 }
 0x675   : > { %6398 = vst [vmem:[%s11435_s14 + $0x8] sm:$0xff] %v6366_v56  ;;  %v6429_v59 = vadd.f32 %v6366_v56, %v6365_v25  ;;  %v8653_v4 = vpop.f32.mrb[148].mxu0 }
 0x676   : > { %v6263_v41 = vadd.f32 %v8653_v4, %v11356_v54  ;;  %v6254_v8 = vpop.f32.mrb[149].mxu0 }
 0x677   : > { %v6430_v5 = vadd.f32 %v6429_v59, %v6367_v20  ;;  %v6255_v13 = vadd.f32 %v6254_v8, %v11349_v35  ;;  %v8654_v33 = vpop.f32.mrb[150].mxu0 }
 0x678   : > { %v6371_v58 = vmax.f32 %v6263_v41, 0.0  ;;  %v6266_v53 = vadd.f32 %v8654_v33, %v11359_v37  ;;  %v6257_v11 = vpop.f32.mrb[151].mxu0 }
 0x679   : > { %v6369_v49 = vmax.f32 %v6255_v13, 0.0  ;;  %v6431_v27 = vadd.f32 %v6430_v5, %v6368_v28  ;;  %v6258_v47 = vadd.f32 %v6257_v11, %v11353_v39 }
 0x67a   : > { %6403 = vst [vmem:[%s11435_s14 + $0x30] sm:$0xff] %v6371_v58  ;;  %v6372_v36 = vmax.f32 %v6266_v53, 0.0 }
 0x67b   : > { %6401 = vst [vmem:[%s11435_s14 + $0x20] sm:$0xff] %v6369_v49  ;;  %v6432_v42 = vadd.f32 %v6431_v27, %v6369_v49  ;;  %v6370_v54 = vmax.f32 %v6258_v47, 0.0 }
 0x67c   : > { %6404 = vst [vmem:[%s11435_s14 + $0x38] sm:$0xff] %v6372_v36 }
 0x67d   : > { %6402 = vst [vmem:[%s11435_s14 + $0x28] sm:$0xff] %v6370_v54  ;;  %v6433_v0 = vadd.f32 %v6432_v42, %v6370_v54  ;;  %v8657_v35 = vpop.f32.mrb[152].mxu0 }
 0x67e   : > { %v6279_v46 = vadd.f32 %v8657_v35, %v11369_v21  ;;  %v6270_v37 = vpop.f32.mrb[153].mxu0 }
 0x67f   : > { %v6434_v52 = vadd.f32 %v6433_v0, %v6371_v58  ;;  %v6271_v15 = vadd.f32 %v6270_v37, %v11362_v17  ;;  %v8658_v39 = vpop.f32.mrb[154].mxu0 }
 0x680   : > { %v6375_v12 = vmax.f32 %v6279_v46, 0.0  ;;  %v6282_v14 = vadd.f32 %v8658_v39, %v11372_v29  ;;  %v6273_v48 = vpop.f32.mrb[155].mxu0 }
 0x681   : > { %v6373_v10 = vmax.f32 %v6271_v15, 0.0  ;;  %v6435_v44 = vadd.f32 %v6434_v52, %v6372_v36  ;;  %v6274_v50 = vadd.f32 %v6273_v48, %v11366_v57 }
 0x682   : > { %6407 = vst [vmem:[%s11435_s14 + $0x50] sm:$0xff] %v6375_v12  ;;  %v6376_v20 = vmax.f32 %v6282_v14, 0.0 }
 0x683   : > { %6405 = vst [vmem:[%s11435_s14 + $0x40] sm:$0xff] %v6373_v10  ;;  %v6436_v55 = vadd.f32 %v6435_v44, %v6373_v10  ;;  %v6374_v21 = vmax.f32 %v6274_v50, 0.0 }
 0x684   : > { %6408 = vst [vmem:[%s11435_s14 + $0x58] sm:$0xff] %v6376_v20 }
 0x685   : > { %6406 = vst [vmem:[%s11435_s14 + $0x48] sm:$0xff] %v6374_v21  ;;  %v6437_v16 = vadd.f32 %v6436_v55, %v6374_v21  ;;  %v8661_v17 = vpop.f32.mrb[156].mxu0 }
 0x686   : > { %v6295_v18 = vadd.f32 %v8661_v17, %v11382_v2  ;;  %v6286_v29 = vpop.f32.mrb[157].mxu0 }
 0x687   : > { %v6438_v43 = vadd.f32 %v6437_v16, %v6375_v12  ;;  %v6287_v25 = vadd.f32 %v6286_v29, %v11375_v7  ;;  %v8662_v57 = vpop.f32.mrb[158].mxu0 }
 0x688   : > { %v6379_v26 = vmax.f32 %v6295_v18, 0.0  ;;  %v6298_v24 = vadd.f32 %v8662_v57, %v11385_v60  ;;  %v6289_v28 = vpop.f32.mrb[159].mxu0 }
 0x689   : > { %v6377_v51 = vmax.f32 %v6287_v25, 0.0  ;;  %v6439_v56 = vadd.f32 %v6438_v43, %v6376_v20  ;;  %v6290_v59 = vadd.f32 %v6289_v28, %v11379_v19 }
 0x68a   : > { %6411 = vst [vmem:[%s11435_s14 + $0x70] sm:$0xff] %v6379_v26  ;;  %v6380_v4 = vmax.f32 %v6298_v24, 0.0 }
 0x68b   : > { %6409 = vst [vmem:[%s11435_s14 + $0x60] sm:$0xff] %v6377_v51  ;;  %v6440_v41 = vadd.f32 %v6439_v56, %v6377_v51  ;;  %v6378_v2 = vmax.f32 %v6290_v59, 0.0 }
 0x68c   : > { %6412 = vst [vmem:[%s11435_s14 + $0x78] sm:$0xff] %v6380_v4 }
 0x68d   : > { %6410 = vst [vmem:[%s11435_s14 + $0x68] sm:$0xff] %v6378_v2  ;;  %v6441_v8 = vadd.f32 %v6440_v41, %v6378_v2  ;;  %v8665_v7 = vpop.f32.mrb[160].mxu0 }
 0x68e   : > { %v6311_v5 = vadd.f32 %v8665_v7, %v11394_v22  ;;  %v6302_v60 = vpop.f32.mrb[161].mxu0 }
 0x68f   : > { %v6442_v13 = vadd.f32 %v6441_v8, %v6379_v26  ;;  %v6303_v33 = vadd.f32 %v6302_v60, %v11388_v31  ;;  %v8666_v19 = vpop.f32.mrb[162].mxu0 }
 0x690   : > { %v6383_v58 = vmax.f32 %v6311_v5, 0.0  ;;  %v6314_v53 = vadd.f32 %v8666_v19, %v11398_v6  ;;  %v6305_v11 = vpop.f32.mrb[163].mxu0 }
 0x691   : > { %v6381_v49 = vmax.f32 %v6303_v33, 0.0  ;;  %v6443_v27 = vadd.f32 %v6442_v13, %v6380_v4  ;;  %v6306_v47 = vadd.f32 %v6305_v11, %v11391_v40 }
 0x692   : > { %6415 = vst [vmem:[%s11435_s14 + $0x90] sm:$0xff] %v6383_v58  ;;  %v6384_v36 = vmax.f32 %v6314_v53, 0.0 }
 0x693   : > { %6413 = vst [vmem:[%s11435_s14 + $0x80] sm:$0xff] %v6381_v49  ;;  %v6444_v42 = vadd.f32 %v6443_v27, %v6381_v49  ;;  %v6382_v22 = vmax.f32 %v6306_v47, 0.0 }
 0x694   : > { %6416 = vst [vmem:[%s11435_s14 + $0x98] sm:$0xff] %v6384_v36 }
 0x695   : > { %6414 = vst [vmem:[%s11435_s14 + $0x88] sm:$0xff] %v6382_v22  ;;  %v6445_v54 = vadd.f32 %v6444_v42, %v6382_v22  ;;  %v8669_v31 = vpop.f32.mrb[164].mxu0 }
 0x696   : > { %v6327_v0 = vadd.f32 %v8669_v31, %v11407_v30  ;;  %v6318_v6 = vpop.f32.mrb[165].mxu0 }
 0x697   : > { %v6446_v35 = vadd.f32 %v6445_v54, %v6383_v58  ;;  %v6319_v46 = vadd.f32 %v6318_v6, %v11401_v32  ;;  %v8670_v40 = vpop.f32.mrb[166].mxu0 }
 0x698   : > { %v6387_v37 = vmax.f32 %v6327_v0, 0.0  ;;  %v6330_v52 = vadd.f32 %v8670_v40, %v11410_v23  ;;  %v6321_v15 = vpop.f32.mrb[167].mxu0 }
 0x699   : > { %v6385_v39 = vmax.f32 %v6319_v46, 0.0  ;;  %v6447_v12 = vadd.f32 %v6446_v35, %v6384_v36  ;;  %v6322_v14 = vadd.f32 %v6321_v15, %v11404_v1 }
 0x69a   : > { %6419 = vst [vmem:[%s11435_s14 + $0xb0] sm:$0xff] %v6387_v37  ;;  %v6388_v48 = vmax.f32 %v6330_v52, 0.0 }
 0x69b   : > { %6417 = vst [vmem:[%s11435_s14 + $0xa0] sm:$0xff] %v6385_v39  ;;  %v6448_v10 = vadd.f32 %v6447_v12, %v6385_v39  ;;  %v6386_v30 = vmax.f32 %v6322_v14, 0.0 }
 0x69c   : > { %6420 = vst [vmem:[%s11435_s14 + $0xb8] sm:$0xff] %v6388_v48 }
 0x69d   : > { %6418 = vst [vmem:[%s11435_s14 + $0xa8] sm:$0xff] %v6386_v30  ;;  %v6449_v44 = vadd.f32 %v6448_v10, %v6386_v30  ;;  %v8673_v32 = vpop.f32.mrb[168].mxu0 }
 0x69e   : > { %v6343_v50 = vadd.f32 %v8673_v32, %v11419_v61  ;;  %v6334_v23 = vpop.f32.mrb[169].mxu0 }
 0x69f   : > { %v6450_v20 = vadd.f32 %v6449_v44, %v6387_v37  ;;  %v6335_v55 = vadd.f32 %v6334_v23, %v11413_v9  ;;  %v8674_v1 = vpop.f32.mrb[170].mxu0 }
 0x6a0   : > { %v6391_v21 = vmax.f32 %v6343_v50, 0.0  ;;  %v6346_v16 = vadd.f32 %v8674_v1, %v11422_v38  ;;  %v6337_v17 = vpop.f32.mrb[171].mxu0 }
 0x6a1   : > { %v6389_v18 = vmax.f32 %v6335_v55, 0.0  ;;  %v6451_v29 = vadd.f32 %v6450_v20, %v6388_v48  ;;  %v6338_v43 = vadd.f32 %v6337_v17, %v11416_v45 }
 0x6a2   : > { %6423 = vst [vmem:[%s11435_s14 + $0xd0] sm:$0xff] %v6391_v21  ;;  %v6392_v25 = vmax.f32 %v6346_v16, 0.0 }
 0x6a3   : > { %6421 = vst [vmem:[%s11435_s14 + $0xc0] sm:$0xff] %v6389_v18  ;;  %v6452_v57 = vadd.f32 %v6451_v29, %v6389_v18  ;;  %v6390_v61 = vmax.f32 %v6338_v43, 0.0 }
 0x6a4   : > { %6424 = vst [vmem:[%s11435_s14 + $0xd8] sm:$0xff] %v6392_v25 }
 0x6a5   : > { %6422 = vst [vmem:[%s11435_s14 + $0xc8] sm:$0xff] %v6390_v61  ;;  %v6453_v26 = vadd.f32 %v6452_v57, %v6390_v61  ;;  %v8677_v9 = vpop.f32.mrb[172].mxu0 }
 0x6a6   : > { %v6359_v24 = vadd.f32 %v8677_v9, %v11438_v34  ;;  %v6350_v38 = vpop.f32.mrb[173].mxu0 }
 0x6a7   : > { %v6454_v28 = vadd.f32 %v6453_v26, %v6391_v21  ;;  %v6351_v51 = vadd.f32 %v6350_v38, %v11425_v62  ;;  %v8678_v45 = vpop.f32.mrb[174].mxu0 }
 0x6a8   : > { %v6395_v56 = vmax.f32 %v6359_v24, 0.0  ;;  %v6362_v59 = vadd.f32 %v8678_v45, %v11442_v3  ;;  %v6353_v4 = vpop.f32.mrb[175].mxu0 }
 0x6a9   : > { %v6393_v41 = vmax.f32 %v6351_v51, 0.0  ;;  %v6455_v2 = vadd.f32 %v6454_v28, %v6392_v25  ;;  %v6354_v8 = vadd.f32 %v6353_v4, %v11428_v63 }
 0x6aa   : > { %6427 = vst [vmem:[%s11435_s14 + $0xf0] sm:$0xff] %v6395_v56  ;;  %v6396_v7 = vmax.f32 %v6362_v59, 0.0 }
 0x6ab   : > { %6425 = vst [vmem:[%s11435_s14 + $0xe0] sm:$0xff] %v6393_v41  ;;  %v6456_v5 = vadd.f32 %v6455_v2, %v6393_v41  ;;  %v6394_v34 = vmax.f32 %v6354_v8, 0.0 }
 0x6ac   : > { %6428 = vst [vmem:[%s11435_s14 + $0xf8] sm:$0xff] %v6396_v7 }
 0x6ad   : > { %6426 = vst [vmem:[%s11435_s14 + $0xe8] sm:$0xff] %v6394_v34  ;;  %v6457_v62 = vadd.f32 %v6456_v5, %v6394_v34 }
 0x6af   : > { %v6458_v60 = vadd.f32 %v6457_v62, %v6395_v56 }
 0x6b1   : > { %v6459_v13 = vadd.f32 %v6458_v60, %v6396_v7 }
 0x6b3   : > { %v6460_v33 = vrot.slane %v6459_v13, 4 }
 0x6b5   : > { %v6461_v3 = vadd.f32 %v6460_v33, %v6459_v13 }
 0x6b7   : > { %v6462_v19 = vrot.slane %v6461_v3, 2 }
 0x6b9   : > { %v6463_v58 = vadd.f32 %v6462_v19, %v6461_v3 }
 0x6bb   : > { %v6464_v53 = vrot.slane %v6463_v58, 1 }
 0x6bd   : > { %v6465_v63 = vadd.f32 %v6464_v53, %v6463_v58 }
 0x6bf   : > { %v6467_v11 = vmul.f32 0.00390625, %v6465_v63 }
 0x6c1   : > { %v6468_v49 = vpack.c.bf16 %v6467_v11, %v6467_v11 }
 0x6c3   : > { %8696 = vmatmul.mubr.bf16.vlgmr.msra.gmra.mrb[176].mxu1 %v6468_v49 }
 0x6c4   : > { %9208 = shalt.err (!%p9205_p13)
}
 0x6c5   : > { %s9209_s8 = scalar_lea.hbm %s11509_s30, 4096  ;;  %s9213_s28 = scalar_lea.hbm %s11677_s10, 8192 }
 0x6c6   : > { %p9210_p9 = scmp.ne.s32.totalorder %s11509_s30, %s9209_s8  ;;  %p9214_p4 = scmp.lt.u32.totalorder %s11509_s30, %s11677_s10 }
 0x6c7   : > { %p9215_p8 = scmp.lt.u32.totalorder %s9213_s28, %s9209_s8  ;;  %p9217_p3 = scmp.lt.u32.totalorder %s9209_s8, %s11509_s30 }
 0x6c8   : > { %p9211_p0 = pnand %p9210_p9, %p9619_p10 }
 0x6c9   : > { %p9216_p6 = por %p9215_p8, %p9214_p4 }
 0x6ca   : > { %p9212_p11 = pneg %p9211_p0 }
 0x6cb   : > { %p9218_p5 = por %p9217_p3, %p9216_p6 }
 0x6cd   : > { %p9219_p7 = pnand %p9218_p5, %p9212_p11 }
 0x6cf   : > { %9222 = shalt.err (!%p9219_p7)
}
 0x6d0   : > { %s9376_s0 = smov 128   ;;  %s9377_s16 = smov 8  }
 0x6d1   : > { %8734 = dma.vmem_to_hbm [thread:$0]  (%p9619_p10), %s11518_s27, 4096, %s11509_s30, %s11520_s26, %s9376_s0, %s9376_s0, %s9377_s16  }
 0x6d2   : > { %s11720_s29 = sld [smem:[#allocation32_spill]]  ;;  %s6603_s28 = sshll.u32 %s10249_s17, 4  ;;  %s11554_s28 = int_to_ptr.vmem [resolvable:$true] %s6603_s28 }
 0x6d3   : > { %s6635_s19 = sshll.u32 %s11435_s14, 4  ;;  %s6576_s2 = scalar_lea.sflag [#allocation5], %s9671_s15  ;;  %s11586_s19 = int_to_ptr.vmem [resolvable:$true] %s6635_s19 }
 0x6d4   : > { %s9223_s3 = scalar_lea.vmem %s11554_s28, 4096  ;;  %s9378_s4 = smov [#allocation12]  }
 0x6d5   : > { %p9224_p12 = scmp.ne.s32.totalorder %s11554_s28, %s9223_s3  ;;  %s9227_s30 = sshll.u32 %s9378_s4, 4  ;;  %s9228_s30 = int_to_ptr.vmem [resolvable:$false] %s9227_s30 }
 0x6d6   : > { %s9229_s27 = scalar_lea.vmem %s9228_s30, 8192  ;;  %p9230_p13 = scmp.lt.s32.totalorder %s11554_s28, %s9228_s30 }
 0x6d7   : > { %p9225_p1 = pnand %p9224_p12, %p9619_p10  ;;  %p9231_p9 = scmp.lt.s32.totalorder %s9229_s27, %s9223_s3 }
 0x6d8   : > { %s11551_s13 = scalar_lea.hbm %s11720_s29, %s11503_s9 }
 0x6d9   : > { %p9226_p2 = pneg %p9225_p1  ;;  %p9232_p0 = por %p9231_p9, %p9230_p13 }
 0x6db   : > { %p9233_p11 = pnand %p9232_p0, %p9226_p2 }
 0x6dd   : > { %9236 = shalt.err (!%p9233_p11)
}
 0x6de   : > { %s9237_s17 = scalar_lea.hbm %s11551_s13, 4096  ;;  %s9241_s4 = scalar_lea.hbm %s11720_s29, 8192 }
 0x6df   : > { %p9238_p4 = scmp.ne.s32.totalorder %s11551_s13, %s9237_s17  ;;  %p9242_p3 = scmp.lt.u32.totalorder %s11551_s13, %s11720_s29 }
 0x6e0   : > { %p9243_p5 = scmp.lt.u32.totalorder %s9241_s4, %s9237_s17  ;;  %p9245_p12 = scmp.lt.u32.totalorder %s9237_s17, %s11551_s13 }
 0x6e1   : > { %p9239_p8 = pnand %p9238_p4, %p9619_p10 }
 0x6e2   : > { %p9244_p7 = por %p9243_p5, %p9242_p3 }
 0x6e3   : > { %p9240_p6 = pneg %p9239_p8 }
 0x6e4   : > { %p9246_p1 = por %p9245_p12, %p9244_p7 }
 0x6e6   : > { %p9247_p2 = pnand %p9246_p1, %p9240_p6 }
 0x6e8   : > { %9250 = shalt.err (!%p9247_p2)
}
 0x6e9   : > { %8733 = dma.vmem_to_hbm [thread:$0]  (%p9619_p10), %s11554_s28, 4096, %s11551_s13, %s6576_s2, %s9376_s0, %s9376_s0, %s9377_s16  }
 0x6ea   : > { %s9251_s3 = scalar_lea.vmem %s11586_s19, 4096  ;;  %s9379_s27 = smov [#allocation15]  }
 0x6eb   : > { %p9252_p13 = scmp.ne.s32.totalorder %s11586_s19, %s9251_s3  ;;  %s9255_s17 = sshll.u32 %s9379_s27, 4  ;;  %s9256_s17 = int_to_ptr.vmem [resolvable:$false] %s9255_s17 }
 0x6ec   : > { %s9257_s9 = scalar_lea.vmem %s9256_s17, 8192  ;;  %p9258_p11 = scmp.lt.s32.totalorder %s11586_s19, %s9256_s17 }
 0x6ed   : > { %p9253_p9 = pnand %p9252_p13, %p9619_p10  ;;  %p9259_p4 = scmp.lt.s32.totalorder %s9257_s9, %s9251_s3 }
 0x6ef   : > { %p9254_p0 = pneg %p9253_p9  ;;  %p9260_p8 = por %p9259_p4, %p9258_p11 }
 0x6f1   : > { %p9261_p6 = pnand %p9260_p8, %p9254_p0 }
 0x6f3   : > { %9264 = shalt.err (!%p9261_p6)
}
 0x6f4   : > { %s9265_s2 = scalar_lea.hbm %s11516_s11, 4096  ;;  %s9269_s28 = scalar_lea.hbm %s11719_s18, 8192 }
 0x6f5   : > { %p9266_p3 = scmp.ne.s32.totalorder %s11516_s11, %s9265_s2  ;;  %p9270_p12 = scmp.lt.u32.totalorder %s11516_s11, %s11719_s18 }
 0x6f6   : > { %p9271_p1 = scmp.lt.u32.totalorder %s9269_s28, %s9265_s2  ;;  %p9273_p13 = scmp.lt.u32.totalorder %s9265_s2, %s11516_s11 }
 0x6f7   : > { %p9267_p5 = pnand %p9266_p3, %p9619_p10 }
 0x6f8   : > { %p9272_p2 = por %p9271_p1, %p9270_p12 }
 0x6f9   : > { %p9268_p7 = pneg %p9267_p5 }
 0x6fa   : > { %p9274_p9 = por %p9273_p13, %p9272_p2 }
 0x6fc   : > { %p9275_p0 = pnand %p9274_p9, %p9268_p7 }
 0x6fe   : > { %9278 = shalt.err (!%p9275_p0)
}
 0x6ff   : > { %8735 = dma.vmem_to_hbm [thread:$0]  (%p9619_p10), %s11586_s19, 4096, %s11516_s11, %s11520_s26, %s9376_s0, %s9376_s0, %s9377_s16  }
 0x700   : > { %s11721_s3 = sld [smem:[#allocation31_spill]]  ;;  %s7103_s27 = sshll.u32 %s9467_s25, 4 }
 0x701   : > { %s516_s17 = scalar_lea.vmem [#allocation16], %s9671_s15  ;;  %s11722_s13 = sld [smem:[#allocation34_spill]] }
 0x702   : > { %s6651_s9 = sshll.u32 %s516_s17, 4  ;;  %s6591_s11 = scalar_lea.sflag [#allocation17], %s9671_s15  ;;  %s11623_s9 = int_to_ptr.vmem [resolvable:$true] %s6651_s9 }
 0x703   : > { %s9279_s25 = scalar_lea.vmem %s11623_s9, 16  ;;  %s9380_s26 = smov [#allocation16]  }
 0x704   : > { %p9280_p11 = scmp.ne.s32.totalorder %s11623_s9, %s9279_s25  ;;  %s9283_s0 = sshll.u32 %s9380_s26, 4  ;;  %s9284_s0 = int_to_ptr.vmem [resolvable:$false] %s9283_s0 }
 0x705   : > { %s9285_s16 = scalar_lea.vmem %s9284_s0, 32  ;;  %p9286_p6 = scmp.lt.s32.totalorder %s11623_s9, %s9284_s0 }
 0x706   : > { %v6485_v27 = vld [vmem:[%s11721_s3] sm:$0x1]  ;;  %p9281_p4 = pnand %p9280_p11, %p9619_p10  ;;  %p9287_p3 = scmp.lt.s32.totalorder %s9285_s16, %s9279_s25 }
 0x707   : > { %s11621_s28 = scalar_lea.hbm %s11722_s13, %s7103_s27 }
 0x708   : > { %p9282_p8 = pneg %p9281_p4  ;;  %p9288_p5 = por %p9287_p3, %p9286_p6 }
 0x70a   : > { %p9289_p7 = pnand %p9288_p5, %p9282_p8 }
 0x796   : > { %v6568_v47 = vpop.f32.mrb[176].mxu1 }
 0x797   : > { %v6569_v36 = vadd.f32 %v6568_v47, %v6485_v27  ;;  %v8697_v42 = vpop.f32.mrb[177].mxu1 }
 0x798   : > { %v6571_v22 = vpop.f32.mrb[178].mxu1 }
 0x799   : > { %6574 = vst [vmem:[%s516_s17] sm:$0x1] %v6569_v36  ;;  %v8698_v54 = vpop.f32.mrb[179].mxu1 }
 0x79a   : > { %9292 = shalt.err (!%p9289_p7)
}
 0x79b   : > { %s9293_s15 = scalar_lea.hbm %s11621_s28, 16  ;;  %s9297_s4 = scalar_lea.hbm %s11722_s13, 32 }
 0x79c   : > { %p9294_p12 = scmp.ne.s32.totalorder %s11621_s28, %s9293_s15  ;;  %p9298_p13 = scmp.lt.u32.totalorder %s11621_s28, %s11722_s13 }
 0x79d   : > { %p9299_p9 = scmp.lt.u32.totalorder %s9297_s4, %s9293_s15  ;;  %p9301_p11 = scmp.lt.u32.totalorder %s9293_s15, %s11621_s28 }
 0x79e   : > { %p9295_p1 = pnand %p9294_p12, %p9619_p10 }
 0x79f   : > { %p9300_p0 = por %p9299_p9, %p9298_p13 }
 0x7a0   : > { %p9296_p2 = pneg %p9295_p1 }
 0x7a1   : > { %p9302_p4 = por %p9301_p11, %p9300_p0 }
 0x7a3   : > { %p9303_p8 = pnand %p9302_p4, %p9296_p2 }
 0x7a5   : > { %9306 = shalt.err (!%p9303_p8)
}
 0x7a6   : > { %8736 = dma.vmem_to_hbm [thread:$0]  (%p9619_p10), %s11623_s9, 16, %s11621_s28, %s6591_s11  }
 0x7a7 PF: > { %s11723_s3 = sld [smem:[#allocation24_spill]]  ;;  %s11724_s27 = sld [smem:[#allocation25_spill]] }
 0x7a8   : > { %p11726_p3 = scmp.ge.s32.totalorder %s9361_s24, 2 }
 0x7ad   : > { %s6663_s17 = sand.u32 1, %s11723_s3   ;;  %p11725_p6 = scmp.ne.s32.totalorder %s11724_s27, 0 }
 0x7ae   : > { %s6664_s2 = scalar_lea.sflag [#allocation5], %s6663_s17 }
 0x7af   : > { %p8759_p5 = pnand %p11726_p3, %p11725_p6 }
 0x7b1   : > { %9336 = dma.done.wait (!%p8759_p5), %s6664_s2, 4096  }
 0x7b2   : > { %9338 = vsyncadd (!%p8759_p5), %s6664_s2, 4294963200  ;;  %s11727_s14 = sadd.s32 4294967294, %s9361_s24  }
 0x7b3   : > { %s6672_s25 = sand.u32 1, %s11727_s14  }
 0x7b4   : > { %s6673_s26 = scalar_lea.sflag [#allocation14], %s6672_s25 }
 0x7b5   : > { %9340 = dma.done.wait (!%p8759_p5), %s6673_s26, 8192  }
 0x7b6   : > { %9342 = vsyncadd (!%p8759_p5), %s6673_s26, 4294959104  ;;  %s6691_s12 = scalar_lea.sflag [#allocation17], %s6663_s17 }
 0x7b7   : > { %9344 = dma.done.wait (!%p8759_p5), %s6691_s12, 16  }
 0x7b8   : > { %9346 = vsyncadd (!%p8759_p5), %s6691_s12, 4294967280  ;;  %s11728_s9 = smov %s9609_s21  ;;  %p34_p10 = scmp.ge.s32.totalorder %s9609_s21, 4  }
 0x7b9   : > { %s11729_s21 = smov %s9353_s22  ;;  %s11730_s22 = smov %s9357_s23 }
 0x7ba   : > { %s11731_s23 = smov %s9625_s20  ;;  %s11732_s24 = smov %s11728_s9 }
 0x7bb   :  { %36 = sbr.rel (!%p34_p10) target bundleno = 21 (0x15), region = 169 }
 0x7c2   :  { %6695 = vsyncpa [#allocation4], 1 }
 0x7c3   :  { %6697 = vsyncpa [#allocation4 + $0x1], 1 }
 0x7c4   :  { %6698 = vsyncpa [#allocation7], 1 }
 0x7c5   :  { %6699 = vsyncpa [#allocation10], 1 }
 0x7c6   :  { %6700 = vsyncpa [#allocation5], 1 }
 0x7c7   :  { %6702 = vsyncpa [#allocation5 + $0x1], 1 }
 0x7c8   :  { %6703 = vsyncpa [#allocation14], 1 }
 0x7c9   :  { %6705 = vsyncpa [#allocation14 + $0x1], 1 }
 0x7ca   :  { %6706 = vsyncpa [#allocation17], 1 }
 0x7cb   :  { %6708 = vsyncpa [#allocation17 + $0x1], 1 }

</bundles_post_ra>
